<compile_context>
chip_gen: v5e
topology: v5e:2x2
jax: 0.10.0
libtpu: 0.0.40
codegen_flags: <defaults>
</compile_context>

<pallas_src>
import math

import jax
import jax.numpy as jnp
from jax import lax
from jax.experimental import pallas as pl
from jax.experimental.pallas import tpu as pltpu

# ----------------------------- model dimensions ------------------------------
S = 8            # sequence length (small example)
B = 2            # batch
D = 40           # feature_size / d_model (divisible by NHEAD=10)
NHEAD = 10       # hardcoded in the PyTorch module
HDIM = D // NHEAD
FF = 2048        # nn.TransformerEncoderLayer default dim_feedforward
H = 2            # LSTM hidden_size
EPS = 1e-5       # LayerNorm eps (PyTorch default)
SB = S * B

VMEM_SPEC = pl.BlockSpec(memory_space=pltpu.MemorySpace.VMEM)


# ------------------------------ kernel helpers --------------------------------
def _layer_norm(y, g, b):
    mu = jnp.mean(y, axis=-1, keepdims=True)
    var = jnp.mean((y - mu) ** 2, axis=-1, keepdims=True)
    return (y - mu) * lax.rsqrt(var + EPS) * g + b


def _lstm_cell(gates, c):
    # PyTorch gate order: i, f, g, o
    i = jax.nn.sigmoid(gates[:, 0:H])
    f = jax.nn.sigmoid(gates[:, H:2 * H])
    g = jnp.tanh(gates[:, 2 * H:3 * H])
    o = jax.nn.sigmoid(gates[:, 3 * H:4 * H])
    c_new = f * c + i * g
    h_new = o * jnp.tanh(c_new)
    return h_new, c_new


def _hh_term(h, w_hh):
    # h: (B, H), w_hh: (H, 4H).  H=2 -> two VPU broadcast-multiply-adds,
    # keeping the tiny recurrent update off the MXU push/pop path.
    acc = h[:, 0:1] * w_hh[0:1, :]
    for k in range(1, H):
        acc = acc + h[:, k:k + 1] * w_hh[k:k + 1, :]
    return acc


def _bilstm_layer(gx_f, gx_b, whf, whb):
    # gx_*: (S*B, 4H) hoisted input projections (+bias), rows in (s, b) order.
    hf = jnp.zeros((B, H), jnp.float32)
    cf = jnp.zeros((B, H), jnp.float32)
    hb = jnp.zeros((B, H), jnp.float32)
    cb = jnp.zeros((B, H), jnp.float32)
    hf_out = [None] * S
    hb_out = [None] * S
    for t in range(S):                       # static unroll: fwd/bwd interleave
        tr = S - 1 - t
        gf = gx_f[t * B:(t + 1) * B, :] + _hh_term(hf, whf)
        hf, cf = _lstm_cell(gf, cf)
        hf_out[t] = hf
        gb = gx_b[tr * B:(tr + 1) * B, :] + _hh_term(hb, whb)
        hb, cb = _lstm_cell(gb, cb)
        hb_out[tr] = hb
    out_f = jnp.concatenate(hf_out, axis=0)  # (S*B, H), rows in (s, b) order
    out_b = jnp.concatenate(hb_out, axis=0)  # (S*B, H)
    return out_f, out_b


# ------------------------------- fused kernel ---------------------------------
def transam_kernel(src_ref, pe_ref, mask_ref,
                   w_in_ref, b_in_ref, w_out_ref, b_out_ref, g1_ref, be1_ref,
                   ffw1_ref, ffb1_ref, ffw2_ref, ffb2_ref, g2_ref, be2_ref,
                   wi0f_ref, wh0f_ref, b0f_ref, wi0b_ref, wh0b_ref, b0b_ref,
                   wi1f_ref, wh1f_ref, bl1f_ref, wi1b_ref, wh1b_ref, bl1b_ref,
                   linw_ref, linb_ref, o_ref):
    # --------- transformer encoder layer (post-norm), sequence-first ---------
    x = src_ref[...] + pe_ref[...]                        # (S, B, D)
    xf = x.reshape(SB, D)
    qkv = jnp.dot(xf, w_in_ref[...],
                  preferred_element_type=jnp.float32) + b_in_ref[...]   # (SB, 3D)

    scale = 1.0 / math.sqrt(HDIM)
    q = jnp.stack([qkv[:, h * HDIM:(h + 1) * HDIM]
                   for h in range(NHEAD)], axis=0) * scale              # (NH, SB, HD)
    k = jnp.stack([qkv[:, D + h * HDIM:D + (h + 1) * HDIM]
                   for h in range(NHEAD)], axis=0)
    v = jnp.stack([qkv[:, 2 * D + h * HDIM:2 * D + (h + 1) * HDIM]
                   for h in range(NHEAD)], axis=0)

    # One batched attention pass; mask folds causal + batch block-diagonal.
    s = jnp.einsum('hqd,hkd->hqk', q, k, preferred_element_type=jnp.float32)
    s = s + mask_ref[...][None]                                         # (NH, SB, SB)
    m = jnp.max(s, axis=-1, keepdims=True)
    p = jnp.exp(s - m)
    p = p * pl.reciprocal(jnp.sum(p, axis=-1, keepdims=True), approx=True)
    ctx = jnp.einsum('hqk,hkd->hqd', p, v, preferred_element_type=jnp.float32)
    ctx_f = jnp.concatenate([ctx[h] for h in range(NHEAD)], axis=-1)    # (SB, D)
    # TODO(synk): attention / residual dropout omitted (inference semantics).

    attn = jnp.dot(ctx_f, w_out_ref[...],
                   preferred_element_type=jnp.float32) + b_out_ref[...]
    y = _layer_norm(xf + attn, g1_ref[...], be1_ref[...])               # (SB, D)

    # ------------------------------ feed-forward ------------------------------
    h1 = jnp.dot(y.astype(jnp.bfloat16), ffw1_ref[...],
                 preferred_element_type=jnp.float32) + ffb1_ref[...]    # (SB, FF)
    h1 = jnp.maximum(h1, 0.0)
    y2 = jnp.dot(h1.astype(jnp.bfloat16), ffw2_ref[...],
                 preferred_element_type=jnp.float32) + ffb2_ref[...]    # (SB, D)
    y = _layer_norm(y + y2, g2_ref[...], be2_ref[...])                  # (SB, D)

    # ------------------- 2-layer bidirectional LSTM decoder -------------------
    # Layer 0: input projections hoisted out of the recurrence.
    gx0f = jnp.dot(y, wi0f_ref[...], preferred_element_type=jnp.float32) + b0f_ref[...]
    gx0b = jnp.dot(y, wi0b_ref[...], preferred_element_type=jnp.float32) + b0b_ref[...]
    out0_f, out0_b = _bilstm_layer(gx0f, gx0b, wh0f_ref[...], wh0b_ref[...])

    # Layer 1: split the (2H)-wide input projection across fwd/bwd halves so we
    # never materialize a lane-sparse concat of the layer-0 outputs.
    wi1f = wi1f_ref[...]
    wi1b = wi1b_ref[...]
    gx1f = (jnp.dot(out0_f, wi1f[0:H, :], preferred_element_type=jnp.float32)
            + jnp.dot(out0_b, wi1f[H:2 * H, :], preferred_element_type=jnp.float32)
            + bl1f_ref[...])
    gx1b = (jnp.dot(out0_f, wi1b[0:H, :], preferred_element_type=jnp.float32)
            + jnp.dot(out0_b, wi1b[H:2 * H, :], preferred_element_type=jnp.float32)
            + bl1b_ref[...])
    out1_f, out1_b = _bilstm_layer(gx1f, gx1b, wh1f_ref[...], wh1b_ref[...])

    # ------------------------------- linear head -------------------------------
    lw = linw_ref[...]                                                  # (1, 2H)
    out = (jnp.sum(out1_f * lw[:, 0:H], axis=-1, keepdims=True)
           + jnp.sum(out1_b * lw[:, H:2 * H], axis=-1, keepdims=True)
           + linb_ref[...])                                             # (SB, 1)
    o_ref[...] = out.reshape(S, B, 1)


_transam_call = pl.pallas_call(
    transam_kernel,
    out_shape=jax.ShapeDtypeStruct((S, B, 1), jnp.float32),
    in_specs=[VMEM_SPEC] * 29,
    out_specs=VMEM_SPEC,
)


# ------------------------------ parameter init --------------------------------
def init_params(key):
    ks = iter(jax.random.split(key, 24))

    def xavier_u(k, shape):
        fan_out, fan_in = shape
        a = math.sqrt(6.0 / (fan_in + fan_out))
        return jax.random.uniform(k, shape, jnp.float32, -a, a)

    def xavier_n(k, shape):
        fan_out, fan_in = shape
        std = math.sqrt(2.0 / (fan_in + fan_out))
        return std * jax.random.normal(k, shape, dtype=jnp.float32)

    p = {}

    # positional encoding buffer, pre-broadcast to (S, B, D) sequence-first
    pos = jnp.arange(S, dtype=jnp.float32)[:, None]
    div = jnp.exp(jnp.arange(0, D, 2, dtype=jnp.float32) * (-math.log(10000.0) / D))
    pe = jnp.zeros((S, D), jnp.float32)
    pe = pe.at[:, 0::2].set(jnp.sin(pos * div))
    pe = pe.at[:, 1::2].set(jnp.cos(pos * div))
    p['pe'] = jnp.broadcast_to(pe[:, None, :], (S, B, D)).astype(jnp.float32)

    # combined attention mask over flattened (s, b) rows:
    #   allowed iff same batch element AND key_time <= query_time (causal)
    s_idx = jnp.arange(SB) // B
    b_idx = jnp.arange(SB) % B
    allowed = (b_idx[:, None] == b_idx[None, :]) & (s_idx[None, :] <= s_idx[:, None])
    p['mask'] = jnp.where(allowed, 0.0, -1e9).astype(jnp.float32)

    # multi-head self attention (in_proj + out_proj) + LayerNorm1
    p['w_in_t'] = xavier_u(next(ks), (3 * D, D)).T        # (D, 3D)
    p['b_in'] = jnp.zeros((1, 3 * D), jnp.float32)
    p['w_out_t'] = xavier_u(next(ks), (D, D)).T           # (D, D)
    p['b_out'] = jnp.zeros((1, D), jnp.float32)
    p['ln1_g'] = jnp.ones((1, D), jnp.float32)
    p['ln1_b'] = jnp.zeros((1, D), jnp.float32)

    # feed-forward + LayerNorm2 (weights stored bf16 as MXU operands; f32 accum)
    p['ffn_w1_t'] = xavier_u(next(ks), (FF, D)).T.astype(jnp.bfloat16)   # (D, FF)
    p['ffn_b1'] = jax.random.uniform(next(ks), (1, FF), jnp.float32, -0.02, 0.02)
    p['ffn_w2_t'] = xavier_u(next(ks), (D, FF)).T.astype(jnp.bfloat16)   # (FF, D)
    p['ffn_b2'] = jax.random.uniform(next(ks), (1, D), jnp.float32, -0.02, 0.02)
    p['ln2_g'] = jnp.ones((1, D), jnp.float32)
    p['ln2_b'] = jnp.zeros((1, D), jnp.float32)

    # 2-layer bidirectional LSTM (weights xavier_normal, biases zero per module)
    def lstm_dir(k1, k2, in_dim):
        return (xavier_n(k1, (4 * H, in_dim)).T,           # w_ih^T (in_dim, 4H)
                xavier_n(k2, (4 * H, H)).T,                # w_hh^T (H, 4H)
                jnp.zeros((1, 4 * H), jnp.float32))        # b_ih + b_hh (zeros)

    p['lstm0_f'] = lstm_dir(next(ks), next(ks), D)
    p['lstm0_b'] = lstm_dir(next(ks), next(ks), D)
    p['lstm1_f'] = lstm_dir(next(ks), next(ks), 2 * H)
    p['lstm1_b'] = lstm_dir(next(ks), next(ks), 2 * H)

    # final linear head: Linear(hidden*2 -> 1), uniform(-0.1, 0.1), zero bias
    p['lin_w'] = jax.random.uniform(next(ks), (1, 2 * H), jnp.float32, -0.1, 0.1)
    p['lin_b'] = jnp.zeros((1, 1), jnp.float32)
    return p


# ------------------------------- forward pass ---------------------------------
@jax.jit
def transam_forward(src, p):
    # src: (S, B, D) sequence-first, like the PyTorch module.  Single fused call.
    return _transam_call(
        src, p['pe'], p['mask'],
        p['w_in_t'], p['b_in'], p['w_out_t'], p['b_out'], p['ln1_g'], p['ln1_b'],
        p['ffn_w1_t'], p['ffn_b1'], p['ffn_w2_t'], p['ffn_b2'], p['ln2_g'], p['ln2_b'],
        *p['lstm0_f'], *p['lstm0_b'], *p['lstm1_f'], *p['lstm1_b'],
        p['lin_w'], p['lin_b'])


# ----------------------------------- main --------------------------------------
if __name__ == "__main__":
    key = jax.random.PRNGKey(0)
    k_src, k_par = jax.random.split(key)
    src = jax.random.normal(k_src, (S, B, D), dtype=jnp.float32)
    params = init_params(k_par)

    out = transam_forward(src, params)
    out = jax.block_until_ready(out)

    assert out.shape == (S, B, 1), out.shape
    assert bool(jnp.all(jnp.isfinite(out)))
    print("KERNEL_OK")
</pallas_src>

<mosaic_0001>
module attributes {stable_mosaic.version = 11 : i64} {
  func.func @transam_kernel(%arg0: memref<8x2x40xf32, #tpu.memory_space<vmem>>, %arg1: memref<8x2x40xf32, #tpu.memory_space<vmem>>, %arg2: memref<16x16xf32, #tpu.memory_space<vmem>>, %arg3: memref<40x120xf32, #tpu.memory_space<vmem>>, %arg4: memref<1x120xf32, #tpu.memory_space<vmem>>, %arg5: memref<40x40xf32, #tpu.memory_space<vmem>>, %arg6: memref<1x40xf32, #tpu.memory_space<vmem>>, %arg7: memref<1x40xf32, #tpu.memory_space<vmem>>, %arg8: memref<1x40xf32, #tpu.memory_space<vmem>>, %arg9: memref<40x2048xbf16, #tpu.memory_space<vmem>>, %arg10: memref<1x2048xf32, #tpu.memory_space<vmem>>, %arg11: memref<2048x40xbf16, #tpu.memory_space<vmem>>, %arg12: memref<1x40xf32, #tpu.memory_space<vmem>>, %arg13: memref<1x40xf32, #tpu.memory_space<vmem>>, %arg14: memref<1x40xf32, #tpu.memory_space<vmem>>, %arg15: memref<40x8xf32, #tpu.memory_space<vmem>>, %arg16: memref<2x8xf32, #tpu.memory_space<vmem>>, %arg17: memref<1x8xf32, #tpu.memory_space<vmem>>, %arg18: memref<40x8xf32, #tpu.memory_space<vmem>>, %arg19: memref<2x8xf32, #tpu.memory_space<vmem>>, %arg20: memref<1x8xf32, #tpu.memory_space<vmem>>, %arg21: memref<4x8xf32, #tpu.memory_space<vmem>>, %arg22: memref<2x8xf32, #tpu.memory_space<vmem>>, %arg23: memref<1x8xf32, #tpu.memory_space<vmem>>, %arg24: memref<4x8xf32, #tpu.memory_space<vmem>>, %arg25: memref<2x8xf32, #tpu.memory_space<vmem>>, %arg26: memref<1x8xf32, #tpu.memory_space<vmem>>, %arg27: memref<1x4xf32, #tpu.memory_space<vmem>>, %arg28: memref<1x1xf32, #tpu.memory_space<vmem>>, %arg29: memref<8x2x1xf32, #tpu.memory_space<vmem>>) attributes {dimension_semantics = [], scalar_prefetch = 0 : i64, scratch_operands = 0 : i64, tpu.core_type = #tpu.core_type<tc>} {
    %c0 = arith.constant 0 : index
    %c0_0 = arith.constant 0 : index
    %c0_1 = arith.constant 0 : index
    %0 = vector.load %arg0[%c0, %c0_0, %c0_1] : memref<8x2x40xf32, #tpu.memory_space<vmem>>, vector<8x2x40xf32>
    %c0_2 = arith.constant 0 : index
    %c0_3 = arith.constant 0 : index
    %c0_4 = arith.constant 0 : index
    %1 = vector.load %arg1[%c0_2, %c0_3, %c0_4] : memref<8x2x40xf32, #tpu.memory_space<vmem>>, vector<8x2x40xf32>
    %2 = arith.addf %0, %1 : vector<8x2x40xf32>
    %3 = vector.shape_cast %2 : vector<8x2x40xf32> to vector<16x40xf32>
    %c0_5 = arith.constant 0 : index
    %c0_6 = arith.constant 0 : index
    %4 = vector.load %arg3[%c0_5, %c0_6] : memref<40x120xf32, #tpu.memory_space<vmem>>, vector<40x120xf32>
    %cst = arith.constant dense<0.000000e+00> : vector<16x120xf32>
    %5 = tpu.matmul %3, %4, %cst {dimension_numbers = #tpu.dot_dimension_numbers<[1], [0], [0], [1], [0, 0, 1, 1], [], []>} : vector<16x40xf32>, vector<40x120xf32>, vector<16x120xf32> -> vector<16x120xf32>
    %c0_7 = arith.constant 0 : index
    %c0_8 = arith.constant 0 : index
    %6 = vector.load %arg4[%c0_7, %c0_8] : memref<1x120xf32, #tpu.memory_space<vmem>>, vector<1x120xf32>
    %7 = vector.broadcast %6 : vector<1x120xf32> to vector<16x120xf32>
    %8 = arith.addf %5, %7 : vector<16x120xf32>
    %9 = vector.extract_strided_slice %8 {offsets = [0, 0], sizes = [16, 4], strides = [1, 1]} : vector<16x120xf32> to vector<16x4xf32>
    %10 = vector.extract_strided_slice %8 {offsets = [0, 4], sizes = [16, 4], strides = [1, 1]} : vector<16x120xf32> to vector<16x4xf32>
    %11 = vector.extract_strided_slice %8 {offsets = [0, 8], sizes = [16, 4], strides = [1, 1]} : vector<16x120xf32> to vector<16x4xf32>
    %12 = vector.extract_strided_slice %8 {offsets = [0, 12], sizes = [16, 4], strides = [1, 1]} : vector<16x120xf32> to vector<16x4xf32>
    %13 = vector.extract_strided_slice %8 {offsets = [0, 16], sizes = [16, 4], strides = [1, 1]} : vector<16x120xf32> to vector<16x4xf32>
    %14 = vector.extract_strided_slice %8 {offsets = [0, 20], sizes = [16, 4], strides = [1, 1]} : vector<16x120xf32> to vector<16x4xf32>
    %15 = vector.extract_strided_slice %8 {offsets = [0, 24], sizes = [16, 4], strides = [1, 1]} : vector<16x120xf32> to vector<16x4xf32>
    %16 = vector.extract_strided_slice %8 {offsets = [0, 28], sizes = [16, 4], strides = [1, 1]} : vector<16x120xf32> to vector<16x4xf32>
    %17 = vector.extract_strided_slice %8 {offsets = [0, 32], sizes = [16, 4], strides = [1, 1]} : vector<16x120xf32> to vector<16x4xf32>
    %18 = vector.extract_strided_slice %8 {offsets = [0, 36], sizes = [16, 4], strides = [1, 1]} : vector<16x120xf32> to vector<16x4xf32>
    %19 = vector.shape_cast %9 : vector<16x4xf32> to vector<1x16x4xf32>
    %20 = vector.shape_cast %10 : vector<16x4xf32> to vector<1x16x4xf32>
    %21 = vector.shape_cast %11 : vector<16x4xf32> to vector<1x16x4xf32>
    %22 = vector.shape_cast %12 : vector<16x4xf32> to vector<1x16x4xf32>
    %23 = vector.shape_cast %13 : vector<16x4xf32> to vector<1x16x4xf32>
    %24 = vector.shape_cast %14 : vector<16x4xf32> to vector<1x16x4xf32>
    %25 = vector.shape_cast %15 : vector<16x4xf32> to vector<1x16x4xf32>
    %26 = vector.shape_cast %16 : vector<16x4xf32> to vector<1x16x4xf32>
    %27 = vector.shape_cast %17 : vector<16x4xf32> to vector<1x16x4xf32>
    %28 = vector.shape_cast %18 : vector<16x4xf32> to vector<1x16x4xf32>
    %29 = tpu.concatenate %19, %20, %21, %22, %23, %24, %25, %26, %27, %28 in 0 : vector<1x16x4xf32>, vector<1x16x4xf32>, vector<1x16x4xf32>, vector<1x16x4xf32>, vector<1x16x4xf32>, vector<1x16x4xf32>, vector<1x16x4xf32>, vector<1x16x4xf32>, vector<1x16x4xf32>, vector<1x16x4xf32> -> vector<10x16x4xf32>
    %cst_9 = arith.constant 5.000000e-01 : f32
    %30 = vector.broadcast %cst_9 : f32 to vector<10x16x4xf32>
    %31 = arith.mulf %29, %30 : vector<10x16x4xf32>
    %32 = vector.extract_strided_slice %8 {offsets = [0, 40], sizes = [16, 4], strides = [1, 1]} : vector<16x120xf32> to vector<16x4xf32>
    %33 = vector.extract_strided_slice %8 {offsets = [0, 44], sizes = [16, 4], strides = [1, 1]} : vector<16x120xf32> to vector<16x4xf32>
    %34 = vector.extract_strided_slice %8 {offsets = [0, 48], sizes = [16, 4], strides = [1, 1]} : vector<16x120xf32> to vector<16x4xf32>
    %35 = vector.extract_strided_slice %8 {offsets = [0, 52], sizes = [16, 4], strides = [1, 1]} : vector<16x120xf32> to vector<16x4xf32>
    %36 = vector.extract_strided_slice %8 {offsets = [0, 56], sizes = [16, 4], strides = [1, 1]} : vector<16x120xf32> to vector<16x4xf32>
    %37 = vector.extract_strided_slice %8 {offsets = [0, 60], sizes = [16, 4], strides = [1, 1]} : vector<16x120xf32> to vector<16x4xf32>
    %38 = vector.extract_strided_slice %8 {offsets = [0, 64], sizes = [16, 4], strides = [1, 1]} : vector<16x120xf32> to vector<16x4xf32>
    %39 = vector.extract_strided_slice %8 {offsets = [0, 68], sizes = [16, 4], strides = [1, 1]} : vector<16x120xf32> to vector<16x4xf32>
    %40 = vector.extract_strided_slice %8 {offsets = [0, 72], sizes = [16, 4], strides = [1, 1]} : vector<16x120xf32> to vector<16x4xf32>
    %41 = vector.extract_strided_slice %8 {offsets = [0, 76], sizes = [16, 4], strides = [1, 1]} : vector<16x120xf32> to vector<16x4xf32>
    %42 = vector.shape_cast %32 : vector<16x4xf32> to vector<1x16x4xf32>
    %43 = vector.shape_cast %33 : vector<16x4xf32> to vector<1x16x4xf32>
    %44 = vector.shape_cast %34 : vector<16x4xf32> to vector<1x16x4xf32>
    %45 = vector.shape_cast %35 : vector<16x4xf32> to vector<1x16x4xf32>
    %46 = vector.shape_cast %36 : vector<16x4xf32> to vector<1x16x4xf32>
    %47 = vector.shape_cast %37 : vector<16x4xf32> to vector<1x16x4xf32>
    %48 = vector.shape_cast %38 : vector<16x4xf32> to vector<1x16x4xf32>
    %49 = vector.shape_cast %39 : vector<16x4xf32> to vector<1x16x4xf32>
    %50 = vector.shape_cast %40 : vector<16x4xf32> to vector<1x16x4xf32>
    %51 = vector.shape_cast %41 : vector<16x4xf32> to vector<1x16x4xf32>
    %52 = tpu.concatenate %42, %43, %44, %45, %46, %47, %48, %49, %50, %51 in 0 : vector<1x16x4xf32>, vector<1x16x4xf32>, vector<1x16x4xf32>, vector<1x16x4xf32>, vector<1x16x4xf32>, vector<1x16x4xf32>, vector<1x16x4xf32>, vector<1x16x4xf32>, vector<1x16x4xf32>, vector<1x16x4xf32> -> vector<10x16x4xf32>
    %53 = vector.extract_strided_slice %8 {offsets = [0, 80], sizes = [16, 4], strides = [1, 1]} : vector<16x120xf32> to vector<16x4xf32>
    %54 = vector.extract_strided_slice %8 {offsets = [0, 84], sizes = [16, 4], strides = [1, 1]} : vector<16x120xf32> to vector<16x4xf32>
    %55 = vector.extract_strided_slice %8 {offsets = [0, 88], sizes = [16, 4], strides = [1, 1]} : vector<16x120xf32> to vector<16x4xf32>
    %56 = vector.extract_strided_slice %8 {offsets = [0, 92], sizes = [16, 4], strides = [1, 1]} : vector<16x120xf32> to vector<16x4xf32>
    %57 = vector.extract_strided_slice %8 {offsets = [0, 96], sizes = [16, 4], strides = [1, 1]} : vector<16x120xf32> to vector<16x4xf32>
    %58 = vector.extract_strided_slice %8 {offsets = [0, 100], sizes = [16, 4], strides = [1, 1]} : vector<16x120xf32> to vector<16x4xf32>
    %59 = vector.extract_strided_slice %8 {offsets = [0, 104], sizes = [16, 4], strides = [1, 1]} : vector<16x120xf32> to vector<16x4xf32>
    %60 = vector.extract_strided_slice %8 {offsets = [0, 108], sizes = [16, 4], strides = [1, 1]} : vector<16x120xf32> to vector<16x4xf32>
    %61 = vector.extract_strided_slice %8 {offsets = [0, 112], sizes = [16, 4], strides = [1, 1]} : vector<16x120xf32> to vector<16x4xf32>
    %62 = vector.extract_strided_slice %8 {offsets = [0, 116], sizes = [16, 4], strides = [1, 1]} : vector<16x120xf32> to vector<16x4xf32>
    %63 = vector.shape_cast %53 : vector<16x4xf32> to vector<1x16x4xf32>
    %64 = vector.shape_cast %54 : vector<16x4xf32> to vector<1x16x4xf32>
    %65 = vector.shape_cast %55 : vector<16x4xf32> to vector<1x16x4xf32>
    %66 = vector.shape_cast %56 : vector<16x4xf32> to vector<1x16x4xf32>
    %67 = vector.shape_cast %57 : vector<16x4xf32> to vector<1x16x4xf32>
    %68 = vector.shape_cast %58 : vector<16x4xf32> to vector<1x16x4xf32>
    %69 = vector.shape_cast %59 : vector<16x4xf32> to vector<1x16x4xf32>
    %70 = vector.shape_cast %60 : vector<16x4xf32> to vector<1x16x4xf32>
    %71 = vector.shape_cast %61 : vector<16x4xf32> to vector<1x16x4xf32>
    %72 = vector.shape_cast %62 : vector<16x4xf32> to vector<1x16x4xf32>
    %73 = tpu.concatenate %63, %64, %65, %66, %67, %68, %69, %70, %71, %72 in 0 : vector<1x16x4xf32>, vector<1x16x4xf32>, vector<1x16x4xf32>, vector<1x16x4xf32>, vector<1x16x4xf32>, vector<1x16x4xf32>, vector<1x16x4xf32>, vector<1x16x4xf32>, vector<1x16x4xf32>, vector<1x16x4xf32> -> vector<10x16x4xf32>
    "tpu.trace_start"() <{level = 10 : i32, message = "hqd,hkd->hqk"}> : () -> ()
    %cst_10 = arith.constant dense<0.000000e+00> : vector<10x16x16xf32>
    %74 = tpu.matmul %31, %52, %cst_10 {dimension_numbers = #tpu.dot_dimension_numbers<[2], [2], [1], [1], [0, 0, 0, 1, 1, 1], [0], [0]>} : vector<10x16x4xf32>, vector<10x16x4xf32>, vector<10x16x16xf32> -> vector<10x16x16xf32>
    "tpu.trace_stop"() : () -> ()
    %c0_11 = arith.constant 0 : index
    %c0_12 = arith.constant 0 : index
    %75 = vector.load %arg2[%c0_11, %c0_12] : memref<16x16xf32, #tpu.memory_space<vmem>>, vector<16x16xf32>
    %76 = vector.shape_cast %75 : vector<16x16xf32> to vector<1x16x16xf32>
    %77 = vector.broadcast %76 : vector<1x16x16xf32> to vector<10x16x16xf32>
    %78 = arith.addf %74, %77 : vector<10x16x16xf32>
    %cst_13 = arith.constant dense<0xFF800000> : vector<10x16xf32>
    %79 = vector.multi_reduction <maximumf>, %78, %cst_13 [2] : vector<10x16x16xf32> to vector<10x16xf32>
    %80 = vector.shape_cast %79 : vector<10x16xf32> to vector<10x16x1xf32>
    %81 = vector.broadcast %80 : vector<10x16x1xf32> to vector<10x16x16xf32>
    %82 = arith.subf %78, %81 : vector<10x16x16xf32>
    %83 = math.exp %82 : vector<10x16x16xf32>
    %cst_14 = arith.constant dense<0.000000e+00> : vector<10x16xf32>
    %84 = vector.multi_reduction <add>, %83, %cst_14 [2] : vector<10x16x16xf32> to vector<10x16xf32>
    %85 = vector.shape_cast %84 : vector<10x16xf32> to vector<10x16x1xf32>
    %86 = tpu.reciprocal %85 {approx = true} : vector<10x16x1xf32> -> vector<10x16x1xf32>
    %87 = vector.broadcast %86 : vector<10x16x1xf32> to vector<10x16x16xf32>
    %88 = arith.mulf %83, %87 : vector<10x16x16xf32>
    "tpu.trace_start"() <{level = 10 : i32, message = "hqk,hkd->hqd"}> : () -> ()
    %cst_15 = arith.constant dense<0.000000e+00> : vector<10x16x4xf32>
    %89 = tpu.matmul %88, %73, %cst_15 {dimension_numbers = #tpu.dot_dimension_numbers<[2], [1], [1], [2], [0, 0, 0, 1, 1, 2], [0], [0]>} : vector<10x16x16xf32>, vector<10x16x4xf32>, vector<10x16x4xf32> -> vector<10x16x4xf32>
    "tpu.trace_stop"() : () -> ()
    %90 = vector.extract_strided_slice %89 {offsets = [0, 0, 0], sizes = [1, 16, 4], strides = [1, 1, 1]} : vector<10x16x4xf32> to vector<1x16x4xf32>
    %91 = vector.shape_cast %90 : vector<1x16x4xf32> to vector<16x4xf32>
    %92 = vector.extract_strided_slice %89 {offsets = [1, 0, 0], sizes = [1, 16, 4], strides = [1, 1, 1]} : vector<10x16x4xf32> to vector<1x16x4xf32>
    %93 = vector.shape_cast %92 : vector<1x16x4xf32> to vector<16x4xf32>
    %94 = vector.extract_strided_slice %89 {offsets = [2, 0, 0], sizes = [1, 16, 4], strides = [1, 1, 1]} : vector<10x16x4xf32> to vector<1x16x4xf32>
    %95 = vector.shape_cast %94 : vector<1x16x4xf32> to vector<16x4xf32>
    %96 = vector.extract_strided_slice %89 {offsets = [3, 0, 0], sizes = [1, 16, 4], strides = [1, 1, 1]} : vector<10x16x4xf32> to vector<1x16x4xf32>
    %97 = vector.shape_cast %96 : vector<1x16x4xf32> to vector<16x4xf32>
    %98 = vector.extract_strided_slice %89 {offsets = [4, 0, 0], sizes = [1, 16, 4], strides = [1, 1, 1]} : vector<10x16x4xf32> to vector<1x16x4xf32>
    %99 = vector.shape_cast %98 : vector<1x16x4xf32> to vector<16x4xf32>
    %100 = vector.extract_strided_slice %89 {offsets = [5, 0, 0], sizes = [1, 16, 4], strides = [1, 1, 1]} : vector<10x16x4xf32> to vector<1x16x4xf32>
    %101 = vector.shape_cast %100 : vector<1x16x4xf32> to vector<16x4xf32>
    %102 = vector.extract_strided_slice %89 {offsets = [6, 0, 0], sizes = [1, 16, 4], strides = [1, 1, 1]} : vector<10x16x4xf32> to vector<1x16x4xf32>
    %103 = vector.shape_cast %102 : vector<1x16x4xf32> to vector<16x4xf32>
    %104 = vector.extract_strided_slice %89 {offsets = [7, 0, 0], sizes = [1, 16, 4], strides = [1, 1, 1]} : vector<10x16x4xf32> to vector<1x16x4xf32>
    %105 = vector.shape_cast %104 : vector<1x16x4xf32> to vector<16x4xf32>
    %106 = vector.extract_strided_slice %89 {offsets = [8, 0, 0], sizes = [1, 16, 4], strides = [1, 1, 1]} : vector<10x16x4xf32> to vector<1x16x4xf32>
    %107 = vector.shape_cast %106 : vector<1x16x4xf32> to vector<16x4xf32>
    %108 = vector.extract_strided_slice %89 {offsets = [9, 0, 0], sizes = [1, 16, 4], strides = [1, 1, 1]} : vector<10x16x4xf32> to vector<1x16x4xf32>
    %109 = vector.shape_cast %108 : vector<1x16x4xf32> to vector<16x4xf32>
    %110 = tpu.concatenate %91, %93, %95, %97, %99, %101, %103, %105, %107, %109 in 1 : vector<16x4xf32>, vector<16x4xf32>, vector<16x4xf32>, vector<16x4xf32>, vector<16x4xf32>, vector<16x4xf32>, vector<16x4xf32>, vector<16x4xf32>, vector<16x4xf32>, vector<16x4xf32> -> vector<16x40xf32>
    %c0_16 = arith.constant 0 : index
    %c0_17 = arith.constant 0 : index
    %111 = vector.load %arg5[%c0_16, %c0_17] : memref<40x40xf32, #tpu.memory_space<vmem>>, vector<40x40xf32>
    %cst_18 = arith.constant dense<0.000000e+00> : vector<16x40xf32>
    %112 = tpu.matmul %110, %111, %cst_18 {dimension_numbers = #tpu.dot_dimension_numbers<[1], [0], [0], [1], [0, 0, 1, 1], [], []>} : vector<16x40xf32>, vector<40x40xf32>, vector<16x40xf32> -> vector<16x40xf32>
    %c0_19 = arith.constant 0 : index
    %c0_20 = arith.constant 0 : index
    %113 = vector.load %arg6[%c0_19, %c0_20] : memref<1x40xf32, #tpu.memory_space<vmem>>, vector<1x40xf32>
    %114 = vector.broadcast %113 : vector<1x40xf32> to vector<16x40xf32>
    %115 = arith.addf %112, %114 : vector<16x40xf32>
    %116 = arith.addf %3, %115 : vector<16x40xf32>
    %c0_21 = arith.constant 0 : index
    %c0_22 = arith.constant 0 : index
    %117 = vector.load %arg7[%c0_21, %c0_22] : memref<1x40xf32, #tpu.memory_space<vmem>>, vector<1x40xf32>
    %c0_23 = arith.constant 0 : index
    %c0_24 = arith.constant 0 : index
    %118 = vector.load %arg8[%c0_23, %c0_24] : memref<1x40xf32, #tpu.memory_space<vmem>>, vector<1x40xf32>
    %cst_25 = arith.constant dense<0.000000e+00> : vector<16xf32>
    %119 = vector.multi_reduction <add>, %116, %cst_25 [1] : vector<16x40xf32> to vector<16xf32>
    %120 = vector.shape_cast %119 : vector<16xf32> to vector<16x1xf32>
    %cst_26 = arith.constant 4.000000e+01 : f32
    %121 = vector.broadcast %cst_26 : f32 to vector<16x1xf32>
    %122 = arith.divf %120, %121 : vector<16x1xf32>
    %123 = vector.broadcast %122 : vector<16x1xf32> to vector<16x40xf32>
    %124 = arith.subf %116, %123 : vector<16x40xf32>
    %125 = arith.mulf %124, %124 : vector<16x40xf32>
    %cst_27 = arith.constant dense<0.000000e+00> : vector<16xf32>
    %126 = vector.multi_reduction <add>, %125, %cst_27 [1] : vector<16x40xf32> to vector<16xf32>
    %127 = vector.shape_cast %126 : vector<16xf32> to vector<16x1xf32>
    %cst_28 = arith.constant 4.000000e+01 : f32
    %128 = vector.broadcast %cst_28 : f32 to vector<16x1xf32>
    %129 = arith.divf %127, %128 : vector<16x1xf32>
    %130 = vector.broadcast %122 : vector<16x1xf32> to vector<16x40xf32>
    %131 = arith.subf %116, %130 : vector<16x40xf32>
    %cst_29 = arith.constant 9.99999974E-6 : f32
    %132 = vector.broadcast %cst_29 : f32 to vector<16x1xf32>
    %133 = arith.addf %129, %132 : vector<16x1xf32>
    %134 = math.rsqrt %133 : vector<16x1xf32>
    %135 = vector.broadcast %134 : vector<16x1xf32> to vector<16x40xf32>
    %136 = arith.mulf %131, %135 : vector<16x40xf32>
    %137 = vector.broadcast %117 : vector<1x40xf32> to vector<16x40xf32>
    %138 = arith.mulf %136, %137 : vector<16x40xf32>
    %139 = vector.broadcast %118 : vector<1x40xf32> to vector<16x40xf32>
    %140 = arith.addf %138, %139 : vector<16x40xf32>
    %141 = arith.truncf %140 : vector<16x40xf32> to vector<16x40xbf16>
    %c0_30 = arith.constant 0 : index
    %c0_31 = arith.constant 0 : index
    %142 = vector.load %arg9[%c0_30, %c0_31] : memref<40x2048xbf16, #tpu.memory_space<vmem>>, vector<40x2048xbf16>
    %cst_32 = arith.constant dense<0.000000e+00> : vector<16x2048xf32>
    %143 = tpu.matmul %141, %142, %cst_32 {dimension_numbers = #tpu.dot_dimension_numbers<[1], [0], [0], [1], [0, 0, 1, 1], [], []>} : vector<16x40xbf16>, vector<40x2048xbf16>, vector<16x2048xf32> -> vector<16x2048xf32>
    %c0_33 = arith.constant 0 : index
    %c0_34 = arith.constant 0 : index
    %144 = vector.load %arg10[%c0_33, %c0_34] : memref<1x2048xf32, #tpu.memory_space<vmem>>, vector<1x2048xf32>
    %145 = vector.broadcast %144 : vector<1x2048xf32> to vector<16x2048xf32>
    %146 = arith.addf %143, %145 : vector<16x2048xf32>
    %cst_35 = arith.constant 0.000000e+00 : f32
    %147 = vector.broadcast %cst_35 : f32 to vector<16x2048xf32>
    %148 = arith.maximumf %146, %147 : vector<16x2048xf32>
    %149 = arith.truncf %148 : vector<16x2048xf32> to vector<16x2048xbf16>
    %c0_36 = arith.constant 0 : index
    %c0_37 = arith.constant 0 : index
    %150 = vector.load %arg11[%c0_36, %c0_37] : memref<2048x40xbf16, #tpu.memory_space<vmem>>, vector<2048x40xbf16>
    %cst_38 = arith.constant dense<0.000000e+00> : vector<16x40xf32>
    %151 = tpu.matmul %149, %150, %cst_38 {dimension_numbers = #tpu.dot_dimension_numbers<[1], [0], [0], [1], [0, 0, 1, 1], [], []>} : vector<16x2048xbf16>, vector<2048x40xbf16>, vector<16x40xf32> -> vector<16x40xf32>
    %c0_39 = arith.constant 0 : index
    %c0_40 = arith.constant 0 : index
    %152 = vector.load %arg12[%c0_39, %c0_40] : memref<1x40xf32, #tpu.memory_space<vmem>>, vector<1x40xf32>
    %153 = vector.broadcast %152 : vector<1x40xf32> to vector<16x40xf32>
    %154 = arith.addf %151, %153 : vector<16x40xf32>
    %155 = arith.addf %140, %154 : vector<16x40xf32>
    %c0_41 = arith.constant 0 : index
    %c0_42 = arith.constant 0 : index
    %156 = vector.load %arg13[%c0_41, %c0_42] : memref<1x40xf32, #tpu.memory_space<vmem>>, vector<1x40xf32>
    %c0_43 = arith.constant 0 : index
    %c0_44 = arith.constant 0 : index
    %157 = vector.load %arg14[%c0_43, %c0_44] : memref<1x40xf32, #tpu.memory_space<vmem>>, vector<1x40xf32>
    %cst_45 = arith.constant dense<0.000000e+00> : vector<16xf32>
    %158 = vector.multi_reduction <add>, %155, %cst_45 [1] : vector<16x40xf32> to vector<16xf32>
    %159 = vector.shape_cast %158 : vector<16xf32> to vector<16x1xf32>
    %cst_46 = arith.constant 4.000000e+01 : f32
    %160 = vector.broadcast %cst_46 : f32 to vector<16x1xf32>
    %161 = arith.divf %159, %160 : vector<16x1xf32>
    %162 = vector.broadcast %161 : vector<16x1xf32> to vector<16x40xf32>
    %163 = arith.subf %155, %162 : vector<16x40xf32>
    %164 = arith.mulf %163, %163 : vector<16x40xf32>
    %cst_47 = arith.constant dense<0.000000e+00> : vector<16xf32>
    %165 = vector.multi_reduction <add>, %164, %cst_47 [1] : vector<16x40xf32> to vector<16xf32>
    %166 = vector.shape_cast %165 : vector<16xf32> to vector<16x1xf32>
    %cst_48 = arith.constant 4.000000e+01 : f32
    %167 = vector.broadcast %cst_48 : f32 to vector<16x1xf32>
    %168 = arith.divf %166, %167 : vector<16x1xf32>
    %169 = vector.broadcast %161 : vector<16x1xf32> to vector<16x40xf32>
    %170 = arith.subf %155, %169 : vector<16x40xf32>
    %cst_49 = arith.constant 9.99999974E-6 : f32
    %171 = vector.broadcast %cst_49 : f32 to vector<16x1xf32>
    %172 = arith.addf %168, %171 : vector<16x1xf32>
    %173 = math.rsqrt %172 : vector<16x1xf32>
    %174 = vector.broadcast %173 : vector<16x1xf32> to vector<16x40xf32>
    %175 = arith.mulf %170, %174 : vector<16x40xf32>
    %176 = vector.broadcast %156 : vector<1x40xf32> to vector<16x40xf32>
    %177 = arith.mulf %175, %176 : vector<16x40xf32>
    %178 = vector.broadcast %157 : vector<1x40xf32> to vector<16x40xf32>
    %179 = arith.addf %177, %178 : vector<16x40xf32>
    %c0_50 = arith.constant 0 : index
    %c0_51 = arith.constant 0 : index
    %180 = vector.load %arg15[%c0_50, %c0_51] : memref<40x8xf32, #tpu.memory_space<vmem>>, vector<40x8xf32>
    %cst_52 = arith.constant dense<0.000000e+00> : vector<16x8xf32>
    %181 = tpu.matmul %179, %180, %cst_52 {dimension_numbers = #tpu.dot_dimension_numbers<[1], [0], [0], [1], [0, 0, 1, 1], [], []>} : vector<16x40xf32>, vector<40x8xf32>, vector<16x8xf32> -> vector<16x8xf32>
    %c0_53 = arith.constant 0 : index
    %c0_54 = arith.constant 0 : index
    %182 = vector.load %arg17[%c0_53, %c0_54] : memref<1x8xf32, #tpu.memory_space<vmem>>, vector<1x8xf32>
    %183 = vector.broadcast %182 : vector<1x8xf32> to vector<16x8xf32>
    %184 = arith.addf %181, %183 : vector<16x8xf32>
    %c0_55 = arith.constant 0 : index
    %c0_56 = arith.constant 0 : index
    %185 = vector.load %arg18[%c0_55, %c0_56] : memref<40x8xf32, #tpu.memory_space<vmem>>, vector<40x8xf32>
    %cst_57 = arith.constant dense<0.000000e+00> : vector<16x8xf32>
    %186 = tpu.matmul %179, %185, %cst_57 {dimension_numbers = #tpu.dot_dimension_numbers<[1], [0], [0], [1], [0, 0, 1, 1], [], []>} : vector<16x40xf32>, vector<40x8xf32>, vector<16x8xf32> -> vector<16x8xf32>
    %c0_58 = arith.constant 0 : index
    %c0_59 = arith.constant 0 : index
    %187 = vector.load %arg20[%c0_58, %c0_59] : memref<1x8xf32, #tpu.memory_space<vmem>>, vector<1x8xf32>
    %188 = vector.broadcast %187 : vector<1x8xf32> to vector<16x8xf32>
    %189 = arith.addf %186, %188 : vector<16x8xf32>
    %c0_60 = arith.constant 0 : index
    %c0_61 = arith.constant 0 : index
    %190 = vector.load %arg16[%c0_60, %c0_61] : memref<2x8xf32, #tpu.memory_space<vmem>>, vector<2x8xf32>
    %c0_62 = arith.constant 0 : index
    %c0_63 = arith.constant 0 : index
    %191 = vector.load %arg19[%c0_62, %c0_63] : memref<2x8xf32, #tpu.memory_space<vmem>>, vector<2x8xf32>
    %cst_64 = arith.constant 0.000000e+00 : f32
    %192 = vector.broadcast %cst_64 : f32 to vector<2x2xf32>
    %cst_65 = arith.constant 0.000000e+00 : f32
    %193 = vector.broadcast %cst_65 : f32 to vector<2x2xf32>
    %cst_66 = arith.constant 0.000000e+00 : f32
    %194 = vector.broadcast %cst_66 : f32 to vector<2x2xf32>
    %cst_67 = arith.constant 0.000000e+00 : f32
    %195 = vector.broadcast %cst_67 : f32 to vector<2x2xf32>
    %196 = vector.extract_strided_slice %184 {offsets = [0, 0], sizes = [2, 8], strides = [1, 1]} : vector<16x8xf32> to vector<2x8xf32>
    %197 = vector.extract_strided_slice %192 {offsets = [0, 0], sizes = [2, 1], strides = [1, 1]} : vector<2x2xf32> to vector<2x1xf32>
    %198 = vector.extract_strided_slice %190 {offsets = [0, 0], sizes = [1, 8], strides = [1, 1]} : vector<2x8xf32> to vector<1x8xf32>
    %199 = vector.broadcast %197 : vector<2x1xf32> to vector<2x8xf32>
    %200 = vector.broadcast %198 : vector<1x8xf32> to vector<2x8xf32>
    %201 = arith.mulf %199, %200 : vector<2x8xf32>
    %202 = vector.extract_strided_slice %192 {offsets = [0, 1], sizes = [2, 1], strides = [1, 1]} : vector<2x2xf32> to vector<2x1xf32>
    %203 = vector.extract_strided_slice %190 {offsets = [1, 0], sizes = [1, 8], strides = [1, 1]} : vector<2x8xf32> to vector<1x8xf32>
    %204 = vector.broadcast %202 : vector<2x1xf32> to vector<2x8xf32>
    %205 = vector.broadcast %203 : vector<1x8xf32> to vector<2x8xf32>
    %206 = arith.mulf %204, %205 : vector<2x8xf32>
    %207 = arith.addf %201, %206 : vector<2x8xf32>
    %208 = arith.addf %196, %207 : vector<2x8xf32>
    %209 = vector.extract_strided_slice %208 {offsets = [0, 0], sizes = [2, 2], strides = [1, 1]} : vector<2x8xf32> to vector<2x2xf32>
    %210 = arith.negf %209 : vector<2x2xf32>
    %211 = math.exp %210 : vector<2x2xf32>
    %cst_68 = arith.constant 1.000000e+00 : f32
    %212 = vector.broadcast %cst_68 : f32 to vector<2x2xf32>
    %213 = arith.addf %212, %211 : vector<2x2xf32>
    %214 = arith.divf %212, %213 : vector<2x2xf32>
    %215 = vector.extract_strided_slice %208 {offsets = [0, 2], sizes = [2, 2], strides = [1, 1]} : vector<2x8xf32> to vector<2x2xf32>
    %216 = arith.negf %215 : vector<2x2xf32>
    %217 = math.exp %216 : vector<2x2xf32>
    %cst_69 = arith.constant 1.000000e+00 : f32
    %218 = vector.broadcast %cst_69 : f32 to vector<2x2xf32>
    %219 = arith.addf %218, %217 : vector<2x2xf32>
    %220 = arith.divf %218, %219 : vector<2x2xf32>
    %221 = vector.extract_strided_slice %208 {offsets = [0, 4], sizes = [2, 2], strides = [1, 1]} : vector<2x8xf32> to vector<2x2xf32>
    %222 = math.tanh %221 : vector<2x2xf32>
    %223 = vector.extract_strided_slice %208 {offsets = [0, 6], sizes = [2, 2], strides = [1, 1]} : vector<2x8xf32> to vector<2x2xf32>
    %224 = arith.negf %223 : vector<2x2xf32>
    %225 = math.exp %224 : vector<2x2xf32>
    %cst_70 = arith.constant 1.000000e+00 : f32
    %226 = vector.broadcast %cst_70 : f32 to vector<2x2xf32>
    %227 = arith.addf %226, %225 : vector<2x2xf32>
    %228 = arith.divf %226, %227 : vector<2x2xf32>
    %229 = arith.mulf %220, %193 : vector<2x2xf32>
    %230 = arith.mulf %214, %222 : vector<2x2xf32>
    %231 = arith.addf %229, %230 : vector<2x2xf32>
    %232 = math.tanh %231 : vector<2x2xf32>
    %233 = arith.mulf %228, %232 : vector<2x2xf32>
    %234 = vector.extract_strided_slice %189 {offsets = [14, 0], sizes = [2, 8], strides = [1, 1]} : vector<16x8xf32> to vector<2x8xf32>
    %235 = vector.extract_strided_slice %194 {offsets = [0, 0], sizes = [2, 1], strides = [1, 1]} : vector<2x2xf32> to vector<2x1xf32>
    %236 = vector.extract_strided_slice %191 {offsets = [0, 0], sizes = [1, 8], strides = [1, 1]} : vector<2x8xf32> to vector<1x8xf32>
    %237 = vector.broadcast %235 : vector<2x1xf32> to vector<2x8xf32>
    %238 = vector.broadcast %236 : vector<1x8xf32> to vector<2x8xf32>
    %239 = arith.mulf %237, %238 : vector<2x8xf32>
    %240 = vector.extract_strided_slice %194 {offsets = [0, 1], sizes = [2, 1], strides = [1, 1]} : vector<2x2xf32> to vector<2x1xf32>
    %241 = vector.extract_strided_slice %191 {offsets = [1, 0], sizes = [1, 8], strides = [1, 1]} : vector<2x8xf32> to vector<1x8xf32>
    %242 = vector.broadcast %240 : vector<2x1xf32> to vector<2x8xf32>
    %243 = vector.broadcast %241 : vector<1x8xf32> to vector<2x8xf32>
    %244 = arith.mulf %242, %243 : vector<2x8xf32>
    %245 = arith.addf %239, %244 : vector<2x8xf32>
    %246 = arith.addf %234, %245 : vector<2x8xf32>
    %247 = vector.extract_strided_slice %246 {offsets = [0, 0], sizes = [2, 2], strides = [1, 1]} : vector<2x8xf32> to vector<2x2xf32>
    %248 = arith.negf %247 : vector<2x2xf32>
    %249 = math.exp %248 : vector<2x2xf32>
    %cst_71 = arith.constant 1.000000e+00 : f32
    %250 = vector.broadcast %cst_71 : f32 to vector<2x2xf32>
    %251 = arith.addf %250, %249 : vector<2x2xf32>
    %252 = arith.divf %250, %251 : vector<2x2xf32>
    %253 = vector.extract_strided_slice %246 {offsets = [0, 2], sizes = [2, 2], strides = [1, 1]} : vector<2x8xf32> to vector<2x2xf32>
    %254 = arith.negf %253 : vector<2x2xf32>
    %255 = math.exp %254 : vector<2x2xf32>
    %cst_72 = arith.constant 1.000000e+00 : f32
    %256 = vector.broadcast %cst_72 : f32 to vector<2x2xf32>
    %257 = arith.addf %256, %255 : vector<2x2xf32>
    %258 = arith.divf %256, %257 : vector<2x2xf32>
    %259 = vector.extract_strided_slice %246 {offsets = [0, 4], sizes = [2, 2], strides = [1, 1]} : vector<2x8xf32> to vector<2x2xf32>
    %260 = math.tanh %259 : vector<2x2xf32>
    %261 = vector.extract_strided_slice %246 {offsets = [0, 6], sizes = [2, 2], strides = [1, 1]} : vector<2x8xf32> to vector<2x2xf32>
    %262 = arith.negf %261 : vector<2x2xf32>
    %263 = math.exp %262 : vector<2x2xf32>
    %cst_73 = arith.constant 1.000000e+00 : f32
    %264 = vector.broadcast %cst_73 : f32 to vector<2x2xf32>
    %265 = arith.addf %264, %263 : vector<2x2xf32>
    %266 = arith.divf %264, %265 : vector<2x2xf32>
    %267 = arith.mulf %258, %195 : vector<2x2xf32>
    %268 = arith.mulf %252, %260 : vector<2x2xf32>
    %269 = arith.addf %267, %268 : vector<2x2xf32>
    %270 = math.tanh %269 : vector<2x2xf32>
    %271 = arith.mulf %266, %270 : vector<2x2xf32>
    %272 = vector.extract_strided_slice %184 {offsets = [2, 0], sizes = [2, 8], strides = [1, 1]} : vector<16x8xf32> to vector<2x8xf32>
    %273 = vector.extract_strided_slice %233 {offsets = [0, 0], sizes = [2, 1], strides = [1, 1]} : vector<2x2xf32> to vector<2x1xf32>
    %274 = vector.extract_strided_slice %190 {offsets = [0, 0], sizes = [1, 8], strides = [1, 1]} : vector<2x8xf32> to vector<1x8xf32>
    %275 = vector.broadcast %273 : vector<2x1xf32> to vector<2x8xf32>
    %276 = vector.broadcast %274 : vector<1x8xf32> to vector<2x8xf32>
    %277 = arith.mulf %275, %276 : vector<2x8xf32>
    %278 = vector.extract_strided_slice %233 {offsets = [0, 1], sizes = [2, 1], strides = [1, 1]} : vector<2x2xf32> to vector<2x1xf32>
    %279 = vector.extract_strided_slice %190 {offsets = [1, 0], sizes = [1, 8], strides = [1, 1]} : vector<2x8xf32> to vector<1x8xf32>
    %280 = vector.broadcast %278 : vector<2x1xf32> to vector<2x8xf32>
    %281 = vector.broadcast %279 : vector<1x8xf32> to vector<2x8xf32>
    %282 = arith.mulf %280, %281 : vector<2x8xf32>
    %283 = arith.addf %277, %282 : vector<2x8xf32>
    %284 = arith.addf %272, %283 : vector<2x8xf32>
    %285 = vector.extract_strided_slice %284 {offsets = [0, 0], sizes = [2, 2], strides = [1, 1]} : vector<2x8xf32> to vector<2x2xf32>
    %286 = arith.negf %285 : vector<2x2xf32>
    %287 = math.exp %286 : vector<2x2xf32>
    %cst_74 = arith.constant 1.000000e+00 : f32
    %288 = vector.broadcast %cst_74 : f32 to vector<2x2xf32>
    %289 = arith.addf %288, %287 : vector<2x2xf32>
    %290 = arith.divf %288, %289 : vector<2x2xf32>
    %291 = vector.extract_strided_slice %284 {offsets = [0, 2], sizes = [2, 2], strides = [1, 1]} : vector<2x8xf32> to vector<2x2xf32>
    %292 = arith.negf %291 : vector<2x2xf32>
    %293 = math.exp %292 : vector<2x2xf32>
    %cst_75 = arith.constant 1.000000e+00 : f32
    %294 = vector.broadcast %cst_75 : f32 to vector<2x2xf32>
    %295 = arith.addf %294, %293 : vector<2x2xf32>
    %296 = arith.divf %294, %295 : vector<2x2xf32>
    %297 = vector.extract_strided_slice %284 {offsets = [0, 4], sizes = [2, 2], strides = [1, 1]} : vector<2x8xf32> to vector<2x2xf32>
    %298 = math.tanh %297 : vector<2x2xf32>
    %299 = vector.extract_strided_slice %284 {offsets = [0, 6], sizes = [2, 2], strides = [1, 1]} : vector<2x8xf32> to vector<2x2xf32>
    %300 = arith.negf %299 : vector<2x2xf32>
    %301 = math.exp %300 : vector<2x2xf32>
    %cst_76 = arith.constant 1.000000e+00 : f32
    %302 = vector.broadcast %cst_76 : f32 to vector<2x2xf32>
    %303 = arith.addf %302, %301 : vector<2x2xf32>
    %304 = arith.divf %302, %303 : vector<2x2xf32>
    %305 = arith.mulf %296, %231 : vector<2x2xf32>
    %306 = arith.mulf %290, %298 : vector<2x2xf32>
    %307 = arith.addf %305, %306 : vector<2x2xf32>
    %308 = math.tanh %307 : vector<2x2xf32>
    %309 = arith.mulf %304, %308 : vector<2x2xf32>
    %310 = vector.extract_strided_slice %189 {offsets = [12, 0], sizes = [2, 8], strides = [1, 1]} : vector<16x8xf32> to vector<2x8xf32>
    %311 = vector.extract_strided_slice %271 {offsets = [0, 0], sizes = [2, 1], strides = [1, 1]} : vector<2x2xf32> to vector<2x1xf32>
    %312 = vector.extract_strided_slice %191 {offsets = [0, 0], sizes = [1, 8], strides = [1, 1]} : vector<2x8xf32> to vector<1x8xf32>
    %313 = vector.broadcast %311 : vector<2x1xf32> to vector<2x8xf32>
    %314 = vector.broadcast %312 : vector<1x8xf32> to vector<2x8xf32>
    %315 = arith.mulf %313, %314 : vector<2x8xf32>
    %316 = vector.extract_strided_slice %271 {offsets = [0, 1], sizes = [2, 1], strides = [1, 1]} : vector<2x2xf32> to vector<2x1xf32>
    %317 = vector.extract_strided_slice %191 {offsets = [1, 0], sizes = [1, 8], strides = [1, 1]} : vector<2x8xf32> to vector<1x8xf32>
    %318 = vector.broadcast %316 : vector<2x1xf32> to vector<2x8xf32>
    %319 = vector.broadcast %317 : vector<1x8xf32> to vector<2x8xf32>
    %320 = arith.mulf %318, %319 : vector<2x8xf32>
    %321 = arith.addf %315, %320 : vector<2x8xf32>
    %322 = arith.addf %310, %321 : vector<2x8xf32>
    %323 = vector.extract_strided_slice %322 {offsets = [0, 0], sizes = [2, 2], strides = [1, 1]} : vector<2x8xf32> to vector<2x2xf32>
    %324 = arith.negf %323 : vector<2x2xf32>
    %325 = math.exp %324 : vector<2x2xf32>
    %cst_77 = arith.constant 1.000000e+00 : f32
    %326 = vector.broadcast %cst_77 : f32 to vector<2x2xf32>
    %327 = arith.addf %326, %325 : vector<2x2xf32>
    %328 = arith.divf %326, %327 : vector<2x2xf32>
    %329 = vector.extract_strided_slice %322 {offsets = [0, 2], sizes = [2, 2], strides = [1, 1]} : vector<2x8xf32> to vector<2x2xf32>
    %330 = arith.negf %329 : vector<2x2xf32>
    %331 = math.exp %330 : vector<2x2xf32>
    %cst_78 = arith.constant 1.000000e+00 : f32
    %332 = vector.broadcast %cst_78 : f32 to vector<2x2xf32>
    %333 = arith.addf %332, %331 : vector<2x2xf32>
    %334 = arith.divf %332, %333 : vector<2x2xf32>
    %335 = vector.extract_strided_slice %322 {offsets = [0, 4], sizes = [2, 2], strides = [1, 1]} : vector<2x8xf32> to vector<2x2xf32>
    %336 = math.tanh %335 : vector<2x2xf32>
    %337 = vector.extract_strided_slice %322 {offsets = [0, 6], sizes = [2, 2], strides = [1, 1]} : vector<2x8xf32> to vector<2x2xf32>
    %338 = arith.negf %337 : vector<2x2xf32>
    %339 = math.exp %338 : vector<2x2xf32>
    %cst_79 = arith.constant 1.000000e+00 : f32
    %340 = vector.broadcast %cst_79 : f32 to vector<2x2xf32>
    %341 = arith.addf %340, %339 : vector<2x2xf32>
    %342 = arith.divf %340, %341 : vector<2x2xf32>
    %343 = arith.mulf %334, %269 : vector<2x2xf32>
    %344 = arith.mulf %328, %336 : vector<2x2xf32>
    %345 = arith.addf %343, %344 : vector<2x2xf32>
    %346 = math.tanh %345 : vector<2x2xf32>
    %347 = arith.mulf %342, %346 : vector<2x2xf32>
    %348 = vector.extract_strided_slice %184 {offsets = [4, 0], sizes = [2, 8], strides = [1, 1]} : vector<16x8xf32> to vector<2x8xf32>
    %349 = vector.extract_strided_slice %309 {offsets = [0, 0], sizes = [2, 1], strides = [1, 1]} : vector<2x2xf32> to vector<2x1xf32>
    %350 = vector.extract_strided_slice %190 {offsets = [0, 0], sizes = [1, 8], strides = [1, 1]} : vector<2x8xf32> to vector<1x8xf32>
    %351 = vector.broadcast %349 : vector<2x1xf32> to vector<2x8xf32>
    %352 = vector.broadcast %350 : vector<1x8xf32> to vector<2x8xf32>
    %353 = arith.mulf %351, %352 : vector<2x8xf32>
    %354 = vector.extract_strided_slice %309 {offsets = [0, 1], sizes = [2, 1], strides = [1, 1]} : vector<2x2xf32> to vector<2x1xf32>
    %355 = vector.extract_strided_slice %190 {offsets = [1, 0], sizes = [1, 8], strides = [1, 1]} : vector<2x8xf32> to vector<1x8xf32>
    %356 = vector.broadcast %354 : vector<2x1xf32> to vector<2x8xf32>
    %357 = vector.broadcast %355 : vector<1x8xf32> to vector<2x8xf32>
    %358 = arith.mulf %356, %357 : vector<2x8xf32>
    %359 = arith.addf %353, %358 : vector<2x8xf32>
    %360 = arith.addf %348, %359 : vector<2x8xf32>
    %361 = vector.extract_strided_slice %360 {offsets = [0, 0], sizes = [2, 2], strides = [1, 1]} : vector<2x8xf32> to vector<2x2xf32>
    %362 = arith.negf %361 : vector<2x2xf32>
    %363 = math.exp %362 : vector<2x2xf32>
    %cst_80 = arith.constant 1.000000e+00 : f32
    %364 = vector.broadcast %cst_80 : f32 to vector<2x2xf32>
    %365 = arith.addf %364, %363 : vector<2x2xf32>
    %366 = arith.divf %364, %365 : vector<2x2xf32>
    %367 = vector.extract_strided_slice %360 {offsets = [0, 2], sizes = [2, 2], strides = [1, 1]} : vector<2x8xf32> to vector<2x2xf32>
    %368 = arith.negf %367 : vector<2x2xf32>
    %369 = math.exp %368 : vector<2x2xf32>
    %cst_81 = arith.constant 1.000000e+00 : f32
    %370 = vector.broadcast %cst_81 : f32 to vector<2x2xf32>
    %371 = arith.addf %370, %369 : vector<2x2xf32>
    %372 = arith.divf %370, %371 : vector<2x2xf32>
    %373 = vector.extract_strided_slice %360 {offsets = [0, 4], sizes = [2, 2], strides = [1, 1]} : vector<2x8xf32> to vector<2x2xf32>
    %374 = math.tanh %373 : vector<2x2xf32>
    %375 = vector.extract_strided_slice %360 {offsets = [0, 6], sizes = [2, 2], strides = [1, 1]} : vector<2x8xf32> to vector<2x2xf32>
    %376 = arith.negf %375 : vector<2x2xf32>
    %377 = math.exp %376 : vector<2x2xf32>
    %cst_82 = arith.constant 1.000000e+00 : f32
    %378 = vector.broadcast %cst_82 : f32 to vector<2x2xf32>
    %379 = arith.addf %378, %377 : vector<2x2xf32>
    %380 = arith.divf %378, %379 : vector<2x2xf32>
    %381 = arith.mulf %372, %307 : vector<2x2xf32>
    %382 = arith.mulf %366, %374 : vector<2x2xf32>
    %383 = arith.addf %381, %382 : vector<2x2xf32>
    %384 = math.tanh %383 : vector<2x2xf32>
    %385 = arith.mulf %380, %384 : vector<2x2xf32>
    %386 = vector.extract_strided_slice %189 {offsets = [10, 0], sizes = [2, 8], strides = [1, 1]} : vector<16x8xf32> to vector<2x8xf32>
    %387 = vector.extract_strided_slice %347 {offsets = [0, 0], sizes = [2, 1], strides = [1, 1]} : vector<2x2xf32> to vector<2x1xf32>
    %388 = vector.extract_strided_slice %191 {offsets = [0, 0], sizes = [1, 8], strides = [1, 1]} : vector<2x8xf32> to vector<1x8xf32>
    %389 = vector.broadcast %387 : vector<2x1xf32> to vector<2x8xf32>
    %390 = vector.broadcast %388 : vector<1x8xf32> to vector<2x8xf32>
    %391 = arith.mulf %389, %390 : vector<2x8xf32>
    %392 = vector.extract_strided_slice %347 {offsets = [0, 1], sizes = [2, 1], strides = [1, 1]} : vector<2x2xf32> to vector<2x1xf32>
    %393 = vector.extract_strided_slice %191 {offsets = [1, 0], sizes = [1, 8], strides = [1, 1]} : vector<2x8xf32> to vector<1x8xf32>
    %394 = vector.broadcast %392 : vector<2x1xf32> to vector<2x8xf32>
    %395 = vector.broadcast %393 : vector<1x8xf32> to vector<2x8xf32>
    %396 = arith.mulf %394, %395 : vector<2x8xf32>
    %397 = arith.addf %391, %396 : vector<2x8xf32>
    %398 = arith.addf %386, %397 : vector<2x8xf32>
    %399 = vector.extract_strided_slice %398 {offsets = [0, 0], sizes = [2, 2], strides = [1, 1]} : vector<2x8xf32> to vector<2x2xf32>
    %400 = arith.negf %399 : vector<2x2xf32>
    %401 = math.exp %400 : vector<2x2xf32>
    %cst_83 = arith.constant 1.000000e+00 : f32
    %402 = vector.broadcast %cst_83 : f32 to vector<2x2xf32>
    %403 = arith.addf %402, %401 : vector<2x2xf32>
    %404 = arith.divf %402, %403 : vector<2x2xf32>
    %405 = vector.extract_strided_slice %398 {offsets = [0, 2], sizes = [2, 2], strides = [1, 1]} : vector<2x8xf32> to vector<2x2xf32>
    %406 = arith.negf %405 : vector<2x2xf32>
    %407 = math.exp %406 : vector<2x2xf32>
    %cst_84 = arith.constant 1.000000e+00 : f32
    %408 = vector.broadcast %cst_84 : f32 to vector<2x2xf32>
    %409 = arith.addf %408, %407 : vector<2x2xf32>
    %410 = arith.divf %408, %409 : vector<2x2xf32>
    %411 = vector.extract_strided_slice %398 {offsets = [0, 4], sizes = [2, 2], strides = [1, 1]} : vector<2x8xf32> to vector<2x2xf32>
    %412 = math.tanh %411 : vector<2x2xf32>
    %413 = vector.extract_strided_slice %398 {offsets = [0, 6], sizes = [2, 2], strides = [1, 1]} : vector<2x8xf32> to vector<2x2xf32>
    %414 = arith.negf %413 : vector<2x2xf32>
    %415 = math.exp %414 : vector<2x2xf32>
    %cst_85 = arith.constant 1.000000e+00 : f32
    %416 = vector.broadcast %cst_85 : f32 to vector<2x2xf32>
    %417 = arith.addf %416, %415 : vector<2x2xf32>
    %418 = arith.divf %416, %417 : vector<2x2xf32>
    %419 = arith.mulf %410, %345 : vector<2x2xf32>
    %420 = arith.mulf %404, %412 : vector<2x2xf32>
    %421 = arith.addf %419, %420 : vector<2x2xf32>
    %422 = math.tanh %421 : vector<2x2xf32>
    %423 = arith.mulf %418, %422 : vector<2x2xf32>
    %424 = vector.extract_strided_slice %184 {offsets = [6, 0], sizes = [2, 8], strides = [1, 1]} : vector<16x8xf32> to vector<2x8xf32>
    %425 = vector.extract_strided_slice %385 {offsets = [0, 0], sizes = [2, 1], strides = [1, 1]} : vector<2x2xf32> to vector<2x1xf32>
    %426 = vector.extract_strided_slice %190 {offsets = [0, 0], sizes = [1, 8], strides = [1, 1]} : vector<2x8xf32> to vector<1x8xf32>
    %427 = vector.broadcast %425 : vector<2x1xf32> to vector<2x8xf32>
    %428 = vector.broadcast %426 : vector<1x8xf32> to vector<2x8xf32>
    %429 = arith.mulf %427, %428 : vector<2x8xf32>
    %430 = vector.extract_strided_slice %385 {offsets = [0, 1], sizes = [2, 1], strides = [1, 1]} : vector<2x2xf32> to vector<2x1xf32>
    %431 = vector.extract_strided_slice %190 {offsets = [1, 0], sizes = [1, 8], strides = [1, 1]} : vector<2x8xf32> to vector<1x8xf32>
    %432 = vector.broadcast %430 : vector<2x1xf32> to vector<2x8xf32>
    %433 = vector.broadcast %431 : vector<1x8xf32> to vector<2x8xf32>
    %434 = arith.mulf %432, %433 : vector<2x8xf32>
    %435 = arith.addf %429, %434 : vector<2x8xf32>
    %436 = arith.addf %424, %435 : vector<2x8xf32>
    %437 = vector.extract_strided_slice %436 {offsets = [0, 0], sizes = [2, 2], strides = [1, 1]} : vector<2x8xf32> to vector<2x2xf32>
    %438 = arith.negf %437 : vector<2x2xf32>
    %439 = math.exp %438 : vector<2x2xf32>
    %cst_86 = arith.constant 1.000000e+00 : f32
    %440 = vector.broadcast %cst_86 : f32 to vector<2x2xf32>
    %441 = arith.addf %440, %439 : vector<2x2xf32>
    %442 = arith.divf %440, %441 : vector<2x2xf32>
    %443 = vector.extract_strided_slice %436 {offsets = [0, 2], sizes = [2, 2], strides = [1, 1]} : vector<2x8xf32> to vector<2x2xf32>
    %444 = arith.negf %443 : vector<2x2xf32>
    %445 = math.exp %444 : vector<2x2xf32>
    %cst_87 = arith.constant 1.000000e+00 : f32
    %446 = vector.broadcast %cst_87 : f32 to vector<2x2xf32>
    %447 = arith.addf %446, %445 : vector<2x2xf32>
    %448 = arith.divf %446, %447 : vector<2x2xf32>
    %449 = vector.extract_strided_slice %436 {offsets = [0, 4], sizes = [2, 2], strides = [1, 1]} : vector<2x8xf32> to vector<2x2xf32>
    %450 = math.tanh %449 : vector<2x2xf32>
    %451 = vector.extract_strided_slice %436 {offsets = [0, 6], sizes = [2, 2], strides = [1, 1]} : vector<2x8xf32> to vector<2x2xf32>
    %452 = arith.negf %451 : vector<2x2xf32>
    %453 = math.exp %452 : vector<2x2xf32>
    %cst_88 = arith.constant 1.000000e+00 : f32
    %454 = vector.broadcast %cst_88 : f32 to vector<2x2xf32>
    %455 = arith.addf %454, %453 : vector<2x2xf32>
    %456 = arith.divf %454, %455 : vector<2x2xf32>
    %457 = arith.mulf %448, %383 : vector<2x2xf32>
    %458 = arith.mulf %442, %450 : vector<2x2xf32>
    %459 = arith.addf %457, %458 : vector<2x2xf32>
    %460 = math.tanh %459 : vector<2x2xf32>
    %461 = arith.mulf %456, %460 : vector<2x2xf32>
    %462 = vector.extract_strided_slice %189 {offsets = [8, 0], sizes = [2, 8], strides = [1, 1]} : vector<16x8xf32> to vector<2x8xf32>
    %463 = vector.extract_strided_slice %423 {offsets = [0, 0], sizes = [2, 1], strides = [1, 1]} : vector<2x2xf32> to vector<2x1xf32>
    %464 = vector.extract_strided_slice %191 {offsets = [0, 0], sizes = [1, 8], strides = [1, 1]} : vector<2x8xf32> to vector<1x8xf32>
    %465 = vector.broadcast %463 : vector<2x1xf32> to vector<2x8xf32>
    %466 = vector.broadcast %464 : vector<1x8xf32> to vector<2x8xf32>
    %467 = arith.mulf %465, %466 : vector<2x8xf32>
    %468 = vector.extract_strided_slice %423 {offsets = [0, 1], sizes = [2, 1], strides = [1, 1]} : vector<2x2xf32> to vector<2x1xf32>
    %469 = vector.extract_strided_slice %191 {offsets = [1, 0], sizes = [1, 8], strides = [1, 1]} : vector<2x8xf32> to vector<1x8xf32>
    %470 = vector.broadcast %468 : vector<2x1xf32> to vector<2x8xf32>
    %471 = vector.broadcast %469 : vector<1x8xf32> to vector<2x8xf32>
    %472 = arith.mulf %470, %471 : vector<2x8xf32>
    %473 = arith.addf %467, %472 : vector<2x8xf32>
    %474 = arith.addf %462, %473 : vector<2x8xf32>
    %475 = vector.extract_strided_slice %474 {offsets = [0, 0], sizes = [2, 2], strides = [1, 1]} : vector<2x8xf32> to vector<2x2xf32>
    %476 = arith.negf %475 : vector<2x2xf32>
    %477 = math.exp %476 : vector<2x2xf32>
    %cst_89 = arith.constant 1.000000e+00 : f32
    %478 = vector.broadcast %cst_89 : f32 to vector<2x2xf32>
    %479 = arith.addf %478, %477 : vector<2x2xf32>
    %480 = arith.divf %478, %479 : vector<2x2xf32>
    %481 = vector.extract_strided_slice %474 {offsets = [0, 2], sizes = [2, 2], strides = [1, 1]} : vector<2x8xf32> to vector<2x2xf32>
    %482 = arith.negf %481 : vector<2x2xf32>
    %483 = math.exp %482 : vector<2x2xf32>
    %cst_90 = arith.constant 1.000000e+00 : f32
    %484 = vector.broadcast %cst_90 : f32 to vector<2x2xf32>
    %485 = arith.addf %484, %483 : vector<2x2xf32>
    %486 = arith.divf %484, %485 : vector<2x2xf32>
    %487 = vector.extract_strided_slice %474 {offsets = [0, 4], sizes = [2, 2], strides = [1, 1]} : vector<2x8xf32> to vector<2x2xf32>
    %488 = math.tanh %487 : vector<2x2xf32>
    %489 = vector.extract_strided_slice %474 {offsets = [0, 6], sizes = [2, 2], strides = [1, 1]} : vector<2x8xf32> to vector<2x2xf32>
    %490 = arith.negf %489 : vector<2x2xf32>
    %491 = math.exp %490 : vector<2x2xf32>
    %cst_91 = arith.constant 1.000000e+00 : f32
    %492 = vector.broadcast %cst_91 : f32 to vector<2x2xf32>
    %493 = arith.addf %492, %491 : vector<2x2xf32>
    %494 = arith.divf %492, %493 : vector<2x2xf32>
    %495 = arith.mulf %486, %421 : vector<2x2xf32>
    %496 = arith.mulf %480, %488 : vector<2x2xf32>
    %497 = arith.addf %495, %496 : vector<2x2xf32>
    %498 = math.tanh %497 : vector<2x2xf32>
    %499 = arith.mulf %494, %498 : vector<2x2xf32>
    %500 = vector.extract_strided_slice %184 {offsets = [8, 0], sizes = [2, 8], strides = [1, 1]} : vector<16x8xf32> to vector<2x8xf32>
    %501 = vector.extract_strided_slice %461 {offsets = [0, 0], sizes = [2, 1], strides = [1, 1]} : vector<2x2xf32> to vector<2x1xf32>
    %502 = vector.extract_strided_slice %190 {offsets = [0, 0], sizes = [1, 8], strides = [1, 1]} : vector<2x8xf32> to vector<1x8xf32>
    %503 = vector.broadcast %501 : vector<2x1xf32> to vector<2x8xf32>
    %504 = vector.broadcast %502 : vector<1x8xf32> to vector<2x8xf32>
    %505 = arith.mulf %503, %504 : vector<2x8xf32>
    %506 = vector.extract_strided_slice %461 {offsets = [0, 1], sizes = [2, 1], strides = [1, 1]} : vector<2x2xf32> to vector<2x1xf32>
    %507 = vector.extract_strided_slice %190 {offsets = [1, 0], sizes = [1, 8], strides = [1, 1]} : vector<2x8xf32> to vector<1x8xf32>
    %508 = vector.broadcast %506 : vector<2x1xf32> to vector<2x8xf32>
    %509 = vector.broadcast %507 : vector<1x8xf32> to vector<2x8xf32>
    %510 = arith.mulf %508, %509 : vector<2x8xf32>
    %511 = arith.addf %505, %510 : vector<2x8xf32>
    %512 = arith.addf %500, %511 : vector<2x8xf32>
    %513 = vector.extract_strided_slice %512 {offsets = [0, 0], sizes = [2, 2], strides = [1, 1]} : vector<2x8xf32> to vector<2x2xf32>
    %514 = arith.negf %513 : vector<2x2xf32>
    %515 = math.exp %514 : vector<2x2xf32>
    %cst_92 = arith.constant 1.000000e+00 : f32
    %516 = vector.broadcast %cst_92 : f32 to vector<2x2xf32>
    %517 = arith.addf %516, %515 : vector<2x2xf32>
    %518 = arith.divf %516, %517 : vector<2x2xf32>
    %519 = vector.extract_strided_slice %512 {offsets = [0, 2], sizes = [2, 2], strides = [1, 1]} : vector<2x8xf32> to vector<2x2xf32>
    %520 = arith.negf %519 : vector<2x2xf32>
    %521 = math.exp %520 : vector<2x2xf32>
    %cst_93 = arith.constant 1.000000e+00 : f32
    %522 = vector.broadcast %cst_93 : f32 to vector<2x2xf32>
    %523 = arith.addf %522, %521 : vector<2x2xf32>
    %524 = arith.divf %522, %523 : vector<2x2xf32>
    %525 = vector.extract_strided_slice %512 {offsets = [0, 4], sizes = [2, 2], strides = [1, 1]} : vector<2x8xf32> to vector<2x2xf32>
    %526 = math.tanh %525 : vector<2x2xf32>
    %527 = vector.extract_strided_slice %512 {offsets = [0, 6], sizes = [2, 2], strides = [1, 1]} : vector<2x8xf32> to vector<2x2xf32>
    %528 = arith.negf %527 : vector<2x2xf32>
    %529 = math.exp %528 : vector<2x2xf32>
    %cst_94 = arith.constant 1.000000e+00 : f32
    %530 = vector.broadcast %cst_94 : f32 to vector<2x2xf32>
    %531 = arith.addf %530, %529 : vector<2x2xf32>
    %532 = arith.divf %530, %531 : vector<2x2xf32>
    %533 = arith.mulf %524, %459 : vector<2x2xf32>
    %534 = arith.mulf %518, %526 : vector<2x2xf32>
    %535 = arith.addf %533, %534 : vector<2x2xf32>
    %536 = math.tanh %535 : vector<2x2xf32>
    %537 = arith.mulf %532, %536 : vector<2x2xf32>
    %538 = vector.extract_strided_slice %189 {offsets = [6, 0], sizes = [2, 8], strides = [1, 1]} : vector<16x8xf32> to vector<2x8xf32>
    %539 = vector.extract_strided_slice %499 {offsets = [0, 0], sizes = [2, 1], strides = [1, 1]} : vector<2x2xf32> to vector<2x1xf32>
    %540 = vector.extract_strided_slice %191 {offsets = [0, 0], sizes = [1, 8], strides = [1, 1]} : vector<2x8xf32> to vector<1x8xf32>
    %541 = vector.broadcast %539 : vector<2x1xf32> to vector<2x8xf32>
    %542 = vector.broadcast %540 : vector<1x8xf32> to vector<2x8xf32>
    %543 = arith.mulf %541, %542 : vector<2x8xf32>
    %544 = vector.extract_strided_slice %499 {offsets = [0, 1], sizes = [2, 1], strides = [1, 1]} : vector<2x2xf32> to vector<2x1xf32>
    %545 = vector.extract_strided_slice %191 {offsets = [1, 0], sizes = [1, 8], strides = [1, 1]} : vector<2x8xf32> to vector<1x8xf32>
    %546 = vector.broadcast %544 : vector<2x1xf32> to vector<2x8xf32>
    %547 = vector.broadcast %545 : vector<1x8xf32> to vector<2x8xf32>
    %548 = arith.mulf %546, %547 : vector<2x8xf32>
    %549 = arith.addf %543, %548 : vector<2x8xf32>
    %550 = arith.addf %538, %549 : vector<2x8xf32>
    %551 = vector.extract_strided_slice %550 {offsets = [0, 0], sizes = [2, 2], strides = [1, 1]} : vector<2x8xf32> to vector<2x2xf32>
    %552 = arith.negf %551 : vector<2x2xf32>
    %553 = math.exp %552 : vector<2x2xf32>
    %cst_95 = arith.constant 1.000000e+00 : f32
    %554 = vector.broadcast %cst_95 : f32 to vector<2x2xf32>
    %555 = arith.addf %554, %553 : vector<2x2xf32>
    %556 = arith.divf %554, %555 : vector<2x2xf32>
    %557 = vector.extract_strided_slice %550 {offsets = [0, 2], sizes = [2, 2], strides = [1, 1]} : vector<2x8xf32> to vector<2x2xf32>
    %558 = arith.negf %557 : vector<2x2xf32>
    %559 = math.exp %558 : vector<2x2xf32>
    %cst_96 = arith.constant 1.000000e+00 : f32
    %560 = vector.broadcast %cst_96 : f32 to vector<2x2xf32>
    %561 = arith.addf %560, %559 : vector<2x2xf32>
    %562 = arith.divf %560, %561 : vector<2x2xf32>
    %563 = vector.extract_strided_slice %550 {offsets = [0, 4], sizes = [2, 2], strides = [1, 1]} : vector<2x8xf32> to vector<2x2xf32>
    %564 = math.tanh %563 : vector<2x2xf32>
    %565 = vector.extract_strided_slice %550 {offsets = [0, 6], sizes = [2, 2], strides = [1, 1]} : vector<2x8xf32> to vector<2x2xf32>
    %566 = arith.negf %565 : vector<2x2xf32>
    %567 = math.exp %566 : vector<2x2xf32>
    %cst_97 = arith.constant 1.000000e+00 : f32
    %568 = vector.broadcast %cst_97 : f32 to vector<2x2xf32>
    %569 = arith.addf %568, %567 : vector<2x2xf32>
    %570 = arith.divf %568, %569 : vector<2x2xf32>
    %571 = arith.mulf %562, %497 : vector<2x2xf32>
    %572 = arith.mulf %556, %564 : vector<2x2xf32>
    %573 = arith.addf %571, %572 : vector<2x2xf32>
    %574 = math.tanh %573 : vector<2x2xf32>
    %575 = arith.mulf %570, %574 : vector<2x2xf32>
    %576 = vector.extract_strided_slice %184 {offsets = [10, 0], sizes = [2, 8], strides = [1, 1]} : vector<16x8xf32> to vector<2x8xf32>
    %577 = vector.extract_strided_slice %537 {offsets = [0, 0], sizes = [2, 1], strides = [1, 1]} : vector<2x2xf32> to vector<2x1xf32>
    %578 = vector.extract_strided_slice %190 {offsets = [0, 0], sizes = [1, 8], strides = [1, 1]} : vector<2x8xf32> to vector<1x8xf32>
    %579 = vector.broadcast %577 : vector<2x1xf32> to vector<2x8xf32>
    %580 = vector.broadcast %578 : vector<1x8xf32> to vector<2x8xf32>
    %581 = arith.mulf %579, %580 : vector<2x8xf32>
    %582 = vector.extract_strided_slice %537 {offsets = [0, 1], sizes = [2, 1], strides = [1, 1]} : vector<2x2xf32> to vector<2x1xf32>
    %583 = vector.extract_strided_slice %190 {offsets = [1, 0], sizes = [1, 8], strides = [1, 1]} : vector<2x8xf32> to vector<1x8xf32>
    %584 = vector.broadcast %582 : vector<2x1xf32> to vector<2x8xf32>
    %585 = vector.broadcast %583 : vector<1x8xf32> to vector<2x8xf32>
    %586 = arith.mulf %584, %585 : vector<2x8xf32>
    %587 = arith.addf %581, %586 : vector<2x8xf32>
    %588 = arith.addf %576, %587 : vector<2x8xf32>
    %589 = vector.extract_strided_slice %588 {offsets = [0, 0], sizes = [2, 2], strides = [1, 1]} : vector<2x8xf32> to vector<2x2xf32>
    %590 = arith.negf %589 : vector<2x2xf32>
    %591 = math.exp %590 : vector<2x2xf32>
    %cst_98 = arith.constant 1.000000e+00 : f32
    %592 = vector.broadcast %cst_98 : f32 to vector<2x2xf32>
    %593 = arith.addf %592, %591 : vector<2x2xf32>
    %594 = arith.divf %592, %593 : vector<2x2xf32>
    %595 = vector.extract_strided_slice %588 {offsets = [0, 2], sizes = [2, 2], strides = [1, 1]} : vector<2x8xf32> to vector<2x2xf32>
    %596 = arith.negf %595 : vector<2x2xf32>
    %597 = math.exp %596 : vector<2x2xf32>
    %cst_99 = arith.constant 1.000000e+00 : f32
    %598 = vector.broadcast %cst_99 : f32 to vector<2x2xf32>
    %599 = arith.addf %598, %597 : vector<2x2xf32>
    %600 = arith.divf %598, %599 : vector<2x2xf32>
    %601 = vector.extract_strided_slice %588 {offsets = [0, 4], sizes = [2, 2], strides = [1, 1]} : vector<2x8xf32> to vector<2x2xf32>
    %602 = math.tanh %601 : vector<2x2xf32>
    %603 = vector.extract_strided_slice %588 {offsets = [0, 6], sizes = [2, 2], strides = [1, 1]} : vector<2x8xf32> to vector<2x2xf32>
    %604 = arith.negf %603 : vector<2x2xf32>
    %605 = math.exp %604 : vector<2x2xf32>
    %cst_100 = arith.constant 1.000000e+00 : f32
    %606 = vector.broadcast %cst_100 : f32 to vector<2x2xf32>
    %607 = arith.addf %606, %605 : vector<2x2xf32>
    %608 = arith.divf %606, %607 : vector<2x2xf32>
    %609 = arith.mulf %600, %535 : vector<2x2xf32>
    %610 = arith.mulf %594, %602 : vector<2x2xf32>
    %611 = arith.addf %609, %610 : vector<2x2xf32>
    %612 = math.tanh %611 : vector<2x2xf32>
    %613 = arith.mulf %608, %612 : vector<2x2xf32>
    %614 = vector.extract_strided_slice %189 {offsets = [4, 0], sizes = [2, 8], strides = [1, 1]} : vector<16x8xf32> to vector<2x8xf32>
    %615 = vector.extract_strided_slice %575 {offsets = [0, 0], sizes = [2, 1], strides = [1, 1]} : vector<2x2xf32> to vector<2x1xf32>
    %616 = vector.extract_strided_slice %191 {offsets = [0, 0], sizes = [1, 8], strides = [1, 1]} : vector<2x8xf32> to vector<1x8xf32>
    %617 = vector.broadcast %615 : vector<2x1xf32> to vector<2x8xf32>
    %618 = vector.broadcast %616 : vector<1x8xf32> to vector<2x8xf32>
    %619 = arith.mulf %617, %618 : vector<2x8xf32>
    %620 = vector.extract_strided_slice %575 {offsets = [0, 1], sizes = [2, 1], strides = [1, 1]} : vector<2x2xf32> to vector<2x1xf32>
    %621 = vector.extract_strided_slice %191 {offsets = [1, 0], sizes = [1, 8], strides = [1, 1]} : vector<2x8xf32> to vector<1x8xf32>
    %622 = vector.broadcast %620 : vector<2x1xf32> to vector<2x8xf32>
    %623 = vector.broadcast %621 : vector<1x8xf32> to vector<2x8xf32>
    %624 = arith.mulf %622, %623 : vector<2x8xf32>
    %625 = arith.addf %619, %624 : vector<2x8xf32>
    %626 = arith.addf %614, %625 : vector<2x8xf32>
    %627 = vector.extract_strided_slice %626 {offsets = [0, 0], sizes = [2, 2], strides = [1, 1]} : vector<2x8xf32> to vector<2x2xf32>
    %628 = arith.negf %627 : vector<2x2xf32>
    %629 = math.exp %628 : vector<2x2xf32>
    %cst_101 = arith.constant 1.000000e+00 : f32
    %630 = vector.broadcast %cst_101 : f32 to vector<2x2xf32>
    %631 = arith.addf %630, %629 : vector<2x2xf32>
    %632 = arith.divf %630, %631 : vector<2x2xf32>
    %633 = vector.extract_strided_slice %626 {offsets = [0, 2], sizes = [2, 2], strides = [1, 1]} : vector<2x8xf32> to vector<2x2xf32>
    %634 = arith.negf %633 : vector<2x2xf32>
    %635 = math.exp %634 : vector<2x2xf32>
    %cst_102 = arith.constant 1.000000e+00 : f32
    %636 = vector.broadcast %cst_102 : f32 to vector<2x2xf32>
    %637 = arith.addf %636, %635 : vector<2x2xf32>
    %638 = arith.divf %636, %637 : vector<2x2xf32>
    %639 = vector.extract_strided_slice %626 {offsets = [0, 4], sizes = [2, 2], strides = [1, 1]} : vector<2x8xf32> to vector<2x2xf32>
    %640 = math.tanh %639 : vector<2x2xf32>
    %641 = vector.extract_strided_slice %626 {offsets = [0, 6], sizes = [2, 2], strides = [1, 1]} : vector<2x8xf32> to vector<2x2xf32>
    %642 = arith.negf %641 : vector<2x2xf32>
    %643 = math.exp %642 : vector<2x2xf32>
    %cst_103 = arith.constant 1.000000e+00 : f32
    %644 = vector.broadcast %cst_103 : f32 to vector<2x2xf32>
    %645 = arith.addf %644, %643 : vector<2x2xf32>
    %646 = arith.divf %644, %645 : vector<2x2xf32>
    %647 = arith.mulf %638, %573 : vector<2x2xf32>
    %648 = arith.mulf %632, %640 : vector<2x2xf32>
    %649 = arith.addf %647, %648 : vector<2x2xf32>
    %650 = math.tanh %649 : vector<2x2xf32>
    %651 = arith.mulf %646, %650 : vector<2x2xf32>
    %652 = vector.extract_strided_slice %184 {offsets = [12, 0], sizes = [2, 8], strides = [1, 1]} : vector<16x8xf32> to vector<2x8xf32>
    %653 = vector.extract_strided_slice %613 {offsets = [0, 0], sizes = [2, 1], strides = [1, 1]} : vector<2x2xf32> to vector<2x1xf32>
    %654 = vector.extract_strided_slice %190 {offsets = [0, 0], sizes = [1, 8], strides = [1, 1]} : vector<2x8xf32> to vector<1x8xf32>
    %655 = vector.broadcast %653 : vector<2x1xf32> to vector<2x8xf32>
    %656 = vector.broadcast %654 : vector<1x8xf32> to vector<2x8xf32>
    %657 = arith.mulf %655, %656 : vector<2x8xf32>
    %658 = vector.extract_strided_slice %613 {offsets = [0, 1], sizes = [2, 1], strides = [1, 1]} : vector<2x2xf32> to vector<2x1xf32>
    %659 = vector.extract_strided_slice %190 {offsets = [1, 0], sizes = [1, 8], strides = [1, 1]} : vector<2x8xf32> to vector<1x8xf32>
    %660 = vector.broadcast %658 : vector<2x1xf32> to vector<2x8xf32>
    %661 = vector.broadcast %659 : vector<1x8xf32> to vector<2x8xf32>
    %662 = arith.mulf %660, %661 : vector<2x8xf32>
    %663 = arith.addf %657, %662 : vector<2x8xf32>
    %664 = arith.addf %652, %663 : vector<2x8xf32>
    %665 = vector.extract_strided_slice %664 {offsets = [0, 0], sizes = [2, 2], strides = [1, 1]} : vector<2x8xf32> to vector<2x2xf32>
    %666 = arith.negf %665 : vector<2x2xf32>
    %667 = math.exp %666 : vector<2x2xf32>
    %cst_104 = arith.constant 1.000000e+00 : f32
    %668 = vector.broadcast %cst_104 : f32 to vector<2x2xf32>
    %669 = arith.addf %668, %667 : vector<2x2xf32>
    %670 = arith.divf %668, %669 : vector<2x2xf32>
    %671 = vector.extract_strided_slice %664 {offsets = [0, 2], sizes = [2, 2], strides = [1, 1]} : vector<2x8xf32> to vector<2x2xf32>
    %672 = arith.negf %671 : vector<2x2xf32>
    %673 = math.exp %672 : vector<2x2xf32>
    %cst_105 = arith.constant 1.000000e+00 : f32
    %674 = vector.broadcast %cst_105 : f32 to vector<2x2xf32>
    %675 = arith.addf %674, %673 : vector<2x2xf32>
    %676 = arith.divf %674, %675 : vector<2x2xf32>
    %677 = vector.extract_strided_slice %664 {offsets = [0, 4], sizes = [2, 2], strides = [1, 1]} : vector<2x8xf32> to vector<2x2xf32>
    %678 = math.tanh %677 : vector<2x2xf32>
    %679 = vector.extract_strided_slice %664 {offsets = [0, 6], sizes = [2, 2], strides = [1, 1]} : vector<2x8xf32> to vector<2x2xf32>
    %680 = arith.negf %679 : vector<2x2xf32>
    %681 = math.exp %680 : vector<2x2xf32>
    %cst_106 = arith.constant 1.000000e+00 : f32
    %682 = vector.broadcast %cst_106 : f32 to vector<2x2xf32>
    %683 = arith.addf %682, %681 : vector<2x2xf32>
    %684 = arith.divf %682, %683 : vector<2x2xf32>
    %685 = arith.mulf %676, %611 : vector<2x2xf32>
    %686 = arith.mulf %670, %678 : vector<2x2xf32>
    %687 = arith.addf %685, %686 : vector<2x2xf32>
    %688 = math.tanh %687 : vector<2x2xf32>
    %689 = arith.mulf %684, %688 : vector<2x2xf32>
    %690 = vector.extract_strided_slice %189 {offsets = [2, 0], sizes = [2, 8], strides = [1, 1]} : vector<16x8xf32> to vector<2x8xf32>
    %691 = vector.extract_strided_slice %651 {offsets = [0, 0], sizes = [2, 1], strides = [1, 1]} : vector<2x2xf32> to vector<2x1xf32>
    %692 = vector.extract_strided_slice %191 {offsets = [0, 0], sizes = [1, 8], strides = [1, 1]} : vector<2x8xf32> to vector<1x8xf32>
    %693 = vector.broadcast %691 : vector<2x1xf32> to vector<2x8xf32>
    %694 = vector.broadcast %692 : vector<1x8xf32> to vector<2x8xf32>
    %695 = arith.mulf %693, %694 : vector<2x8xf32>
    %696 = vector.extract_strided_slice %651 {offsets = [0, 1], sizes = [2, 1], strides = [1, 1]} : vector<2x2xf32> to vector<2x1xf32>
    %697 = vector.extract_strided_slice %191 {offsets = [1, 0], sizes = [1, 8], strides = [1, 1]} : vector<2x8xf32> to vector<1x8xf32>
    %698 = vector.broadcast %696 : vector<2x1xf32> to vector<2x8xf32>
    %699 = vector.broadcast %697 : vector<1x8xf32> to vector<2x8xf32>
    %700 = arith.mulf %698, %699 : vector<2x8xf32>
    %701 = arith.addf %695, %700 : vector<2x8xf32>
    %702 = arith.addf %690, %701 : vector<2x8xf32>
    %703 = vector.extract_strided_slice %702 {offsets = [0, 0], sizes = [2, 2], strides = [1, 1]} : vector<2x8xf32> to vector<2x2xf32>
    %704 = arith.negf %703 : vector<2x2xf32>
    %705 = math.exp %704 : vector<2x2xf32>
    %cst_107 = arith.constant 1.000000e+00 : f32
    %706 = vector.broadcast %cst_107 : f32 to vector<2x2xf32>
    %707 = arith.addf %706, %705 : vector<2x2xf32>
    %708 = arith.divf %706, %707 : vector<2x2xf32>
    %709 = vector.extract_strided_slice %702 {offsets = [0, 2], sizes = [2, 2], strides = [1, 1]} : vector<2x8xf32> to vector<2x2xf32>
    %710 = arith.negf %709 : vector<2x2xf32>
    %711 = math.exp %710 : vector<2x2xf32>
    %cst_108 = arith.constant 1.000000e+00 : f32
    %712 = vector.broadcast %cst_108 : f32 to vector<2x2xf32>
    %713 = arith.addf %712, %711 : vector<2x2xf32>
    %714 = arith.divf %712, %713 : vector<2x2xf32>
    %715 = vector.extract_strided_slice %702 {offsets = [0, 4], sizes = [2, 2], strides = [1, 1]} : vector<2x8xf32> to vector<2x2xf32>
    %716 = math.tanh %715 : vector<2x2xf32>
    %717 = vector.extract_strided_slice %702 {offsets = [0, 6], sizes = [2, 2], strides = [1, 1]} : vector<2x8xf32> to vector<2x2xf32>
    %718 = arith.negf %717 : vector<2x2xf32>
    %719 = math.exp %718 : vector<2x2xf32>
    %cst_109 = arith.constant 1.000000e+00 : f32
    %720 = vector.broadcast %cst_109 : f32 to vector<2x2xf32>
    %721 = arith.addf %720, %719 : vector<2x2xf32>
    %722 = arith.divf %720, %721 : vector<2x2xf32>
    %723 = arith.mulf %714, %649 : vector<2x2xf32>
    %724 = arith.mulf %708, %716 : vector<2x2xf32>
    %725 = arith.addf %723, %724 : vector<2x2xf32>
    %726 = math.tanh %725 : vector<2x2xf32>
    %727 = arith.mulf %722, %726 : vector<2x2xf32>
    %728 = vector.extract_strided_slice %184 {offsets = [14, 0], sizes = [2, 8], strides = [1, 1]} : vector<16x8xf32> to vector<2x8xf32>
    %729 = vector.extract_strided_slice %689 {offsets = [0, 0], sizes = [2, 1], strides = [1, 1]} : vector<2x2xf32> to vector<2x1xf32>
    %730 = vector.extract_strided_slice %190 {offsets = [0, 0], sizes = [1, 8], strides = [1, 1]} : vector<2x8xf32> to vector<1x8xf32>
    %731 = vector.broadcast %729 : vector<2x1xf32> to vector<2x8xf32>
    %732 = vector.broadcast %730 : vector<1x8xf32> to vector<2x8xf32>
    %733 = arith.mulf %731, %732 : vector<2x8xf32>
    %734 = vector.extract_strided_slice %689 {offsets = [0, 1], sizes = [2, 1], strides = [1, 1]} : vector<2x2xf32> to vector<2x1xf32>
    %735 = vector.extract_strided_slice %190 {offsets = [1, 0], sizes = [1, 8], strides = [1, 1]} : vector<2x8xf32> to vector<1x8xf32>
    %736 = vector.broadcast %734 : vector<2x1xf32> to vector<2x8xf32>
    %737 = vector.broadcast %735 : vector<1x8xf32> to vector<2x8xf32>
    %738 = arith.mulf %736, %737 : vector<2x8xf32>
    %739 = arith.addf %733, %738 : vector<2x8xf32>
    %740 = arith.addf %728, %739 : vector<2x8xf32>
    %741 = vector.extract_strided_slice %740 {offsets = [0, 0], sizes = [2, 2], strides = [1, 1]} : vector<2x8xf32> to vector<2x2xf32>
    %742 = arith.negf %741 : vector<2x2xf32>
    %743 = math.exp %742 : vector<2x2xf32>
    %cst_110 = arith.constant 1.000000e+00 : f32
    %744 = vector.broadcast %cst_110 : f32 to vector<2x2xf32>
    %745 = arith.addf %744, %743 : vector<2x2xf32>
    %746 = arith.divf %744, %745 : vector<2x2xf32>
    %747 = vector.extract_strided_slice %740 {offsets = [0, 2], sizes = [2, 2], strides = [1, 1]} : vector<2x8xf32> to vector<2x2xf32>
    %748 = arith.negf %747 : vector<2x2xf32>
    %749 = math.exp %748 : vector<2x2xf32>
    %cst_111 = arith.constant 1.000000e+00 : f32
    %750 = vector.broadcast %cst_111 : f32 to vector<2x2xf32>
    %751 = arith.addf %750, %749 : vector<2x2xf32>
    %752 = arith.divf %750, %751 : vector<2x2xf32>
    %753 = vector.extract_strided_slice %740 {offsets = [0, 4], sizes = [2, 2], strides = [1, 1]} : vector<2x8xf32> to vector<2x2xf32>
    %754 = math.tanh %753 : vector<2x2xf32>
    %755 = vector.extract_strided_slice %740 {offsets = [0, 6], sizes = [2, 2], strides = [1, 1]} : vector<2x8xf32> to vector<2x2xf32>
    %756 = arith.negf %755 : vector<2x2xf32>
    %757 = math.exp %756 : vector<2x2xf32>
    %cst_112 = arith.constant 1.000000e+00 : f32
    %758 = vector.broadcast %cst_112 : f32 to vector<2x2xf32>
    %759 = arith.addf %758, %757 : vector<2x2xf32>
    %760 = arith.divf %758, %759 : vector<2x2xf32>
    %761 = arith.mulf %752, %687 : vector<2x2xf32>
    %762 = arith.mulf %746, %754 : vector<2x2xf32>
    %763 = arith.addf %761, %762 : vector<2x2xf32>
    %764 = math.tanh %763 : vector<2x2xf32>
    %765 = arith.mulf %760, %764 : vector<2x2xf32>
    %766 = vector.extract_strided_slice %189 {offsets = [0, 0], sizes = [2, 8], strides = [1, 1]} : vector<16x8xf32> to vector<2x8xf32>
    %767 = vector.extract_strided_slice %727 {offsets = [0, 0], sizes = [2, 1], strides = [1, 1]} : vector<2x2xf32> to vector<2x1xf32>
    %768 = vector.extract_strided_slice %191 {offsets = [0, 0], sizes = [1, 8], strides = [1, 1]} : vector<2x8xf32> to vector<1x8xf32>
    %769 = vector.broadcast %767 : vector<2x1xf32> to vector<2x8xf32>
    %770 = vector.broadcast %768 : vector<1x8xf32> to vector<2x8xf32>
    %771 = arith.mulf %769, %770 : vector<2x8xf32>
    %772 = vector.extract_strided_slice %727 {offsets = [0, 1], sizes = [2, 1], strides = [1, 1]} : vector<2x2xf32> to vector<2x1xf32>
    %773 = vector.extract_strided_slice %191 {offsets = [1, 0], sizes = [1, 8], strides = [1, 1]} : vector<2x8xf32> to vector<1x8xf32>
    %774 = vector.broadcast %772 : vector<2x1xf32> to vector<2x8xf32>
    %775 = vector.broadcast %773 : vector<1x8xf32> to vector<2x8xf32>
    %776 = arith.mulf %774, %775 : vector<2x8xf32>
    %777 = arith.addf %771, %776 : vector<2x8xf32>
    %778 = arith.addf %766, %777 : vector<2x8xf32>
    %779 = vector.extract_strided_slice %778 {offsets = [0, 0], sizes = [2, 2], strides = [1, 1]} : vector<2x8xf32> to vector<2x2xf32>
    %780 = arith.negf %779 : vector<2x2xf32>
    %781 = math.exp %780 : vector<2x2xf32>
    %cst_113 = arith.constant 1.000000e+00 : f32
    %782 = vector.broadcast %cst_113 : f32 to vector<2x2xf32>
    %783 = arith.addf %782, %781 : vector<2x2xf32>
    %784 = arith.divf %782, %783 : vector<2x2xf32>
    %785 = vector.extract_strided_slice %778 {offsets = [0, 2], sizes = [2, 2], strides = [1, 1]} : vector<2x8xf32> to vector<2x2xf32>
    %786 = arith.negf %785 : vector<2x2xf32>
    %787 = math.exp %786 : vector<2x2xf32>
    %cst_114 = arith.constant 1.000000e+00 : f32
    %788 = vector.broadcast %cst_114 : f32 to vector<2x2xf32>
    %789 = arith.addf %788, %787 : vector<2x2xf32>
    %790 = arith.divf %788, %789 : vector<2x2xf32>
    %791 = vector.extract_strided_slice %778 {offsets = [0, 4], sizes = [2, 2], strides = [1, 1]} : vector<2x8xf32> to vector<2x2xf32>
    %792 = math.tanh %791 : vector<2x2xf32>
    %793 = vector.extract_strided_slice %778 {offsets = [0, 6], sizes = [2, 2], strides = [1, 1]} : vector<2x8xf32> to vector<2x2xf32>
    %794 = arith.negf %793 : vector<2x2xf32>
    %795 = math.exp %794 : vector<2x2xf32>
    %cst_115 = arith.constant 1.000000e+00 : f32
    %796 = vector.broadcast %cst_115 : f32 to vector<2x2xf32>
    %797 = arith.addf %796, %795 : vector<2x2xf32>
    %798 = arith.divf %796, %797 : vector<2x2xf32>
    %799 = arith.mulf %790, %725 : vector<2x2xf32>
    %800 = arith.mulf %784, %792 : vector<2x2xf32>
    %801 = arith.addf %799, %800 : vector<2x2xf32>
    %802 = math.tanh %801 : vector<2x2xf32>
    %803 = arith.mulf %798, %802 : vector<2x2xf32>
    %804 = tpu.concatenate %233, %309, %385, %461, %537, %613, %689, %765 in 0 : vector<2x2xf32>, vector<2x2xf32>, vector<2x2xf32>, vector<2x2xf32>, vector<2x2xf32>, vector<2x2xf32>, vector<2x2xf32>, vector<2x2xf32> -> vector<16x2xf32>
    %805 = tpu.concatenate %803, %727, %651, %575, %499, %423, %347, %271 in 0 : vector<2x2xf32>, vector<2x2xf32>, vector<2x2xf32>, vector<2x2xf32>, vector<2x2xf32>, vector<2x2xf32>, vector<2x2xf32>, vector<2x2xf32> -> vector<16x2xf32>
    %c0_116 = arith.constant 0 : index
    %c0_117 = arith.constant 0 : index
    %806 = vector.load %arg21[%c0_116, %c0_117] : memref<4x8xf32, #tpu.memory_space<vmem>>, vector<4x8xf32>
    %c0_118 = arith.constant 0 : index
    %c0_119 = arith.constant 0 : index
    %807 = vector.load %arg24[%c0_118, %c0_119] : memref<4x8xf32, #tpu.memory_space<vmem>>, vector<4x8xf32>
    %808 = vector.extract_strided_slice %806 {offsets = [0, 0], sizes = [2, 8], strides = [1, 1]} : vector<4x8xf32> to vector<2x8xf32>
    %cst_120 = arith.constant dense<0.000000e+00> : vector<16x8xf32>
    %809 = tpu.matmul %804, %808, %cst_120 {dimension_numbers = #tpu.dot_dimension_numbers<[1], [0], [0], [1], [0, 0, 1, 1], [], []>} : vector<16x2xf32>, vector<2x8xf32>, vector<16x8xf32> -> vector<16x8xf32>
    %810 = vector.extract_strided_slice %806 {offsets = [2, 0], sizes = [2, 8], strides = [1, 1]} : vector<4x8xf32> to vector<2x8xf32>
    %cst_121 = arith.constant dense<0.000000e+00> : vector<16x8xf32>
    %811 = tpu.matmul %805, %810, %cst_121 {dimension_numbers = #tpu.dot_dimension_numbers<[1], [0], [0], [1], [0, 0, 1, 1], [], []>} : vector<16x2xf32>, vector<2x8xf32>, vector<16x8xf32> -> vector<16x8xf32>
    %812 = arith.addf %809, %811 : vector<16x8xf32>
    %c0_122 = arith.constant 0 : index
    %c0_123 = arith.constant 0 : index
    %813 = vector.load %arg23[%c0_122, %c0_123] : memref<1x8xf32, #tpu.memory_space<vmem>>, vector<1x8xf32>
    %814 = vector.broadcast %813 : vector<1x8xf32> to vector<16x8xf32>
    %815 = arith.addf %812, %814 : vector<16x8xf32>
    %816 = vector.extract_strided_slice %807 {offsets = [0, 0], sizes = [2, 8], strides = [1, 1]} : vector<4x8xf32> to vector<2x8xf32>
    %cst_124 = arith.constant dense<0.000000e+00> : vector<16x8xf32>
    %817 = tpu.matmul %804, %816, %cst_124 {dimension_numbers = #tpu.dot_dimension_numbers<[1], [0], [0], [1], [0, 0, 1, 1], [], []>} : vector<16x2xf32>, vector<2x8xf32>, vector<16x8xf32> -> vector<16x8xf32>
    %818 = vector.extract_strided_slice %807 {offsets = [2, 0], sizes = [2, 8], strides = [1, 1]} : vector<4x8xf32> to vector<2x8xf32>
    %cst_125 = arith.constant dense<0.000000e+00> : vector<16x8xf32>
    %819 = tpu.matmul %805, %818, %cst_125 {dimension_numbers = #tpu.dot_dimension_numbers<[1], [0], [0], [1], [0, 0, 1, 1], [], []>} : vector<16x2xf32>, vector<2x8xf32>, vector<16x8xf32> -> vector<16x8xf32>
    %820 = arith.addf %817, %819 : vector<16x8xf32>
    %c0_126 = arith.constant 0 : index
    %c0_127 = arith.constant 0 : index
    %821 = vector.load %arg26[%c0_126, %c0_127] : memref<1x8xf32, #tpu.memory_space<vmem>>, vector<1x8xf32>
    %822 = vector.broadcast %821 : vector<1x8xf32> to vector<16x8xf32>
    %823 = arith.addf %820, %822 : vector<16x8xf32>
    %c0_128 = arith.constant 0 : index
    %c0_129 = arith.constant 0 : index
    %824 = vector.load %arg22[%c0_128, %c0_129] : memref<2x8xf32, #tpu.memory_space<vmem>>, vector<2x8xf32>
    %c0_130 = arith.constant 0 : index
    %c0_131 = arith.constant 0 : index
    %825 = vector.load %arg25[%c0_130, %c0_131] : memref<2x8xf32, #tpu.memory_space<vmem>>, vector<2x8xf32>
    %cst_132 = arith.constant 0.000000e+00 : f32
    %826 = vector.broadcast %cst_132 : f32 to vector<2x2xf32>
    %cst_133 = arith.constant 0.000000e+00 : f32
    %827 = vector.broadcast %cst_133 : f32 to vector<2x2xf32>
    %cst_134 = arith.constant 0.000000e+00 : f32
    %828 = vector.broadcast %cst_134 : f32 to vector<2x2xf32>
    %cst_135 = arith.constant 0.000000e+00 : f32
    %829 = vector.broadcast %cst_135 : f32 to vector<2x2xf32>
    %830 = vector.extract_strided_slice %815 {offsets = [0, 0], sizes = [2, 8], strides = [1, 1]} : vector<16x8xf32> to vector<2x8xf32>
    %831 = vector.extract_strided_slice %826 {offsets = [0, 0], sizes = [2, 1], strides = [1, 1]} : vector<2x2xf32> to vector<2x1xf32>
    %832 = vector.extract_strided_slice %824 {offsets = [0, 0], sizes = [1, 8], strides = [1, 1]} : vector<2x8xf32> to vector<1x8xf32>
    %833 = vector.broadcast %831 : vector<2x1xf32> to vector<2x8xf32>
    %834 = vector.broadcast %832 : vector<1x8xf32> to vector<2x8xf32>
    %835 = arith.mulf %833, %834 : vector<2x8xf32>
    %836 = vector.extract_strided_slice %826 {offsets = [0, 1], sizes = [2, 1], strides = [1, 1]} : vector<2x2xf32> to vector<2x1xf32>
    %837 = vector.extract_strided_slice %824 {offsets = [1, 0], sizes = [1, 8], strides = [1, 1]} : vector<2x8xf32> to vector<1x8xf32>
    %838 = vector.broadcast %836 : vector<2x1xf32> to vector<2x8xf32>
    %839 = vector.broadcast %837 : vector<1x8xf32> to vector<2x8xf32>
    %840 = arith.mulf %838, %839 : vector<2x8xf32>
    %841 = arith.addf %835, %840 : vector<2x8xf32>
    %842 = arith.addf %830, %841 : vector<2x8xf32>
    %843 = vector.extract_strided_slice %842 {offsets = [0, 0], sizes = [2, 2], strides = [1, 1]} : vector<2x8xf32> to vector<2x2xf32>
    %844 = arith.negf %843 : vector<2x2xf32>
    %845 = math.exp %844 : vector<2x2xf32>
    %cst_136 = arith.constant 1.000000e+00 : f32
    %846 = vector.broadcast %cst_136 : f32 to vector<2x2xf32>
    %847 = arith.addf %846, %845 : vector<2x2xf32>
    %848 = arith.divf %846, %847 : vector<2x2xf32>
    %849 = vector.extract_strided_slice %842 {offsets = [0, 2], sizes = [2, 2], strides = [1, 1]} : vector<2x8xf32> to vector<2x2xf32>
    %850 = arith.negf %849 : vector<2x2xf32>
    %851 = math.exp %850 : vector<2x2xf32>
    %cst_137 = arith.constant 1.000000e+00 : f32
    %852 = vector.broadcast %cst_137 : f32 to vector<2x2xf32>
    %853 = arith.addf %852, %851 : vector<2x2xf32>
    %854 = arith.divf %852, %853 : vector<2x2xf32>
    %855 = vector.extract_strided_slice %842 {offsets = [0, 4], sizes = [2, 2], strides = [1, 1]} : vector<2x8xf32> to vector<2x2xf32>
    %856 = math.tanh %855 : vector<2x2xf32>
    %857 = vector.extract_strided_slice %842 {offsets = [0, 6], sizes = [2, 2], strides = [1, 1]} : vector<2x8xf32> to vector<2x2xf32>
    %858 = arith.negf %857 : vector<2x2xf32>
    %859 = math.exp %858 : vector<2x2xf32>
    %cst_138 = arith.constant 1.000000e+00 : f32
    %860 = vector.broadcast %cst_138 : f32 to vector<2x2xf32>
    %861 = arith.addf %860, %859 : vector<2x2xf32>
    %862 = arith.divf %860, %861 : vector<2x2xf32>
    %863 = arith.mulf %854, %827 : vector<2x2xf32>
    %864 = arith.mulf %848, %856 : vector<2x2xf32>
    %865 = arith.addf %863, %864 : vector<2x2xf32>
    %866 = math.tanh %865 : vector<2x2xf32>
    %867 = arith.mulf %862, %866 : vector<2x2xf32>
    %868 = vector.extract_strided_slice %823 {offsets = [14, 0], sizes = [2, 8], strides = [1, 1]} : vector<16x8xf32> to vector<2x8xf32>
    %869 = vector.extract_strided_slice %828 {offsets = [0, 0], sizes = [2, 1], strides = [1, 1]} : vector<2x2xf32> to vector<2x1xf32>
    %870 = vector.extract_strided_slice %825 {offsets = [0, 0], sizes = [1, 8], strides = [1, 1]} : vector<2x8xf32> to vector<1x8xf32>
    %871 = vector.broadcast %869 : vector<2x1xf32> to vector<2x8xf32>
    %872 = vector.broadcast %870 : vector<1x8xf32> to vector<2x8xf32>
    %873 = arith.mulf %871, %872 : vector<2x8xf32>
    %874 = vector.extract_strided_slice %828 {offsets = [0, 1], sizes = [2, 1], strides = [1, 1]} : vector<2x2xf32> to vector<2x1xf32>
    %875 = vector.extract_strided_slice %825 {offsets = [1, 0], sizes = [1, 8], strides = [1, 1]} : vector<2x8xf32> to vector<1x8xf32>
    %876 = vector.broadcast %874 : vector<2x1xf32> to vector<2x8xf32>
    %877 = vector.broadcast %875 : vector<1x8xf32> to vector<2x8xf32>
    %878 = arith.mulf %876, %877 : vector<2x8xf32>
    %879 = arith.addf %873, %878 : vector<2x8xf32>
    %880 = arith.addf %868, %879 : vector<2x8xf32>
    %881 = vector.extract_strided_slice %880 {offsets = [0, 0], sizes = [2, 2], strides = [1, 1]} : vector<2x8xf32> to vector<2x2xf32>
    %882 = arith.negf %881 : vector<2x2xf32>
    %883 = math.exp %882 : vector<2x2xf32>
    %cst_139 = arith.constant 1.000000e+00 : f32
    %884 = vector.broadcast %cst_139 : f32 to vector<2x2xf32>
    %885 = arith.addf %884, %883 : vector<2x2xf32>
    %886 = arith.divf %884, %885 : vector<2x2xf32>
    %887 = vector.extract_strided_slice %880 {offsets = [0, 2], sizes = [2, 2], strides = [1, 1]} : vector<2x8xf32> to vector<2x2xf32>
    %888 = arith.negf %887 : vector<2x2xf32>
    %889 = math.exp %888 : vector<2x2xf32>
    %cst_140 = arith.constant 1.000000e+00 : f32
    %890 = vector.broadcast %cst_140 : f32 to vector<2x2xf32>
    %891 = arith.addf %890, %889 : vector<2x2xf32>
    %892 = arith.divf %890, %891 : vector<2x2xf32>
    %893 = vector.extract_strided_slice %880 {offsets = [0, 4], sizes = [2, 2], strides = [1, 1]} : vector<2x8xf32> to vector<2x2xf32>
    %894 = math.tanh %893 : vector<2x2xf32>
    %895 = vector.extract_strided_slice %880 {offsets = [0, 6], sizes = [2, 2], strides = [1, 1]} : vector<2x8xf32> to vector<2x2xf32>
    %896 = arith.negf %895 : vector<2x2xf32>
    %897 = math.exp %896 : vector<2x2xf32>
    %cst_141 = arith.constant 1.000000e+00 : f32
    %898 = vector.broadcast %cst_141 : f32 to vector<2x2xf32>
    %899 = arith.addf %898, %897 : vector<2x2xf32>
    %900 = arith.divf %898, %899 : vector<2x2xf32>
    %901 = arith.mulf %892, %829 : vector<2x2xf32>
    %902 = arith.mulf %886, %894 : vector<2x2xf32>
    %903 = arith.addf %901, %902 : vector<2x2xf32>
    %904 = math.tanh %903 : vector<2x2xf32>
    %905 = arith.mulf %900, %904 : vector<2x2xf32>
    %906 = vector.extract_strided_slice %815 {offsets = [2, 0], sizes = [2, 8], strides = [1, 1]} : vector<16x8xf32> to vector<2x8xf32>
    %907 = vector.extract_strided_slice %867 {offsets = [0, 0], sizes = [2, 1], strides = [1, 1]} : vector<2x2xf32> to vector<2x1xf32>
    %908 = vector.extract_strided_slice %824 {offsets = [0, 0], sizes = [1, 8], strides = [1, 1]} : vector<2x8xf32> to vector<1x8xf32>
    %909 = vector.broadcast %907 : vector<2x1xf32> to vector<2x8xf32>
    %910 = vector.broadcast %908 : vector<1x8xf32> to vector<2x8xf32>
    %911 = arith.mulf %909, %910 : vector<2x8xf32>
    %912 = vector.extract_strided_slice %867 {offsets = [0, 1], sizes = [2, 1], strides = [1, 1]} : vector<2x2xf32> to vector<2x1xf32>
    %913 = vector.extract_strided_slice %824 {offsets = [1, 0], sizes = [1, 8], strides = [1, 1]} : vector<2x8xf32> to vector<1x8xf32>
    %914 = vector.broadcast %912 : vector<2x1xf32> to vector<2x8xf32>
    %915 = vector.broadcast %913 : vector<1x8xf32> to vector<2x8xf32>
    %916 = arith.mulf %914, %915 : vector<2x8xf32>
    %917 = arith.addf %911, %916 : vector<2x8xf32>
    %918 = arith.addf %906, %917 : vector<2x8xf32>
    %919 = vector.extract_strided_slice %918 {offsets = [0, 0], sizes = [2, 2], strides = [1, 1]} : vector<2x8xf32> to vector<2x2xf32>
    %920 = arith.negf %919 : vector<2x2xf32>
    %921 = math.exp %920 : vector<2x2xf32>
    %cst_142 = arith.constant 1.000000e+00 : f32
    %922 = vector.broadcast %cst_142 : f32 to vector<2x2xf32>
    %923 = arith.addf %922, %921 : vector<2x2xf32>
    %924 = arith.divf %922, %923 : vector<2x2xf32>
    %925 = vector.extract_strided_slice %918 {offsets = [0, 2], sizes = [2, 2], strides = [1, 1]} : vector<2x8xf32> to vector<2x2xf32>
    %926 = arith.negf %925 : vector<2x2xf32>
    %927 = math.exp %926 : vector<2x2xf32>
    %cst_143 = arith.constant 1.000000e+00 : f32
    %928 = vector.broadcast %cst_143 : f32 to vector<2x2xf32>
    %929 = arith.addf %928, %927 : vector<2x2xf32>
    %930 = arith.divf %928, %929 : vector<2x2xf32>
    %931 = vector.extract_strided_slice %918 {offsets = [0, 4], sizes = [2, 2], strides = [1, 1]} : vector<2x8xf32> to vector<2x2xf32>
    %932 = math.tanh %931 : vector<2x2xf32>
    %933 = vector.extract_strided_slice %918 {offsets = [0, 6], sizes = [2, 2], strides = [1, 1]} : vector<2x8xf32> to vector<2x2xf32>
    %934 = arith.negf %933 : vector<2x2xf32>
    %935 = math.exp %934 : vector<2x2xf32>
    %cst_144 = arith.constant 1.000000e+00 : f32
    %936 = vector.broadcast %cst_144 : f32 to vector<2x2xf32>
    %937 = arith.addf %936, %935 : vector<2x2xf32>
    %938 = arith.divf %936, %937 : vector<2x2xf32>
    %939 = arith.mulf %930, %865 : vector<2x2xf32>
    %940 = arith.mulf %924, %932 : vector<2x2xf32>
    %941 = arith.addf %939, %940 : vector<2x2xf32>
    %942 = math.tanh %941 : vector<2x2xf32>
    %943 = arith.mulf %938, %942 : vector<2x2xf32>
    %944 = vector.extract_strided_slice %823 {offsets = [12, 0], sizes = [2, 8], strides = [1, 1]} : vector<16x8xf32> to vector<2x8xf32>
    %945 = vector.extract_strided_slice %905 {offsets = [0, 0], sizes = [2, 1], strides = [1, 1]} : vector<2x2xf32> to vector<2x1xf32>
    %946 = vector.extract_strided_slice %825 {offsets = [0, 0], sizes = [1, 8], strides = [1, 1]} : vector<2x8xf32> to vector<1x8xf32>
    %947 = vector.broadcast %945 : vector<2x1xf32> to vector<2x8xf32>
    %948 = vector.broadcast %946 : vector<1x8xf32> to vector<2x8xf32>
    %949 = arith.mulf %947, %948 : vector<2x8xf32>
    %950 = vector.extract_strided_slice %905 {offsets = [0, 1], sizes = [2, 1], strides = [1, 1]} : vector<2x2xf32> to vector<2x1xf32>
    %951 = vector.extract_strided_slice %825 {offsets = [1, 0], sizes = [1, 8], strides = [1, 1]} : vector<2x8xf32> to vector<1x8xf32>
    %952 = vector.broadcast %950 : vector<2x1xf32> to vector<2x8xf32>
    %953 = vector.broadcast %951 : vector<1x8xf32> to vector<2x8xf32>
    %954 = arith.mulf %952, %953 : vector<2x8xf32>
    %955 = arith.addf %949, %954 : vector<2x8xf32>
    %956 = arith.addf %944, %955 : vector<2x8xf32>
    %957 = vector.extract_strided_slice %956 {offsets = [0, 0], sizes = [2, 2], strides = [1, 1]} : vector<2x8xf32> to vector<2x2xf32>
    %958 = arith.negf %957 : vector<2x2xf32>
    %959 = math.exp %958 : vector<2x2xf32>
    %cst_145 = arith.constant 1.000000e+00 : f32
    %960 = vector.broadcast %cst_145 : f32 to vector<2x2xf32>
    %961 = arith.addf %960, %959 : vector<2x2xf32>
    %962 = arith.divf %960, %961 : vector<2x2xf32>
    %963 = vector.extract_strided_slice %956 {offsets = [0, 2], sizes = [2, 2], strides = [1, 1]} : vector<2x8xf32> to vector<2x2xf32>
    %964 = arith.negf %963 : vector<2x2xf32>
    %965 = math.exp %964 : vector<2x2xf32>
    %cst_146 = arith.constant 1.000000e+00 : f32
    %966 = vector.broadcast %cst_146 : f32 to vector<2x2xf32>
    %967 = arith.addf %966, %965 : vector<2x2xf32>
    %968 = arith.divf %966, %967 : vector<2x2xf32>
    %969 = vector.extract_strided_slice %956 {offsets = [0, 4], sizes = [2, 2], strides = [1, 1]} : vector<2x8xf32> to vector<2x2xf32>
    %970 = math.tanh %969 : vector<2x2xf32>
    %971 = vector.extract_strided_slice %956 {offsets = [0, 6], sizes = [2, 2], strides = [1, 1]} : vector<2x8xf32> to vector<2x2xf32>
    %972 = arith.negf %971 : vector<2x2xf32>
    %973 = math.exp %972 : vector<2x2xf32>
    %cst_147 = arith.constant 1.000000e+00 : f32
    %974 = vector.broadcast %cst_147 : f32 to vector<2x2xf32>
    %975 = arith.addf %974, %973 : vector<2x2xf32>
    %976 = arith.divf %974, %975 : vector<2x2xf32>
    %977 = arith.mulf %968, %903 : vector<2x2xf32>
    %978 = arith.mulf %962, %970 : vector<2x2xf32>
    %979 = arith.addf %977, %978 : vector<2x2xf32>
    %980 = math.tanh %979 : vector<2x2xf32>
    %981 = arith.mulf %976, %980 : vector<2x2xf32>
    %982 = vector.extract_strided_slice %815 {offsets = [4, 0], sizes = [2, 8], strides = [1, 1]} : vector<16x8xf32> to vector<2x8xf32>
    %983 = vector.extract_strided_slice %943 {offsets = [0, 0], sizes = [2, 1], strides = [1, 1]} : vector<2x2xf32> to vector<2x1xf32>
    %984 = vector.extract_strided_slice %824 {offsets = [0, 0], sizes = [1, 8], strides = [1, 1]} : vector<2x8xf32> to vector<1x8xf32>
    %985 = vector.broadcast %983 : vector<2x1xf32> to vector<2x8xf32>
    %986 = vector.broadcast %984 : vector<1x8xf32> to vector<2x8xf32>
    %987 = arith.mulf %985, %986 : vector<2x8xf32>
    %988 = vector.extract_strided_slice %943 {offsets = [0, 1], sizes = [2, 1], strides = [1, 1]} : vector<2x2xf32> to vector<2x1xf32>
    %989 = vector.extract_strided_slice %824 {offsets = [1, 0], sizes = [1, 8], strides = [1, 1]} : vector<2x8xf32> to vector<1x8xf32>
    %990 = vector.broadcast %988 : vector<2x1xf32> to vector<2x8xf32>
    %991 = vector.broadcast %989 : vector<1x8xf32> to vector<2x8xf32>
    %992 = arith.mulf %990, %991 : vector<2x8xf32>
    %993 = arith.addf %987, %992 : vector<2x8xf32>
    %994 = arith.addf %982, %993 : vector<2x8xf32>
    %995 = vector.extract_strided_slice %994 {offsets = [0, 0], sizes = [2, 2], strides = [1, 1]} : vector<2x8xf32> to vector<2x2xf32>
    %996 = arith.negf %995 : vector<2x2xf32>
    %997 = math.exp %996 : vector<2x2xf32>
    %cst_148 = arith.constant 1.000000e+00 : f32
    %998 = vector.broadcast %cst_148 : f32 to vector<2x2xf32>
    %999 = arith.addf %998, %997 : vector<2x2xf32>
    %1000 = arith.divf %998, %999 : vector<2x2xf32>
    %1001 = vector.extract_strided_slice %994 {offsets = [0, 2], sizes = [2, 2], strides = [1, 1]} : vector<2x8xf32> to vector<2x2xf32>
    %1002 = arith.negf %1001 : vector<2x2xf32>
    %1003 = math.exp %1002 : vector<2x2xf32>
    %cst_149 = arith.constant 1.000000e+00 : f32
    %1004 = vector.broadcast %cst_149 : f32 to vector<2x2xf32>
    %1005 = arith.addf %1004, %1003 : vector<2x2xf32>
    %1006 = arith.divf %1004, %1005 : vector<2x2xf32>
    %1007 = vector.extract_strided_slice %994 {offsets = [0, 4], sizes = [2, 2], strides = [1, 1]} : vector<2x8xf32> to vector<2x2xf32>
    %1008 = math.tanh %1007 : vector<2x2xf32>
    %1009 = vector.extract_strided_slice %994 {offsets = [0, 6], sizes = [2, 2], strides = [1, 1]} : vector<2x8xf32> to vector<2x2xf32>
    %1010 = arith.negf %1009 : vector<2x2xf32>
    %1011 = math.exp %1010 : vector<2x2xf32>
    %cst_150 = arith.constant 1.000000e+00 : f32
    %1012 = vector.broadcast %cst_150 : f32 to vector<2x2xf32>
    %1013 = arith.addf %1012, %1011 : vector<2x2xf32>
    %1014 = arith.divf %1012, %1013 : vector<2x2xf32>
    %1015 = arith.mulf %1006, %941 : vector<2x2xf32>
    %1016 = arith.mulf %1000, %1008 : vector<2x2xf32>
    %1017 = arith.addf %1015, %1016 : vector<2x2xf32>
    %1018 = math.tanh %1017 : vector<2x2xf32>
    %1019 = arith.mulf %1014, %1018 : vector<2x2xf32>
    %1020 = vector.extract_strided_slice %823 {offsets = [10, 0], sizes = [2, 8], strides = [1, 1]} : vector<16x8xf32> to vector<2x8xf32>
    %1021 = vector.extract_strided_slice %981 {offsets = [0, 0], sizes = [2, 1], strides = [1, 1]} : vector<2x2xf32> to vector<2x1xf32>
    %1022 = vector.extract_strided_slice %825 {offsets = [0, 0], sizes = [1, 8], strides = [1, 1]} : vector<2x8xf32> to vector<1x8xf32>
    %1023 = vector.broadcast %1021 : vector<2x1xf32> to vector<2x8xf32>
    %1024 = vector.broadcast %1022 : vector<1x8xf32> to vector<2x8xf32>
    %1025 = arith.mulf %1023, %1024 : vector<2x8xf32>
    %1026 = vector.extract_strided_slice %981 {offsets = [0, 1], sizes = [2, 1], strides = [1, 1]} : vector<2x2xf32> to vector<2x1xf32>
    %1027 = vector.extract_strided_slice %825 {offsets = [1, 0], sizes = [1, 8], strides = [1, 1]} : vector<2x8xf32> to vector<1x8xf32>
    %1028 = vector.broadcast %1026 : vector<2x1xf32> to vector<2x8xf32>
    %1029 = vector.broadcast %1027 : vector<1x8xf32> to vector<2x8xf32>
    %1030 = arith.mulf %1028, %1029 : vector<2x8xf32>
    %1031 = arith.addf %1025, %1030 : vector<2x8xf32>
    %1032 = arith.addf %1020, %1031 : vector<2x8xf32>
    %1033 = vector.extract_strided_slice %1032 {offsets = [0, 0], sizes = [2, 2], strides = [1, 1]} : vector<2x8xf32> to vector<2x2xf32>
    %1034 = arith.negf %1033 : vector<2x2xf32>
    %1035 = math.exp %1034 : vector<2x2xf32>
    %cst_151 = arith.constant 1.000000e+00 : f32
    %1036 = vector.broadcast %cst_151 : f32 to vector<2x2xf32>
    %1037 = arith.addf %1036, %1035 : vector<2x2xf32>
    %1038 = arith.divf %1036, %1037 : vector<2x2xf32>
    %1039 = vector.extract_strided_slice %1032 {offsets = [0, 2], sizes = [2, 2], strides = [1, 1]} : vector<2x8xf32> to vector<2x2xf32>
    %1040 = arith.negf %1039 : vector<2x2xf32>
    %1041 = math.exp %1040 : vector<2x2xf32>
    %cst_152 = arith.constant 1.000000e+00 : f32
    %1042 = vector.broadcast %cst_152 : f32 to vector<2x2xf32>
    %1043 = arith.addf %1042, %1041 : vector<2x2xf32>
    %1044 = arith.divf %1042, %1043 : vector<2x2xf32>
    %1045 = vector.extract_strided_slice %1032 {offsets = [0, 4], sizes = [2, 2], strides = [1, 1]} : vector<2x8xf32> to vector<2x2xf32>
    %1046 = math.tanh %1045 : vector<2x2xf32>
    %1047 = vector.extract_strided_slice %1032 {offsets = [0, 6], sizes = [2, 2], strides = [1, 1]} : vector<2x8xf32> to vector<2x2xf32>
    %1048 = arith.negf %1047 : vector<2x2xf32>
    %1049 = math.exp %1048 : vector<2x2xf32>
    %cst_153 = arith.constant 1.000000e+00 : f32
    %1050 = vector.broadcast %cst_153 : f32 to vector<2x2xf32>
    %1051 = arith.addf %1050, %1049 : vector<2x2xf32>
    %1052 = arith.divf %1050, %1051 : vector<2x2xf32>
    %1053 = arith.mulf %1044, %979 : vector<2x2xf32>
    %1054 = arith.mulf %1038, %1046 : vector<2x2xf32>
    %1055 = arith.addf %1053, %1054 : vector<2x2xf32>
    %1056 = math.tanh %1055 : vector<2x2xf32>
    %1057 = arith.mulf %1052, %1056 : vector<2x2xf32>
    %1058 = vector.extract_strided_slice %815 {offsets = [6, 0], sizes = [2, 8], strides = [1, 1]} : vector<16x8xf32> to vector<2x8xf32>
    %1059 = vector.extract_strided_slice %1019 {offsets = [0, 0], sizes = [2, 1], strides = [1, 1]} : vector<2x2xf32> to vector<2x1xf32>
    %1060 = vector.extract_strided_slice %824 {offsets = [0, 0], sizes = [1, 8], strides = [1, 1]} : vector<2x8xf32> to vector<1x8xf32>
    %1061 = vector.broadcast %1059 : vector<2x1xf32> to vector<2x8xf32>
    %1062 = vector.broadcast %1060 : vector<1x8xf32> to vector<2x8xf32>
    %1063 = arith.mulf %1061, %1062 : vector<2x8xf32>
    %1064 = vector.extract_strided_slice %1019 {offsets = [0, 1], sizes = [2, 1], strides = [1, 1]} : vector<2x2xf32> to vector<2x1xf32>
    %1065 = vector.extract_strided_slice %824 {offsets = [1, 0], sizes = [1, 8], strides = [1, 1]} : vector<2x8xf32> to vector<1x8xf32>
    %1066 = vector.broadcast %1064 : vector<2x1xf32> to vector<2x8xf32>
    %1067 = vector.broadcast %1065 : vector<1x8xf32> to vector<2x8xf32>
    %1068 = arith.mulf %1066, %1067 : vector<2x8xf32>
    %1069 = arith.addf %1063, %1068 : vector<2x8xf32>
    %1070 = arith.addf %1058, %1069 : vector<2x8xf32>
    %1071 = vector.extract_strided_slice %1070 {offsets = [0, 0], sizes = [2, 2], strides = [1, 1]} : vector<2x8xf32> to vector<2x2xf32>
    %1072 = arith.negf %1071 : vector<2x2xf32>
    %1073 = math.exp %1072 : vector<2x2xf32>
    %cst_154 = arith.constant 1.000000e+00 : f32
    %1074 = vector.broadcast %cst_154 : f32 to vector<2x2xf32>
    %1075 = arith.addf %1074, %1073 : vector<2x2xf32>
    %1076 = arith.divf %1074, %1075 : vector<2x2xf32>
    %1077 = vector.extract_strided_slice %1070 {offsets = [0, 2], sizes = [2, 2], strides = [1, 1]} : vector<2x8xf32> to vector<2x2xf32>
    %1078 = arith.negf %1077 : vector<2x2xf32>
    %1079 = math.exp %1078 : vector<2x2xf32>
    %cst_155 = arith.constant 1.000000e+00 : f32
    %1080 = vector.broadcast %cst_155 : f32 to vector<2x2xf32>
    %1081 = arith.addf %1080, %1079 : vector<2x2xf32>
    %1082 = arith.divf %1080, %1081 : vector<2x2xf32>
    %1083 = vector.extract_strided_slice %1070 {offsets = [0, 4], sizes = [2, 2], strides = [1, 1]} : vector<2x8xf32> to vector<2x2xf32>
    %1084 = math.tanh %1083 : vector<2x2xf32>
    %1085 = vector.extract_strided_slice %1070 {offsets = [0, 6], sizes = [2, 2], strides = [1, 1]} : vector<2x8xf32> to vector<2x2xf32>
    %1086 = arith.negf %1085 : vector<2x2xf32>
    %1087 = math.exp %1086 : vector<2x2xf32>
    %cst_156 = arith.constant 1.000000e+00 : f32
    %1088 = vector.broadcast %cst_156 : f32 to vector<2x2xf32>
    %1089 = arith.addf %1088, %1087 : vector<2x2xf32>
    %1090 = arith.divf %1088, %1089 : vector<2x2xf32>
    %1091 = arith.mulf %1082, %1017 : vector<2x2xf32>
    %1092 = arith.mulf %1076, %1084 : vector<2x2xf32>
    %1093 = arith.addf %1091, %1092 : vector<2x2xf32>
    %1094 = math.tanh %1093 : vector<2x2xf32>
    %1095 = arith.mulf %1090, %1094 : vector<2x2xf32>
    %1096 = vector.extract_strided_slice %823 {offsets = [8, 0], sizes = [2, 8], strides = [1, 1]} : vector<16x8xf32> to vector<2x8xf32>
    %1097 = vector.extract_strided_slice %1057 {offsets = [0, 0], sizes = [2, 1], strides = [1, 1]} : vector<2x2xf32> to vector<2x1xf32>
    %1098 = vector.extract_strided_slice %825 {offsets = [0, 0], sizes = [1, 8], strides = [1, 1]} : vector<2x8xf32> to vector<1x8xf32>
    %1099 = vector.broadcast %1097 : vector<2x1xf32> to vector<2x8xf32>
    %1100 = vector.broadcast %1098 : vector<1x8xf32> to vector<2x8xf32>
    %1101 = arith.mulf %1099, %1100 : vector<2x8xf32>
    %1102 = vector.extract_strided_slice %1057 {offsets = [0, 1], sizes = [2, 1], strides = [1, 1]} : vector<2x2xf32> to vector<2x1xf32>
    %1103 = vector.extract_strided_slice %825 {offsets = [1, 0], sizes = [1, 8], strides = [1, 1]} : vector<2x8xf32> to vector<1x8xf32>
    %1104 = vector.broadcast %1102 : vector<2x1xf32> to vector<2x8xf32>
    %1105 = vector.broadcast %1103 : vector<1x8xf32> to vector<2x8xf32>
    %1106 = arith.mulf %1104, %1105 : vector<2x8xf32>
    %1107 = arith.addf %1101, %1106 : vector<2x8xf32>
    %1108 = arith.addf %1096, %1107 : vector<2x8xf32>
    %1109 = vector.extract_strided_slice %1108 {offsets = [0, 0], sizes = [2, 2], strides = [1, 1]} : vector<2x8xf32> to vector<2x2xf32>
    %1110 = arith.negf %1109 : vector<2x2xf32>
    %1111 = math.exp %1110 : vector<2x2xf32>
    %cst_157 = arith.constant 1.000000e+00 : f32
    %1112 = vector.broadcast %cst_157 : f32 to vector<2x2xf32>
    %1113 = arith.addf %1112, %1111 : vector<2x2xf32>
    %1114 = arith.divf %1112, %1113 : vector<2x2xf32>
    %1115 = vector.extract_strided_slice %1108 {offsets = [0, 2], sizes = [2, 2], strides = [1, 1]} : vector<2x8xf32> to vector<2x2xf32>
    %1116 = arith.negf %1115 : vector<2x2xf32>
    %1117 = math.exp %1116 : vector<2x2xf32>
    %cst_158 = arith.constant 1.000000e+00 : f32
    %1118 = vector.broadcast %cst_158 : f32 to vector<2x2xf32>
    %1119 = arith.addf %1118, %1117 : vector<2x2xf32>
    %1120 = arith.divf %1118, %1119 : vector<2x2xf32>
    %1121 = vector.extract_strided_slice %1108 {offsets = [0, 4], sizes = [2, 2], strides = [1, 1]} : vector<2x8xf32> to vector<2x2xf32>
    %1122 = math.tanh %1121 : vector<2x2xf32>
    %1123 = vector.extract_strided_slice %1108 {offsets = [0, 6], sizes = [2, 2], strides = [1, 1]} : vector<2x8xf32> to vector<2x2xf32>
    %1124 = arith.negf %1123 : vector<2x2xf32>
    %1125 = math.exp %1124 : vector<2x2xf32>
    %cst_159 = arith.constant 1.000000e+00 : f32
    %1126 = vector.broadcast %cst_159 : f32 to vector<2x2xf32>
    %1127 = arith.addf %1126, %1125 : vector<2x2xf32>
    %1128 = arith.divf %1126, %1127 : vector<2x2xf32>
    %1129 = arith.mulf %1120, %1055 : vector<2x2xf32>
    %1130 = arith.mulf %1114, %1122 : vector<2x2xf32>
    %1131 = arith.addf %1129, %1130 : vector<2x2xf32>
    %1132 = math.tanh %1131 : vector<2x2xf32>
    %1133 = arith.mulf %1128, %1132 : vector<2x2xf32>
    %1134 = vector.extract_strided_slice %815 {offsets = [8, 0], sizes = [2, 8], strides = [1, 1]} : vector<16x8xf32> to vector<2x8xf32>
    %1135 = vector.extract_strided_slice %1095 {offsets = [0, 0], sizes = [2, 1], strides = [1, 1]} : vector<2x2xf32> to vector<2x1xf32>
    %1136 = vector.extract_strided_slice %824 {offsets = [0, 0], sizes = [1, 8], strides = [1, 1]} : vector<2x8xf32> to vector<1x8xf32>
    %1137 = vector.broadcast %1135 : vector<2x1xf32> to vector<2x8xf32>
    %1138 = vector.broadcast %1136 : vector<1x8xf32> to vector<2x8xf32>
    %1139 = arith.mulf %1137, %1138 : vector<2x8xf32>
    %1140 = vector.extract_strided_slice %1095 {offsets = [0, 1], sizes = [2, 1], strides = [1, 1]} : vector<2x2xf32> to vector<2x1xf32>
    %1141 = vector.extract_strided_slice %824 {offsets = [1, 0], sizes = [1, 8], strides = [1, 1]} : vector<2x8xf32> to vector<1x8xf32>
    %1142 = vector.broadcast %1140 : vector<2x1xf32> to vector<2x8xf32>
    %1143 = vector.broadcast %1141 : vector<1x8xf32> to vector<2x8xf32>
    %1144 = arith.mulf %1142, %1143 : vector<2x8xf32>
    %1145 = arith.addf %1139, %1144 : vector<2x8xf32>
    %1146 = arith.addf %1134, %1145 : vector<2x8xf32>
    %1147 = vector.extract_strided_slice %1146 {offsets = [0, 0], sizes = [2, 2], strides = [1, 1]} : vector<2x8xf32> to vector<2x2xf32>
    %1148 = arith.negf %1147 : vector<2x2xf32>
    %1149 = math.exp %1148 : vector<2x2xf32>
    %cst_160 = arith.constant 1.000000e+00 : f32
    %1150 = vector.broadcast %cst_160 : f32 to vector<2x2xf32>
    %1151 = arith.addf %1150, %1149 : vector<2x2xf32>
    %1152 = arith.divf %1150, %1151 : vector<2x2xf32>
    %1153 = vector.extract_strided_slice %1146 {offsets = [0, 2], sizes = [2, 2], strides = [1, 1]} : vector<2x8xf32> to vector<2x2xf32>
    %1154 = arith.negf %1153 : vector<2x2xf32>
    %1155 = math.exp %1154 : vector<2x2xf32>
    %cst_161 = arith.constant 1.000000e+00 : f32
    %1156 = vector.broadcast %cst_161 : f32 to vector<2x2xf32>
    %1157 = arith.addf %1156, %1155 : vector<2x2xf32>
    %1158 = arith.divf %1156, %1157 : vector<2x2xf32>
    %1159 = vector.extract_strided_slice %1146 {offsets = [0, 4], sizes = [2, 2], strides = [1, 1]} : vector<2x8xf32> to vector<2x2xf32>
    %1160 = math.tanh %1159 : vector<2x2xf32>
    %1161 = vector.extract_strided_slice %1146 {offsets = [0, 6], sizes = [2, 2], strides = [1, 1]} : vector<2x8xf32> to vector<2x2xf32>
    %1162 = arith.negf %1161 : vector<2x2xf32>
    %1163 = math.exp %1162 : vector<2x2xf32>
    %cst_162 = arith.constant 1.000000e+00 : f32
    %1164 = vector.broadcast %cst_162 : f32 to vector<2x2xf32>
    %1165 = arith.addf %1164, %1163 : vector<2x2xf32>
    %1166 = arith.divf %1164, %1165 : vector<2x2xf32>
    %1167 = arith.mulf %1158, %1093 : vector<2x2xf32>
    %1168 = arith.mulf %1152, %1160 : vector<2x2xf32>
    %1169 = arith.addf %1167, %1168 : vector<2x2xf32>
    %1170 = math.tanh %1169 : vector<2x2xf32>
    %1171 = arith.mulf %1166, %1170 : vector<2x2xf32>
    %1172 = vector.extract_strided_slice %823 {offsets = [6, 0], sizes = [2, 8], strides = [1, 1]} : vector<16x8xf32> to vector<2x8xf32>
    %1173 = vector.extract_strided_slice %1133 {offsets = [0, 0], sizes = [2, 1], strides = [1, 1]} : vector<2x2xf32> to vector<2x1xf32>
    %1174 = vector.extract_strided_slice %825 {offsets = [0, 0], sizes = [1, 8], strides = [1, 1]} : vector<2x8xf32> to vector<1x8xf32>
    %1175 = vector.broadcast %1173 : vector<2x1xf32> to vector<2x8xf32>
    %1176 = vector.broadcast %1174 : vector<1x8xf32> to vector<2x8xf32>
    %1177 = arith.mulf %1175, %1176 : vector<2x8xf32>
    %1178 = vector.extract_strided_slice %1133 {offsets = [0, 1], sizes = [2, 1], strides = [1, 1]} : vector<2x2xf32> to vector<2x1xf32>
    %1179 = vector.extract_strided_slice %825 {offsets = [1, 0], sizes = [1, 8], strides = [1, 1]} : vector<2x8xf32> to vector<1x8xf32>
    %1180 = vector.broadcast %1178 : vector<2x1xf32> to vector<2x8xf32>
    %1181 = vector.broadcast %1179 : vector<1x8xf32> to vector<2x8xf32>
    %1182 = arith.mulf %1180, %1181 : vector<2x8xf32>
    %1183 = arith.addf %1177, %1182 : vector<2x8xf32>
    %1184 = arith.addf %1172, %1183 : vector<2x8xf32>
    %1185 = vector.extract_strided_slice %1184 {offsets = [0, 0], sizes = [2, 2], strides = [1, 1]} : vector<2x8xf32> to vector<2x2xf32>
    %1186 = arith.negf %1185 : vector<2x2xf32>
    %1187 = math.exp %1186 : vector<2x2xf32>
    %cst_163 = arith.constant 1.000000e+00 : f32
    %1188 = vector.broadcast %cst_163 : f32 to vector<2x2xf32>
    %1189 = arith.addf %1188, %1187 : vector<2x2xf32>
    %1190 = arith.divf %1188, %1189 : vector<2x2xf32>
    %1191 = vector.extract_strided_slice %1184 {offsets = [0, 2], sizes = [2, 2], strides = [1, 1]} : vector<2x8xf32> to vector<2x2xf32>
    %1192 = arith.negf %1191 : vector<2x2xf32>
    %1193 = math.exp %1192 : vector<2x2xf32>
    %cst_164 = arith.constant 1.000000e+00 : f32
    %1194 = vector.broadcast %cst_164 : f32 to vector<2x2xf32>
    %1195 = arith.addf %1194, %1193 : vector<2x2xf32>
    %1196 = arith.divf %1194, %1195 : vector<2x2xf32>
    %1197 = vector.extract_strided_slice %1184 {offsets = [0, 4], sizes = [2, 2], strides = [1, 1]} : vector<2x8xf32> to vector<2x2xf32>
    %1198 = math.tanh %1197 : vector<2x2xf32>
    %1199 = vector.extract_strided_slice %1184 {offsets = [0, 6], sizes = [2, 2], strides = [1, 1]} : vector<2x8xf32> to vector<2x2xf32>
    %1200 = arith.negf %1199 : vector<2x2xf32>
    %1201 = math.exp %1200 : vector<2x2xf32>
    %cst_165 = arith.constant 1.000000e+00 : f32
    %1202 = vector.broadcast %cst_165 : f32 to vector<2x2xf32>
    %1203 = arith.addf %1202, %1201 : vector<2x2xf32>
    %1204 = arith.divf %1202, %1203 : vector<2x2xf32>
    %1205 = arith.mulf %1196, %1131 : vector<2x2xf32>
    %1206 = arith.mulf %1190, %1198 : vector<2x2xf32>
    %1207 = arith.addf %1205, %1206 : vector<2x2xf32>
    %1208 = math.tanh %1207 : vector<2x2xf32>
    %1209 = arith.mulf %1204, %1208 : vector<2x2xf32>
    %1210 = vector.extract_strided_slice %815 {offsets = [10, 0], sizes = [2, 8], strides = [1, 1]} : vector<16x8xf32> to vector<2x8xf32>
    %1211 = vector.extract_strided_slice %1171 {offsets = [0, 0], sizes = [2, 1], strides = [1, 1]} : vector<2x2xf32> to vector<2x1xf32>
    %1212 = vector.extract_strided_slice %824 {offsets = [0, 0], sizes = [1, 8], strides = [1, 1]} : vector<2x8xf32> to vector<1x8xf32>
    %1213 = vector.broadcast %1211 : vector<2x1xf32> to vector<2x8xf32>
    %1214 = vector.broadcast %1212 : vector<1x8xf32> to vector<2x8xf32>
    %1215 = arith.mulf %1213, %1214 : vector<2x8xf32>
    %1216 = vector.extract_strided_slice %1171 {offsets = [0, 1], sizes = [2, 1], strides = [1, 1]} : vector<2x2xf32> to vector<2x1xf32>
    %1217 = vector.extract_strided_slice %824 {offsets = [1, 0], sizes = [1, 8], strides = [1, 1]} : vector<2x8xf32> to vector<1x8xf32>
    %1218 = vector.broadcast %1216 : vector<2x1xf32> to vector<2x8xf32>
    %1219 = vector.broadcast %1217 : vector<1x8xf32> to vector<2x8xf32>
    %1220 = arith.mulf %1218, %1219 : vector<2x8xf32>
    %1221 = arith.addf %1215, %1220 : vector<2x8xf32>
    %1222 = arith.addf %1210, %1221 : vector<2x8xf32>
    %1223 = vector.extract_strided_slice %1222 {offsets = [0, 0], sizes = [2, 2], strides = [1, 1]} : vector<2x8xf32> to vector<2x2xf32>
    %1224 = arith.negf %1223 : vector<2x2xf32>
    %1225 = math.exp %1224 : vector<2x2xf32>
    %cst_166 = arith.constant 1.000000e+00 : f32
    %1226 = vector.broadcast %cst_166 : f32 to vector<2x2xf32>
    %1227 = arith.addf %1226, %1225 : vector<2x2xf32>
    %1228 = arith.divf %1226, %1227 : vector<2x2xf32>
    %1229 = vector.extract_strided_slice %1222 {offsets = [0, 2], sizes = [2, 2], strides = [1, 1]} : vector<2x8xf32> to vector<2x2xf32>
    %1230 = arith.negf %1229 : vector<2x2xf32>
    %1231 = math.exp %1230 : vector<2x2xf32>
    %cst_167 = arith.constant 1.000000e+00 : f32
    %1232 = vector.broadcast %cst_167 : f32 to vector<2x2xf32>
    %1233 = arith.addf %1232, %1231 : vector<2x2xf32>
    %1234 = arith.divf %1232, %1233 : vector<2x2xf32>
    %1235 = vector.extract_strided_slice %1222 {offsets = [0, 4], sizes = [2, 2], strides = [1, 1]} : vector<2x8xf32> to vector<2x2xf32>
    %1236 = math.tanh %1235 : vector<2x2xf32>
    %1237 = vector.extract_strided_slice %1222 {offsets = [0, 6], sizes = [2, 2], strides = [1, 1]} : vector<2x8xf32> to vector<2x2xf32>
    %1238 = arith.negf %1237 : vector<2x2xf32>
    %1239 = math.exp %1238 : vector<2x2xf32>
    %cst_168 = arith.constant 1.000000e+00 : f32
    %1240 = vector.broadcast %cst_168 : f32 to vector<2x2xf32>
    %1241 = arith.addf %1240, %1239 : vector<2x2xf32>
    %1242 = arith.divf %1240, %1241 : vector<2x2xf32>
    %1243 = arith.mulf %1234, %1169 : vector<2x2xf32>
    %1244 = arith.mulf %1228, %1236 : vector<2x2xf32>
    %1245 = arith.addf %1243, %1244 : vector<2x2xf32>
    %1246 = math.tanh %1245 : vector<2x2xf32>
    %1247 = arith.mulf %1242, %1246 : vector<2x2xf32>
    %1248 = vector.extract_strided_slice %823 {offsets = [4, 0], sizes = [2, 8], strides = [1, 1]} : vector<16x8xf32> to vector<2x8xf32>
    %1249 = vector.extract_strided_slice %1209 {offsets = [0, 0], sizes = [2, 1], strides = [1, 1]} : vector<2x2xf32> to vector<2x1xf32>
    %1250 = vector.extract_strided_slice %825 {offsets = [0, 0], sizes = [1, 8], strides = [1, 1]} : vector<2x8xf32> to vector<1x8xf32>
    %1251 = vector.broadcast %1249 : vector<2x1xf32> to vector<2x8xf32>
    %1252 = vector.broadcast %1250 : vector<1x8xf32> to vector<2x8xf32>
    %1253 = arith.mulf %1251, %1252 : vector<2x8xf32>
    %1254 = vector.extract_strided_slice %1209 {offsets = [0, 1], sizes = [2, 1], strides = [1, 1]} : vector<2x2xf32> to vector<2x1xf32>
    %1255 = vector.extract_strided_slice %825 {offsets = [1, 0], sizes = [1, 8], strides = [1, 1]} : vector<2x8xf32> to vector<1x8xf32>
    %1256 = vector.broadcast %1254 : vector<2x1xf32> to vector<2x8xf32>
    %1257 = vector.broadcast %1255 : vector<1x8xf32> to vector<2x8xf32>
    %1258 = arith.mulf %1256, %1257 : vector<2x8xf32>
    %1259 = arith.addf %1253, %1258 : vector<2x8xf32>
    %1260 = arith.addf %1248, %1259 : vector<2x8xf32>
    %1261 = vector.extract_strided_slice %1260 {offsets = [0, 0], sizes = [2, 2], strides = [1, 1]} : vector<2x8xf32> to vector<2x2xf32>
    %1262 = arith.negf %1261 : vector<2x2xf32>
    %1263 = math.exp %1262 : vector<2x2xf32>
    %cst_169 = arith.constant 1.000000e+00 : f32
    %1264 = vector.broadcast %cst_169 : f32 to vector<2x2xf32>
    %1265 = arith.addf %1264, %1263 : vector<2x2xf32>
    %1266 = arith.divf %1264, %1265 : vector<2x2xf32>
    %1267 = vector.extract_strided_slice %1260 {offsets = [0, 2], sizes = [2, 2], strides = [1, 1]} : vector<2x8xf32> to vector<2x2xf32>
    %1268 = arith.negf %1267 : vector<2x2xf32>
    %1269 = math.exp %1268 : vector<2x2xf32>
    %cst_170 = arith.constant 1.000000e+00 : f32
    %1270 = vector.broadcast %cst_170 : f32 to vector<2x2xf32>
    %1271 = arith.addf %1270, %1269 : vector<2x2xf32>
    %1272 = arith.divf %1270, %1271 : vector<2x2xf32>
    %1273 = vector.extract_strided_slice %1260 {offsets = [0, 4], sizes = [2, 2], strides = [1, 1]} : vector<2x8xf32> to vector<2x2xf32>
    %1274 = math.tanh %1273 : vector<2x2xf32>
    %1275 = vector.extract_strided_slice %1260 {offsets = [0, 6], sizes = [2, 2], strides = [1, 1]} : vector<2x8xf32> to vector<2x2xf32>
    %1276 = arith.negf %1275 : vector<2x2xf32>
    %1277 = math.exp %1276 : vector<2x2xf32>
    %cst_171 = arith.constant 1.000000e+00 : f32
    %1278 = vector.broadcast %cst_171 : f32 to vector<2x2xf32>
    %1279 = arith.addf %1278, %1277 : vector<2x2xf32>
    %1280 = arith.divf %1278, %1279 : vector<2x2xf32>
    %1281 = arith.mulf %1272, %1207 : vector<2x2xf32>
    %1282 = arith.mulf %1266, %1274 : vector<2x2xf32>
    %1283 = arith.addf %1281, %1282 : vector<2x2xf32>
    %1284 = math.tanh %1283 : vector<2x2xf32>
    %1285 = arith.mulf %1280, %1284 : vector<2x2xf32>
    %1286 = vector.extract_strided_slice %815 {offsets = [12, 0], sizes = [2, 8], strides = [1, 1]} : vector<16x8xf32> to vector<2x8xf32>
    %1287 = vector.extract_strided_slice %1247 {offsets = [0, 0], sizes = [2, 1], strides = [1, 1]} : vector<2x2xf32> to vector<2x1xf32>
    %1288 = vector.extract_strided_slice %824 {offsets = [0, 0], sizes = [1, 8], strides = [1, 1]} : vector<2x8xf32> to vector<1x8xf32>
    %1289 = vector.broadcast %1287 : vector<2x1xf32> to vector<2x8xf32>
    %1290 = vector.broadcast %1288 : vector<1x8xf32> to vector<2x8xf32>
    %1291 = arith.mulf %1289, %1290 : vector<2x8xf32>
    %1292 = vector.extract_strided_slice %1247 {offsets = [0, 1], sizes = [2, 1], strides = [1, 1]} : vector<2x2xf32> to vector<2x1xf32>
    %1293 = vector.extract_strided_slice %824 {offsets = [1, 0], sizes = [1, 8], strides = [1, 1]} : vector<2x8xf32> to vector<1x8xf32>
    %1294 = vector.broadcast %1292 : vector<2x1xf32> to vector<2x8xf32>
    %1295 = vector.broadcast %1293 : vector<1x8xf32> to vector<2x8xf32>
    %1296 = arith.mulf %1294, %1295 : vector<2x8xf32>
    %1297 = arith.addf %1291, %1296 : vector<2x8xf32>
    %1298 = arith.addf %1286, %1297 : vector<2x8xf32>
    %1299 = vector.extract_strided_slice %1298 {offsets = [0, 0], sizes = [2, 2], strides = [1, 1]} : vector<2x8xf32> to vector<2x2xf32>
    %1300 = arith.negf %1299 : vector<2x2xf32>
    %1301 = math.exp %1300 : vector<2x2xf32>
    %cst_172 = arith.constant 1.000000e+00 : f32
    %1302 = vector.broadcast %cst_172 : f32 to vector<2x2xf32>
    %1303 = arith.addf %1302, %1301 : vector<2x2xf32>
    %1304 = arith.divf %1302, %1303 : vector<2x2xf32>
    %1305 = vector.extract_strided_slice %1298 {offsets = [0, 2], sizes = [2, 2], strides = [1, 1]} : vector<2x8xf32> to vector<2x2xf32>
    %1306 = arith.negf %1305 : vector<2x2xf32>
    %1307 = math.exp %1306 : vector<2x2xf32>
    %cst_173 = arith.constant 1.000000e+00 : f32
    %1308 = vector.broadcast %cst_173 : f32 to vector<2x2xf32>
    %1309 = arith.addf %1308, %1307 : vector<2x2xf32>
    %1310 = arith.divf %1308, %1309 : vector<2x2xf32>
    %1311 = vector.extract_strided_slice %1298 {offsets = [0, 4], sizes = [2, 2], strides = [1, 1]} : vector<2x8xf32> to vector<2x2xf32>
    %1312 = math.tanh %1311 : vector<2x2xf32>
    %1313 = vector.extract_strided_slice %1298 {offsets = [0, 6], sizes = [2, 2], strides = [1, 1]} : vector<2x8xf32> to vector<2x2xf32>
    %1314 = arith.negf %1313 : vector<2x2xf32>
    %1315 = math.exp %1314 : vector<2x2xf32>
    %cst_174 = arith.constant 1.000000e+00 : f32
    %1316 = vector.broadcast %cst_174 : f32 to vector<2x2xf32>
    %1317 = arith.addf %1316, %1315 : vector<2x2xf32>
    %1318 = arith.divf %1316, %1317 : vector<2x2xf32>
    %1319 = arith.mulf %1310, %1245 : vector<2x2xf32>
    %1320 = arith.mulf %1304, %1312 : vector<2x2xf32>
    %1321 = arith.addf %1319, %1320 : vector<2x2xf32>
    %1322 = math.tanh %1321 : vector<2x2xf32>
    %1323 = arith.mulf %1318, %1322 : vector<2x2xf32>
    %1324 = vector.extract_strided_slice %823 {offsets = [2, 0], sizes = [2, 8], strides = [1, 1]} : vector<16x8xf32> to vector<2x8xf32>
    %1325 = vector.extract_strided_slice %1285 {offsets = [0, 0], sizes = [2, 1], strides = [1, 1]} : vector<2x2xf32> to vector<2x1xf32>
    %1326 = vector.extract_strided_slice %825 {offsets = [0, 0], sizes = [1, 8], strides = [1, 1]} : vector<2x8xf32> to vector<1x8xf32>
    %1327 = vector.broadcast %1325 : vector<2x1xf32> to vector<2x8xf32>
    %1328 = vector.broadcast %1326 : vector<1x8xf32> to vector<2x8xf32>
    %1329 = arith.mulf %1327, %1328 : vector<2x8xf32>
    %1330 = vector.extract_strided_slice %1285 {offsets = [0, 1], sizes = [2, 1], strides = [1, 1]} : vector<2x2xf32> to vector<2x1xf32>
    %1331 = vector.extract_strided_slice %825 {offsets = [1, 0], sizes = [1, 8], strides = [1, 1]} : vector<2x8xf32> to vector<1x8xf32>
    %1332 = vector.broadcast %1330 : vector<2x1xf32> to vector<2x8xf32>
    %1333 = vector.broadcast %1331 : vector<1x8xf32> to vector<2x8xf32>
    %1334 = arith.mulf %1332, %1333 : vector<2x8xf32>
    %1335 = arith.addf %1329, %1334 : vector<2x8xf32>
    %1336 = arith.addf %1324, %1335 : vector<2x8xf32>
    %1337 = vector.extract_strided_slice %1336 {offsets = [0, 0], sizes = [2, 2], strides = [1, 1]} : vector<2x8xf32> to vector<2x2xf32>
    %1338 = arith.negf %1337 : vector<2x2xf32>
    %1339 = math.exp %1338 : vector<2x2xf32>
    %cst_175 = arith.constant 1.000000e+00 : f32
    %1340 = vector.broadcast %cst_175 : f32 to vector<2x2xf32>
    %1341 = arith.addf %1340, %1339 : vector<2x2xf32>
    %1342 = arith.divf %1340, %1341 : vector<2x2xf32>
    %1343 = vector.extract_strided_slice %1336 {offsets = [0, 2], sizes = [2, 2], strides = [1, 1]} : vector<2x8xf32> to vector<2x2xf32>
    %1344 = arith.negf %1343 : vector<2x2xf32>
    %1345 = math.exp %1344 : vector<2x2xf32>
    %cst_176 = arith.constant 1.000000e+00 : f32
    %1346 = vector.broadcast %cst_176 : f32 to vector<2x2xf32>
    %1347 = arith.addf %1346, %1345 : vector<2x2xf32>
    %1348 = arith.divf %1346, %1347 : vector<2x2xf32>
    %1349 = vector.extract_strided_slice %1336 {offsets = [0, 4], sizes = [2, 2], strides = [1, 1]} : vector<2x8xf32> to vector<2x2xf32>
    %1350 = math.tanh %1349 : vector<2x2xf32>
    %1351 = vector.extract_strided_slice %1336 {offsets = [0, 6], sizes = [2, 2], strides = [1, 1]} : vector<2x8xf32> to vector<2x2xf32>
    %1352 = arith.negf %1351 : vector<2x2xf32>
    %1353 = math.exp %1352 : vector<2x2xf32>
    %cst_177 = arith.constant 1.000000e+00 : f32
    %1354 = vector.broadcast %cst_177 : f32 to vector<2x2xf32>
    %1355 = arith.addf %1354, %1353 : vector<2x2xf32>
    %1356 = arith.divf %1354, %1355 : vector<2x2xf32>
    %1357 = arith.mulf %1348, %1283 : vector<2x2xf32>
    %1358 = arith.mulf %1342, %1350 : vector<2x2xf32>
    %1359 = arith.addf %1357, %1358 : vector<2x2xf32>
    %1360 = math.tanh %1359 : vector<2x2xf32>
    %1361 = arith.mulf %1356, %1360 : vector<2x2xf32>
    %1362 = vector.extract_strided_slice %815 {offsets = [14, 0], sizes = [2, 8], strides = [1, 1]} : vector<16x8xf32> to vector<2x8xf32>
    %1363 = vector.extract_strided_slice %1323 {offsets = [0, 0], sizes = [2, 1], strides = [1, 1]} : vector<2x2xf32> to vector<2x1xf32>
    %1364 = vector.extract_strided_slice %824 {offsets = [0, 0], sizes = [1, 8], strides = [1, 1]} : vector<2x8xf32> to vector<1x8xf32>
    %1365 = vector.broadcast %1363 : vector<2x1xf32> to vector<2x8xf32>
    %1366 = vector.broadcast %1364 : vector<1x8xf32> to vector<2x8xf32>
    %1367 = arith.mulf %1365, %1366 : vector<2x8xf32>
    %1368 = vector.extract_strided_slice %1323 {offsets = [0, 1], sizes = [2, 1], strides = [1, 1]} : vector<2x2xf32> to vector<2x1xf32>
    %1369 = vector.extract_strided_slice %824 {offsets = [1, 0], sizes = [1, 8], strides = [1, 1]} : vector<2x8xf32> to vector<1x8xf32>
    %1370 = vector.broadcast %1368 : vector<2x1xf32> to vector<2x8xf32>
    %1371 = vector.broadcast %1369 : vector<1x8xf32> to vector<2x8xf32>
    %1372 = arith.mulf %1370, %1371 : vector<2x8xf32>
    %1373 = arith.addf %1367, %1372 : vector<2x8xf32>
    %1374 = arith.addf %1362, %1373 : vector<2x8xf32>
    %1375 = vector.extract_strided_slice %1374 {offsets = [0, 0], sizes = [2, 2], strides = [1, 1]} : vector<2x8xf32> to vector<2x2xf32>
    %1376 = arith.negf %1375 : vector<2x2xf32>
    %1377 = math.exp %1376 : vector<2x2xf32>
    %cst_178 = arith.constant 1.000000e+00 : f32
    %1378 = vector.broadcast %cst_178 : f32 to vector<2x2xf32>
    %1379 = arith.addf %1378, %1377 : vector<2x2xf32>
    %1380 = arith.divf %1378, %1379 : vector<2x2xf32>
    %1381 = vector.extract_strided_slice %1374 {offsets = [0, 2], sizes = [2, 2], strides = [1, 1]} : vector<2x8xf32> to vector<2x2xf32>
    %1382 = arith.negf %1381 : vector<2x2xf32>
    %1383 = math.exp %1382 : vector<2x2xf32>
    %cst_179 = arith.constant 1.000000e+00 : f32
    %1384 = vector.broadcast %cst_179 : f32 to vector<2x2xf32>
    %1385 = arith.addf %1384, %1383 : vector<2x2xf32>
    %1386 = arith.divf %1384, %1385 : vector<2x2xf32>
    %1387 = vector.extract_strided_slice %1374 {offsets = [0, 4], sizes = [2, 2], strides = [1, 1]} : vector<2x8xf32> to vector<2x2xf32>
    %1388 = math.tanh %1387 : vector<2x2xf32>
    %1389 = vector.extract_strided_slice %1374 {offsets = [0, 6], sizes = [2, 2], strides = [1, 1]} : vector<2x8xf32> to vector<2x2xf32>
    %1390 = arith.negf %1389 : vector<2x2xf32>
    %1391 = math.exp %1390 : vector<2x2xf32>
    %cst_180 = arith.constant 1.000000e+00 : f32
    %1392 = vector.broadcast %cst_180 : f32 to vector<2x2xf32>
    %1393 = arith.addf %1392, %1391 : vector<2x2xf32>
    %1394 = arith.divf %1392, %1393 : vector<2x2xf32>
    %1395 = arith.mulf %1386, %1321 : vector<2x2xf32>
    %1396 = arith.mulf %1380, %1388 : vector<2x2xf32>
    %1397 = arith.addf %1395, %1396 : vector<2x2xf32>
    %1398 = math.tanh %1397 : vector<2x2xf32>
    %1399 = arith.mulf %1394, %1398 : vector<2x2xf32>
    %1400 = vector.extract_strided_slice %823 {offsets = [0, 0], sizes = [2, 8], strides = [1, 1]} : vector<16x8xf32> to vector<2x8xf32>
    %1401 = vector.extract_strided_slice %1361 {offsets = [0, 0], sizes = [2, 1], strides = [1, 1]} : vector<2x2xf32> to vector<2x1xf32>
    %1402 = vector.extract_strided_slice %825 {offsets = [0, 0], sizes = [1, 8], strides = [1, 1]} : vector<2x8xf32> to vector<1x8xf32>
    %1403 = vector.broadcast %1401 : vector<2x1xf32> to vector<2x8xf32>
    %1404 = vector.broadcast %1402 : vector<1x8xf32> to vector<2x8xf32>
    %1405 = arith.mulf %1403, %1404 : vector<2x8xf32>
    %1406 = vector.extract_strided_slice %1361 {offsets = [0, 1], sizes = [2, 1], strides = [1, 1]} : vector<2x2xf32> to vector<2x1xf32>
    %1407 = vector.extract_strided_slice %825 {offsets = [1, 0], sizes = [1, 8], strides = [1, 1]} : vector<2x8xf32> to vector<1x8xf32>
    %1408 = vector.broadcast %1406 : vector<2x1xf32> to vector<2x8xf32>
    %1409 = vector.broadcast %1407 : vector<1x8xf32> to vector<2x8xf32>
    %1410 = arith.mulf %1408, %1409 : vector<2x8xf32>
    %1411 = arith.addf %1405, %1410 : vector<2x8xf32>
    %1412 = arith.addf %1400, %1411 : vector<2x8xf32>
    %1413 = vector.extract_strided_slice %1412 {offsets = [0, 0], sizes = [2, 2], strides = [1, 1]} : vector<2x8xf32> to vector<2x2xf32>
    %1414 = arith.negf %1413 : vector<2x2xf32>
    %1415 = math.exp %1414 : vector<2x2xf32>
    %cst_181 = arith.constant 1.000000e+00 : f32
    %1416 = vector.broadcast %cst_181 : f32 to vector<2x2xf32>
    %1417 = arith.addf %1416, %1415 : vector<2x2xf32>
    %1418 = arith.divf %1416, %1417 : vector<2x2xf32>
    %1419 = vector.extract_strided_slice %1412 {offsets = [0, 2], sizes = [2, 2], strides = [1, 1]} : vector<2x8xf32> to vector<2x2xf32>
    %1420 = arith.negf %1419 : vector<2x2xf32>
    %1421 = math.exp %1420 : vector<2x2xf32>
    %cst_182 = arith.constant 1.000000e+00 : f32
    %1422 = vector.broadcast %cst_182 : f32 to vector<2x2xf32>
    %1423 = arith.addf %1422, %1421 : vector<2x2xf32>
    %1424 = arith.divf %1422, %1423 : vector<2x2xf32>
    %1425 = vector.extract_strided_slice %1412 {offsets = [0, 4], sizes = [2, 2], strides = [1, 1]} : vector<2x8xf32> to vector<2x2xf32>
    %1426 = math.tanh %1425 : vector<2x2xf32>
    %1427 = vector.extract_strided_slice %1412 {offsets = [0, 6], sizes = [2, 2], strides = [1, 1]} : vector<2x8xf32> to vector<2x2xf32>
    %1428 = arith.negf %1427 : vector<2x2xf32>
    %1429 = math.exp %1428 : vector<2x2xf32>
    %cst_183 = arith.constant 1.000000e+00 : f32
    %1430 = vector.broadcast %cst_183 : f32 to vector<2x2xf32>
    %1431 = arith.addf %1430, %1429 : vector<2x2xf32>
    %1432 = arith.divf %1430, %1431 : vector<2x2xf32>
    %1433 = arith.mulf %1424, %1359 : vector<2x2xf32>
    %1434 = arith.mulf %1418, %1426 : vector<2x2xf32>
    %1435 = arith.addf %1433, %1434 : vector<2x2xf32>
    %1436 = math.tanh %1435 : vector<2x2xf32>
    %1437 = arith.mulf %1432, %1436 : vector<2x2xf32>
    %1438 = tpu.concatenate %867, %943, %1019, %1095, %1171, %1247, %1323, %1399 in 0 : vector<2x2xf32>, vector<2x2xf32>, vector<2x2xf32>, vector<2x2xf32>, vector<2x2xf32>, vector<2x2xf32>, vector<2x2xf32>, vector<2x2xf32> -> vector<16x2xf32>
    %1439 = tpu.concatenate %1437, %1361, %1285, %1209, %1133, %1057, %981, %905 in 0 : vector<2x2xf32>, vector<2x2xf32>, vector<2x2xf32>, vector<2x2xf32>, vector<2x2xf32>, vector<2x2xf32>, vector<2x2xf32>, vector<2x2xf32> -> vector<16x2xf32>
    %c0_184 = arith.constant 0 : index
    %c0_185 = arith.constant 0 : index
    %1440 = vector.load %arg27[%c0_184, %c0_185] : memref<1x4xf32, #tpu.memory_space<vmem>>, vector<1x4xf32>
    %1441 = vector.extract_strided_slice %1440 {offsets = [0, 0], sizes = [1, 2], strides = [1, 1]} : vector<1x4xf32> to vector<1x2xf32>
    %1442 = vector.broadcast %1441 : vector<1x2xf32> to vector<16x2xf32>
    %1443 = arith.mulf %1438, %1442 : vector<16x2xf32>
    %cst_186 = arith.constant dense<0.000000e+00> : vector<16xf32>
    %1444 = vector.multi_reduction <add>, %1443, %cst_186 [1] : vector<16x2xf32> to vector<16xf32>
    %1445 = vector.shape_cast %1444 : vector<16xf32> to vector<16x1xf32>
    %1446 = vector.extract_strided_slice %1440 {offsets = [0, 2], sizes = [1, 2], strides = [1, 1]} : vector<1x4xf32> to vector<1x2xf32>
    %1447 = vector.broadcast %1446 : vector<1x2xf32> to vector<16x2xf32>
    %1448 = arith.mulf %1439, %1447 : vector<16x2xf32>
    %cst_187 = arith.constant dense<0.000000e+00> : vector<16xf32>
    %1449 = vector.multi_reduction <add>, %1448, %cst_187 [1] : vector<16x2xf32> to vector<16xf32>
    %1450 = vector.shape_cast %1449 : vector<16xf32> to vector<16x1xf32>
    %1451 = arith.addf %1445, %1450 : vector<16x1xf32>
    %c0_188 = arith.constant 0 : index
    %c0_189 = arith.constant 0 : index
    %1452 = vector.load %arg28[%c0_188, %c0_189] : memref<1x1xf32, #tpu.memory_space<vmem>>, vector<1x1xf32>
    %1453 = vector.broadcast %1452 : vector<1x1xf32> to vector<16x1xf32>
    %1454 = arith.addf %1451, %1453 : vector<16x1xf32>
    %1455 = vector.shape_cast %1454 : vector<16x1xf32> to vector<8x2x1xf32>
    %c0_190 = arith.constant 0 : index
    %c0_191 = arith.constant 0 : index
    %c0_192 = arith.constant 0 : index
    %1456 = vector.load %arg29[%c0_190, %c0_191, %c0_192] : memref<8x2x1xf32, #tpu.memory_space<vmem>>, vector<8x2x1xf32>
    tpu.vector_store %arg29[%c0_190, %c0_191, %c0_192], %1455 {strides = array<i32>} : memref<8x2x1xf32, #tpu.memory_space<vmem>>, vector<8x2x1xf32>,
    return
  }
}

</mosaic_0001>

<bundles_post_ra>
// kernel: transam_forward.1
= control target key start
LH: loop header
LB: loop body
LE: loop exit
PB: predicated region body
PF: predicated region fallthrough
CT: control target
= control target key end

     0   :  { %s7320_s3 = smov 3   ;;  %s7321_s10 = smov 1   ;;  %vm183_vm0 = vcmask 326656   ;;  %vm293_vm1 = vcmask 31744   ;;  %vm660_vm2 = vcmask 130048   ;;  %vm1305_vm3 = vcmask 64512   ;;  %s9090_s0 = inlined_call_operand.smem [shape: u32[30], index: -1, kind: input, shape index: {}] }
   0x1   :  { %s5870_s6 = sld [smem:[%s9090_s0 + %s7320_s3]]   ;;  %s7322_s14 = smov 4   ;;  %vm1308_vm4 = vcmask 97280   ;;  %vm1313_vm5 = vcmask 162816   ;;  %vm1316_vm6 = vcmask 195584   ;;  %vm1319_vm7 = vcmask 228352  }
   0x2   :  { %s1_s9 = sld [smem:[%s9090_s0]]   ;;  %s7323_s18 = smov 108   ;;  %vm1322_vm8 = vcmask 261120   ;;  %vm1325_vm9 = vcmask 293888   ;;  %vm1938_vm11 = vcmask 1043456  }
   0x3   :  { %s7384_s13 = sld [smem:[%s9090_s0 + %s7321_s10]]   ;;  %s7324_s19 = smov 112  }
   0x4   :  { %s7390_s17 = sld [smem:[%s9090_s0 + %s7322_s14]]   ;;  %s7325_s20 = smov 124  }
   0x5   :  { %s7326_s21 = smov 104   ;;  %s7327_s22 = smov 120  }
   0x6   :  { %s7328_s23 = smov 116   ;;  %s7329_s24 = smov 100  }
   0x7   :  { %v153_v0 = vld [vmem:[%s5870_s6 + $0x20] sm:$0xff]  ;;  %v152_v1 = vld [vmem:[%s5870_s6 + $0x18] sm:$0xff]  ;;  %v151_v2 = vld [vmem:[%s5870_s6 + $0x10] sm:$0xff]  ;;  %s7330_s25 = smov 96   ;;  %s7331_s26 = smov 92  }
   0x8   :  { %199 = vmatpush.msra.mxu0 %v153_v0  ;;  %v125_v3 = vld [vmem:[%s1_s9] sm:$0x3]  ;;  %v150_v4 = vld [vmem:[%s5870_s6 + $0x8] sm:$0xff]  ;;  %v126_v5 = vld [vmem:[%s1_s9 + $0x2] sm:$0x3]  ;;  %s7332_s27 = smov 88  }
   0x9   :  { %v127_v6 = vld [vmem:[%s1_s9 + $0x4] sm:$0x3]  ;;  %v128_v7 = vld [vmem:[%s1_s9 + $0x6] sm:$0x3]  ;;  %v133_v8 = vld [vmem:[%s7384_s13] sm:$0x3] }
   0xa   :  { %200 = vmatpush.msra.mxu0 %v152_v1  ;;  %v134_v9 = vld [vmem:[%s7384_s13 + $0x2] sm:$0x3]  ;;  %v135_v10 = vld [vmem:[%s7384_s13 + $0x4] sm:$0x3]  ;;  %v136_v12 = vld [vmem:[%s7384_s13 + $0x6] sm:$0x3]  ;;  %v7396_v13 = vadd.f32 %v133_v8, %v125_v3 }
   0xb   :  { %v149_v11 = vld [vmem:[%s5870_s6] sm:$0xff]  ;;  %v7398_v14 = vadd.f32 %v134_v9, %v126_v5  ;;  %v7400_v15 = vadd.f32 %v135_v10, %v127_v6  ;;  %v129_v16 = vld [vmem:[%s1_s9 + $0x8] sm:$0x3]  ;;  %v130_v17 = vld [vmem:[%s1_s9 + $0xa] sm:$0x3]  ;;  %v7402_v18 = vadd.f32 %v136_v12, %v128_v7  ;;  %s7333_s28 = smov 48  }
   0xc   :  { %201 = vmatpush.msra.mxu0 %v151_v2  ;;  %v131_v19 = vld [vmem:[%s1_s9 + $0xc] sm:$0x3]  ;;  %v132_v20 = vld [vmem:[%s1_s9 + $0xe] sm:$0x3]  ;;  %v137_v21 = vld [vmem:[%s7384_s13 + $0x8] sm:$0x3] }
   0xd   :  { %166 = vst [vmem:[#allocation1] ss:$4 sm:$0xff] %v7396_v13  ;;  %v138_v22 = vld [vmem:[%s7384_s13 + $0xa] sm:$0x3]  ;;  %v139_v23 = vld [vmem:[%s7384_s13 + $0xc] sm:$0x3]  ;;  %v7408_v24 = vadd.f32 %v137_v21, %v129_v16 }
   0xe   :  { %202 = vmatpush.msra.mxu0 %v150_v4  ;;  %168 = vst [vmem:[#allocation1 + $0x1] ss:$4 sm:$0xff] %v7398_v14  ;;  %v140_v25 = vld [vmem:[%s7384_s13 + $0xe] sm:$0x3]  ;;  %v7412_v26 = vadd.f32 %v138_v22, %v130_v17  ;;  %v7415_v27 = vadd.f32 %v139_v23, %v131_v19  ;;  %v6961_v31 = vld [vmem:[%s7390_s17] ss:$0 sm:$0xff] }
   0xf   :  { %170 = vst [vmem:[#allocation1 + $0x2] ss:$4 sm:$0xff] %v7400_v15  ;;  %v7418_v28 = vadd.f32 %v140_v25, %v132_v20  ;;  %s7334_s29 = smov 2   ;;  %s7335_s3 = smov 12  }
  0x10   :  { %203 = vmatpush.msra.mxu0 %v149_v11  ;;  %172 = vst [vmem:[#allocation1 + $0x3] ss:$4 sm:$0xff] %v7402_v18  ;;  %s5869_s2 = sld [smem:[%s9090_s0 + %s7334_s29]]   ;;  %s7336_s7 = smov 8  }
  0x11   :  { %174 = vst [vmem:[#allocation1 + $0x20] ss:$4 sm:$0xff] %v7408_v24  ;;  %s7825_s6 = sld [smem:[%s9090_s0 + %s7335_s3]]   ;;  %s7337_s11 = smov 20  }
  0x12   :  { %176 = vst [vmem:[#allocation1 + $0x21] ss:$4 sm:$0xff] %v7412_v26  ;;  %s7839_s10 = sld [smem:[%s9090_s0 + %s7336_s7]]   ;;  %s7338_s16 = smov 28  }
  0x13   :  { %178 = vst [vmem:[#allocation1 + $0x22] ss:$4 sm:$0xff] %v7415_v27  ;;  %s7848_s15 = sld [smem:[%s9090_s0 + %s7337_s11]]   ;;  %s7344_s30 = smov 5  }
  0x14   :  { %180 = vst [vmem:[#allocation1 + $0x23] ss:$4 sm:$0xff] %v7418_v28  ;;  %s7345_s4 = smov 7   ;;  %s7351_s9 = smov 9  }
  0x15   :  { %s7940_s8 = sld [smem:[%s9090_s0 + %s7345_s4]]   ;;  %s7355_s1 = smov 14  }
  0x16   :  { %s7999_s13 = sld [smem:[%s9090_s0 + %s7351_s9]]   ;;  %s7356_s5 = smov 17  }
  0x17   :  { %v181_v29 = vld.sshfl [vmem:[#allocation1] sm:$0xff pattern:$0x73625140]  ;;  %s8406_s4 = sld [smem:[%s9090_s0 + %s7355_s1]]   ;;  %s7365_s12 = smov 26  }
  0x18   :  { %5897 = vmatmul.msk.f32.vlgmr.msra.gmra.mxu0 %vm183_vm0, %v181_v29  ;;  %s8455_s9 = sld [smem:[%s9090_s0 + %s7356_s5]]   ;;  %s7366_s17 = smov 22  }
  0x1b   :  { %v182_v30 = vld.sshfl [vmem:[#allocation1 + $0x20] sm:$0xff pattern:$0x73625140] }
  0x20   :  { %5898 = vmatmul.msk.f32.gmra.mxu0 %vm183_vm0, %v182_v30 }
  0x95   :  { %v205_v32 = vpop.f32.mrf.mxu0 }
  0x96   :  { %v7427_v33 = vadd.f32 %v6961_v31, %v205_v32 }
  0x98   :  { %237 = vrot.lane.b32.xlu0 %v7427_v33, %s7323_s18  ;;  %231 = vrot.lane.b32.xlu2 %v7427_v33, %s7324_s19  ;;  %v267_v58 = vmul.f32 0.5, %v7427_v33 }
  0x99   :  { %213 = vrot.lane.b32.xlu1 %v7427_v33, %s7325_s20 }
  0x9d   :  { %v208_v34 = vpop.f32.mrf.mxu0 }
  0x9e   :  { %v7433_v35 = vadd.f32 %v6961_v31, %v208_v34 }
  0xa0   :  { %215 = vrot.lane.b32.xlu0 %v7433_v35, %s7325_s20  ;;  %243 = vrot.lane.b32.xlu2 %v7427_v33, %s7326_s21  ;;  %v268_v62 = vmul.f32 0.5, %v7433_v35 }
  0xa1   :  { %219 = vrot.lane.b32.xlu1 %v7427_v33, %s7327_s22 }
  0xa8   :  { %221 = vrot.lane.b32.xlu0 %v7433_v35, %s7327_s22  ;;  %227 = vrot.lane.b32.xlu2 %v7433_v35, %s7328_s23  ;;  %s7340_s22 = smov 24  }
  0xa9   :  { %225 = vrot.lane.b32.xlu1 %v7427_v33, %s7328_s23  ;;  %s7341_s23 = smov 32   ;;  %s5891_s1 = sld [smem:[%s9090_s0 + %s7340_s22]]  }
  0xb0   :  { %249 = vrot.lane.b32.xlu0 %v7427_v33, %s7329_s24  ;;  %233 = vrot.lane.b32.xlu2 %v7433_v35, %s7324_s19  ;;  %s5895_s19 = sld [smem:[%s9090_s0 + %s7338_s16]]  }
  0xb1   :  { %255 = vrot.lane.b32.xlu1 %v7427_v33, %s7330_s25 }
  0xb8   :  { %239 = vrot.lane.b32.xlu0 %v7433_v35, %s7323_s18  ;;  %261 = vrot.lane.b32.xlu2 %v7427_v33, %s7331_s26 }
  0xb9   :  { %245 = vrot.lane.b32.xlu1 %v7433_v35, %s7326_s21  ;;  %s7339_s21 = smov 16  }
  0xc0   :  { %289 = vrot.lane.b32.xlu0 %v7427_v33, %s7332_s27  ;;  %251 = vrot.lane.b32.xlu2 %v7433_v35, %s7329_s24  ;;  %s7342_s24 = smov 6  }
  0xc1   :  { %263 = vrot.lane.b32.xlu1 %v7433_v35, %s7331_s26 }
  0xc8   :  { %257 = vrot.lane.b32.xlu0 %v7433_v35, %s7330_s25  ;;  %s7367_s25 = smov 25  }
  0xd0   :  { %291 = vrot.lane.b32.xlu0 %v7433_v35, %s7332_s27 }
  0xf2   :  { %v7455_v36 = vpop.permute.xlu2 %231 }
  0xf3   :  { %v275_v22 = vmul.f32 0.5, %v7455_v36 }
  0xfa   :  { %v7459_v38 = vpop.permute.xlu2 %243 }
  0xfb   :  { %v279_v31 = vmul.f32 0.5, %v7459_v38 }
 0x102   :  { %v7469_v42 = vpop.permute.xlu2 %227 }
 0x103   :  { %v274_v34 = vmul.f32 0.5, %v7469_v42 }
 0x10a   :  { %v7457_v37 = vpop.permute.xlu0 %237  ;;  %v7478_v45 = vpop.permute.xlu2 %233 }
 0x10b   :  { %v7461_v39 = vpop.permute.xlu1 %213  ;;  %v6885_v56 = vpack.i.bf16 %v7457_v37, %v7455_v36  ;;  %v277_v12 = vmul.f32 0.5, %v7457_v37  ;;  %v276_v32 = vmul.f32 0.5, %v7478_v45 }
 0x10c   :  { %327 = vrot.lane.b32.xlu1 %v7461_v39, %s7332_s27  ;;  %v6875_v57 = vpack.i.bf16 %v7461_v39, %v7427_v33  ;;  %v269_v8 = vmul.f32 0.5, %v7461_v39 }
 0x112   :  { %v7465_v40 = vpop.permute.xlu0 %215  ;;  %v7489_v48 = vpop.permute.xlu2 %261 }
 0x113   :  { %v220_v41 = vpop.permute.xlu1 %219  ;;  %v6890_v63 = vpack.i.bf16 %v7465_v40, %v7433_v35  ;;  %v270_v16 = vmul.f32 0.5, %v7465_v40 }
 0x114   :  { %329 = vrot.lane.b32.xlu1 %v7465_v40, %s7332_s27  ;;  %v271_v4 = vmul.f32 0.5, %v220_v41 }
 0x11a   :  { %v222_v43 = vpop.permute.xlu0 %221  ;;  %v7501_v52 = vpop.permute.xlu2 %251 }
 0x11b   :  { %v7471_v44 = vpop.permute.xlu1 %225  ;;  %366 = vrot.lane.b32.xlu2 %v222_v43, %s7332_s27  ;;  %v6895_v60 = vpack.i.bf16 %v7469_v42, %v222_v43  ;;  %v272_v7 = vmul.f32 0.5, %v222_v43 }
 0x11c   :  { %438 = vrot.lane.b32.xlu1 %v7455_v36, %s7332_s27  ;;  %401 = vrot.lane.b32.xlu0 %v7471_v44, %s7332_s27  ;;  %v6880_v59 = vpack.i.bf16 %v7471_v44, %v220_v41  ;;  %v273_v23 = vmul.f32 0.5, %v7471_v44 }
 0x122   :  { %v7480_v46 = vpop.permute.xlu0 %249 }
 0x123   :  { %v7482_v47 = vpop.permute.xlu1 %255  ;;  %364 = vrot.lane.b32.xlu2 %v220_v41, %s7332_s27  ;;  %v281_v39 = vmul.f32 0.5, %v7480_v46 }
 0x124   :  { %440 = vrot.lane.b32.xlu1 %v7478_v45, %s7332_s27  ;;  %403 = vrot.lane.b32.xlu0 %v7469_v42, %s7332_s27 }
 0x12a   :  { %v7491_v49 = vpop.permute.xlu0 %239 }
 0x12b   :  { %v7493_v50 = vpop.permute.xlu1 %245  ;;  %477 = vrot.lane.b32.xlu2 %v7491_v49, %s7332_s27  ;;  %v6900_v61 = vpack.i.bf16 %v7491_v49, %v7478_v45  ;;  %v278_v21 = vmul.f32 0.5, %v7491_v49  ;;  %v283_v45 = vmul.f32 0.5, %v7482_v47  ;;  %v285_v49 = vmul.f32 0.5, %v7489_v48 }
 0x12c   :  { %512 = vrot.lane.b32.xlu1 %v7459_v38, %s7332_s27  ;;  %514 = vrot.lane.b32.xlu0 %v7493_v50, %s7332_s27  ;;  %v6905_v0 = vpack.i.bf16 %v7501_v52, %v7493_v50 }
 0x132   :  { %v290_v51 = vpop.permute.xlu0 %289 }
 0x133   :  { %v7503_v53 = vpop.permute.xlu1 %263  ;;  %475 = vrot.lane.b32.xlu2 %v7457_v37, %s7332_s27  ;;  %v280_v37 = vmul.f32 0.5, %v7493_v50  ;;  %v282_v50 = vmul.f32 0.5, %v7501_v52 }
 0x134   :  { %551 = vrot.lane.b32.xlu1 %v7501_v52, %s7332_s27  ;;  %625 = vrot.lane.b32.xlu0 %v7503_v53, %s7332_s27 }
 0x13a   :  { %v7511_v54 = vpop.permute.xlu0 %257 }
 0x13b   :  { %588 = vrot.lane.b32.xlu2 %v7511_v54, %s7332_s27 }
 0x13c   :  { %623 = vrot.lane.b32.xlu1 %v7489_v48, %s7332_s27  ;;  %586 = vrot.lane.b32.xlu0 %v7482_v47, %s7332_s27 }
 0x142   :  { %v292_v55 = vpop.permute.xlu0 %291 }
 0x143   :  { %5899 = vmatpush.xpose.msk.msra.mxu1 %vm293_vm1, %v292_v55  ;;  %549 = vrot.lane.b32.xlu2 %v7480_v46, %s7332_s27  ;;  %s7898_s27 = sld [smem:[%s9090_s0 + %s7342_s24]]  }
 0x144   :  { %6886 = vrot.lane.b32.xlu1 %v6885_v56, %s7333_s28  ;;  %6876 = vrot.lane.b32.xlu0 %v6875_v57, %s7333_s28 }
 0x147   :  { %5900 = vmatpush.xpose.msk.msra.mxu1 %vm293_vm1, %v290_v51 }
 0x14a   :  { %5901 = vmatmul.msk.f32.vlgmr.msra.gmra.mxu1 %vm293_vm1, %v267_v58  ;;  %v284_v58 = vmul.f32 0.5, %v7511_v54 }
 0x14b   :  { %6881 = vrot.lane.b32.xlu2 %v6880_v59, %s7333_s28  ;;  %v286_v59 = vmul.f32 0.5, %v7503_v53 }
 0x14c   :  { %6896 = vrot.lane.b32.xlu1 %v6895_v60, %s7333_s28  ;;  %6901 = vrot.lane.b32.xlu0 %v6900_v61, %s7333_s28 }
 0x152   :  { %5902 = vmatmul.msk.f32.gmra.mxu1 %vm293_vm1, %v268_v62 }
 0x153   :  { %6891 = vrot.lane.b32.xlu2 %v6890_v63, %s7333_s28 }
 0x154   :  { %6906 = vrot.lane.b32.xlu1 %v6905_v0, %s7333_s28 }
 0x175   :  { %v367_v1 = vpop.permute.xlu2 %366 }
 0x176   :  { %5907 = vmatpush.xpose.msk.msra.mxu3 %vm293_vm1, %v367_v1 }
 0x17d   :  { %v365_v2 = vpop.permute.xlu2 %364 }
 0x17e   :  { %v328_v3 = vpop.permute.xlu1 %327  ;;  %5908 = vmatpush.xpose.msk.msra.mxu3 %vm293_vm1, %v365_v2 }
 0x181   :  { %5909 = vmatmul.msk.f32.vlgmr.msra.gmra.mxu3 %vm293_vm1, %v271_v4 }
 0x185   :  { %v478_v5 = vpop.permute.xlu2 %477 }
 0x186   :  { %v330_v6 = vpop.permute.xlu1 %329  ;;  %5919 = vmatpush.xpose.msk.msrb.mxu3 %vm293_vm1, %v478_v5  ;;  %v7602_v5 = vld [vmem:[%s5869_s2] sm:$0xff] }
 0x187   :  { %5903 = vmatpush.xpose.msk.msra.mxu2 %vm293_vm1, %v330_v6 }
 0x189   :  { %5910 = vmatmul.msk.f32.gmra.mxu3 %vm293_vm1, %v272_v7 }
 0x18b   :  { %5904 = vmatpush.xpose.msk.msra.mxu2 %vm293_vm1, %v328_v3 }
 0x18d   :  { %v476_v9 = vpop.permute.xlu2 %475 }
 0x18e   :  { %v402_v10 = vpop.permute.xlu0 %401  ;;  %5905 = vmatmul.msk.f32.vlgmr.msra.gmra.mxu2 %vm293_vm1, %v269_v8  ;;  %v439_v11 = vpop.permute.xlu1 %438  ;;  %5920 = vmatpush.xpose.msk.msrb.mxu3 %vm293_vm1, %v476_v9 }
 0x191   :  { %5921 = vmatmul.msk.f32.vlgmr.msrb.gmra.mxu3 %vm293_vm1, %v277_v12  ;;  %v7609_v12 = vld [vmem:[%s5869_s2 + $0x8] sm:$0xff]  ;;  %s7363_s2 = smov 21  }
 0x192   :  { %s5888_s5 = sld [smem:[%s9090_s0 + %s7363_s2]]  }
 0x195   :  { %v589_v17 = vpop.permute.xlu2 %588 }
 0x196   :  { %v404_v19 = vpop.permute.xlu0 %403  ;;  %5906 = vmatmul.msk.f32.gmra.mxu2 %vm293_vm1, %v270_v16  ;;  %v441_v20 = vpop.permute.xlu1 %440 }
 0x197   :  { %5911 = vmatpush.xpose.msk.msrb.mxu1 %vm293_vm1, %v404_v19  ;;  %5915 = vmatpush.xpose.msk.msrb.mxu2 %vm293_vm1, %v441_v20 }
 0x199   :  { %5922 = vmatmul.msk.f32.gmra.mxu3 %vm293_vm1, %v278_v21 }
 0x19b   :  { %5912 = vmatpush.xpose.msk.msrb.mxu1 %vm293_vm1, %v402_v10  ;;  %5916 = vmatpush.xpose.msk.msrb.mxu2 %vm293_vm1, %v439_v11 }
 0x19d   :  { %v550_v25 = vpop.permute.xlu2 %549 }
 0x19e   :  { %v515_v29 = vpop.permute.xlu0 %514  ;;  %5917 = vmatmul.msk.f32.vlgmr.msrb.gmra.mxu2 %vm293_vm1, %v275_v22  ;;  %v513_v30 = vpop.permute.xlu1 %512  ;;  %5913 = vmatmul.msk.f32.vlgmr.msrb.gmra.mxu1 %vm293_vm1, %v273_v23 }
 0x19f   :  { %5931 = vmatpush.xpose.msk.msra.mxu2 %vm293_vm1, %v589_v17  ;;  %5923 = vmatpush.xpose.msk.msrb.mxu0 %vm293_vm1, %v515_v29 }
 0x1a3   :  { %5924 = vmatpush.xpose.msk.msrb.mxu0 %vm293_vm1, %v513_v30 }
 0x1a5   :  { %v6882_v33 = vpop.permute.xlu2 %6881 }
 0x1a6   :  { %v626_v35 = vpop.permute.xlu0 %625  ;;  %5918 = vmatmul.msk.f32.gmra.mxu2 %vm293_vm1, %v276_v32  ;;  %5925 = vmatmul.msk.f32.vlgmr.msrb.gmra.mxu0 %vm293_vm1, %v279_v31  ;;  %v552_v36 = vpop.permute.xlu1 %551  ;;  %v6884_v1 = vunpack.i.h.bf16 %v6882_v33  ;;  %v6883_v2 = vunpack.i.l.bf16 %v6882_v33 }
 0x1a7   :  { %5914 = vmatmul.msk.f32.gmra.mxu1 %vm293_vm1, %v274_v34  ;;  %5935 = vmatpush.xpose.msk.msra.mxu3 %vm293_vm1, %v626_v35 }
 0x1a8   :  { %5927 = vmatpush.xpose.msk.msra.mxu1 %vm293_vm1, %v552_v36 }
 0x1ac   :  { %5928 = vmatpush.xpose.msk.msra.mxu1 %vm293_vm1, %v550_v25 }
 0x1ad   :  { %v6892_v40 = vpop.permute.xlu2 %6891 }
 0x1ae   :  { %v6894_v41 = vunpack.i.h.bf16 %v6892_v40  ;;  %v6893_v42 = vunpack.i.l.bf16 %v6892_v40  ;;  %v587_v43 = vpop.permute.xlu0 %586  ;;  %5926 = vmatmul.msk.f32.gmra.mxu0 %vm293_vm1, %v280_v37  ;;  %v624_v44 = vpop.permute.xlu1 %623 }
 0x1af   :  { %5929 = vmatmul.msk.f32.vlgmr.msra.gmra.mxu1 %vm293_vm1, %v281_v39  ;;  %5932 = vmatpush.xpose.msk.msra.mxu2 %vm293_vm1, %v587_v43 }
 0x1b0   :  { %5936 = vmatpush.xpose.msk.msra.mxu3 %vm293_vm1, %v624_v44  ;;  %907 = vmatpush.msra.mxu0 %v6893_v42 }
 0x1b1   :  { %942 = vmatpush.msrb.mxu1 %v6894_v41 }
 0x1b2   :  { %5933 = vmatmul.msk.f32.vlgmr.msra.gmra.mxu2 %vm293_vm1, %v283_v45 }
 0x1b3   :  { %5937 = vmatmul.msk.f32.vlgmr.msra.gmra.mxu3 %vm293_vm1, %v285_v49 }
 0x1b6   :  { %v6877_v51 = vpop.permute.xlu0 %6876  ;;  %v6887_v55 = vpop.permute.xlu1 %6886 }
 0x1b7   :  { %v6879_v56 = vunpack.i.h.bf16 %v6877_v51  ;;  %v6878_v57 = vunpack.i.l.bf16 %v6877_v51  ;;  %5930 = vmatmul.msk.f32.gmra.mxu1 %vm293_vm1, %v282_v50  ;;  %v6889_v3 = vunpack.i.h.bf16 %v6887_v55  ;;  %v6888_v4 = vunpack.i.l.bf16 %v6887_v55 }
 0x1b9   :  { %908 = vmatpush.msra.mxu0 %v6878_v57  ;;  %943 = vmatpush.msrb.mxu1 %v6879_v56 }
 0x1ba   :  { %5934 = vmatmul.msk.f32.gmra.mxu2 %vm293_vm1, %v284_v58 }
 0x1bb   :  { %5938 = vmatmul.msk.f32.gmra.mxu3 %vm293_vm1, %v286_v59 }
 0x1be   :  { %v6902_v52 = vpop.permute.xlu0 %6901  ;;  %v6897_v60 = vpop.permute.xlu1 %6896 }
 0x1bf   :  { %v6904_v61 = vunpack.i.h.bf16 %v6902_v52  ;;  %v6903_v62 = vunpack.i.l.bf16 %v6902_v52  ;;  %v6899_v63 = vunpack.i.h.bf16 %v6897_v60  ;;  %v6898_v0 = vunpack.i.l.bf16 %v6897_v60 }
 0x1c1   :  { %977 = vmatpush.msrb.mxu2 %v6898_v0  ;;  %1012 = vmatpush.msrb.mxu3 %v6899_v63 }
 0x1c2   :  { %1047 = vmatpush.msrb.mxu0 %v6903_v62  ;;  %1082 = vmatpush.msra.mxu1 %v6904_v61 }
 0x1c3   :  { %978 = vmatpush.msrb.mxu2 %v6883_v2  ;;  %1013 = vmatpush.msrb.mxu3 %v6884_v1 }
 0x1c4   :  { %1048 = vmatpush.msrb.mxu0 %v6888_v4  ;;  %1083 = vmatpush.msra.mxu1 %v6889_v3 }
 0x1c6   :  { %v6907_v6 = vpop.permute.xlu1 %6906 }
 0x1c7   :  { %v6909_v7 = vunpack.i.h.bf16 %v6907_v6  ;;  %v6908_v8 = vunpack.i.l.bf16 %v6907_v6  ;;  %v321_v9 = vpop.f32.mrf.mxu1 }
 0x1c8   :  { %v7605_v10 = vadd.f32 %v321_v9, %v7602_v5 }
 0x1c9   :  { %1117 = vmatpush.msra.mxu2 %v6908_v8  ;;  %1152 = vmatpush.msra.mxu3 %v6909_v7 }
 0x1ca   :  { %v661_v11 = vsel %vm660_vm2, %v7605_v10, -inf }
 0x1cb   :  { %662 = vmax.xlane.f32.xlu2 %v661_v11 }
 0x1cf   :  { %v324_v16 = vpop.f32.mrf.mxu1 }
 0x1d0   :  { %v7612_v17 = vadd.f32 %v324_v16, %v7609_v12 }
 0x1d2   :  { %v664_v19 = vsel %vm660_vm2, %v7612_v17, -inf }
 0x1d3   :  { %665 = vmax.xlane.f32.xlu1 %v664_v19 }
 0x204   :  { %v395_v20 = vpop.f32.mrf.mxu3 }
 0x205   :  { %v7617_v21 = vadd.f32 %v395_v20, %v7602_v5 }
 0x207   :  { %v673_v22 = vsel %vm660_vm2, %v7617_v21, -inf }
 0x208   :  { %674 = vmax.xlane.f32.xlu2 %v673_v22 }
 0x20c   :  { %v398_v23 = vpop.f32.mrf.mxu3 }
 0x20d   :  { %v7622_v25 = vadd.f32 %v398_v23, %v7609_v12 }
 0x20f   :  { %v676_v29 = vsel %vm660_vm2, %v7622_v25, -inf }
 0x210   :  { %677 = vmax.xlane.f32.xlu1 %v676_v29 }
 0x211   :  { %v358_v30 = vpop.f32.mrf.mxu2 }
 0x212   :  { %v7652_v55 = vadd.f32 %v358_v30, %v7602_v5 }
 0x214   :  { %v506_v31 = vpop.f32.mrf.mxu3  ;;  %v667_v59 = vsel %vm660_vm2, %v7652_v55, -inf }
 0x215   :  { %v7627_v32 = vadd.f32 %v506_v31, %v7602_v5 }
 0x217   :  { %v691_v33 = vsel %vm660_vm2, %v7627_v32, -inf }
 0x218   :  { %692 = vmax.xlane.f32.xlu1 %v691_v33 }
 0x219   :  { %v361_v34 = vpop.f32.mrf.mxu2 }
 0x21a   :  { %v7632_v35 = vadd.f32 %v361_v34, %v7609_v12 }
 0x21b   :  { %v432_v36 = vpop.f32.mrf.mxu1 }
 0x21c   :  { %v7635_v37 = vadd.f32 %v432_v36, %v7602_v5  ;;  %v509_v39 = vpop.f32.mrf.mxu3  ;;  %v670_v40 = vsel %vm660_vm2, %v7632_v35, -inf }
 0x21d   :  { %v7640_v41 = vadd.f32 %v509_v39, %v7609_v12  ;;  %671 = vmax.xlane.f32.xlu2 %v670_v40 }
 0x21e   :  { %v679_v42 = vsel %vm660_vm2, %v7635_v37, -inf }
 0x21f   :  { %680 = vmax.xlane.f32.xlu0 %v679_v42  ;;  %v694_v43 = vsel %vm660_vm2, %v7640_v41, -inf }
 0x220   :  { %695 = vmax.xlane.f32.xlu1 %v694_v43 }
 0x221   :  { %v469_v44 = vpop.f32.mrf.mxu2 }
 0x222   :  { %v7665_v61 = vadd.f32 %v469_v44, %v7602_v5 }
 0x223   :  { %v543_v45 = vpop.f32.mrf.mxu0 }
 0x224   :  { %v435_v49 = vpop.f32.mrf.mxu1  ;;  %v7647_v50 = vadd.f32 %v543_v45, %v7602_v5  ;;  %v685_v2 = vsel %vm660_vm2, %v7665_v61, -inf }
 0x225   :  { %v7662_v60 = vadd.f32 %v435_v49, %v7609_v12 }
 0x226   :  { %v697_v51 = vsel %vm660_vm2, %v7647_v50, -inf }
 0x227   :  { %698 = vmax.xlane.f32.xlu0 %v697_v51  ;;  %v682_v0 = vsel %vm660_vm2, %v7662_v60, -inf }
 0x229   :  { %v472_v57 = vpop.f32.mrf.mxu2 }
 0x22a   :  { %v7693_v30 = vadd.f32 %v472_v57, %v7609_v12 }
 0x22b   :  { %v546_v1 = vpop.f32.mrf.mxu0 }
 0x22c   :  { %v580_v56 = vpop.f32.mrf.mxu1  ;;  %v7677_v6 = vadd.f32 %v546_v1, %v7609_v12  ;;  %v688_v34 = vsel %vm660_vm2, %v7693_v30, -inf }
 0x22d   :  { %v7655_v58 = vadd.f32 %v580_v56, %v7602_v5 }
 0x22e   :  { %v700_v16 = vsel %vm660_vm2, %v7677_v6, -inf }
 0x22f   :  { %668 = vmax.xlane.f32.xlu0 %v667_v59  ;;  %v703_v52 = vsel %vm660_vm2, %v7655_v58, -inf }
 0x230   :  { %704 = vmax.xlane.f32.xlu2 %v703_v52 }
 0x234   :  { %v583_v3 = vpop.f32.mrf.mxu1 }
 0x235   :  { %v617_v62 = vpop.f32.mrf.mxu2  ;;  %v7680_v7 = vadd.f32 %v583_v3, %v7609_v12 }
 0x236   :  { %v7668_v63 = vadd.f32 %v617_v62, %v7602_v5  ;;  %v654_v9 = vpop.f32.mrf.mxu3 }
 0x237   :  { %683 = vmax.xlane.f32.xlu0 %v682_v0  ;;  %v706_v20 = vsel %vm660_vm2, %v7680_v7, -inf  ;;  %v7712_v45 = vadd.f32 %v654_v9, %v7602_v5 }
 0x238   :  { %686 = vmax.xlane.f32.xlu2 %v685_v2  ;;  %v709_v4 = vsel %vm660_vm2, %v7668_v63, -inf }
 0x239   :  { %710 = vmax.xlane.f32.xlu1 %v709_v4  ;;  %v715_v49 = vsel %vm660_vm2, %v7712_v45, -inf }
 0x23d   :  { %v620_v8 = vpop.f32.mrf.mxu2 }
 0x23e   :  { %v7683_v11 = vadd.f32 %v620_v8, %v7609_v12  ;;  %v663_v19 = vpop.xlane.xlu2 %662  ;;  %v657_v36 = vpop.f32.mrf.mxu3 }
 0x23f   :  { %701 = vmax.xlane.f32.xlu0 %v700_v16  ;;  %v721_v22 = vsub.f32 %v7605_v10, %v663_v19  ;;  %v7703_v42 = vadd.f32 %v657_v36, %v7609_v12 }
 0x240   :  { %707 = vmax.xlane.f32.xlu2 %v706_v20  ;;  %v712_v23 = vsel %vm660_vm2, %v7683_v11, -inf }
 0x241   :  { %v741_v29 = vmul.f32 1.442695, %v721_v22  ;;  %713 = vmax.xlane.f32.xlu1 %v712_v23  ;;  %v718_v43 = vsel %vm660_vm2, %v7703_v42, -inf }
 0x243   :  { %6974 = vpow2.f32 %v741_v29 }
 0x246   :  { %v666_v31 = vpop.xlane.xlu1 %665 }
 0x247   :  { %v722_v33 = vsub.f32 %v7612_v17, %v666_v31 }
 0x248   :  { %689 = vmax.xlane.f32.xlu2 %v688_v34 }
 0x249   :  { %v7698_v39 = vpop.eup %6974  ;;  %v743_v10 = vmul.f32 1.442695, %v722_v33 }
 0x24a   :  { %v781_v40 = vsel %vm660_vm2, %v7698_v39, 0.0 }
 0x24b   :  { %6976 = vpow2.f32 %v743_v10  ;;  %782 = vadd.xlane.f32.xlu0 %v781_v40 }
 0x250   :  { %719 = vmax.xlane.f32.xlu2 %v718_v43 }
 0x251   :  { %v7707_v17 = vpop.eup %6976 }
 0x252   :  { %v784_v44 = vsel %vm660_vm2, %v7707_v17, 0.0 }
 0x253   :  { %785 = vadd.xlane.f32.xlu0 %v784_v44 }
 0x25b   :  { %716 = vmax.xlane.f32.xlu0 %v715_v49 }
 0x27b   :  { %v675_v57 = vpop.xlane.xlu2 %674 }
 0x283   :  { %v678_v12 = vpop.xlane.xlu1 %677 }
 0x284   :  { %v726_v51 = vsub.f32 %v7622_v25, %v678_v12 }
 0x286   :  { %v751_v56 = vmul.f32 1.442695, %v726_v51 }
 0x288   :  { %6978 = vpow2.f32 %v751_v56 }
 0x28b   :  { %v693_v59 = vpop.xlane.xlu1 %692 }
 0x28c   :  { %v731_v52 = vsub.f32 %v7627_v32, %v693_v59  ;;  %v6915_v59 = vpack.i.bf16 %v7503_v53, %v7511_v54 }
 0x28e   :  { %v7718_v62 = vpop.eup %6978  ;;  %v761_v0 = vmul.f32 1.442695, %v731_v52 }
 0x28f   :  { %v796_v5 = vsel %vm660_vm2, %v7718_v62, 0.0 }
 0x290   :  { %6980 = vpow2.f32 %v761_v0  ;;  %v672_v1 = vpop.xlane.xlu2 %671  ;;  %797 = vadd.xlane.f32.xlu2 %v796_v5 }
 0x291   :  { %v724_v2 = vsub.f32 %v7632_v35, %v672_v1 }
 0x292   :  { %v681_v3 = vpop.xlane.xlu0 %680 }
 0x293   :  { %v747_v4 = vmul.f32 1.442695, %v724_v2  ;;  %v727_v25 = vsub.f32 %v7635_v37, %v681_v3 }
 0x295   :  { %6982 = vpow2.f32 %v747_v4  ;;  %v753_v8 = vmul.f32 1.442695, %v727_v25 }
 0x296   :  { %v7724_v9 = vpop.eup %6980 }
 0x297   :  { %6984 = vpow2.f32 %v753_v8  ;;  %v811_v32 = vsel %vm660_vm2, %v7724_v9, 0.0 }
 0x298   :  { %812 = vadd.xlane.f32.xlu2 %v811_v32 }
 0x29a   :  { %v699_v16 = vpop.xlane.xlu0 %698 }
 0x29b   :  { %v7728_v19 = vpop.eup %6982  ;;  %v733_v20 = vsub.f32 %v7647_v50, %v699_v16  ;;  %v725_v50 = vsub.f32 %v7617_v21, %v675_v57 }
 0x29c   :  { %v790_v35 = vsel %vm660_vm2, %v7728_v19, 0.0 }
 0x29d   :  { %v7733_v22 = vpop.eup %6984  ;;  %v765_v37 = vmul.f32 1.442695, %v733_v20  ;;  %791 = vadd.xlane.f32.xlu0 %v790_v35  ;;  %v749_v44 = vmul.f32 1.442695, %v725_v50 }
 0x29e   :  { %v799_v23 = vsel %vm660_vm2, %v7733_v22, 0.0 }
 0x29f   :  { %6986 = vpow2.f32 %v765_v37  ;;  %800 = vadd.xlane.f32.xlu1 %v799_v23 }
 0x2a2   :  { %v669_v29 = vpop.xlane.xlu0 %668 }
 0x2a3   :  { %v723_v31 = vsub.f32 %v7652_v55, %v669_v29  ;;  %v705_v33 = vpop.xlane.xlu2 %704 }
 0x2a4   :  { %v735_v34 = vsub.f32 %v7655_v58, %v705_v33 }
 0x2a5   :  { %v7739_v36 = vpop.eup %6986  ;;  %v745_v10 = vmul.f32 1.442695, %v723_v31  ;;  %v696_v31 = vpop.xlane.xlu1 %695 }
 0x2a6   :  { %v769_v40 = vmul.f32 1.442695, %v735_v34  ;;  %v817_v43 = vsel %vm660_vm2, %v7739_v36, 0.0 }
 0x2a7   :  { %6988 = vpow2.f32 %v745_v10  ;;  %818 = vadd.xlane.f32.xlu1 %v817_v43  ;;  %v732_v10 = vsub.f32 %v7640_v41, %v696_v31 }
 0x2a8   :  { %6990 = vpow2.f32 %v769_v40 }
 0x2a9   :  { %6992 = vpow2.f32 %v749_v44  ;;  %v763_v44 = vmul.f32 1.442695, %v732_v10 }
 0x2aa   :  { %v684_v49 = vpop.xlane.xlu0 %683 }
 0x2ab   :  { %v687_v12 = vpop.xlane.xlu2 %686  ;;  %v728_v58 = vsub.f32 %v7662_v60, %v684_v49 }
 0x2ac   :  { %v729_v55 = vsub.f32 %v7665_v61, %v687_v12 }
 0x2ad   :  { %v7745_v51 = vpop.eup %6988  ;;  %v755_v61 = vmul.f32 1.442695, %v728_v58  ;;  %v711_v12 = vpop.xlane.xlu1 %710  ;;  %v6910_v58 = vpack.i.bf16 %v7480_v46, %v7459_v38 }
 0x2ae   :  { %v7748_v56 = vpop.eup %6990  ;;  %v757_v21 = vmul.f32 1.442695, %v729_v55  ;;  %v787_v57 = vsel %vm660_vm2, %v7745_v51, 0.0 }
 0x2af   :  { %788 = vadd.xlane.f32.xlu1 %v787_v57  ;;  %v823_v52 = vsel %vm660_vm2, %v7748_v56, 0.0  ;;  %v7757_v0 = vpop.eup %6992 }
 0x2b0   :  { %6994 = vpow2.f32 %v757_v21  ;;  %824 = vadd.xlane.f32.xlu0 %v823_v52  ;;  %6916 = vrot.lane.b32.xlu2 %v6915_v59, %s7333_s28  ;;  %v793_v53 = vsel %vm660_vm2, %v7757_v0, 0.0 }
 0x2b1   :  { %6996 = vpow2.f32 %v755_v61 }
 0x2b2   :  { %v702_v2 = vpop.xlane.xlu0 %701 }
 0x2b3   :  { %v708_v60 = vpop.xlane.xlu2 %707  ;;  %v734_v32 = vsub.f32 %v7677_v6, %v702_v2 }
 0x2b4   :  { %v736_v5 = vsub.f32 %v7680_v7, %v708_v60 }
 0x2b5   :  { %v767_v23 = vmul.f32 1.442695, %v734_v32  ;;  %v714_v2 = vpop.xlane.xlu1 %713 }
 0x2b6   :  { %v7760_v1 = vpop.eup %6994  ;;  %v771_v3 = vmul.f32 1.442695, %v736_v5 }
 0x2b7   :  { %794 = vadd.xlane.f32.xlu1 %v793_v53  ;;  %v805_v54 = vsel %vm660_vm2, %v7760_v1, 0.0  ;;  %v7766_v4 = vpop.eup %6996 }
 0x2b8   :  { %6998 = vpow2.f32 %v771_v3  ;;  %806 = vadd.xlane.f32.xlu0 %v805_v54  ;;  %v802_v35 = vsel %vm660_vm2, %v7766_v4, 0.0  ;;  %v738_v3 = vsub.f32 %v7683_v11, %v714_v2 }
 0x2ba   :  { %v775_v53 = vmul.f32 1.442695, %v738_v3 }
 0x2bb   :  { %v690_v25 = vpop.xlane.xlu2 %689 }
 0x2bc   :  { %v730_v8 = vsub.f32 %v7693_v30, %v690_v25 }
 0x2be   :  { %v7769_v7 = vpop.eup %6998  ;;  %v759_v16 = vmul.f32 1.442695, %v730_v8  ;;  %v783_v20 = vpop.xlane.xlu0 %782  ;;  %v6920_v8 = vpack.i.bf16 %v7489_v48, %v7482_v47 }
 0x2bf   :  { %7000 = vrcp.f32 %v783_v20  ;;  %803 = vadd.xlane.f32.xlu1 %v802_v35  ;;  %v826_v37 = vsel %vm660_vm2, %v7769_v7, 0.0 }
 0x2c0   :  { %7002 = vpow2.f32 %v759_v16  ;;  %827 = vadd.xlane.f32.xlu0 %v826_v37 }
 0x2c1   :  { %7004 = vpow2.f32 %v767_v23 }
 0x2c3   :  { %v720_v29 = vpop.xlane.xlu2 %719 }
 0x2c4   :  { %v740_v34 = vsub.f32 %v7703_v42, %v720_v29  ;;  %v737_v42 = vsub.f32 %v7668_v63, %v711_v12 }
 0x2c5   :  { %v7001_v30 = vpop.eup %7000 }
 0x2c6   :  { %v7776_v33 = vpop.eup %7002  ;;  %v861_v6 = vmul.f32 %v7001_v30, %v7698_v39  ;;  %v786_v50 = vpop.xlane.xlu0 %785  ;;  %v779_v43 = vmul.f32 1.442695, %v740_v34  ;;  %v773_v21 = vmul.f32 1.442695, %v737_v42 }
 0x2c7   :  { %7006 = vrcp.f32 %v786_v50  ;;  %v808_v40 = vsel %vm660_vm2, %v7776_v33, 0.0  ;;  %v7784_v49 = vpop.eup %7004 }
 0x2c8   :  { %809 = vadd.xlane.f32.xlu1 %v808_v40  ;;  %5939 = vmatmul.msk.f32.vlgmr.msra.gmra.mxu0 %vm660_vm2, %v861_v6  ;;  %7008 = vpow2.f32 %v779_v43  ;;  %v820_v41 = vsel %vm660_vm2, %v7784_v49, 0.0 }
 0x2c9   :  { %7010 = vpow2.f32 %v763_v44 }
 0x2ca   :  { %7012 = vpow2.f32 %v773_v21 }
 0x2cd   :  { %v7007_v55 = vpop.eup %7006 }
 0x2ce   :  { %v862_v39 = vmul.f32 %v7007_v55, %v7707_v17  ;;  %v7793_v57 = vpop.eup %7008  ;;  %v717_v59 = vpop.xlane.xlu0 %716 }
 0x2cf   :  { %v7796_v52 = vpop.eup %7010  ;;  %v739_v63 = vsub.f32 %v7712_v45, %v717_v59  ;;  %v838_v17 = vsel %vm660_vm2, %v7793_v57, 0.0 }
 0x2d0   :  { %821 = vadd.xlane.f32.xlu1 %v820_v41  ;;  %5940 = vmatmul.msk.f32.gmra.mxu0 %vm660_vm2, %v862_v39  ;;  %v814_v61 = vsel %vm660_vm2, %v7796_v52, 0.0  ;;  %v7803_v46 = vpop.eup %7012 }
 0x2d1   :  { %v777_v38 = vmul.f32 1.442695, %v739_v63  ;;  %v829_v60 = vsel %vm660_vm2, %v7803_v46, 0.0 }
 0x2d3   :  { %7014 = vpow2.f32 %v777_v38 }
 0x2d4   :  { %6911 = vrot.lane.b32.xlu0 %v6910_v58, %s7333_s28  ;;  %7016 = vpow2.f32 %v775_v53 }
 0x2d8   :  { %839 = vadd.xlane.f32.xlu1 %v838_v17 }
 0x2d9   :  { %815 = vadd.xlane.f32.xlu2 %v814_v61  ;;  %v7807_v5 = vpop.eup %7014 }
 0x2da   :  { %v835_v45 = vsel %vm660_vm2, %v7807_v5, 0.0  ;;  %v7812_v54 = vpop.eup %7016 }
 0x2db   :  { %v832_v25 = vsel %vm660_vm2, %v7812_v54, 0.0 }
 0x2e1   :  { %830 = vadd.xlane.f32.xlu2 %v829_v60 }
 0x2e9   :  { %836 = vadd.xlane.f32.xlu2 %v835_v45 }
 0x2fe   :  { %833 = vadd.xlane.f32.xlu0 %v832_v25 }
 0x301   :  { %6921 = vrot.lane.b32.xlu2 %v6920_v8, %s7333_s28  ;;  %s7343_s28 = smov 36  }
 0x303   :  { %v798_v32 = vpop.xlane.xlu2 %797 }
 0x30b   :  { %v813_v16 = vpop.xlane.xlu2 %812 }
 0x310   :  { %v792_v31 = vpop.xlane.xlu0 %791 }
 0x312   :  { %v801_v20 = vpop.xlane.xlu1 %800 }
 0x313   :  { %7018 = vrcp.f32 %v801_v20  ;;  %v6917_v35 = vpop.permute.xlu2 %6916 }
 0x314   :  { %v6918_v37 = vunpack.i.l.bf16 %v6917_v35 }
 0x316   :  { %1187 = vmatpush.msra.mxu0 %v6918_v37 }
 0x319   :  { %v7019_v11 = vpop.eup %7018 }
 0x31a   :  { %v867_v23 = vmul.f32 %v7019_v11, %v7733_v22  ;;  %v819_v29 = vpop.xlane.xlu1 %818  ;;  %v6919_v22 = vunpack.i.h.bf16 %v6917_v35 }
 0x31c   :  { %5945 = vmatmul.msk.f32.vlgmr.msrb.gmra.mxu3 %vm660_vm2, %v867_v23 }
 0x322   :  { %v789_v47 = vpop.xlane.xlu1 %788 }
 0x323   :  { %7020 = vrcp.f32 %v789_v47  ;;  %v825_v48 = vpop.xlane.xlu0 %824 }
 0x324   :  { %7022 = vrcp.f32 %v792_v31 }
 0x329   :  { %v7021_v30 = vpop.eup %7020 }
 0x32a   :  { %v863_v6 = vmul.f32 %v7021_v30, %v7745_v51  ;;  %v795_v34 = vpop.xlane.xlu1 %794  ;;  %v7023_v10 = vpop.eup %7022  ;;  %v64_v30 = vstv %s5895_s19  ;;  %s7353_s19 = smov 10  }
 0x32b   :  { %7024 = vrcp.f32 %v795_v34  ;;  %v807_v50 = vpop.xlane.xlu0 %806  ;;  %v864_v55 = vmul.f32 %v7023_v10, %v7728_v19  ;;  %65 = vst [vmem:[#allocation2] sm:$0x1] %v64_v30  ;;  %s8299_s26 = sld [smem:[%s9090_s0 + %s7353_s19]]  }
 0x32c   :  { %7026 = vrcp.f32 %v807_v50  ;;  %5941 = vmatmul.msk.f32.vlgmr.msrb.gmra.mxu1 %vm660_vm2, %v863_v6 }
 0x32d   :  { %1222 = vmatpush.msrb.mxu1 %v6919_v22  ;;  %7028 = vrcp.f32 %v798_v32 }
 0x32e   :  { %7030 = vrcp.f32 %v813_v16 }
 0x331   :  { %v7025_v40 = vpop.eup %7024 }
 0x332   :  { %v7027_v43 = vpop.eup %7026  ;;  %v865_v44 = vmul.f32 %v7025_v40, %v7757_v0  ;;  %v804_v12 = vpop.xlane.xlu1 %803 }
 0x333   :  { %v869_v51 = vmul.f32 %v7027_v43, %v7760_v1  ;;  %7032 = vrcp.f32 %v804_v12  ;;  %v7029_v39 = vpop.eup %7028 }
 0x334   :  { %5942 = vmatmul.msk.f32.gmra.mxu1 %vm660_vm2, %v864_v55  ;;  %5943 = vmatmul.msk.f32.vlgmr.msrb.gmra.mxu2 %vm660_vm2, %v865_v44  ;;  %v7031_v42 = vpop.eup %7030  ;;  %v866_v19 = vmul.f32 %v7029_v39, %v7718_v62  ;;  %v828_v62 = vpop.xlane.xlu0 %827 }
 0x335   :  { %5947 = vmatmul.msk.f32.vlgmr.msrb.gmra.mxu0 %vm660_vm2, %v869_v51  ;;  %v871_v41 = vmul.f32 %v7031_v42, %v7724_v9 }
 0x339   :  { %v7033_v0 = vpop.eup %7032 }
 0x33a   :  { %v868_v1 = vmul.f32 %v7033_v0, %v7766_v4 }
 0x33b   :  { %v810_v58 = vpop.xlane.xlu1 %809 }
 0x33c   :  { %7034 = vrcp.f32 %v810_v58  ;;  %5944 = vmatmul.msk.f32.gmra.mxu2 %vm660_vm2, %v866_v19  ;;  %5946 = vmatmul.msk.f32.gmra.mxu3 %vm660_vm2, %v868_v1 }
 0x33d   :  { %5949 = vmatmul.msk.f32.vlgmr.msra.gmra.mxu1 %vm660_vm2, %v871_v41  ;;  %7036 = vrcp.f32 %v819_v29 }
 0x33e   :  { %7038 = vrcp.f32 %v825_v48 }
 0x33f   :  { %7040 = vrcp.f32 %v828_v62 }
 0x342   :  { %v7035_v4 = vpop.eup %7034 }
 0x343   :  { %v870_v9 = vmul.f32 %v7035_v4, %v7776_v33  ;;  %v7037_v21 = vpop.eup %7036  ;;  %v822_v59 = vpop.xlane.xlu1 %821 }
 0x344   :  { %v7039_v63 = vpop.eup %7038  ;;  %7042 = vrcp.f32 %v822_v59  ;;  %v873_v60 = vmul.f32 %v7037_v21, %v7739_v36 }
 0x345   :  { %5948 = vmatmul.msk.f32.gmra.mxu0 %vm660_vm2, %v870_v9  ;;  %v875_v45 = vmul.f32 %v7039_v63, %v7748_v56  ;;  %v7041_v33 = vpop.eup %7040 }
 0x346   :  { %v6912_v17 = vpop.permute.xlu0 %6911  ;;  %v876_v25 = vmul.f32 %v7041_v33, %v7769_v7 }
 0x347   :  { %v6914_v61 = vunpack.i.h.bf16 %v6912_v17  ;;  %v6913_v38 = vunpack.i.l.bf16 %v6912_v17 }
 0x349   :  { %1118 = vmatpush.msra.mxu2 %v6913_v38  ;;  %1153 = vmatpush.msra.mxu3 %v6914_v61 }
 0x34a   :  { %5951 = vmatmul.msk.f32.vlgmr.msra.gmra.mxu2 %vm660_vm2, %v873_v60  ;;  %5953 = vmatmul.msk.f32.vlgmr.msra.gmra.mxu3 %vm660_vm2, %v875_v45  ;;  %v7043_v3 = vpop.eup %7042 }
 0x34b   :  { %v874_v53 = vmul.f32 %v7043_v3, %v7784_v49  ;;  %v840_v20 = vpop.xlane.xlu1 %839 }
 0x34c   :  { %v816_v2 = vpop.xlane.xlu2 %815 }
 0x34d   :  { %7044 = vrcp.f32 %v816_v2 }
 0x352   :  { %5952 = vmatmul.msk.f32.gmra.mxu2 %vm660_vm2, %v874_v53  ;;  %5954 = vmatmul.msk.f32.gmra.mxu3 %vm660_vm2, %v876_v25 }
 0x353   :  { %v7045_v36 = vpop.eup %7044 }
 0x354   :  { %v831_v56 = vpop.xlane.xlu2 %830  ;;  %v872_v8 = vmul.f32 %v7045_v36, %v7796_v52 }
 0x355   :  { %7046 = vrcp.f32 %v831_v56 }
 0x356   :  { %5950 = vmatmul.msk.f32.gmra.mxu1 %vm660_vm2, %v872_v8 }
 0x35b   :  { %v7047_v16 = vpop.eup %7046 }
 0x35c   :  { %v837_v32 = vpop.xlane.xlu2 %836  ;;  %v877_v11 = vmul.f32 %v7047_v16, %v7803_v46 }
 0x35d   :  { %7048 = vrcp.f32 %v837_v32 }
 0x35e   :  { %7050 = vrcp.f32 %v840_v20 }
 0x363   :  { %v7049_v35 = vpop.eup %7048 }
 0x364   :  { %v6922_v37 = vpop.permute.xlu2 %6921  ;;  %v879_v23 = vmul.f32 %v7049_v35, %v7807_v5  ;;  %v7051_v52 = vpop.eup %7050 }
 0x365   :  { %v6924_v49 = vunpack.i.h.bf16 %v6922_v37  ;;  %v6923_v7 = vunpack.i.l.bf16 %v6922_v37  ;;  %v880_v29 = vmul.f32 %v7051_v52, %v7793_v57  ;;  %v7878_v5 = vpop.f32.mrf.mxu0 }
 0x367   :  { %1188 = vmatpush.msra.mxu0 %v6923_v7  ;;  %1223 = vmatpush.msrb.mxu1 %v6924_v49 }
 0x368   :  { %5955 = vmatmul.msk.f32.vlgmr.msra.gmra.mxu0 %vm660_vm2, %v877_v11  ;;  %5957 = vmatmul.msk.f32.vlgmr.msrb.gmra.mxu1 %vm660_vm2, %v879_v23 }
 0x370   :  { %5958 = vmatmul.msk.f32.gmra.mxu1 %vm660_vm2, %v880_v29 }
 0x371   :  { %v834_v31 = vpop.xlane.xlu0 %833 }
 0x372   :  { %7052 = vrcp.f32 %v834_v31 }
 0x378   :  { %v7053_v47 = vpop.eup %7052 }
 0x379   :  { %v878_v48 = vmul.f32 %v7053_v47, %v7812_v54  ;;  %v7881_v54 = vpop.f32.mrf.mxu0 }
 0x37b   :  { %5956 = vmatmul.msk.f32.gmra.mxu0 %vm660_vm2, %v878_v48 }
 0x39f   :  { %v1015_v46 = vpop.f32.mrf.mxu3 }
 0x3a0   :  { %1249 = vrot.lane.b32.xlu2 %v1015_v46, %s7335_s3 }
 0x3a9   :  { %v945_v57 = vpop.f32.mrf.mxu1 }
 0x3aa   :  { %1233 = vrot.lane.b32.xlu1 %v945_v57, %s7322_s14 }
 0x3b1   :  { %v948_v6 = vpop.f32.mrf.mxu1 }
 0x3b2   :  { %v1050_v22 = vpop.f32.mrf.mxu0 }
 0x3b7   :  { %v980_v34 = vpop.f32.mrf.mxu2 }
 0x3b8   :  { %1241 = vrot.lane.b32.xlu2 %v980_v34, %s7336_s7  ;;  %v6963_v34 = vld [vmem:[%s7898_s27] ss:$0 sm:$0xff]  ;;  %s5892_s27 = sld [smem:[%s9090_s0 + %s7367_s25]]  }
 0x3ba   :  { %v1085_v50 = vpop.f32.mrf.mxu1 }
 0x3bb   :  { %1265 = vrot.lane.b32.xlu1 %v1085_v50, %s7337_s11 }
 0x3bf   :  { %v1018_v10 = vpop.f32.mrf.mxu3  ;;  %v983_v43 = vpop.f32.mrf.mxu2 }
 0x3c0   :  { %1235 = vrot.lane.b32.xlu2 %v948_v6, %s7322_s14  ;;  %1251 = vrot.lane.b32.xlu0 %v1018_v10, %s7335_s3  ;;  %s5872_s3 = sld [smem:[%s9090_s0 + %s7344_s30]]  }
 0x3c2   :  { %v1053_v40 = vpop.f32.mrf.mxu0 }
 0x3c3   :  { %1259 = vrot.lane.b32.xlu1 %v1053_v40, %s7339_s21 }
 0x3c6   :  { %v1332_v4 = vld [vmem:[%s5872_s3 + $0x20] sm:$0xff]  ;;  %v1331_v9 = vld [vmem:[%s5872_s3 + $0x18] sm:$0xff]  ;;  %v1330_v21 = vld [vmem:[%s5872_s3 + $0x10] sm:$0xff] }
 0x3c7   :  { %1354 = vmatpush.msrb.mxu2 %v1332_v4  ;;  %v1329_v59 = vld [vmem:[%s5872_s3 + $0x8] sm:$0xff]  ;;  %v1328_v17 = vld [vmem:[%s5872_s3] sm:$0xff] }
 0x3c8   :  { %1243 = vrot.lane.b32.xlu2 %v983_v43, %s7336_s7  ;;  %s7364_s7 = smov 23  }
 0x3c9   :  { %1355 = vmatpush.msrb.mxu2 %v1331_v9 }
 0x3cb   :  { %1356 = vmatpush.msrb.mxu2 %v1330_v21 }
 0x3cd   :  { %v1120_v44 = vpop.f32.mrf.mxu2  ;;  %v1155_v12 = vpop.f32.mrf.mxu3  ;;  %1357 = vmatpush.msrb.mxu2 %v1329_v59  ;;  %v7347_v59 = vmov 269488144  }
 0x3ce   :  { %1281 = vrot.lane.b32.xlu0 %v1155_v12, %s7338_s16 }
 0x3cf   :  { %1358 = vmatpush.msrb.mxu2 %v1328_v17  ;;  %v7348_v17 = vmov 842150450  }
 0x3d0   :  { %1257 = vrot.lane.b32.xlu2 %v1050_v22, %s7339_s21 }
 0x3d3   :  { %v1088_v51 = vpop.f32.mrf.mxu1 }
 0x3d5   :  { %v1123_v55 = vpop.f32.mrf.mxu2  ;;  %v1158_v19 = vpop.f32.mrf.mxu3 }
 0x3d6   :  { %1275 = vrot.lane.b32.xlu0 %v1123_v55, %s7340_s22 }
 0x3d8   :  { %1273 = vrot.lane.b32.xlu2 %v1120_v44, %s7340_s22  ;;  %s7362_s22 = smov 122  }
 0x3e0   :  { %1267 = vrot.lane.b32.xlu2 %v1088_v51, %s7337_s11  ;;  %s7357_s11 = smov 15  }
 0x3e5   :  { %v1190_v39 = vpop.f32.mrf.mxu0  ;;  %v1225_v42 = vpop.f32.mrf.mxu1 }
 0x3e6   :  { %1289 = vrot.lane.b32.xlu1 %v1190_v39, %s7341_s23 }
 0x3ed   :  { %v1228_v0 = vpop.f32.mrf.mxu1 }
 0x3ee   :  { %1299 = vrot.lane.b32.xlu0 %v1228_v0, %s7343_s28  ;;  %1297 = vrot.lane.b32.xlu1 %v1225_v42, %s7343_s28  ;;  %s7368_s28 = smov 27  }
 0x3f6   :  { %1283 = vrot.lane.b32.xlu1 %v1158_v19, %s7338_s16  ;;  %s7358_s16 = smov 18  }
 0x3f7   :  { %s5885_s19 = sld [smem:[%s9090_s0 + %s7358_s16]]  }
 0x3f8   :  { %v1193_v1 = vpop.f32.mrf.mxu0  ;;  %s5893_s16 = sld [smem:[%s9090_s0 + %s7365_s12]]  }
 0x3f9   :  { %1291 = vrot.lane.b32.xlu2 %v1193_v1, %s7341_s23  ;;  %s5889_s23 = sld [smem:[%s9090_s0 + %s7366_s17]]  }
 0x3fa   :  { %v1250_v41 = vpop.permute.xlu2 %1249 }
 0x412   :  { %v1242_v58 = vpop.permute.xlu2 %1241 }
 0x41a   :  { %v1236_v62 = vpop.permute.xlu2 %1235 }
 0x41b   :  { %v1304_v49 = vsel %vm293_vm1, %v7881_v54, %v1236_v62 }
 0x41c   :  { %v1234_v63 = vpop.permute.xlu1 %1233 }
 0x41d   :  { %v1303_v2 = vsel %vm293_vm1, %v7878_v5, %v1234_v63  ;;  %v1435_v63 = vunpack.c.l.s4 %v7347_v59 }
 0x41e   :  { %v1306_v3 = vsel %vm1305_vm3, %v1303_v2, %v1242_v58 }
 0x41f   :  { %v1309_v56 = vsel %vm1308_vm4, %v1306_v3, %v1250_v41  ;;  %v7944_v3 = vunpack.c.0.s8 %v1435_v63 }
 0x422   :  { %v1244_v61 = vpop.permute.xlu2 %1243 }
 0x423   :  { %v1307_v23 = vsel %vm1305_vm3, %v1304_v49, %v1244_v61  ;;  %v1439_v61 = vunpack.c.l.s4 %v7348_v17  ;;  %v6027_v17 = vld [vmem:[%s7999_s13 + $0x80] sm:$0xf] }
 0x42a   :  { %v1258_v60 = vpop.permute.xlu2 %1257 }
 0x42b   :  { %v1311_v8 = vsel %vm660_vm2, %v1309_v56, %v1258_v60 }
 0x42d   :  { %v1266_v38 = vpop.permute.xlu1 %1265 }
 0x42e   :  { %v1314_v32 = vsel %vm1313_vm5, %v1311_v8, %v1266_v38  ;;  %v7349_v38 = vmov 1414812756  }
 0x42f   :  { %v1443_v60 = vunpack.c.l.s4 %v7349_v38  ;;  %v6681_v38 = vld [vmem:[%s7999_s13 + $0x84] sm:$0xf] }
 0x432   :  { %v1252_v45 = vpop.permute.xlu0 %1251  ;;  %v1274_v53 = vpop.permute.xlu2 %1273 }
 0x433   :  { %v1317_v16 = vsel %vm1316_vm6, %v1314_v32, %v1274_v53  ;;  %v1310_v29 = vsel %vm1308_vm4, %v1307_v23, %v1252_v45  ;;  %v7350_v45 = vmov 1987475062   ;;  %v7946_v53 = vunpack.c.0.s8 %v1439_v61  ;;  %v6689_v61 = vld [vmem:[%s7999_s13 + $0xbc] sm:$0xf0] }
 0x435   :  { %v1260_v33 = vpop.permute.xlu1 %1259 }
 0x436   :  { %v1312_v31 = vsel %vm660_vm2, %v1310_v29, %v1260_v33  ;;  %v1447_v33 = vunpack.c.l.s4 %v7350_v45  ;;  %v6028_v45 = vor.u32 %v6689_v61, %v6027_v17 }
 0x43a   :  { %v1268_v7 = vpop.permute.xlu2 %1267 }
 0x43b   :  { %v1315_v47 = vsel %vm1313_vm5, %v1312_v31, %v1268_v7 }
 0x440   :  { %v1282_v25 = vpop.permute.xlu0 %1281 }
 0x441   :  { %v1320_v20 = vsel %vm1319_vm7, %v1317_v16, %v1282_v25  ;;  %v7948_v25 = vunpack.c.0.s8 %v1443_v60 }
 0x448   :  { %v1276_v52 = vpop.permute.xlu0 %1275 }
 0x449   :  { %v1318_v48 = vsel %vm1316_vm6, %v1315_v47, %v1276_v52 }
 0x453   :  { %v1292_v5 = vpop.permute.xlu2 %1291 }
 0x458   :  { %v1290_v36 = vpop.permute.xlu1 %1289 }
 0x459   :  { %v1323_v35 = vsel %vm1322_vm8, %v1320_v20, %v1290_v36  ;;  %v7950_v36 = vunpack.c.0.s8 %v1447_v33  ;;  %v6029_v33 = vld [vmem:[%s7999_s13 + $0xc0] sm:$0xf0] }
 0x460   :  { %v1298_v37 = vpop.permute.xlu1 %1297  ;;  %v1300_v30 = vpop.permute.xlu0 %1299 }
 0x461   :  { %v1326_v11 = vsel %vm1325_vm9, %v1323_v35, %v1298_v37 }
 0x462   :  { %5959 = vmatmul.msk.f32.vlgmr.msrb.gmra.mxu2 %vm183_vm0, %v1326_v11 }
 0x468   :  { %v1284_v46 = vpop.permute.xlu1 %1283 }
 0x469   :  { %v1321_v57 = vsel %vm1319_vm7, %v1318_v48, %v1284_v46 }
 0x46a   :  { %v1324_v6 = vsel %vm1322_vm8, %v1321_v57, %v1292_v5 }
 0x46b   :  { %v1327_v54 = vsel %vm1325_vm9, %v1324_v6, %v1300_v30 }
 0x46c   :  { %5960 = vmatmul.msk.f32.gmra.mxu2 %vm183_vm0, %v1327_v54 }
 0x4e5   :  { %v1360_v22 = vpop.f32.mrf.mxu2 }
 0x4e6   :  { %v1361_v50 = vadd.f32 %v6963_v34, %v1360_v22 }
 0x4e8   :  { %v1368_v10 = vrot.slane %v1361_v50, 2  ;;  %v1369_v40 = vrot.slane %v1361_v50, 4  ;;  %v1370_v43 = vrot.slane %v1361_v50, 6  ;;  %v1380_v44 = vadd.f32 %v1361_v50, %v7396_v13 }
 0x4ea   :  { %v1381_v12 = vadd.f32 %v1368_v10, %v7398_v14  ;;  %v1382_v55 = vadd.f32 %v1369_v40, %v7400_v15  ;;  %v1383_v51 = vadd.f32 %v1370_v43, %v7402_v18  ;;  %1398 = vst [vmem:[#allocation1] ss:$4 sm:$0xff] %v1380_v44 }
 0x4ec   :  { %1400 = vst [vmem:[#allocation1 + $0x1] ss:$4 sm:$0xff] %v1381_v12 }
 0x4ed   :  { %1402 = vst [vmem:[#allocation1 + $0x2] ss:$4 sm:$0xff] %v1382_v55 }
 0x4ee   :  { %1404 = vst [vmem:[#allocation1 + $0x3] ss:$4 sm:$0xff] %v1383_v51 }
 0x4ef   :  { %v1363_v39 = vpop.f32.mrf.mxu2 }
 0x4f0   :  { %v1364_v42 = vadd.f32 %v6963_v34, %v1363_v39 }
 0x4f2   :  { %v1371_v0 = vrot.slane %v1364_v42, 2  ;;  %v1372_v19 = vrot.slane %v1364_v42, 4  ;;  %v1373_v1 = vrot.slane %v1364_v42, 6  ;;  %v1384_v41 = vadd.f32 %v1364_v42, %v7408_v24 }
 0x4f3   :  { %v7346_v24 = vmov 40.0  }
 0x4f4   :  { %v1385_v58 = vadd.f32 %v1371_v0, %v7412_v26  ;;  %v1386_v13 = vadd.f32 %v1372_v19, %v7415_v27  ;;  %v1387_v14 = vadd.f32 %v1373_v1, %v7418_v28  ;;  %1406 = vst [vmem:[#allocation1 + $0x20] ss:$4 sm:$0xff] %v1384_v41  ;;  %7054 = vrcp.f32 %v7346_v24  ;;  %v1691_v19 = vld [vmem:[%s7999_s13 + $0x100] sm:$0xff]  ;;  %v1692_v1 = vld [vmem:[%s7999_s13 + $0x108] sm:$0xff] }
 0x4f5   :  { %v1413_v15 = vld.sshfl [vmem:[#allocation1] sm:$0xff pattern:$0x73625140] }
 0x4f6   :  { %1408 = vst [vmem:[#allocation1 + $0x21] ss:$4 sm:$0xff] %v1385_v58  ;;  %v1417_v18 = vsel %vm183_vm0, %v1413_v15, 0.0 }
 0x4f7   :  { %1410 = vst [vmem:[#allocation1 + $0x22] ss:$4 sm:$0xff] %v1386_v13  ;;  %1418 = vadd.xlane.f32.xlu1 %v1417_v18 }
 0x4f8   :  { %1412 = vst [vmem:[#allocation1 + $0x23] ss:$4 sm:$0xff] %v1387_v14 }
 0x4fa   :  { %v7055_v26 = vpop.eup %7054 }
 0x4fb   :  { %v1424_v27 = vmul.f32 40.0, %v7055_v26  ;;  %vm1428_vm10 = vweird.f32 %v7055_v26 }
 0x4fd   :  { %v1425_v28 = vsub.f32 1.0, %v1424_v27 }
 0x4ff   :  { %v1414_v62 = vld.sshfl [vmem:[#allocation1 + $0x20] sm:$0xff pattern:$0x73625140]  ;;  %v1426_v9 = vmul.f32 %v7055_v26, %v1425_v28 }
 0x500   :  { %v1420_v4 = vsel %vm183_vm0, %v1414_v62, 0.0 }
 0x501   :  { %1421 = vadd.xlane.f32.xlu2 %v1420_v4  ;;  %v1427_v21 = vadd.f32 %v7055_v26, %v1426_v9 }
 0x503   :  { %v7942_v2 = vsel %vm1428_vm10, %v7055_v26, %v1427_v21 }
 0x56a   :  { %v1419_v56 = vpop.xlane.xlu1 %1418 }
 0x56b   :  { %v1430_v8 = vmul.f32 %v7942_v2, %v1419_v56  ;;  %v6035_v56 = vld [vmem:[%s7999_s13 + $0x88] sm:$0xf] }
 0x56d   :  { %v1437_v32 = vperm.slane %v1430_v8, %v7944_v3  ;;  %v1441_v16 = vperm.slane %v1430_v8, %v7946_v53  ;;  %v1445_v20 = vperm.slane %v1430_v8, %v7948_v25  ;;  %v1449_v35 = vperm.slane %v1430_v8, %v7950_v36 }
 0x56f   :  { %v7957_v37 = vsub.f32 %v1380_v44, %v1437_v32  ;;  %v7959_v49 = vsub.f32 %v1381_v12, %v1441_v16  ;;  %v7961_v7 = vsub.f32 %v1382_v55, %v1445_v20  ;;  %v7963_v11 = vsub.f32 %v1383_v51, %v1449_v35  ;;  %v6690_v16 = vld [vmem:[%s7999_s13 + $0xc4] sm:$0xf0]  ;;  %v6682_v20 = vld [vmem:[%s7999_s13 + $0x8c] sm:$0xf] }
 0x570   :  { %v6032_v32 = vor.u32 %v6681_v38, %v6029_v33  ;;  %v6037_v35 = vld [vmem:[%s7999_s13 + $0xc8] sm:$0xf0] }
 0x571   :  { %v1482_v23 = vmul.f32 %v7957_v37, %v7957_v37  ;;  %v1483_v52 = vmul.f32 %v7959_v49, %v7959_v49  ;;  %v1484_v29 = vmul.f32 %v7961_v7, %v7961_v7  ;;  %v1485_v31 = vmul.f32 %v7963_v11, %v7963_v11 }
 0x573   :  { %1498 = vst [vmem:[#allocation1] ss:$4 sm:$0xff] %v1482_v23  ;;  %v8024_v23 = vld [vmem:[%s7839_s10] ss:$0 sm:$0xff]  ;;  %s7352_s10 = smov 11  }
 0x574   :  { %1500 = vst [vmem:[#allocation1 + $0x1] ss:$4 sm:$0xff] %v1483_v52  ;;  %v1422_v47 = vpop.xlane.xlu2 %1421  ;;  %v8027_v52 = vld [vmem:[%s7940_s8] ss:$0 sm:$0xff]  ;;  %s8214_s18 = sld [smem:[%s9090_s0 + %s7352_s10]]  }
 0x575   :  { %1502 = vst [vmem:[#allocation1 + $0x2] ss:$4 sm:$0xff] %v1484_v29  ;;  %v1431_v48 = vmul.f32 %v7942_v2, %v1422_v47  ;;  %v6036_v29 = vor.u32 %v6690_v16, %v6035_v56  ;;  %s5882_s10 = sld [smem:[%s9090_s0 + %s7357_s11]]  }
 0x576   :  { %1504 = vst [vmem:[#allocation1 + $0x3] ss:$4 sm:$0xff] %v1485_v31  ;;  %v6040_v31 = vor.u32 %v6682_v20, %v6037_v35  ;;  %v6045_v35 = vld [vmem:[%s7999_s13 + $0xd0] sm:$0xf0]  ;;  %s5890_s11 = sld [smem:[%s9090_s0 + %s7364_s7]]  }
 0x577   :  { %v1453_v46 = vperm.slane %v1431_v48, %v7944_v3  ;;  %v1457_v5 = vperm.slane %v1431_v48, %v7946_v53  ;;  %v1461_v57 = vperm.slane %v1431_v48, %v7948_v25  ;;  %v1465_v30 = vperm.slane %v1431_v48, %v7950_v36  ;;  %v5963_v48 = vld [vmem:[%s7999_s13] sm:$0xf] }
 0x579   :  { %v7978_v6 = vsub.f32 %v1384_v41, %v1453_v46  ;;  %v7980_v54 = vsub.f32 %v1385_v58, %v1457_v5  ;;  %v7982_v34 = vsub.f32 %v1386_v13, %v1461_v57  ;;  %v7984_v22 = vsub.f32 %v1387_v14, %v1465_v30  ;;  %v6673_v46 = vld [vmem:[%s7999_s13 + $0x3c] sm:$0xf0]  ;;  %v6665_v57 = vld [vmem:[%s7999_s13 + $0x4] sm:$0xf] }
 0x57a   :  { %v1839_v41 = vunpack.c.l.b16 %v1691_v19  ;;  %v1840_v58 = vunpack.c.h.b16 %v1691_v19  ;;  %v1841_v13 = vunpack.c.l.b16 %v1692_v1  ;;  %v1842_v14 = vunpack.c.h.b16 %v1692_v1  ;;  %v5965_v30 = vld [vmem:[%s7999_s13 + $0x40] sm:$0xf0] }
 0x57b   :  { %v1486_v50 = vmul.f32 %v7978_v6, %v7978_v6  ;;  %v1487_v10 = vmul.f32 %v7980_v54, %v7980_v54  ;;  %v1488_v40 = vmul.f32 %v7982_v34, %v7982_v34  ;;  %v1489_v43 = vmul.f32 %v7984_v22, %v7984_v22 }
 0x57c   :  { %v1887_v15 = vpack.c.b16 %v1839_v41, %v1839_v41  ;;  %v1888_v18 = vpack.c.b16 %v1840_v58, %v1840_v58  ;;  %v1889_v62 = vpack.c.b16 %v1841_v13, %v1841_v13  ;;  %v1890_v4 = vpack.c.b16 %v1842_v14, %v1842_v14 }
 0x57d   :  { %v1513_v44 = vld.sshfl [vmem:[#allocation1] sm:$0xff pattern:$0x73625140]  ;;  %1506 = vst [vmem:[#allocation1 + $0x20] ss:$4 sm:$0xff] %v1486_v50  ;;  %v5964_v5 = vor.u32 %v6673_v46, %v5963_v48  ;;  %v1619_v41 = vrot.slane %v8024_v23, 6 }
 0x57e   :  { %1508 = vst [vmem:[#allocation1 + $0x21] ss:$4 sm:$0xff] %v1487_v10  ;;  %v1517_v12 = vsel %vm183_vm0, %v1513_v44, 0.0  ;;  %v1940_v26 = vsel %vm1938_vm11, %v1887_v15, 0  ;;  %v1943_v27 = vsel %vm1938_vm11, %v1888_v18, 0  ;;  %v1946_v28 = vsel %vm1938_vm11, %v1889_v62, 0 }
 0x57f   :  { %1510 = vst [vmem:[#allocation1 + $0x22] ss:$4 sm:$0xff] %v1488_v40  ;;  %1518 = vadd.xlane.f32.xlu0 %v1517_v12  ;;  %v1949_v9 = vsel %vm1938_vm11, %v1890_v4, 0  ;;  %1992 = vmatpush.bf16.msrb.mxu3 %v1940_v26  ;;  %v5971_v50 = vld [vmem:[%s7999_s13 + $0x8] sm:$0xf]  ;;  %v5968_v40 = vor.u32 %v6665_v57, %v5965_v30  ;;  %v1617_v12 = vrot.slane %v8024_v23, 2 }
 0x580   :  { %1512 = vst [vmem:[#allocation1 + $0x23] ss:$4 sm:$0xff] %v1489_v43  ;;  %2006 = vmatpush.bf16.msrb.mxu0 %v1943_v27  ;;  %2020 = vmatpush.bf16.msra.mxu1 %v1946_v28  ;;  %v6674_v43 = vld [vmem:[%s7999_s13 + $0x44] sm:$0xf0]  ;;  %v6666_v44 = vld [vmem:[%s7999_s13 + $0xc] sm:$0xf] }
 0x581   :  { %2034 = vmatpush.bf16.msra.mxu2 %v1949_v9  ;;  %v1600_v58 = vrot.slane %v8027_v52, 2  ;;  %v1601_v13 = vrot.slane %v8027_v52, 4  ;;  %v1602_v14 = vrot.slane %v8027_v52, 6  ;;  %v1693_v18 = vld [vmem:[%s7999_s13 + $0x110] sm:$0xff]  ;;  %v1694_v62 = vld [vmem:[%s7999_s13 + $0x118] sm:$0xff] }
 0x582   :  { %v1843_v9 = vunpack.c.l.b16 %v1693_v18  ;;  %v6051_v46 = vld [vmem:[%s7999_s13 + $0x98] sm:$0xf] }
 0x583   :  { %1993 = vmatpush.bf16.msrb.mxu3 %v6028_v45 }
 0x584   :  { %2007 = vmatpush.bf16.msrb.mxu0 %v6032_v32  ;;  %2021 = vmatpush.bf16.msra.mxu1 %v6036_v29  ;;  %v1891_v33 = vpack.c.b16 %v1843_v9, %v1843_v9  ;;  %v6043_v32 = vld [vmem:[%s7999_s13 + $0x90] sm:$0xf] }
 0x585   :  { %2035 = vmatpush.bf16.msra.mxu2 %v6040_v31 }
 0x586   :  { %v1952_v31 = vsel %vm1938_vm11, %v1891_v33, 0 }
 0x587   :  { %v1514_v55 = vld.sshfl [vmem:[#allocation1 + $0x20] sm:$0xff pattern:$0x73625140]  ;;  %1994 = vmatpush.bf16.msrb.mxu3 %v5964_v5 }
 0x588   :  { %v1520_v51 = vsel %vm183_vm0, %v1514_v55, 0.0  ;;  %v5972_v55 = vor.u32 %v6674_v43, %v5971_v50  ;;  %2008 = vmatpush.bf16.msrb.mxu0 %v5968_v40  ;;  %v6684_v40 = vld [vmem:[%s7999_s13 + $0x9c] sm:$0xf] }
 0x589   :  { %1521 = vadd.xlane.f32.xlu1 %v1520_v51  ;;  %v5973_v51 = vld [vmem:[%s7999_s13 + $0x48] sm:$0xf0]  ;;  %v6053_v43 = vld [vmem:[%s7999_s13 + $0xd8] sm:$0xf0] }
 0x58a   :  { %v5976_v19 = vor.u32 %v6666_v44, %v5973_v51  ;;  %2022 = vmatpush.bf16.msra.mxu1 %v5972_v55  ;;  %v1846_v55 = vunpack.c.h.b16 %v1694_v62 }
 0x58b   :  { %2048 = vmatpush.bf16.msra.mxu3 %v1952_v31 }
 0x58c   :  { %2036 = vmatpush.bf16.msra.mxu2 %v5976_v19  ;;  %v5979_v19 = vld [vmem:[%s7999_s13 + $0x10] sm:$0xf] }
 0x5f2   :  { %v1519_v39 = vpop.xlane.xlu0 %1518 }
 0x5f3   :  { %v1523_v42 = vmul.f32 %v1519_v39, %v7942_v2  ;;  %v1618_v39 = vrot.slane %v8024_v23, 4 }
 0x5f5   :  { %v8002_v0 = vadd.f32 1e-05, %v1523_v42 }
 0x5f7   :  { %7056 = vrsqrt.f32 %v8002_v0  ;;  %vm1533_vm13 = vweird.f32 %v8002_v0 }
 0x5fc   :  { %v1522_v24 = vpop.xlane.xlu1 %1521 }
 0x5fd   :  { %v7057_v21 = vpop.eup %7056  ;;  %v1524_v59 = vmul.f32 %v1522_v24, %v7942_v2 }
 0x5fe   :  { %v1528_v63 = vmul.f32 %v7057_v21, %v8002_v0  ;;  %vm1534_vm12 = vweird.f32 %v7057_v21 }
 0x5ff   :  { %v8016_v60 = vadd.f32 1e-05, %v1524_v59  ;;  %vm1535_vm14 = vmor %vm1533_vm13, %vm1534_vm12  ;;  %v1845_v59 = vunpack.c.l.b16 %v1694_v62  ;;  %v1894_v62 = vpack.c.b16 %v1846_v55, %v1846_v55  ;;  %v6067_v55 = vld [vmem:[%s7999_s13 + $0xa8] sm:$0xf] }
 0x600   :  { %v1529_v8 = vmul.f32 %v7057_v21, %v1528_v63 }
 0x601   :  { %7058 = vrsqrt.f32 %v8016_v60  ;;  %vm1543_vm15 = vweird.f32 %v8016_v60 }
 0x602   :  { %v1530_v47 = vmul.f32 0.5, %v1529_v8  ;;  %v1893_v8 = vpack.c.b16 %v1845_v59, %v1845_v59  ;;  %v6676_v59 = vld [vmem:[%s7999_s13 + $0x54] sm:$0xf0] }
 0x604   :  { %v1531_v10 = vsub.f32 1.5, %v1530_v47  ;;  %v1958_v48 = vsel %vm1938_vm11, %v1893_v8, 0  ;;  %v6668_v8 = vld [vmem:[%s7999_s13 + $0x1c] sm:$0xf] }
 0x605   :  { %2076 = vmatpush.bf16.msrb.mxu1 %v1958_v48 }
 0x606   :  { %v1532_v42 = vmul.f32 %v7057_v21, %v1531_v10  ;;  %v6692_v10 = vld [vmem:[%s7999_s13 + $0xd4] sm:$0xf0] }
 0x607   :  { %v8041_v1 = vpop.eup %7058 }
 0x608   :  { %v1536_v15 = vsel %vm1535_vm14, %v7057_v21, %v1532_v42  ;;  %v1538_v0 = vmul.f32 %v8041_v1, %v8016_v60  ;;  %vm1544_vm1 = vweird.f32 %v8041_v1  ;;  %v1844_v21 = vunpack.c.h.b16 %v1693_v18  ;;  %v5981_v18 = vld [vmem:[%s7999_s13 + $0x50] sm:$0xf0] }
 0x609   :  { %v1552_v4 = vperm.slane %v1536_v15, %v7944_v3  ;;  %v1556_v24 = vperm.slane %v1536_v15, %v7946_v53  ;;  %v1560_v26 = vperm.slane %v1536_v15, %v7948_v25  ;;  %v1564_v27 = vperm.slane %v1536_v15, %v7950_v36  ;;  %v6675_v15 = vld [vmem:[%s7999_s13 + $0x4c] sm:$0xf0]  ;;  %vm1545_vm2 = vmor %vm1543_vm15, %vm1544_vm1 }
 0x60a   :  { %v1539_v28 = vmul.f32 %v8041_v1, %v1538_v0  ;;  %v1892_v56 = vpack.c.b16 %v1844_v21, %v1844_v21  ;;  %v6667_v0 = vld [vmem:[%s7999_s13 + $0x14] sm:$0xf]  ;;  %v5987_v21 = vld [vmem:[%s7999_s13 + $0x18] sm:$0xf] }
 0x60b   :  { %v1589_v63 = vmul.f32 %v1552_v4, %v7957_v37  ;;  %v1590_v17 = vmul.f32 %v1556_v24, %v7959_v49  ;;  %v1591_v61 = vmul.f32 %v1560_v26, %v7961_v7  ;;  %v1592_v38 = vmul.f32 %v1564_v27, %v7963_v11  ;;  %v6691_v7 = vld [vmem:[%s7999_s13 + $0xcc] sm:$0xf0]  ;;  %v6683_v11 = vld [vmem:[%s7999_s13 + $0x94] sm:$0xf] }
 0x60c   :  { %v1540_v45 = vmul.f32 0.5, %v1539_v28  ;;  %v1955_v47 = vsel %vm1938_vm11, %v1892_v56, 0  ;;  %v6044_v51 = vor.u32 %v6691_v7, %v6043_v32  ;;  %v6048_v42 = vor.u32 %v6683_v11, %v6045_v35  ;;  %v5989_v32 = vld [vmem:[%s7999_s13 + $0x58] sm:$0xf0] }
 0x60d   :  { %v1606_v16 = vmul.f32 %v8027_v52, %v1589_v63  ;;  %v1607_v20 = vmul.f32 %v1600_v58, %v1590_v17  ;;  %v1608_v37 = vmul.f32 %v1601_v13, %v1591_v61  ;;  %v1609_v49 = vmul.f32 %v1602_v14, %v1592_v38  ;;  %2062 = vmatpush.bf16.msra.mxu0 %v1955_v47  ;;  %v6059_v47 = vld [vmem:[%s7999_s13 + $0xa0] sm:$0xf] }
 0x60e   :  { %v1541_v29 = vsub.f32 1.5, %v1540_v45  ;;  %v6052_v24 = vor.u32 %v6692_v10, %v6051_v46  ;;  %v6056_v26 = vor.u32 %v6684_v40, %v6053_v43  ;;  %2049 = vmatpush.bf16.msra.mxu3 %v6044_v51  ;;  %v5980_v63 = vor.u32 %v6675_v15, %v5979_v19  ;;  %v6693_v46 = vld [vmem:[%s7999_s13 + $0xdc] sm:$0xf0]  ;;  %v6685_v10 = vld [vmem:[%s7999_s13 + $0xa4] sm:$0xf] }
 0x60f   :  { %v8079_v5 = vadd.f32 %v8024_v23, %v1606_v16  ;;  %v8083_v57 = vadd.f32 %v1617_v12, %v1607_v20  ;;  %v8087_v30 = vadd.f32 %v1618_v39, %v1608_v37  ;;  %v8091_v50 = vadd.f32 %v1619_v41, %v1609_v49  ;;  %v6061_v40 = vld [vmem:[%s7999_s13 + $0xe0] sm:$0xf0]  ;;  %v6694_v51 = vld [vmem:[%s7999_s13 + $0xe4] sm:$0xf0]  ;;  %v6686_v15 = vld [vmem:[%s7999_s13 + $0xac] sm:$0xf] }
 0x610   :  { %v1542_v44 = vmul.f32 %v8041_v1, %v1541_v29  ;;  %v5984_v17 = vor.u32 %v6667_v0, %v5981_v18  ;;  %2077 = vmatpush.bf16.msrb.mxu1 %v6052_v24  ;;  %v5988_v56 = vor.u32 %v6676_v59, %v5987_v21  ;;  %v6069_v0 = vld [vmem:[%s7999_s13 + $0xe8] sm:$0xf0]  ;;  %v6060_v18 = vor.u32 %v6693_v46, %v6059_v47  ;;  %v6677_v24 = vld [vmem:[%s7999_s13 + $0x5c] sm:$0xf0]  ;;  %v6678_v21 = vld [vmem:[%s7999_s13 + $0x64] sm:$0xf0] }
 0x611   :  { %1639 = vst [vmem:[#allocation1] ss:$4 sm:$0xff] %v8079_v5  ;;  %2063 = vmatpush.bf16.msra.mxu0 %v6048_v42  ;;  %v6670_v59 = vld [vmem:[%s7999_s13 + $0x2c] sm:$0xf] }
 0x612   :  { %1641 = vst [vmem:[#allocation1 + $0x1] ss:$4 sm:$0xff] %v8083_v57  ;;  %v1546_v4 = vsel %vm1545_vm2, %v8041_v1, %v1542_v44  ;;  %v1961_v1 = vsel %vm1938_vm11, %v1894_v62, 0  ;;  %2050 = vmatpush.bf16.msra.mxu3 %v5980_v63  ;;  %v5995_v62 = vld [vmem:[%s7999_s13 + $0x20] sm:$0xf]  ;;  %v1697_v63 = vld [vmem:[%s7999_s13 + $0x130] sm:$0xff] }
 0x613   :  { %1643 = vst [vmem:[#allocation1 + $0x2] ss:$4 sm:$0xff] %v8087_v30  ;;  %v1568_v27 = vperm.slane %v1546_v4, %v7944_v3  ;;  %v1572_v28 = vperm.slane %v1546_v4, %v7946_v53  ;;  %v1576_v9 = vperm.slane %v1546_v4, %v7948_v25  ;;  %v1580_v60 = vperm.slane %v1546_v4, %v7950_v36 }
 0x614   :  { %1645 = vst [vmem:[#allocation1 + $0x3] ss:$4 sm:$0xff] %v8091_v50  ;;  %2090 = vmatpush.bf16.msrb.mxu2 %v1961_v1  ;;  %2078 = vmatpush.bf16.msrb.mxu1 %v5988_v56  ;;  %v6064_v4 = vor.u32 %v6685_v10, %v6061_v40  ;;  %v6005_v1 = vld [vmem:[%s7999_s13 + $0x68] sm:$0xf0]  ;;  %v1851_v56 = vunpack.c.l.b16 %v1697_v63  ;;  %v6011_v10 = vld [vmem:[%s7999_s13 + $0x30] sm:$0xf] }
 0x615   :  { %v1593_v61 = vmul.f32 %v1568_v27, %v7978_v6  ;;  %v1594_v38 = vmul.f32 %v1572_v28, %v7980_v54  ;;  %v1595_v45 = vmul.f32 %v1576_v9, %v7982_v34  ;;  %v1596_v33 = vmul.f32 %v1580_v60, %v7984_v22  ;;  %2064 = vmatpush.bf16.msra.mxu0 %v5984_v17  ;;  %v5997_v9 = vld [vmem:[%s7999_s13 + $0x60] sm:$0xf0]  ;;  %v6003_v60 = vld [vmem:[%s7999_s13 + $0x28] sm:$0xf]  ;;  %v1698_v17 = vld [vmem:[%s7999_s13 + $0x138] sm:$0xff] }
 0x616   :  { %v6068_v27 = vor.u32 %v6694_v51, %v6067_v55  ;;  %v6072_v28 = vor.u32 %v6686_v15, %v6069_v0  ;;  %v6679_v40 = vld [vmem:[%s7999_s13 + $0x6c] sm:$0xf0]  ;;  %v6671_v55 = vld [vmem:[%s7999_s13 + $0x34] sm:$0xf]  ;;  %v6672_v15 = vld [vmem:[%s7999_s13 + $0x3c] sm:$0xf] }
 0x617   :  { %v1610_v16 = vmul.f32 %v8027_v52, %v1593_v61  ;;  %v1611_v20 = vmul.f32 %v1600_v58, %v1594_v38  ;;  %v1612_v6 = vmul.f32 %v1601_v13, %v1595_v45  ;;  %v1613_v54 = vmul.f32 %v1602_v14, %v1596_v33  ;;  %v1695_v13 = vld [vmem:[%s7999_s13 + $0x120] sm:$0xff]  ;;  %v6013_v51 = vld [vmem:[%s7999_s13 + $0x70] sm:$0xf0]  ;;  %v6021_v0 = vld [vmem:[%s7999_s13 + $0x78] sm:$0xf0] }
 0x618   :  { %2091 = vmatpush.bf16.msrb.mxu2 %v6056_v26  ;;  %v5992_v58 = vor.u32 %v6668_v8, %v5989_v32  ;;  %v6669_v26 = vld [vmem:[%s7999_s13 + $0x24] sm:$0xf]  ;;  %v5996_v61 = vor.u32 %v6677_v24, %v5995_v62  ;;  %v6004_v45 = vor.u32 %v6678_v21, %v6003_v60  ;;  %v6008_v33 = vor.u32 %v6670_v59, %v6005_v1  ;;  %v6711_v60 = vld [vmem:[%s8214_s18 + $0x70] sm:$0xff] }
 0x619   :  { %v8131_v34 = vadd.f32 %v8024_v23, %v1610_v16  ;;  %v8135_v22 = vadd.f32 %v1617_v12, %v1611_v20  ;;  %v8139_v37 = vadd.f32 %v1618_v39, %v1612_v6  ;;  %v8143_v52 = vadd.f32 %v1619_v41, %v1613_v54  ;;  %v1696_v12 = vld [vmem:[%s7999_s13 + $0x128] sm:$0xff]  ;;  %v6719_v21 = vld [vmem:[%s8214_s18 + $0xb0] sm:$0xff] }
 0x61a   :  { %v1847_v39 = vunpack.c.l.b16 %v1695_v13  ;;  %v1848_v23 = vunpack.c.h.b16 %v1695_v13  ;;  %v1849_v41 = vunpack.c.l.b16 %v1696_v12  ;;  %v1850_v14 = vunpack.c.h.b16 %v1696_v12  ;;  %v6075_v13 = vld [vmem:[%s7999_s13 + $0xb0] sm:$0xf] }
 0x61b   :  { %1647 = vst [vmem:[#allocation1 + $0x20] ss:$4 sm:$0xff] %v8131_v34  ;;  %v1654_v29 = vld.sshfl [vmem:[#allocation1] sm:$0xff pattern:$0x73625140]  ;;  %v6000_v38 = vor.u32 %v6669_v26, %v5997_v9  ;;  %v1852_v8 = vunpack.c.h.b16 %v1697_v63  ;;  %v1853_v32 = vunpack.c.l.b16 %v1698_v17  ;;  %v1854_v16 = vunpack.c.h.b16 %v1698_v17  ;;  %v6712_v26 = vld [vmem:[%s8214_s18 + $0x78] sm:$0xff] }
 0x61c   :  { %1649 = vst [vmem:[#allocation1 + $0x21] ss:$4 sm:$0xff] %v8135_v22  ;;  %2092 = vmatpush.bf16.msrb.mxu2 %v5992_v58  ;;  %v1895_v49 = vpack.c.b16 %v1847_v39, %v1847_v39  ;;  %v1896_v7 = vpack.c.b16 %v1848_v23, %v1848_v23  ;;  %v1897_v11 = vpack.c.b16 %v1849_v41, %v1849_v41  ;;  %v6695_v12 = vld [vmem:[%s7999_s13 + $0xec] sm:$0xf0]  ;;  %v6687_v39 = vld [vmem:[%s7999_s13 + $0xb4] sm:$0xf] }
 0x61d   :  { %1651 = vst [vmem:[#allocation1 + $0x22] ss:$4 sm:$0xff] %v8139_v37  ;;  %v1898_v35 = vpack.c.b16 %v1850_v14, %v1850_v14  ;;  %v1899_v20 = vpack.c.b16 %v1851_v56, %v1851_v56  ;;  %v1900_v6 = vpack.c.b16 %v1852_v8, %v1852_v8  ;;  %v1901_v54 = vpack.c.b16 %v1853_v32, %v1853_v32  ;;  %v6077_v23 = vld [vmem:[%s7999_s13 + $0xf0] sm:$0xf0]  ;;  %v6728_v9 = vld [vmem:[%s8214_s18 + $0xf8] sm:$0xff]  ;;  %v6710_v63 = vld [vmem:[%s8214_s18 + $0x68] sm:$0xff] }
 0x61e   :  { %1653 = vst [vmem:[#allocation1 + $0x23] ss:$4 sm:$0xff] %v8143_v52  ;;  %v1964_v43 = vsel %vm1938_vm11, %v1895_v49, 0  ;;  %v1967_v44 = vsel %vm1938_vm11, %v1896_v7, 0  ;;  %v1970_v42 = vsel %vm1938_vm11, %v1897_v11, 0  ;;  %v1902_v58 = vpack.c.b16 %v1854_v16, %v1854_v16  ;;  %v6703_v59 = vld [vmem:[%s8214_s18 + $0x30] sm:$0xff] }
 0x61f   :  { %v1973_v19 = vsel %vm1938_vm11, %v1898_v35, 0  ;;  %v1976_v41 = vsel %vm1938_vm11, %v1899_v20, 0  ;;  %v1979_v14 = vsel %vm1938_vm11, %v1900_v6, 0  ;;  %v6083_v49 = vld [vmem:[%s7999_s13 + $0xb8] sm:$0xf]  ;;  %v1982_v11 = vsel %vm1938_vm11, %v1901_v54, 0 }
 0x620   :  { %v6696_v7 = vld [vmem:[%s7999_s13 + $0xf4] sm:$0xf0]  ;;  %v1985_v35 = vsel %vm1938_vm11, %v1902_v58, 0  ;;  %v6076_v47 = vor.u32 %v6695_v12, %v6075_v13  ;;  %v6080_v46 = vor.u32 %v6687_v39, %v6077_v23  ;;  %v6024_v24 = vor.u32 %v6672_v15, %v6021_v0  ;;  %v6727_v1 = vld [vmem:[%s8214_s18 + $0xf0] sm:$0xff]  ;;  %v6718_v17 = vld [vmem:[%s8214_s18 + $0xa8] sm:$0xff] }
 0x621   :  { %v6701_v56 = vld [vmem:[%s8214_s18 + $0x20] sm:$0xff]  ;;  %v6708_v32 = vld [vmem:[%s8214_s18 + $0x58] sm:$0xff]  ;;  %v6707_v54 = vld [vmem:[%s8214_s18 + $0x50] sm:$0xff] }
 0x622   :  { %v6725_v8 = vld [vmem:[%s8214_s18 + $0xe0] sm:$0xff]  ;;  %v6716_v16 = vld [vmem:[%s8214_s18 + $0x98] sm:$0xff]  ;;  %v6715_v58 = vld [vmem:[%s8214_s18 + $0x90] sm:$0xff] }
 0x623   :  { %v6700_v20 = vld [vmem:[%s8214_s18 + $0x18] sm:$0xff]  ;;  %v6699_v13 = vld [vmem:[%s8214_s18 + $0x10] sm:$0xff]  ;;  %v6706_v39 = vld [vmem:[%s8214_s18 + $0x48] sm:$0xff] }
 0x624   :  { %v6724_v6 = vld [vmem:[%s8214_s18 + $0xd8] sm:$0xff]  ;;  %v6723_v12 = vld [vmem:[%s8214_s18 + $0xd0] sm:$0xff]  ;;  %v6698_v23 = vld [vmem:[%s8214_s18 + $0x8] sm:$0xff] }
 0x625   :  { %v1655_v31 = vld.sshfl [vmem:[#allocation1 + $0x20] sm:$0xff pattern:$0x73625140]  ;;  %v6758_v15 = vld [vmem:[%s8214_s18 + $0x1e8] sm:$0xff]  ;;  %v6740_v0 = vld [vmem:[%s8214_s18 + $0x158] sm:$0xff] }
 0x626   :  { %v8152_v48 = vpack.c.bf16 %v1655_v31, %v1654_v29  ;;  %v6688_v29 = vld [vmem:[%s7999_s13 + $0xbc] sm:$0xf] }
 0x627   :  { %v6085_v31 = vld [vmem:[%s7999_s13 + $0xf8] sm:$0xf0] }
 0x628   :  { %6089 = vmatmul.msk.bf16.vlgmr.msrb.gmra.mxu3 %vm183_vm0, %v8152_v48  ;;  %6090 = vmatmul.msk.bf16.vlgmr.msrb.gmra.mxu0 %vm183_vm0, %v8152_v48 }
 0x629   :  { %6091 = vmatmul.msk.bf16.vlgmr.msra.gmra.mxu1 %vm183_vm0, %v8152_v48  ;;  %6092 = vmatmul.msk.bf16.vlgmr.msra.gmra.mxu2 %vm183_vm0, %v8152_v48 }
 0x62a   :  { %2104 = vmatpush.bf16.msrb.mxu3 %v1964_v43  ;;  %2118 = vmatpush.bf16.msrb.mxu0 %v1967_v44  ;;  %v6084_v43 = vor.u32 %v6696_v7, %v6083_v49  ;;  %v6088_v44 = vor.u32 %v6688_v29, %v6085_v31  ;;  %v6713_v49 = vld [vmem:[%s8214_s18 + $0x80] sm:$0xff]  ;;  %v6744_v7 = vld [vmem:[%s8214_s18 + $0x178] sm:$0xff] }
 0x62b   :  { %2132 = vmatpush.bf16.msra.mxu1 %v1970_v42  ;;  %2146 = vmatpush.bf16.msra.mxu2 %v1973_v19  ;;  %v6019_v42 = vld [vmem:[%s7999_s13 + $0x38] sm:$0xf]  ;;  %v6721_v29 = vld [vmem:[%s8214_s18 + $0xc0] sm:$0xff] }
 0x62c   :  { %v6680_v19 = vld [vmem:[%s7999_s13 + $0x74] sm:$0xf0] }
 0x62d   :  { %v6020_v62 = vor.u32 %v6680_v19, %v6019_v42  ;;  %v6736_v31 = vld [vmem:[%s8214_s18 + $0x138] sm:$0xff]  ;;  %v6749_v42 = vld [vmem:[%s8214_s18 + $0x1a0] sm:$0xff]  ;;  %v6734_v19 = vld [vmem:[%s8214_s18 + $0x128] sm:$0xff] }
 0x62e   :  { %2105 = vmatpush.bf16.msrb.mxu3 %v6060_v18  ;;  %2119 = vmatpush.bf16.msrb.mxu0 %v6064_v4  ;;  %v6012_v18 = vor.u32 %v6679_v40, %v6011_v10  ;;  %v6016_v4 = vor.u32 %v6671_v55, %v6013_v51  ;;  %v6751_v10 = vld [vmem:[%s8214_s18 + $0x1b0] sm:$0xff]  ;;  %v6750_v55 = vld [vmem:[%s8214_s18 + $0x1a8] sm:$0xff]  ;;  %v6741_v51 = vld [vmem:[%s8214_s18 + $0x160] sm:$0xff] }
 0x62f   :  { %2133 = vmatpush.bf16.msra.mxu1 %v6068_v27  ;;  %2147 = vmatpush.bf16.msra.mxu2 %v6072_v28  ;;  %v6720_v27 = vld [vmem:[%s8214_s18 + $0xb8] sm:$0xff]  ;;  %v6735_v40 = vld [vmem:[%s8214_s18 + $0x130] sm:$0xff] }
 0x630   :  { %v6704_v28 = vld [vmem:[%s8214_s18 + $0x38] sm:$0xff] }
 0x632   :  { %2106 = vmatpush.bf16.msrb.mxu3 %v5996_v61  ;;  %2120 = vmatpush.bf16.msrb.mxu0 %v6000_v38  ;;  %v6702_v61 = vld [vmem:[%s8214_s18 + $0x28] sm:$0xff] }
 0x633   :  { %2134 = vmatpush.bf16.msra.mxu1 %v6004_v45  ;;  %2148 = vmatpush.bf16.msra.mxu2 %v6008_v33  ;;  %v6726_v38 = vld [vmem:[%s8214_s18 + $0xe8] sm:$0xff]  ;;  %v6709_v45 = vld [vmem:[%s8214_s18 + $0x60] sm:$0xff] }
 0x634   :  { %v6717_v33 = vld [vmem:[%s8214_s18 + $0xa0] sm:$0xff] }
 0x638   :  { %6093 = vmatmul.msk.bf16.vlgmr.msra.gmra.mxu3 %vm183_vm0, %v8152_v48  ;;  %6094 = vmatmul.msk.bf16.vlgmr.msra.gmra.mxu0 %vm183_vm0, %v8152_v48 }
 0x639   :  { %6095 = vmatmul.msk.bf16.vlgmr.msrb.gmra.mxu1 %vm183_vm0, %v8152_v48  ;;  %6096 = vmatmul.msk.bf16.vlgmr.msrb.gmra.mxu2 %vm183_vm0, %v8152_v48 }
 0x63a   :  { %2160 = vmatpush.bf16.msra.mxu3 %v1976_v41  ;;  %2174 = vmatpush.bf16.msra.mxu0 %v1979_v14  ;;  %v6722_v41 = vld [vmem:[%s8214_s18 + $0xc8] sm:$0xff]  ;;  %v6705_v14 = vld [vmem:[%s8214_s18 + $0x40] sm:$0xff] }
 0x63b   :  { %2188 = vmatpush.bf16.msrb.mxu1 %v1982_v11  ;;  %2202 = vmatpush.bf16.msrb.mxu2 %v1985_v35  ;;  %v6752_v11 = vld [vmem:[%s8214_s18 + $0x1b8] sm:$0xff]  ;;  %v6697_v35 = vld [vmem:[%s8214_s18] sm:$0xff] }
 0x63e   :  { %2161 = vmatpush.bf16.msra.mxu3 %v6076_v47  ;;  %2175 = vmatpush.bf16.msra.mxu0 %v6080_v46  ;;  %v6760_v47 = vld [vmem:[%s8214_s18 + $0x1f8] sm:$0xff]  ;;  %v6743_v46 = vld [vmem:[%s8214_s18 + $0x170] sm:$0xff] }
 0x63f   :  { %2189 = vmatpush.bf16.msrb.mxu1 %v6084_v43  ;;  %2203 = vmatpush.bf16.msrb.mxu2 %v6088_v44  ;;  %v6759_v43 = vld [vmem:[%s8214_s18 + $0x1f0] sm:$0xff]  ;;  %v6742_v44 = vld [vmem:[%s8214_s18 + $0x168] sm:$0xff] }
 0x642   :  { %2162 = vmatpush.bf16.msra.mxu3 %v6012_v18  ;;  %2176 = vmatpush.bf16.msra.mxu0 %v6016_v4  ;;  %v6748_v18 = vld [vmem:[%s8214_s18 + $0x198] sm:$0xff]  ;;  %v6733_v4 = vld [vmem:[%s8214_s18 + $0x120] sm:$0xff] }
 0x643   :  { %2190 = vmatpush.bf16.msrb.mxu1 %v6020_v62  ;;  %2204 = vmatpush.bf16.msrb.mxu2 %v6024_v24  ;;  %v6757_v62 = vld [vmem:[%s8214_s18 + $0x1e0] sm:$0xff]  ;;  %v6739_v24 = vld [vmem:[%s8214_s18 + $0x150] sm:$0xff] }
 0x648   :  { %6097 = vmatmul.msk.bf16.vlgmr.msrb.gmra.mxu3 %vm183_vm0, %v8152_v48  ;;  %6098 = vmatmul.msk.bf16.vlgmr.msrb.gmra.mxu0 %vm183_vm0, %v8152_v48 }
 0x649   :  { %6099 = vmatmul.msk.bf16.vlgmr.msra.gmra.mxu1 %vm183_vm0, %v8152_v48  ;;  %6100 = vmatmul.msk.bf16.vlgmr.msra.gmra.mxu2 %vm183_vm0, %v8152_v48 }
 0x64a   :  { %3301 = vmatpush.bf16.msrb.mxu0 %v6712_v26  ;;  %3315 = vmatpush.bf16.msra.mxu1 %v6720_v27  ;;  %v6747_v26 = vld [vmem:[%s8214_s18 + $0x190] sm:$0xff]  ;;  %v6732_v27 = vld [vmem:[%s8214_s18 + $0x118] sm:$0xff] }
 0x64b   :  { %3287 = vmatpush.bf16.msrb.mxu3 %v6704_v28  ;;  %3329 = vmatpush.bf16.msra.mxu2 %v6728_v9  ;;  %v6756_v28 = vld [vmem:[%s8214_s18 + $0x1d8] sm:$0xff]  ;;  %v6738_v9 = vld [vmem:[%s8214_s18 + $0x148] sm:$0xff] }
 0x64e   :  { %3302 = vmatpush.bf16.msrb.mxu0 %v6711_v60  ;;  %3316 = vmatpush.bf16.msra.mxu1 %v6719_v21  ;;  %v6746_v60 = vld [vmem:[%s8214_s18 + $0x188] sm:$0xff]  ;;  %v6731_v21 = vld [vmem:[%s8214_s18 + $0x110] sm:$0xff] }
 0x64f   :  { %3288 = vmatpush.bf16.msrb.mxu3 %v6703_v59  ;;  %3330 = vmatpush.bf16.msra.mxu2 %v6727_v1  ;;  %v6755_v59 = vld [vmem:[%s8214_s18 + $0x1d0] sm:$0xff]  ;;  %v6737_v1 = vld [vmem:[%s8214_s18 + $0x140] sm:$0xff] }
 0x652   :  { %3303 = vmatpush.bf16.msrb.mxu0 %v6710_v63  ;;  %3317 = vmatpush.bf16.msra.mxu1 %v6718_v17  ;;  %v6745_v63 = vld [vmem:[%s8214_s18 + $0x180] sm:$0xff]  ;;  %v6730_v17 = vld [vmem:[%s8214_s18 + $0x108] sm:$0xff] }
 0x653   :  { %3289 = vmatpush.bf16.msrb.mxu3 %v6702_v61  ;;  %3331 = vmatpush.bf16.msra.mxu2 %v6726_v38  ;;  %v6754_v61 = vld [vmem:[%s8214_s18 + $0x1c8] sm:$0xff]  ;;  %v6729_v38 = vld [vmem:[%s8214_s18 + $0x100] sm:$0xff] }
 0x656   :  { %3304 = vmatpush.bf16.msrb.mxu0 %v6709_v45  ;;  %3318 = vmatpush.bf16.msra.mxu1 %v6717_v33  ;;  %v6753_v45 = vld [vmem:[%s8214_s18 + $0x1c0] sm:$0xff] }
 0x657   :  { %3290 = vmatpush.bf16.msrb.mxu3 %v6701_v56  ;;  %3332 = vmatpush.bf16.msra.mxu2 %v6725_v8  ;;  %v8302_v33 = vld [vmem:[%s8299_s26] sm:$0xff] }
 0x658   :  { %6101 = vmatmul.msk.bf16.vlgmr.msra.gmra.mxu3 %vm183_vm0, %v8152_v48  ;;  %6102 = vmatmul.msk.bf16.vlgmr.msra.gmra.mxu0 %vm183_vm0, %v8152_v48 }
 0x659   :  { %6103 = vmatmul.msk.bf16.vlgmr.msrb.gmra.mxu1 %vm183_vm0, %v8152_v48  ;;  %6104 = vmatmul.msk.bf16.vlgmr.msrb.gmra.mxu2 %vm183_vm0, %v8152_v48  ;;  %v6714_v48 = vld [vmem:[%s8214_s18 + $0x88] sm:$0xff] }
 0x65a   :  { %3305 = vmatpush.bf16.msrb.mxu0 %v6708_v32  ;;  %3319 = vmatpush.bf16.msra.mxu1 %v6716_v16  ;;  %v1704_v32 = vperm.slane %v8302_v33, 1  ;;  %v1705_v16 = vperm.slane %v8302_v33, 2 }
 0x65b   :  { %3291 = vmatpush.bf16.msrb.mxu3 %v6700_v20  ;;  %3333 = vmatpush.bf16.msra.mxu2 %v6724_v6 }
 0x65e   :  { %3306 = vmatpush.bf16.msrb.mxu0 %v6707_v54  ;;  %3320 = vmatpush.bf16.msra.mxu1 %v6715_v58 }
 0x65f   :  { %3292 = vmatpush.bf16.msrb.mxu3 %v6699_v13  ;;  %3334 = vmatpush.bf16.msra.mxu2 %v6723_v12  ;;  %v1703_v12 = vperm.slane %v8302_v33, 0 }
 0x662   :  { %3307 = vmatpush.bf16.msrb.mxu0 %v6706_v39  ;;  %3321 = vmatpush.bf16.msra.mxu1 %v6714_v48 }
 0x663   :  { %3293 = vmatpush.bf16.msrb.mxu3 %v6698_v23  ;;  %3335 = vmatpush.bf16.msra.mxu2 %v6722_v41  ;;  %v1706_v23 = vperm.slane %v8302_v33, 3 }
 0x666   :  { %3308 = vmatpush.bf16.msrb.mxu0 %v6705_v14  ;;  %3322 = vmatpush.bf16.msra.mxu1 %v6713_v49 }
 0x667   :  { %3294 = vmatpush.bf16.msrb.mxu3 %v6697_v35  ;;  %3336 = vmatpush.bf16.msra.mxu2 %v6721_v29  ;;  %v6776_v35 = vld [vmem:[%s8214_s18 + $0x278] sm:$0xff] }
 0x66a   :  { %3357 = vmatpush.bf16.msra.mxu0 %v6744_v7  ;;  %3371 = vmatpush.bf16.msrb.mxu1 %v6752_v11 }
 0x66b   :  { %3343 = vmatpush.bf16.msra.mxu3 %v6736_v31  ;;  %3385 = vmatpush.bf16.msrb.mxu2 %v6760_v47  ;;  %v6784_v47 = vld [vmem:[%s8214_s18 + $0x2b8] sm:$0xff] }
 0x66e   :  { %3358 = vmatpush.bf16.msra.mxu0 %v6743_v46  ;;  %3372 = vmatpush.bf16.msrb.mxu1 %v6751_v10 }
 0x66f   :  { %3344 = vmatpush.bf16.msra.mxu3 %v6735_v40  ;;  %3386 = vmatpush.bf16.msrb.mxu2 %v6759_v43 }
 0x672   :  { %3359 = vmatpush.bf16.msra.mxu0 %v6742_v44  ;;  %3373 = vmatpush.bf16.msrb.mxu1 %v6750_v55 }
 0x673   :  { %3345 = vmatpush.bf16.msra.mxu3 %v6734_v19  ;;  %3387 = vmatpush.bf16.msrb.mxu2 %v6758_v15 }
 0x676   :  { %3360 = vmatpush.bf16.msra.mxu0 %v6741_v51  ;;  %3374 = vmatpush.bf16.msrb.mxu1 %v6749_v42  ;;  %v6775_v42 = vld [vmem:[%s8214_s18 + $0x270] sm:$0xff] }
 0x677   :  { %3346 = vmatpush.bf16.msra.mxu3 %v6733_v4  ;;  %3388 = vmatpush.bf16.msrb.mxu2 %v6757_v62 }
 0x67a   :  { %3361 = vmatpush.bf16.msra.mxu0 %v6740_v0  ;;  %3375 = vmatpush.bf16.msrb.mxu1 %v6748_v18  ;;  %v6783_v18 = vld [vmem:[%s8214_s18 + $0x2b0] sm:$0xff] }
 0x67b   :  { %3347 = vmatpush.bf16.msra.mxu3 %v6732_v27  ;;  %3389 = vmatpush.bf16.msrb.mxu2 %v6756_v28  ;;  %v1708_v27 = vperm.slane %v8302_v33, 5  ;;  %v6792_v28 = vld [vmem:[%s8214_s18 + $0x2f8] sm:$0xff] }
 0x67e   :  { %3362 = vmatpush.bf16.msra.mxu0 %v6739_v24  ;;  %3376 = vmatpush.bf16.msrb.mxu1 %v6747_v26  ;;  %v6768_v24 = vld [vmem:[%s8214_s18 + $0x238] sm:$0xff] }
 0x67f   :  { %3348 = vmatpush.bf16.msra.mxu3 %v6731_v21  ;;  %3390 = vmatpush.bf16.msrb.mxu2 %v6755_v59  ;;  %v6774_v21 = vld [vmem:[%s8214_s18 + $0x268] sm:$0xff] }
 0x680   :  { %v6782_v59 = vld [vmem:[%s8214_s18 + $0x2a8] sm:$0xff] }
 0x682   :  { %3363 = vmatpush.bf16.msra.mxu0 %v6738_v9  ;;  %3377 = vmatpush.bf16.msrb.mxu1 %v6746_v60  ;;  %v1709_v60 = vperm.slane %v8302_v33, 6 }
 0x683   :  { %3349 = vmatpush.bf16.msra.mxu3 %v6730_v17  ;;  %3391 = vmatpush.bf16.msrb.mxu2 %v6754_v61 }
 0x686   :  { %3364 = vmatpush.bf16.msra.mxu0 %v6737_v1  ;;  %3378 = vmatpush.bf16.msrb.mxu1 %v6745_v63  ;;  %v6767_v63 = vld [vmem:[%s8214_s18 + $0x230] sm:$0xff] }
 0x687   :  { %3350 = vmatpush.bf16.msra.mxu3 %v6729_v38  ;;  %3392 = vmatpush.bf16.msrb.mxu2 %v6753_v45  ;;  %v6791_v38 = vld [vmem:[%s8214_s18 + $0x2f0] sm:$0xff] }
 0x6a5   :  { %v2010_v56 = vpop.f32.mrf.mxu0 }
 0x6a6   :  { %v2024_v8 = vpop.f32.mrf.mxu1  ;;  %v2011_v6 = vadd.f32 %v2010_v56, %v1704_v32 }
 0x6a7   :  { %v2025_v58 = vadd.f32 %v2024_v8, %v1705_v16  ;;  %v6773_v8 = vld [vmem:[%s8214_s18 + $0x260] sm:$0xff] }
 0x6a8   :  { %v2212_v14 = vmax.f32 %v2011_v6, 0.0  ;;  %v6781_v6 = vld [vmem:[%s8214_s18 + $0x2a0] sm:$0xff] }
 0x6a9   :  { %v2213_v7 = vmax.f32 %v2025_v58, 0.0 }
 0x6ab   :  { %v1996_v20 = vpop.f32.mrf.mxu3 }
 0x6ac   :  { %v2038_v54 = vpop.f32.mrf.mxu2  ;;  %v1997_v29 = vadd.f32 %v1996_v20, %v1703_v12 }
 0x6ad   :  { %v2012_v13 = vpop.f32.mrf.mxu0  ;;  %v2039_v46 = vadd.f32 %v2038_v54, %v1706_v23  ;;  %v1710_v54 = vperm.slane %v8302_v33, 7 }
 0x6ae   :  { %v2013_v39 = vadd.f32 %v2012_v13, %v1704_v32  ;;  %v2026_v48 = vpop.f32.mrf.mxu1  ;;  %v2211_v19 = vmax.f32 %v1997_v29, 0.0  ;;  %v1707_v32 = vperm.slane %v8302_v33, 4  ;;  %v6766_v13 = vld [vmem:[%s8214_s18 + $0x228] sm:$0xff] }
 0x6af   :  { %v2027_v41 = vadd.f32 %v2026_v48, %v1705_v16  ;;  %v2214_v4 = vmax.f32 %v2039_v46, 0.0  ;;  %v6790_v48 = vld [vmem:[%s8214_s18 + $0x2e8] sm:$0xff] }
 0x6b0   :  { %v2228_v49 = vmax.f32 %v2013_v39, 0.0 }
 0x6b1   :  { %v2229_v11 = vmax.f32 %v2027_v41, 0.0 }
 0x6b2   :  { %v2244_v31 = vpack.c.bf16 %v2228_v49, %v2212_v14  ;;  %v6772_v14 = vld [vmem:[%s8214_s18 + $0x258] sm:$0xff] }
 0x6b3   :  { %v2245_v10 = vpack.c.bf16 %v2229_v11, %v2213_v7  ;;  %v1998_v40 = vpop.f32.mrf.mxu3  ;;  %v6780_v11 = vld [vmem:[%s8214_s18 + $0x298] sm:$0xff] }
 0x6b4   :  { %v1999_v43 = vadd.f32 %v1998_v40, %v1703_v12  ;;  %v2040_v44 = vpop.f32.mrf.mxu2  ;;  %3309 = vmatmul.bf16.vlgmr.msrb.gmra.mxu0 %v2244_v31  ;;  %v6765_v31 = vld [vmem:[%s8214_s18 + $0x220] sm:$0xff] }
 0x6b5   :  { %v2041_v55 = vadd.f32 %v2040_v44, %v1706_v23  ;;  %3323 = vmatmul.bf16.vlgmr.msra.gmra.mxu1 %v2245_v10  ;;  %3413 = vmatpush.bf16.msrb.mxu0 %v6776_v35  ;;  %v2066_v51 = vpop.f32.mrf.mxu0  ;;  %v6789_v10 = vld [vmem:[%s8214_s18 + $0x2e0] sm:$0xff] }
 0x6b6   :  { %v2227_v15 = vmax.f32 %v1999_v43, 0.0  ;;  %3427 = vmatpush.bf16.msra.mxu1 %v6784_v47  ;;  %v2080_v0 = vpop.f32.mrf.mxu1  ;;  %v2067_v17 = vadd.f32 %v2066_v51, %v1708_v27  ;;  %v8331_v43 = vld [vmem:[%s8299_s26 + $0x8] sm:$0xff]  ;;  %s5883_s26 = sld [smem:[%s9090_s0 + %s7339_s21]]  }
 0x6b7   :  { %v2230_v62 = vmax.f32 %v2041_v55, 0.0  ;;  %v2081_v45 = vadd.f32 %v2080_v0, %v1709_v60  ;;  %v6771_v55 = vld [vmem:[%s8214_s18 + $0x250] sm:$0xff]  ;;  %s9041_s21 = sld [smem:[%s9090_s0 + %s7368_s28]]  }
 0x6b8   :  { %v2243_v26 = vpack.c.bf16 %v2227_v15, %v2211_v19  ;;  %v2216_v12 = vmax.f32 %v2067_v17, 0.0  ;;  %v6779_v15 = vld [vmem:[%s8214_s18 + $0x290] sm:$0xff] }
 0x6b9   :  { %v2246_v9 = vpack.c.bf16 %v2230_v62, %v2214_v4  ;;  %3414 = vmatpush.bf16.msrb.mxu0 %v6775_v42  ;;  %v2217_v23 = vmax.f32 %v2081_v45, 0.0  ;;  %v6764_v4 = vld [vmem:[%s8214_s18 + $0x218] sm:$0xff]  ;;  %v6787_v17 = vld [vmem:[%s8214_s18 + $0x2d0] sm:$0xff]  ;;  %v6769_v45 = vld [vmem:[%s8214_s18 + $0x240] sm:$0xff] }
 0x6ba   :  { %3428 = vmatpush.bf16.msra.mxu1 %v6783_v18  ;;  %3295 = vmatmul.bf16.vlgmr.msrb.gmra.mxu3 %v2243_v26  ;;  %v6788_v26 = vld [vmem:[%s8214_s18 + $0x2d8] sm:$0xff] }
 0x6bb   :  { %3337 = vmatmul.bf16.vlgmr.msra.gmra.mxu2 %v2246_v9  ;;  %3399 = vmatpush.bf16.msrb.mxu3 %v6768_v24  ;;  %v2052_v1 = vpop.f32.mrf.mxu3  ;;  %v1712_v24 = vperm.slane %v8331_v43, 1  ;;  %v6770_v9 = vld [vmem:[%s8214_s18 + $0x248] sm:$0xff] }
 0x6bc   :  { %3441 = vmatpush.bf16.msra.mxu2 %v6792_v28  ;;  %v2094_v61 = vpop.f32.mrf.mxu2  ;;  %v2053_v49 = vadd.f32 %v2052_v1, %v1707_v32  ;;  %v1713_v28 = vperm.slane %v8331_v43, 2 }
 0x6bd   :  { %3415 = vmatpush.bf16.msrb.mxu0 %v6774_v21  ;;  %v2068_v56 = vpop.f32.mrf.mxu0  ;;  %v2095_v33 = vadd.f32 %v2094_v61, %v1710_v54 }
 0x6be   :  { %3429 = vmatpush.bf16.msra.mxu1 %v6782_v59  ;;  %v2069_v16 = vadd.f32 %v2068_v56, %v1708_v27  ;;  %v2082_v20 = vpop.f32.mrf.mxu1  ;;  %v2215_v51 = vmax.f32 %v2053_v49, 0.0  ;;  %v6763_v59 = vld [vmem:[%s8214_s18 + $0x210] sm:$0xff]  ;;  %v1711_v56 = vperm.slane %v8331_v43, 0 }
 0x6bf   :  { %v2083_v58 = vadd.f32 %v2082_v20, %v1709_v60  ;;  %3400 = vmatpush.bf16.msrb.mxu3 %v6767_v63  ;;  %v2218_v0 = vmax.f32 %v2095_v33, 0.0  ;;  %v6778_v60 = vld [vmem:[%s8214_s18 + $0x288] sm:$0xff]  ;;  %v6808_v20 = vld [vmem:[%s8214_s18 + $0x378] sm:$0xff] }
 0x6c0   :  { %v2232_v39 = vmax.f32 %v2069_v16, 0.0  ;;  %3442 = vmatpush.bf16.msra.mxu2 %v6791_v38  ;;  %v6777_v16 = vld [vmem:[%s8214_s18 + $0x280] sm:$0xff] }
 0x6c1   :  { %v2233_v41 = vmax.f32 %v2083_v58, 0.0  ;;  %3416 = vmatpush.bf16.msrb.mxu0 %v6773_v8  ;;  %v6816_v58 = vld [vmem:[%s8214_s18 + $0x3b8] sm:$0xff] }
 0x6c2   :  { %v2248_v7 = vpack.c.bf16 %v2232_v39, %v2216_v12  ;;  %3430 = vmatpush.bf16.msra.mxu1 %v6781_v6  ;;  %v1714_v6 = vperm.slane %v8331_v43, 3 }
 0x6c3   :  { %v2249_v35 = vpack.c.bf16 %v2233_v41, %v2217_v23  ;;  %3401 = vmatpush.bf16.msrb.mxu3 %v6766_v13  ;;  %v2054_v29 = vpop.f32.mrf.mxu3  ;;  %v6762_v13 = vld [vmem:[%s8214_s18 + $0x208] sm:$0xff] }
 0x6c4   :  { %3443 = vmatpush.bf16.msra.mxu2 %v6790_v48  ;;  %v2055_v47 = vadd.f32 %v2054_v29, %v1707_v32  ;;  %v2096_v46 = vpop.f32.mrf.mxu2  ;;  %3365 = vmatmul.bf16.vlgmr.msra.gmra.mxu0 %v2248_v7  ;;  %v6786_v48 = vld [vmem:[%s8214_s18 + $0x2c8] sm:$0xff]  ;;  %v6807_v7 = vld [vmem:[%s8214_s18 + $0x370] sm:$0xff] }
 0x6c5   :  { %v2097_v40 = vadd.f32 %v2096_v46, %v1710_v54  ;;  %3379 = vmatmul.bf16.vlgmr.msrb.gmra.mxu1 %v2249_v35  ;;  %3417 = vmatpush.bf16.msrb.mxu0 %v6772_v14  ;;  %v2122_v44 = vpop.f32.mrf.mxu0  ;;  %v6815_v29 = vld [vmem:[%s8214_s18 + $0x3b0] sm:$0xff] }
 0x6c6   :  { %v2231_v42 = vmax.f32 %v2055_v47, 0.0  ;;  %3431 = vmatpush.bf16.msra.mxu1 %v6780_v11  ;;  %v2136_v19 = vpop.f32.mrf.mxu1  ;;  %v2123_v1 = vadd.f32 %v2122_v44, %v1712_v24 }
 0x6c7   :  { %v2234_v18 = vmax.f32 %v2097_v40, 0.0  ;;  %3402 = vmatpush.bf16.msrb.mxu3 %v6765_v31  ;;  %v2137_v61 = vadd.f32 %v2136_v19, %v1713_v28  ;;  %v6761_v31 = vld [vmem:[%s8214_s18 + $0x200] sm:$0xff]  ;;  %v6800_v40 = vld [vmem:[%s8214_s18 + $0x338] sm:$0xff]  ;;  %v6806_v19 = vld [vmem:[%s8214_s18 + $0x368] sm:$0xff] }
 0x6c8   :  { %v2247_v62 = vpack.c.bf16 %v2231_v42, %v2215_v51  ;;  %3444 = vmatpush.bf16.msra.mxu2 %v6789_v10  ;;  %v2220_v12 = vmax.f32 %v2123_v1, 0.0  ;;  %v6785_v10 = vld [vmem:[%s8214_s18 + $0x2c0] sm:$0xff]  ;;  %v6804_v1 = vld [vmem:[%s8214_s18 + $0x358] sm:$0xff] }
 0x6c9   :  { %v2250_v27 = vpack.c.bf16 %v2234_v18, %v2218_v0  ;;  %3418 = vmatpush.bf16.msrb.mxu0 %v6771_v55  ;;  %v2221_v23 = vmax.f32 %v2137_v61, 0.0  ;;  %v6824_v55 = vld [vmem:[%s8214_s18 + $0x3f8] sm:$0xff]  ;;  %v6814_v18 = vld [vmem:[%s8214_s18 + $0x3a8] sm:$0xff]  ;;  %v6797_v61 = vld [vmem:[%s8214_s18 + $0x320] sm:$0xff] }
 0x6ca   :  { %3432 = vmatpush.bf16.msra.mxu1 %v6779_v15  ;;  %3351 = vmatmul.bf16.vlgmr.msra.gmra.mxu3 %v2247_v62  ;;  %v6799_v62 = vld [vmem:[%s8214_s18 + $0x330] sm:$0xff] }
 0x6cb   :  { %3393 = vmatmul.bf16.vlgmr.msrb.gmra.mxu2 %v2250_v27  ;;  %3403 = vmatpush.bf16.msrb.mxu3 %v6764_v4  ;;  %v2108_v21 = vpop.f32.mrf.mxu3 }
 0x6cc   :  { %3445 = vmatpush.bf16.msra.mxu2 %v6788_v26  ;;  %v2150_v63 = vpop.f32.mrf.mxu2  ;;  %v2109_v14 = vadd.f32 %v2108_v21, %v1711_v56  ;;  %v6823_v26 = vld [vmem:[%s8214_s18 + $0x3f0] sm:$0xff]  ;;  %v6798_v21 = vld [vmem:[%s8214_s18 + $0x328] sm:$0xff] }
 0x6cd   :  { %3419 = vmatpush.bf16.msrb.mxu0 %v6770_v9  ;;  %v2124_v38 = vpop.f32.mrf.mxu0  ;;  %v2151_v11 = vadd.f32 %v2150_v63, %v1714_v6  ;;  %v6812_v63 = vld [vmem:[%s8214_s18 + $0x398] sm:$0xff] }
 0x6ce   :  { %3433 = vmatpush.bf16.msra.mxu1 %v6778_v60  ;;  %v2125_v8 = vadd.f32 %v2124_v38, %v1712_v24  ;;  %v2138_v32 = vpop.f32.mrf.mxu1  ;;  %v2219_v51 = vmax.f32 %v2109_v14, 0.0  ;;  %v6813_v60 = vld [vmem:[%s8214_s18 + $0x3a0] sm:$0xff]  ;;  %v6819_v14 = vld [vmem:[%s8214_s18 + $0x3d0] sm:$0xff] }
 0x6cf   :  { %v2139_v54 = vadd.f32 %v2138_v32, %v1713_v28  ;;  %3404 = vmatpush.bf16.msrb.mxu3 %v6763_v59  ;;  %v2222_v15 = vmax.f32 %v2151_v11, 0.0  ;;  %v6805_v28 = vld [vmem:[%s8214_s18 + $0x360] sm:$0xff]  ;;  %v6822_v59 = vld [vmem:[%s8214_s18 + $0x3e8] sm:$0xff] }
 0x6d0   :  { %v2236_v39 = vmax.f32 %v2125_v8, 0.0  ;;  %3446 = vmatpush.bf16.msra.mxu2 %v6787_v17  ;;  %v6811_v8 = vld [vmem:[%s8214_s18 + $0x390] sm:$0xff]  ;;  %v6801_v11 = vld [vmem:[%s8214_s18 + $0x340] sm:$0xff] }
 0x6d1   :  { %v2237_v41 = vmax.f32 %v2139_v54, 0.0  ;;  %3420 = vmatpush.bf16.msrb.mxu0 %v6769_v45  ;;  %v6821_v45 = vld [vmem:[%s8214_s18 + $0x3e0] sm:$0xff]  ;;  %v6820_v54 = vld [vmem:[%s8214_s18 + $0x3d8] sm:$0xff] }
 0x6d2   :  { %v2252_v49 = vpack.c.bf16 %v2236_v39, %v2220_v12  ;;  %3434 = vmatpush.bf16.msra.mxu1 %v6777_v16  ;;  %v6796_v16 = vld [vmem:[%s8214_s18 + $0x318] sm:$0xff]  ;;  %v6810_v39 = vld [vmem:[%s8214_s18 + $0x388] sm:$0xff] }
 0x6d3   :  { %v2253_v33 = vpack.c.bf16 %v2237_v41, %v2221_v23  ;;  %3405 = vmatpush.bf16.msrb.mxu3 %v6762_v13  ;;  %v2110_v35 = vpop.f32.mrf.mxu3  ;;  %v6802_v13 = vld [vmem:[%s8214_s18 + $0x348] sm:$0xff]  ;;  %v6795_v23 = vld [vmem:[%s8214_s18 + $0x310] sm:$0xff] }
 0x6d4   :  { %3447 = vmatpush.bf16.msra.mxu2 %v6786_v48  ;;  %v2111_v47 = vadd.f32 %v2110_v35, %v1711_v56  ;;  %v2152_v46 = vpop.f32.mrf.mxu2  ;;  %3421 = vmatmul.bf16.vlgmr.msrb.gmra.mxu0 %v2252_v49  ;;  %v6803_v56 = vld [vmem:[%s8214_s18 + $0x350] sm:$0xff] }
 0x6d5   :  { %3469 = vmatpush.bf16.msra.mxu0 %v6808_v20  ;;  %v2153_v44 = vadd.f32 %v2152_v46, %v1714_v6  ;;  %3435 = vmatmul.bf16.vlgmr.msra.gmra.mxu1 %v2253_v33  ;;  %v2178_v27 = vpop.f32.mrf.mxu0  ;;  %v1716_v20 = vperm.slane %v8331_v43, 5  ;;  %v1715_v33 = vperm.slane %v8331_v43, 4 }
 0x6d6   :  { %3483 = vmatpush.bf16.msrb.mxu1 %v6816_v58  ;;  %v2235_v42 = vmax.f32 %v2111_v47, 0.0  ;;  %v2192_v9 = vpop.f32.mrf.mxu1  ;;  %v1717_v58 = vperm.slane %v8331_v43, 6  ;;  %v1718_v47 = vperm.slane %v8331_v43, 7 }
 0x6d7   :  { %v2238_v0 = vmax.f32 %v2153_v44, 0.0  ;;  %3406 = vmatpush.bf16.msrb.mxu3 %v6761_v31  ;;  %v2179_v41 = vadd.f32 %v2178_v27, %v1716_v20  ;;  %v6809_v31 = vld [vmem:[%s8214_s18 + $0x380] sm:$0xff] }
 0x6d8   :  { %v2251_v4 = vpack.c.bf16 %v2235_v42, %v2219_v51  ;;  %3448 = vmatpush.bf16.msra.mxu2 %v6785_v10  ;;  %v2193_v49 = vadd.f32 %v2192_v9, %v1717_v58  ;;  %v6794_v10 = vld [vmem:[%s8214_s18 + $0x308] sm:$0xff] }
 0x6d9   :  { %3470 = vmatpush.bf16.msra.mxu0 %v6807_v7  ;;  %v2254_v24 = vpack.c.bf16 %v2238_v0, %v2222_v15 }
 0x6da   :  { %3484 = vmatpush.bf16.msrb.mxu1 %v6815_v29  ;;  %3407 = vmatmul.bf16.vlgmr.msrb.gmra.mxu3 %v2251_v4  ;;  %v2225_v51 = vmax.f32 %v2193_v49, 0.0  ;;  %v6793_v4 = vld [vmem:[%s8214_s18 + $0x300] sm:$0xff] }
 0x6db   :  { %3455 = vmatpush.bf16.msra.mxu3 %v6800_v40  ;;  %3449 = vmatmul.bf16.vlgmr.msra.gmra.mxu2 %v2254_v24  ;;  %v2164_v17 = vpop.f32.mrf.mxu3  ;;  %v2224_v40 = vmax.f32 %v2179_v41, 0.0 }
 0x6dc   :  { %3497 = vmatpush.bf16.msrb.mxu2 %v6824_v55  ;;  %v2206_v38 = vpop.f32.mrf.mxu2  ;;  %v6818_v55 = vld [vmem:[%s8214_s18 + $0x3c8] sm:$0xff] }
 0x6dd   :  { %3471 = vmatpush.bf16.msra.mxu0 %v6806_v19  ;;  %v2180_v32 = vpop.f32.mrf.mxu0  ;;  %v2165_v19 = vadd.f32 %v2164_v17, %v1715_v33  ;;  %v2207_v0 = vadd.f32 %v2206_v38, %v1718_v47  ;;  %v6965_v38 = vld [vmem:[%s7825_s6] ss:$0 sm:$0xff]  ;;  %s7354_s6 = smov 13  }
 0x6de   :  { %3485 = vmatpush.bf16.msrb.mxu1 %v6814_v18  ;;  %v2194_v6 = vpop.f32.mrf.mxu1  ;;  %v2181_v12 = vadd.f32 %v2180_v32, %v1716_v20  ;;  %s8401_s30 = sld [smem:[%s9090_s0 + %s7354_s6]]   ;;  %s7359_s6 = smov 19  }
 0x6df   :  { %3456 = vmatpush.bf16.msra.mxu3 %v6799_v62  ;;  %v2195_v48 = vadd.f32 %v2194_v6, %v1717_v58  ;;  %v6817_v62 = vld [vmem:[%s8214_s18 + $0x3c0] sm:$0xff]  ;;  %v2226_v27 = vmax.f32 %v2207_v0, 0.0 }
 0x6e0   :  { %3498 = vmatpush.bf16.msrb.mxu2 %v6823_v26  ;;  %v2240_v35 = vmax.f32 %v2181_v12, 0.0  ;;  %v2223_v26 = vmax.f32 %v2165_v19, 0.0 }
 0x6e1   :  { %3472 = vmatpush.bf16.msra.mxu0 %v6805_v28  ;;  %v2241_v46 = vmax.f32 %v2195_v48, 0.0 }
 0x6e2   :  { %3486 = vmatpush.bf16.msrb.mxu1 %v6813_v60  ;;  %v2256_v15 = vpack.c.bf16 %v2240_v35, %v2224_v40 }
 0x6e3   :  { %3457 = vmatpush.bf16.msra.mxu3 %v6798_v21  ;;  %v2166_v7 = vpop.f32.mrf.mxu3  ;;  %v2257_v18 = vpack.c.bf16 %v2241_v46, %v2225_v51 }
 0x6e4   :  { %3499 = vmatpush.bf16.msrb.mxu2 %v6822_v59  ;;  %v2208_v29 = vpop.f32.mrf.mxu2  ;;  %v2167_v44 = vadd.f32 %v2166_v7, %v1715_v33 }
 0x6e5   :  { %3473 = vmatpush.bf16.msra.mxu0 %v6804_v1  ;;  %v2209_v42 = vadd.f32 %v2208_v29, %v1718_v47 }
 0x6e6   :  { %3487 = vmatpush.bf16.msrb.mxu1 %v6812_v63  ;;  %v2239_v43 = vmax.f32 %v2167_v44, 0.0 }
 0x6e7   :  { %3458 = vmatpush.bf16.msra.mxu3 %v6797_v61  ;;  %v2242_v24 = vmax.f32 %v2209_v42, 0.0 }
 0x6e8   :  { %3500 = vmatpush.bf16.msrb.mxu2 %v6821_v45  ;;  %v2255_v28 = vpack.c.bf16 %v2239_v43, %v2223_v26 }
 0x6e9   :  { %3474 = vmatpush.bf16.msra.mxu0 %v6803_v56  ;;  %v2258_v9 = vpack.c.bf16 %v2242_v24, %v2226_v27 }
 0x6ea   :  { %3488 = vmatpush.bf16.msrb.mxu1 %v6811_v8 }
 0x6eb   :  { %3459 = vmatpush.bf16.msra.mxu3 %v6796_v16 }
 0x6ec   :  { %3501 = vmatpush.bf16.msrb.mxu2 %v6820_v54 }
 0x6ed   :  { %3475 = vmatpush.bf16.msra.mxu0 %v6802_v13 }
 0x6ee   :  { %3489 = vmatpush.bf16.msrb.mxu1 %v6810_v39 }
 0x6ef   :  { %3460 = vmatpush.bf16.msra.mxu3 %v6795_v23 }
 0x6f0   :  { %3502 = vmatpush.bf16.msrb.mxu2 %v6819_v14 }
 0x6f1   :  { %3476 = vmatpush.bf16.msra.mxu0 %v6801_v11 }
 0x6f2   :  { %3490 = vmatpush.bf16.msrb.mxu1 %v6809_v31 }
 0x6f3   :  { %3461 = vmatpush.bf16.msra.mxu3 %v6794_v10 }
 0x6f4   :  { %3503 = vmatpush.bf16.msrb.mxu2 %v6818_v55  ;;  %3477 = vmatmul.bf16.vlgmr.msra.gmra.mxu0 %v2256_v15 }
 0x6f5   :  { %3491 = vmatmul.bf16.vlgmr.msrb.gmra.mxu1 %v2257_v18 }
 0x6f7   :  { %3462 = vmatpush.bf16.msra.mxu3 %v6793_v4 }
 0x6f8   :  { %3504 = vmatpush.bf16.msrb.mxu2 %v6817_v62 }
 0x6fa   :  { %3463 = vmatmul.bf16.vlgmr.msra.gmra.mxu3 %v2255_v28 }
 0x6fb   :  { %3505 = vmatmul.bf16.vlgmr.msrb.gmra.mxu2 %v2258_v9 }
 0x731   :  { %v3310_v21 = vpop.f32.mrf.mxu0 }
 0x732   :  { %v3324_v59 = vpop.f32.mrf.mxu1 }
 0x739   :  { %v3312_v17 = vpop.f32.mrf.mxu0 }
 0x73a   :  { %v3326_v61 = vpop.f32.mrf.mxu1 }
 0x73d   :  { %v3296_v60 = vpop.f32.mrf.mxu3 }
 0x73e   :  { %v3338_v1 = vpop.f32.mrf.mxu2  ;;  %v3297_v56 = vadd.f32 %v6965_v38, %v3296_v60 }
 0x740   :  { %v3311_v32 = vadd.f32 %v3310_v21, %v3297_v56 }
 0x741   :  { %v3366_v16 = vpop.f32.mrf.mxu0 }
 0x742   :  { %v3380_v20 = vpop.f32.mrf.mxu1  ;;  %v3325_v6 = vadd.f32 %v3324_v59, %v3311_v32 }
 0x744   :  { %v3339_v13 = vadd.f32 %v3338_v1, %v3325_v6 }
 0x745   :  { %v3298_v63 = vpop.f32.mrf.mxu3 }
 0x746   :  { %v3340_v45 = vpop.f32.mrf.mxu2  ;;  %v3299_v58 = vadd.f32 %v6965_v38, %v3298_v63 }
 0x748   :  { %v3313_v12 = vadd.f32 %v3312_v17, %v3299_v58 }
 0x749   :  { %v3368_v48 = vpop.f32.mrf.mxu0 }
 0x74a   :  { %v3382_v41 = vpop.f32.mrf.mxu1  ;;  %v3327_v14 = vadd.f32 %v3326_v61, %v3313_v12 }
 0x74c   :  { %v3341_v11 = vadd.f32 %v3340_v45, %v3327_v14 }
 0x74d   :  { %v3352_v8 = vpop.f32.mrf.mxu3 }
 0x74e   :  { %v3394_v54 = vpop.f32.mrf.mxu2  ;;  %v3353_v23 = vadd.f32 %v3352_v8, %v3339_v13 }
 0x750   :  { %v3367_v49 = vadd.f32 %v3366_v16, %v3353_v23 }
 0x751   :  { %v3422_v31 = vpop.f32.mrf.mxu0 }
 0x752   :  { %v3381_v33 = vadd.f32 %v3380_v20, %v3367_v49  ;;  %v3436_v46 = vpop.f32.mrf.mxu1 }
 0x754   :  { %v3395_v47 = vadd.f32 %v3394_v54, %v3381_v33 }
 0x755   :  { %v3354_v39 = vpop.f32.mrf.mxu3 }
 0x756   :  { %v3396_v7 = vpop.f32.mrf.mxu2  ;;  %v3355_v35 = vadd.f32 %v3354_v39, %v3341_v11 }
 0x758   :  { %v3369_v10 = vadd.f32 %v3368_v48, %v3355_v35 }
 0x759   :  { %v3424_v19 = vpop.f32.mrf.mxu0 }
 0x75a   :  { %v3383_v55 = vadd.f32 %v3382_v41, %v3369_v10  ;;  %v3438_v0 = vpop.f32.mrf.mxu1 }
 0x75c   :  { %v3397_v15 = vadd.f32 %v3396_v7, %v3383_v55 }
 0x75d   :  { %v3408_v29 = vpop.f32.mrf.mxu3 }
 0x75e   :  { %v3409_v40 = vadd.f32 %v3408_v29, %v3395_v47  ;;  %v3450_v44 = vpop.f32.mrf.mxu2 }
 0x760   :  { %v3423_v51 = vadd.f32 %v3422_v31, %v3409_v40 }
 0x762   :  { %v3437_v18 = vadd.f32 %v3436_v46, %v3423_v51 }
 0x764   :  { %v3451_v62 = vadd.f32 %v3450_v44, %v3437_v18 }
 0x765   :  { %v3410_v42 = vpop.f32.mrf.mxu3 }
 0x766   :  { %v3411_v4 = vadd.f32 %v3410_v42, %v3397_v15  ;;  %v3452_v43 = vpop.f32.mrf.mxu2 }
 0x768   :  { %v3425_v24 = vadd.f32 %v3424_v19, %v3411_v4 }
 0x76a   :  { %v3439_v21 = vadd.f32 %v3438_v0, %v3425_v24 }
 0x76c   :  { %v3453_v17 = vadd.f32 %v3452_v43, %v3439_v21 }
 0x771   :  { %v3478_v27 = vpop.f32.mrf.mxu0 }
 0x772   :  { %v3492_v9 = vpop.f32.mrf.mxu1 }
 0x779   :  { %v3480_v16 = vpop.f32.mrf.mxu0 }
 0x77a   :  { %v3494_v13 = vpop.f32.mrf.mxu1 }
 0x77d   :  { %v3464_v26 = vpop.f32.mrf.mxu3 }
 0x77e   :  { %v3465_v28 = vadd.f32 %v3464_v26, %v3451_v62  ;;  %v3506_v1 = vpop.f32.mrf.mxu2 }
 0x780   :  { %v3479_v60 = vadd.f32 %v3478_v27, %v3465_v28 }
 0x782   :  { %v3493_v59 = vadd.f32 %v3492_v9, %v3479_v60 }
 0x784   :  { %v3507_v63 = vadd.f32 %v3506_v1, %v3493_v59 }
 0x785   :  { %v3466_v61 = vpop.f32.mrf.mxu3 }
 0x786   :  { %v3513_v38 = vrot.slane %v3507_v63, 2  ;;  %v3514_v45 = vrot.slane %v3507_v63, 4  ;;  %v3515_v56 = vrot.slane %v3507_v63, 6  ;;  %v3525_v8 = vadd.f32 %v3507_v63, %v8079_v5  ;;  %v3508_v39 = vpop.f32.mrf.mxu2 }
 0x787   :  { %v3467_v32 = vadd.f32 %v3466_v61, %v3453_v17 }
 0x788   :  { %v3526_v20 = vadd.f32 %v3513_v38, %v8083_v57  ;;  %v3527_v6 = vadd.f32 %v3514_v45, %v8087_v30  ;;  %v3528_v54 = vadd.f32 %v3515_v56, %v8091_v50  ;;  %3543 = vst [vmem:[#allocation1] ss:$4 sm:$0xff] %v3525_v8  ;;  %v3773_v38 = vld [vmem:[%s5882_s10 + $0x20] sm:$0xff]  ;;  %v3772_v56 = vld [vmem:[%s5882_s10 + $0x18] sm:$0xff] }
 0x789   :  { %v3481_v58 = vadd.f32 %v3480_v16, %v3467_v32  ;;  %3818 = vmatpush.msrb.mxu3 %v3773_v38  ;;  %v3770_v32 = vld [vmem:[%s5882_s10 + $0x8] sm:$0xff] }
 0x78a   :  { %3545 = vst [vmem:[#allocation1 + $0x1] ss:$4 sm:$0xff] %v3526_v20 }
 0x78b   :  { %3547 = vst [vmem:[#allocation1 + $0x2] ss:$4 sm:$0xff] %v3527_v6  ;;  %v3495_v12 = vadd.f32 %v3494_v13, %v3481_v58  ;;  %3819 = vmatpush.msrb.mxu3 %v3772_v56 }
 0x78c   :  { %3549 = vst [vmem:[#allocation1 + $0x3] ss:$4 sm:$0xff] %v3528_v54 }
 0x78d   :  { %v3509_v48 = vadd.f32 %v3508_v39, %v3495_v12  ;;  %v3833_v39 = vld [vmem:[%s5885_s19 + $0x18] sm:$0xff] }
 0x78f   :  { %v3516_v23 = vrot.slane %v3509_v48, 2  ;;  %v3517_v41 = vrot.slane %v3509_v48, 4  ;;  %v3518_v5 = vrot.slane %v3509_v48, 6  ;;  %v3529_v14 = vadd.f32 %v3509_v48, %v8131_v34  ;;  %v3832_v48 = vld [vmem:[%s5885_s19 + $0x10] sm:$0xff] }
 0x791   :  { %v3530_v57 = vadd.f32 %v3516_v23, %v8135_v22  ;;  %v3531_v30 = vadd.f32 %v3517_v41, %v8139_v37  ;;  %v3532_v50 = vadd.f32 %v3518_v5, %v8143_v52  ;;  %3551 = vst [vmem:[#allocation1 + $0x20] ss:$4 sm:$0xff] %v3529_v14  ;;  %v3831_v5 = vld [vmem:[%s5885_s19 + $0x8] sm:$0xff] }
 0x793   :  { %3553 = vst [vmem:[#allocation1 + $0x21] ss:$4 sm:$0xff] %v3530_v57  ;;  %v3558_v49 = vld.sshfl [vmem:[#allocation1] sm:$0xff pattern:$0x73625140] }
 0x794   :  { %3555 = vst [vmem:[#allocation1 + $0x22] ss:$4 sm:$0xff] %v3531_v30  ;;  %v3562_v7 = vsel %vm183_vm0, %v3558_v49, 0.0 }
 0x795   :  { %3557 = vst [vmem:[#allocation1 + $0x23] ss:$4 sm:$0xff] %v3532_v50  ;;  %3563 = vadd.xlane.f32.xlu2 %v3562_v7 }
 0x79c   :  { %v3559_v11 = vld.sshfl [vmem:[#allocation1 + $0x20] sm:$0xff pattern:$0x73625140] }
 0x79d   :  { %v3565_v33 = vsel %vm183_vm0, %v3559_v11, 0.0 }
 0x79e   :  { %3566 = vadd.xlane.f32.xlu0 %v3565_v33 }
 0x808   :  { %v3564_v34 = vpop.xlane.xlu2 %3563 }
 0x809   :  { %v3568_v22 = vmul.f32 %v3564_v34, %v7942_v2 }
 0x80b   :  { %v3575_v37 = vperm.slane %v3568_v22, %v7944_v3  ;;  %v3579_v52 = vperm.slane %v3568_v22, %v7946_v53  ;;  %v3583_v35 = vperm.slane %v3568_v22, %v7948_v25  ;;  %v3587_v29 = vperm.slane %v3568_v22, %v7950_v36 }
 0x80d   :  { %v8413_v31 = vsub.f32 %v3525_v8, %v3575_v37  ;;  %v8415_v47 = vsub.f32 %v3526_v20, %v3579_v52  ;;  %v8417_v46 = vsub.f32 %v3527_v6, %v3583_v35  ;;  %v8419_v10 = vsub.f32 %v3528_v54, %v3587_v29  ;;  %v3771_v8 = vld [vmem:[%s5882_s10 + $0x10] sm:$0xff]  ;;  %v3834_v6 = vld [vmem:[%s5885_s19 + $0x20] sm:$0xff] }
 0x80e   :  { %3820 = vmatpush.msrb.mxu3 %v3771_v8  ;;  %v3769_v54 = vld [vmem:[%s5882_s10] sm:$0xff]  ;;  %3871 = vmatpush.msrb.mxu0 %v3834_v6 }
 0x80f   :  { %v3620_v40 = vmul.f32 %v8413_v31, %v8413_v31  ;;  %v3621_v44 = vmul.f32 %v8415_v47, %v8415_v47  ;;  %v3622_v55 = vmul.f32 %v8417_v46, %v8417_v46  ;;  %v3623_v51 = vmul.f32 %v8419_v10, %v8419_v10 }
 0x810   :  { %3821 = vmatpush.msrb.mxu3 %v3770_v32  ;;  %3872 = vmatpush.msrb.mxu0 %v3833_v39 }
 0x811   :  { %3636 = vst [vmem:[#allocation1] ss:$4 sm:$0xff] %v3620_v40  ;;  %v3567_v42 = vpop.xlane.xlu0 %3566 }
 0x812   :  { %3638 = vst [vmem:[#allocation1 + $0x1] ss:$4 sm:$0xff] %v3621_v44  ;;  %v3569_v19 = vmul.f32 %v3567_v42, %v7942_v2  ;;  %3822 = vmatpush.msrb.mxu3 %v3769_v54  ;;  %3873 = vmatpush.msrb.mxu0 %v3832_v48  ;;  %v8501_v48 = vld [vmem:[%s8455_s9] ss:$0 sm:$0xff] }
 0x813   :  { %3640 = vst [vmem:[#allocation1 + $0x2] ss:$4 sm:$0xff] %v3622_v55 }
 0x814   :  { %3642 = vst [vmem:[#allocation1 + $0x3] ss:$4 sm:$0xff] %v3623_v51  ;;  %v3591_v15 = vperm.slane %v3569_v19, %v7944_v3  ;;  %v3595_v0 = vperm.slane %v3569_v19, %v7946_v53  ;;  %v3599_v18 = vperm.slane %v3569_v19, %v7948_v25  ;;  %v3603_v4 = vperm.slane %v3569_v19, %v7950_v36 }
 0x815   :  { %3874 = vmatpush.msrb.mxu0 %v3831_v5 }
 0x816   :  { %v8434_v43 = vsub.f32 %v3529_v14, %v3591_v15  ;;  %v8436_v62 = vsub.f32 %v3530_v57, %v3595_v0  ;;  %v8438_v24 = vsub.f32 %v3531_v30, %v3599_v18  ;;  %v8440_v26 = vsub.f32 %v3532_v50, %v3603_v4  ;;  %v3830_v14 = vld [vmem:[%s5885_s19] sm:$0xff] }
 0x817   :  { %3875 = vmatpush.msrb.mxu0 %v3830_v14  ;;  %v6967_v50 = vld [vmem:[%s8406_s4] ss:$0 sm:$0xff] }
 0x818   :  { %v3624_v27 = vmul.f32 %v8434_v43, %v8434_v43  ;;  %v3625_v28 = vmul.f32 %v8436_v62, %v8436_v62  ;;  %v3626_v9 = vmul.f32 %v8438_v24, %v8438_v24  ;;  %v3627_v60 = vmul.f32 %v8440_v26, %v8440_v26 }
 0x819   :  { %v3755_v40 = vrot.slane %v6967_v50, 2  ;;  %v3756_v44 = vrot.slane %v6967_v50, 4  ;;  %v3757_v0 = vrot.slane %v6967_v50, 6 }
 0x81a   :  { %3644 = vst [vmem:[#allocation1 + $0x20] ss:$4 sm:$0xff] %v3624_v27 }
 0x81b   :  { %3646 = vst [vmem:[#allocation1 + $0x21] ss:$4 sm:$0xff] %v3625_v28  ;;  %v3651_v21 = vld.sshfl [vmem:[#allocation1] sm:$0xff pattern:$0x73625140] }
 0x81c   :  { %3648 = vst [vmem:[#allocation1 + $0x22] ss:$4 sm:$0xff] %v3626_v9  ;;  %v3655_v59 = vsel %vm183_vm0, %v3651_v21, 0.0 }
 0x81d   :  { %3650 = vst [vmem:[#allocation1 + $0x23] ss:$4 sm:$0xff] %v3627_v60  ;;  %3656 = vadd.xlane.f32.xlu1 %v3655_v59 }
 0x824   :  { %v3652_v1 = vld.sshfl [vmem:[#allocation1 + $0x20] sm:$0xff pattern:$0x73625140] }
 0x825   :  { %v3658_v63 = vsel %vm183_vm0, %v3652_v1, 0.0 }
 0x826   :  { %3659 = vadd.xlane.f32.xlu2 %v3658_v63 }
 0x890   :  { %v3657_v17 = vpop.xlane.xlu1 %3656 }
 0x891   :  { %v3661_v61 = vmul.f32 %v3657_v17, %v7942_v2 }
 0x893   :  { %v3663_v45 = vadd.f32 1e-05, %v3661_v61 }
 0x895   :  { %7060 = vrsqrt.f32 %v3663_v45  ;;  %vm3671_vm4 = vweird.f32 %v3663_v45 }
 0x899   :  { %v3660_v16 = vpop.xlane.xlu2 %3659 }
 0x89a   :  { %v3662_v20 = vmul.f32 %v3660_v16, %v7942_v2  ;;  %v6966_v2 = vld [vmem:[%s8401_s30] ss:$0 sm:$0xff]  ;;  %s5886_s30 = sld [smem:[%s9090_s0 + %s7359_s6]]  }
 0x89b   :  { %v7061_v58 = vpop.eup %7060  ;;  %v3738_v11 = vrot.slane %v6966_v2, 2  ;;  %v3739_v33 = vrot.slane %v6966_v2, 4  ;;  %v3740_v34 = vrot.slane %v6966_v2, 6 }
 0x89c   :  { %v3666_v13 = vmul.f32 %v7061_v58, %v3663_v45  ;;  %v3664_v12 = vadd.f32 1e-05, %v3662_v20  ;;  %vm3672_vm3 = vweird.f32 %v7061_v58 }
 0x89d   :  { %vm3673_vm5 = vmor %vm3671_vm4, %vm3672_vm3 }
 0x89e   :  { %v3667_v23 = vmul.f32 %v7061_v58, %v3666_v13  ;;  %7062 = vrsqrt.f32 %v3664_v12  ;;  %vm3681_vm7 = vweird.f32 %v3664_v12 }
 0x8a0   :  { %v3668_v41 = vmul.f32 0.5, %v3667_v23 }
 0x8a2   :  { %v3669_v57 = vsub.f32 1.5, %v3668_v41 }
 0x8a4   :  { %v7063_v30 = vpop.eup %7062  ;;  %v3670_v49 = vmul.f32 %v7061_v58, %v3669_v57  ;;  %v6969_v57 = vld [vmem:[%s7848_s15] ss:$0 sm:$0xff] }
 0x8a5   :  { %v3676_v7 = vmul.f32 %v7063_v30, %v3664_v12  ;;  %vm3682_vm6 = vweird.f32 %v7063_v30 }
 0x8a6   :  { %v3674_v22 = vsel %vm3673_vm5, %v7061_v58, %v3670_v49  ;;  %vm3683_vm8 = vmor %vm3681_vm7, %vm3682_vm6 }
 0x8a7   :  { %v3690_v37 = vperm.slane %v3674_v22, %v7944_v3  ;;  %v3694_v52 = vperm.slane %v3674_v22, %v7946_v53  ;;  %v3698_v35 = vperm.slane %v3674_v22, %v7948_v25  ;;  %v3702_v29 = vperm.slane %v3674_v22, %v7950_v36 }
 0x8a8   :  { %v3677_v55 = vmul.f32 %v7063_v30, %v3676_v7 }
 0x8a9   :  { %v3727_v51 = vmul.f32 %v3690_v37, %v8413_v31  ;;  %v3728_v42 = vmul.f32 %v3694_v52, %v8415_v47  ;;  %v3729_v19 = vmul.f32 %v3698_v35, %v8417_v46  ;;  %v3730_v15 = vmul.f32 %v3702_v29, %v8419_v10 }
 0x8aa   :  { %v3678_v18 = vmul.f32 0.5, %v3677_v55 }
 0x8ab   :  { %v3744_v4 = vmul.f32 %v6966_v2, %v3727_v51  ;;  %v3745_v27 = vmul.f32 %v3738_v11, %v3728_v42  ;;  %v3746_v28 = vmul.f32 %v3739_v33, %v3729_v19  ;;  %v3747_v9 = vmul.f32 %v3740_v34, %v3730_v15 }
 0x8ac   :  { %v3679_v60 = vsub.f32 1.5, %v3678_v18 }
 0x8ad   :  { %v3761_v21 = vadd.f32 %v6967_v50, %v3744_v4  ;;  %v3762_v59 = vadd.f32 %v3755_v40, %v3745_v27  ;;  %v3763_v1 = vadd.f32 %v3756_v44, %v3746_v28  ;;  %v3764_v63 = vadd.f32 %v3757_v0, %v3747_v9 }
 0x8ae   :  { %v3680_v17 = vmul.f32 %v7063_v30, %v3679_v60 }
 0x8af   :  { %3786 = vst [vmem:[#allocation1] ss:$4 sm:$0xff] %v3761_v21 }
 0x8b0   :  { %3788 = vst [vmem:[#allocation1 + $0x1] ss:$4 sm:$0xff] %v3762_v59  ;;  %v3684_v31 = vsel %vm3683_vm8, %v7063_v30, %v3680_v17 }
 0x8b1   :  { %3790 = vst [vmem:[#allocation1 + $0x2] ss:$4 sm:$0xff] %v3763_v1  ;;  %v3706_v47 = vperm.slane %v3684_v31, %v7944_v3  ;;  %v3710_v46 = vperm.slane %v3684_v31, %v7946_v53  ;;  %v3714_v10 = vperm.slane %v3684_v31, %v7948_v25  ;;  %v3718_v61 = vperm.slane %v3684_v31, %v7950_v36 }
 0x8b2   :  { %3792 = vst [vmem:[#allocation1 + $0x3] ss:$4 sm:$0xff] %v3764_v63 }
 0x8b3   :  { %v3731_v38 = vmul.f32 %v3706_v47, %v8434_v43  ;;  %v3732_v45 = vmul.f32 %v3710_v46, %v8436_v62  ;;  %v3733_v56 = vmul.f32 %v3714_v10, %v8438_v24  ;;  %v3734_v8 = vmul.f32 %v3718_v61, %v8440_v26  ;;  %v3883_v24 = vld [vmem:[%s5883_s26] sm:$0x3] }
 0x8b4   :  { %v8491_v26 = vperm.slane %v3883_v24, 0  ;;  %v8493_v13 = vperm.slane %v3883_v24, 1 }
 0x8b5   :  { %v3748_v32 = vmul.f32 %v6966_v2, %v3731_v38  ;;  %v3749_v16 = vmul.f32 %v3738_v11, %v3732_v45  ;;  %v3750_v20 = vmul.f32 %v3739_v33, %v3733_v56  ;;  %v3751_v6 = vmul.f32 %v3740_v34, %v3734_v8  ;;  %v3884_v2 = vld [vmem:[%s5886_s30] sm:$0x3] }
 0x8b6   :  { %v3886_v12 = vmul.f32 0.0, %v8491_v26  ;;  %v3888_v39 = vmul.f32 0.0, %v8493_v13  ;;  %v8508_v30 = vperm.slane %v3884_v2, 0 }
 0x8b7   :  { %v3765_v3 = vadd.f32 %v6967_v50, %v3748_v32  ;;  %v3766_v54 = vadd.f32 %v3755_v40, %v3749_v16  ;;  %v3767_v53 = vadd.f32 %v3756_v44, %v3750_v20  ;;  %v3768_v58 = vadd.f32 %v3757_v0, %v3751_v6 }
 0x8b8   :  { %v3889_v23 = vadd.f32 %v3888_v39, %v3886_v12  ;;  %v8510_v50 = vperm.slane %v3884_v2, 1  ;;  %v3929_v33 = vmul.f32 0.0, %v8508_v30 }
 0x8b9   :  { %3794 = vst [vmem:[#allocation1 + $0x20] ss:$4 sm:$0xff] %v3765_v3  ;;  %v3801_v25 = vld.sshfl [vmem:[#allocation1] sm:$0xff pattern:$0x73625140] }
 0x8ba   :  { %3796 = vst [vmem:[#allocation1 + $0x21] ss:$4 sm:$0xff] %v3766_v54  ;;  %6617 = vmatmul.msk.f32.vlgmr.msrb.gmra.mxu3 %vm183_vm0, %v3801_v25  ;;  %v3931_v34 = vmul.f32 0.0, %v8510_v50 }
 0x8bb   :  { %3798 = vst [vmem:[#allocation1 + $0x22] ss:$4 sm:$0xff] %v3767_v53 }
 0x8bc   :  { %3800 = vst [vmem:[#allocation1 + $0x23] ss:$4 sm:$0xff] %v3768_v58  ;;  %v3932_v22 = vadd.f32 %v3931_v34, %v3929_v33 }
 0x8bd   :  { %3839 = vst [vmem:[#allocation1] ss:$4 sm:$0xff] %v3761_v21 }
 0x8be   :  { %3841 = vst [vmem:[#allocation1 + $0x1] ss:$4 sm:$0xff] %v3762_v59 }
 0x8bf   :  { %3843 = vst [vmem:[#allocation1 + $0x2] ss:$4 sm:$0xff] %v3763_v1 }
 0x8c0   :  { %3845 = vst [vmem:[#allocation1 + $0x3] ss:$4 sm:$0xff] %v3764_v63 }
 0x8c3   :  { %v3802_v36 = vld.sshfl [vmem:[#allocation1 + $0x20] sm:$0xff pattern:$0x73625140] }
 0x8c4   :  { %6618 = vmatmul.msk.f32.gmra.mxu3 %vm183_vm0, %v3802_v36  ;;  %3847 = vst [vmem:[#allocation1 + $0x20] ss:$4 sm:$0xff] %v3765_v3 }
 0x8c5   :  { %3849 = vst [vmem:[#allocation1 + $0x21] ss:$4 sm:$0xff] %v3766_v54 }
 0x8c6   :  { %3851 = vst [vmem:[#allocation1 + $0x22] ss:$4 sm:$0xff] %v3767_v53 }
 0x8c7   :  { %3853 = vst [vmem:[#allocation1 + $0x23] ss:$4 sm:$0xff] %v3768_v58  ;;  %v3854_v43 = vld.sshfl [vmem:[#allocation1] sm:$0xff pattern:$0x73625140] }
 0x8c8   :  { %6619 = vmatmul.msk.f32.vlgmr.msrb.gmra.mxu0 %vm183_vm0, %v3854_v43  ;;  %v7360_v43 = vmov 6  }
 0x8c9   :  { %6927 = vset.pattern.permute.xlu2 %v7360_v43  ;;  %6925 = vset.pattern.permute.xlu0 %v7360_v43 }
 0x8ce   :  { %v3855_v62 = vld.sshfl [vmem:[#allocation1 + $0x20] sm:$0xff pattern:$0x73625140] }
 0x8d0   :  { %6620 = vmatmul.msk.f32.gmra.mxu0 %vm183_vm0, %v3855_v62  ;;  %v7361_v62 = vmov 7  }
 0x8d1   :  { %6926 = vset.pattern.permute.xlu1 %v7361_v62 }
 0x93d   :  { %v3824_v41 = vpop.f32.mrf.mxu3 }
 0x93e   :  { %v8504_v5 = vadd.f32 %v8501_v48, %v3824_v41 }
 0x940   :  { %v3890_v14 = vadd.f32 %v3889_v23, %v8504_v5 }
 0x942   :  { %7064 = vtanh.f32 %v3890_v14  ;;  %v6621_v40 = vmul.f32 -1.442695, %v3890_v14 }
 0x945   :  { %v3877_v49 = vpop.f32.mrf.mxu0 }
 0x946   :  { %v8512_v7 = vadd.f32 %v6969_v57, %v3877_v49 }
 0x948   :  { %v7065_v11 = vpop.eup %7064 }
 0x949   :  { %3913 = vrot.lane.b32.xlu1 %v7065_v11, %s7325_s20 }
 0x94d   :  { %v3880_v37 = vpop.f32.mrf.mxu0 }
 0x94e   :  { %v8517_v52 = vadd.f32 %v6969_v57, %v3880_v37 }
 0x950   :  { %v3933_v35 = vadd.f32 %v3932_v22, %v8517_v52 }
 0x952   :  { %7066 = vtanh.f32 %v3933_v35  ;;  %v6622_v51 = vmul.f32 -1.442695, %v3933_v35 }
 0x953   :  { %7068 = vpow2.f32 %v6621_v40 }
 0x958   :  { %v7067_v29 = vpop.eup %7066 }
 0x959   :  { %3956 = vrot.lane.b32.xlu0 %v7067_v29, %s7325_s20  ;;  %v7069_v44 = vpop.eup %7068 }
 0x95a   :  { %v3894_v55 = vadd.f32 1.0, %v7069_v44 }
 0x95c   :  { %7070 = vrcp.f32 %v3894_v55  ;;  %v3906_v9 = vand.u32 2147483648, %v3894_v55  ;;  %vm3900_vm9 = vweird.f32 %v3894_v55  ;;  %v3904_v60 = vand.u32 2147483647, %v3894_v55 }
 0x95d   :  { %7072 = vpow2.f32 %v6622_v51 }
 0x95e   :  { %v3907_v1 = vor.u32 1.1754944e-38, %v3906_v9  ;;  %vm3905_vm12 = vcmp.eq.f32.partialorder %v3904_v60, 8.507059e+37 }
 0x962   :  { %v7071_v42 = vpop.eup %7070 }
 0x963   :  { %v7073_v19 = vpop.eup %7072  ;;  %v3896_v15 = vmul.f32 %v7071_v42, %v3894_v55  ;;  %vm3901_vm0 = vweird.f32 %v7071_v42 }
 0x964   :  { %v3937_v0 = vadd.f32 1.0, %v7073_v19  ;;  %vm3902_vm10 = vmor %vm3900_vm9, %vm3901_vm0  ;;  %vm4755_vm9 = vcmask 1041408  }
 0x965   :  { %v3897_v18 = vsub.f32 1.0, %v3896_v15 }
 0x966   :  { %7074 = vrcp.f32 %v3937_v0  ;;  %v3949_v61 = vand.u32 2147483648, %v3937_v0  ;;  %vm3943_vm14 = vweird.f32 %v3937_v0  ;;  %v3947_v38 = vand.u32 2147483647, %v3937_v0 }
 0x967   :  { %v3898_v4 = vmul.f32 %v7071_v42, %v3897_v18 }
 0x968   :  { %v3950_v56 = vor.u32 1.1754944e-38, %v3949_v61  ;;  %vm3948_vm1 = vcmp.eq.f32.partialorder %v3947_v38, 8.507059e+37 }
 0x969   :  { %v3899_v27 = vadd.f32 %v7071_v42, %v3898_v4 }
 0x96b   :  { %v3903_v21 = vsel %vm3902_vm10, %v7071_v42, %v3899_v27 }
 0x96c   :  { %v7075_v28 = vpop.eup %7074  ;;  %v3908_v17 = vsel %vm3905_vm12, %v3907_v1, %v3903_v21 }
 0x96d   :  { %v3939_v59 = vmul.f32 %v7075_v28, %v3937_v0  ;;  %vm3944_vm13 = vweird.f32 %v7075_v28  ;;  %v3911_v54 = vmul.f32 0.0, %v3908_v17 }
 0x96e   :  { %vm3945_vm15 = vmor %vm3943_vm14, %vm3944_vm13 }
 0x96f   :  { %v3940_v47 = vsub.f32 1.0, %v3939_v59 }
 0x971   :  { %v3941_v46 = vmul.f32 %v7075_v28, %v3940_v47 }
 0x973   :  { %v3942_v10 = vadd.f32 %v7075_v28, %v3941_v46 }
 0x975   :  { %v3946_v45 = vsel %vm3945_vm15, %v7075_v28, %v3942_v10 }
 0x976   :  { %v3951_v32 = vsel %vm3948_vm1, %v3950_v56, %v3946_v45 }
 0x977   :  { %v3954_v20 = vmul.f32 0.0, %v3951_v32 }
 0x9bb   :  { %v3914_v63 = vpop.permute.xlu1 %3913 }
 0x9bc   :  { %v3916_v31 = vmul.f32 %v3914_v63, %v3908_v17 }
 0x9be   :  { %3918 = vrot.lane.b32.xlu0 %v3916_v31, %s7334_s29 }
 0x9cb   :  { %v3957_v8 = vpop.permute.xlu0 %3956 }
 0x9cc   :  { %v3959_v16 = vmul.f32 %v3957_v8, %v3951_v32 }
 0x9ce   :  { %3961 = vrot.lane.b32.xlu2 %v3959_v16, %s7334_s29 }
 0xa28   :  { %v3962_v6 = vpop.permute.xlu2 %3961 }
 0xa29   :  { %v8523_v3 = vadd.f32 %v3962_v6, %v3954_v20 }
 0xa2b   :  { %7076 = vtanh.f32 %v8523_v3 }
 0xa30   :  { %v3919_v53 = vpop.permute.xlu0 %3918 }
 0xa31   :  { %v7077_v58 = vpop.eup %7076  ;;  %v8526_v25 = vadd.f32 %v3919_v53, %v3911_v54 }
 0xa32   :  { %3967 = vrot.lane.b32.xlu1 %v7077_v58, %s7322_s14  ;;  %v4064_v58 = vrot.slane %v8523_v3, 2  ;;  %v4770_v3 = vld [vmem:[%s5891_s1] sm:$0xf] }
 0xa33   :  { %7078 = vtanh.f32 %v8526_v25  ;;  %6646 = vmatpush.msk.msra.mxu0 %vm4755_vm9, %v4770_v3 }
 0xa39   :  { %v7079_v36 = vpop.eup %7078 }
 0xa3a   :  { %3924 = vrot.lane.b32.xlu2 %v7079_v36, %s7322_s14 }
 0xa94   :  { %v3925_v24 = vpop.permute.xlu2 %3924 }
 0xa95   :  { %v8534_v12 = vmul.f32 %v3925_v24, %v3908_v17 }
 0xa97   :  { %3973 = vperm.xlu2 %6927, %v8534_v12  }
 0xaa4   :  { %v3968_v39 = vpop.permute.xlu1 %3967 }
 0xaa5   :  { %v8537_v23 = vmul.f32 %v3968_v39, %v3951_v32 }
 0xaa7   :  { %4034 = vperm.xlu1 %6926, %v8537_v23   ;;  %4029 = vperm.xlu0 %6925, %v8537_v23  }
 0xaaf   :  { %3978 = vperm.xlu1 %6926, %v8534_v12   ;;  %6928 = vset.pattern.permute.xlu0 %v7361_v62 }
 0xab7   :  { %6929 = vset.pattern.permute.xlu1 %v7360_v43 }
 0xaf1   :  { %v3974_v33 = vpop.permute.xlu2 %3973 }
 0xaf2   :  { %v3976_v37 = vmul.f32 %v3974_v33, %v8491_v26  ;;  %v4851_v33 = vrot.slane %v4770_v3, 2 }
 0xaf4   :  { %6643 = vmatpush.msk.msra.mxu3 %vm4755_vm9, %v4851_v33 }
 0xb19   :  { %v4035_v41 = vpop.permute.xlu1 %4034  ;;  %v4030_v14 = vpop.permute.xlu0 %4029 }
 0xb1a   :  { %v4037_v2 = vmul.f32 %v4035_v41, %v8510_v50  ;;  %v4032_v57 = vmul.f32 %v4030_v14, %v8508_v30  ;;  %v4008_v41 = vrot.slane %v8526_v25, 6 }
 0xb1c   :  { %v4038_v49 = vadd.f32 %v4037_v2, %v4032_v57 }
 0xb1e   :  { %v4040_v11 = vrot.slane %v4038_v49, 2 }
 0xb20   :  { %v4042_v34 = vadd.f32 %v4040_v11, %v8517_v52 }
 0xb21   :  { %v3979_v22 = vpop.permute.xlu1 %3978 }
 0xb22   :  { %7080 = vtanh.f32 %v4042_v34  ;;  %v3981_v35 = vmul.f32 %v3979_v22, %v8493_v13  ;;  %v6624_v42 = vmul.f32 -1.442695, %v4042_v34 }
 0xb24   :  { %v3982_v29 = vadd.f32 %v3981_v35, %v3976_v37 }
 0xb26   :  { %v3984_v40 = vrot.slane %v3982_v29, 6 }
 0xb28   :  { %v7081_v44 = vpop.eup %7080  ;;  %v3986_v55 = vadd.f32 %v3984_v40, %v8504_v5 }
 0xb29   :  { %4068 = vrot.lane.b32.xlu2 %v7081_v44, %s7325_s20 }
 0xb2a   :  { %7082 = vtanh.f32 %v3986_v55  ;;  %v6623_v27 = vmul.f32 -1.442695, %v3986_v55 }
 0xb2b   :  { %7084 = vpow2.f32 %v6624_v42 }
 0xb30   :  { %v7083_v51 = vpop.eup %7082 }
 0xb31   :  { %4012 = vrot.lane.b32.xlu0 %v7083_v51, %s7325_s20  ;;  %v7085_v19 = vpop.eup %7084 }
 0xb32   :  { %v4046_v15 = vadd.f32 1.0, %v7085_v19 }
 0xb34   :  { %7086 = vrcp.f32 %v4046_v15  ;;  %v4058_v60 = vand.u32 2147483648, %v4046_v15  ;;  %vm4052_vm3 = vweird.f32 %v4046_v15  ;;  %v4056_v21 = vand.u32 2147483647, %v4046_v15 }
 0xb35   :  { %7088 = vpow2.f32 %v6623_v27 }
 0xb36   :  { %v4059_v63 = vor.u32 1.1754944e-38, %v4058_v60  ;;  %vm4057_vm5 = vcmp.eq.f32.partialorder %v4056_v21, 8.507059e+37 }
 0xb3a   :  { %v7087_v0 = vpop.eup %7086 }
 0xb3b   :  { %v4048_v18 = vmul.f32 %v7087_v0, %v4046_v15  ;;  %vm4053_vm2 = vweird.f32 %v7087_v0  ;;  %v7089_v59 = vpop.eup %7088 }
 0xb3c   :  { %vm4054_vm4 = vmor %vm4052_vm3, %vm4053_vm2  ;;  %v3990_v17 = vadd.f32 1.0, %v7089_v59 }
 0xb3d   :  { %v4049_v4 = vsub.f32 1.0, %v4048_v18 }
 0xb3e   :  { %7090 = vrcp.f32 %v3990_v17  ;;  %v4002_v8 = vand.u32 2147483648, %v3990_v17  ;;  %vm3996_vm7 = vweird.f32 %v3990_v17  ;;  %v4000_v32 = vand.u32 2147483647, %v3990_v17 }
 0xb3f   :  { %v4050_v28 = vmul.f32 %v7087_v0, %v4049_v4 }
 0xb40   :  { %v4003_v20 = vor.u32 1.1754944e-38, %v4002_v8  ;;  %vm4001_vm0 = vcmp.eq.f32.partialorder %v4000_v32, 8.507059e+37 }
 0xb41   :  { %v4051_v9 = vadd.f32 %v7087_v0, %v4050_v28 }
 0xb43   :  { %v4055_v1 = vsel %vm4054_vm4, %v7087_v0, %v4051_v9 }
 0xb44   :  { %v4060_v47 = vsel %vm4057_vm5, %v4059_v63, %v4055_v1  ;;  %v7091_v10 = vpop.eup %7090 }
 0xb45   :  { %v3992_v61 = vmul.f32 %v7091_v10, %v3990_v17  ;;  %vm3997_vm6 = vweird.f32 %v7091_v10  ;;  %v4066_v36 = vmul.f32 %v4064_v58, %v4060_v47 }
 0xb46   :  { %vm3998_vm8 = vmor %vm3996_vm7, %vm3997_vm6 }
 0xb47   :  { %v3993_v38 = vsub.f32 1.0, %v3992_v61 }
 0xb49   :  { %v3994_v45 = vmul.f32 %v7091_v10, %v3993_v38 }
 0xb4b   :  { %v3995_v56 = vadd.f32 %v7091_v10, %v3994_v45 }
 0xb4d   :  { %v3999_v16 = vsel %vm3998_vm8, %v7091_v10, %v3995_v56 }
 0xb4e   :  { %v4004_v6 = vsel %vm4001_vm0, %v4003_v20, %v3999_v16 }
 0xb4f   :  { %v4010_v14 = vmul.f32 %v4008_v41, %v4004_v6 }
 0xb83   :  { %v4069_v31 = vpop.permute.xlu2 %4068 }
 0xb84   :  { %v4071_v46 = vmul.f32 %v4069_v31, %v4060_v47 }
 0xb86   :  { %4073 = vrot.lane.b32.xlu1 %v4071_v46, %s7334_s29 }
 0xba3   :  { %v4013_v54 = vpop.permute.xlu0 %4012 }
 0xba4   :  { %v4015_v53 = vmul.f32 %v4013_v54, %v4004_v6 }
 0xba6   :  { %4017 = vrot.lane.b32.xlu2 %v4015_v53, %s7334_s29 }
 0xbf8   :  { %v4074_v24 = vpop.permute.xlu1 %4073 }
 0xbf9   :  { %v8555_v39 = vadd.f32 %v4074_v24, %v4066_v36 }
 0xbfb   :  { %7092 = vtanh.f32 %v8555_v39 }
 0xc00   :  { %v4018_v2 = vpop.permute.xlu2 %4017 }
 0xc01   :  { %v7093_v57 = vpop.eup %7092  ;;  %v8559_v49 = vadd.f32 %v4018_v2, %v4010_v14 }
 0xc02   :  { %4079 = vrot.lane.b32.xlu0 %v7093_v57, %s7322_s14 }
 0xc03   :  { %7094 = vtanh.f32 %v8559_v49 }
 0xc09   :  { %v7095_v11 = vpop.eup %7094 }
 0xc0a   :  { %4023 = vrot.lane.b32.xlu1 %v7095_v11, %s7322_s14 }
 0xc74   :  { %v4080_v25 = vpop.permute.xlu0 %4079 }
 0xc75   :  { %v8570_v34 = vmul.f32 %v4080_v25, %v4060_v47  ;;  %v4120_v25 = vrot.slane %v8559_v49, 6 }
 0xc77   :  { %4146 = vperm.xlu0 %6928, %v8570_v34   ;;  %4141 = vperm.xlu2 %6927, %v8570_v34  }
 0xc7c   :  { %v4024_v22 = vpop.permute.xlu1 %4023 }
 0xc7d   :  { %v8574_v37 = vmul.f32 %v4024_v22, %v4004_v6 }
 0xc7f   :  { %4085 = vperm.xlu1 %6929, %v8574_v37   ;;  %6930 = vset.pattern.permute.xlu2 %v7361_v62 }
 0xc80   :  { %4090 = vperm.xlu2 %6930, %v8574_v37   ;;  %6931 = vset.pattern.permute.xlu0 %v7360_v43 }
 0xcd1   :  { %v4142_v35 = vpop.permute.xlu2 %4141 }
 0xcd2   :  { %v4144_v40 = vmul.f32 %v4142_v35, %v8508_v30 }
 0xcda   :  { %v4091_v42 = vpop.permute.xlu2 %4090 }
 0xcdb   :  { %v4093_v0 = vmul.f32 %v4091_v42, %v8493_v13 }
 0xce9   :  { %v4147_v29 = vpop.permute.xlu0 %4146 }
 0xcea   :  { %v4149_v44 = vmul.f32 %v4147_v29, %v8510_v50 }
 0xcec   :  { %v4150_v55 = vadd.f32 %v4149_v44, %v4144_v40  ;;  %v4176_v44 = vrot.slane %v8555_v39, 2  ;;  %v4756_v39 = vsel %vm4755_vm9, %v8534_v12, %v8574_v37 }
 0xcee   :  { %v4152_v51 = vrot.slane %v4150_v55, 2 }
 0xcf0   :  { %v4154_v19 = vadd.f32 %v4152_v51, %v8517_v52 }
 0xcf1   :  { %v4086_v15 = vpop.permute.xlu1 %4085 }
 0xcf2   :  { %7096 = vtanh.f32 %v4154_v19  ;;  %v4088_v18 = vmul.f32 %v4086_v15, %v8491_v26  ;;  %v6626_v63 = vmul.f32 -1.442695, %v4154_v19 }
 0xcf4   :  { %v4094_v4 = vadd.f32 %v4093_v0, %v4088_v18 }
 0xcf6   :  { %v4096_v27 = vrot.slane %v4094_v4, 6 }
 0xcf8   :  { %v7097_v28 = vpop.eup %7096  ;;  %v4098_v9 = vadd.f32 %v4096_v27, %v8504_v5 }
 0xcf9   :  { %4180 = vrot.lane.b32.xlu1 %v7097_v28, %s7325_s20 }
 0xcfa   :  { %7098 = vtanh.f32 %v4098_v9  ;;  %v6625_v21 = vmul.f32 -1.442695, %v4098_v9 }
 0xcfc   :  { %7100 = vpow2.f32 %v6625_v21 }
 0xd00   :  { %v7099_v60 = vpop.eup %7098 }
 0xd01   :  { %4124 = vrot.lane.b32.xlu2 %v7099_v60, %s7325_s20 }
 0xd02   :  { %v7101_v59 = vpop.eup %7100 }
 0xd03   :  { %v4102_v1 = vadd.f32 1.0, %v7101_v59 }
 0xd05   :  { %7102 = vrcp.f32 %v4102_v1  ;;  %v4114_v56 = vand.u32 2147483648, %v4102_v1  ;;  %vm4108_vm12 = vweird.f32 %v4102_v1  ;;  %v4112_v8 = vand.u32 2147483647, %v4102_v1 }
 0xd06   :  { %7104 = vpow2.f32 %v6626_v63 }
 0xd07   :  { %v4115_v20 = vor.u32 1.1754944e-38, %v4114_v56  ;;  %vm4113_vm14 = vcmp.eq.f32.partialorder %v4112_v8, 8.507059e+37 }
 0xd0b   :  { %v7103_v17 = vpop.eup %7102 }
 0xd0c   :  { %v7105_v31 = vpop.eup %7104  ;;  %v4104_v47 = vmul.f32 %v7103_v17, %v4102_v1  ;;  %vm4109_vm10 = vweird.f32 %v7103_v17 }
 0xd0d   :  { %v4158_v46 = vadd.f32 1.0, %v7105_v31  ;;  %vm4110_vm13 = vmor %vm4108_vm12, %vm4109_vm10 }
 0xd0e   :  { %v4105_v10 = vsub.f32 1.0, %v4104_v47 }
 0xd0f   :  { %7106 = vrcp.f32 %v4158_v46  ;;  %v4170_v41 = vand.u32 2147483648, %v4158_v46  ;;  %vm4164_vm1 = vweird.f32 %v4158_v46  ;;  %v4168_v14 = vand.u32 2147483647, %v4158_v46 }
 0xd10   :  { %v4106_v61 = vmul.f32 %v7103_v17, %v4105_v10 }
 0xd11   :  { %v4171_v57 = vor.u32 1.1754944e-38, %v4170_v41  ;;  %vm4169_vm3 = vcmp.eq.f32.partialorder %v4168_v14, 8.507059e+37 }
 0xd12   :  { %v4107_v38 = vadd.f32 %v7103_v17, %v4106_v61 }
 0xd14   :  { %v4111_v32 = vsel %vm4110_vm13, %v7103_v17, %v4107_v38  ;;  %vm4758_vm13 = vcmask 1045504  }
 0xd15   :  { %v7107_v45 = vpop.eup %7106  ;;  %v4116_v54 = vsel %vm4113_vm14, %v4115_v20, %v4111_v32 }
 0xd16   :  { %v4160_v16 = vmul.f32 %v7107_v45, %v4158_v46  ;;  %vm4165_vm15 = vweird.f32 %v7107_v45  ;;  %v4122_v22 = vmul.f32 %v4120_v25, %v4116_v54 }
 0xd17   :  { %vm4166_vm2 = vmor %vm4164_vm1, %vm4165_vm15 }
 0xd18   :  { %v4161_v58 = vsub.f32 1.0, %v4160_v16 }
 0xd1a   :  { %v4162_v36 = vmul.f32 %v7107_v45, %v4161_v58 }
 0xd1c   :  { %v4163_v24 = vadd.f32 %v7107_v45, %v4162_v36 }
 0xd1e   :  { %v4167_v2 = vsel %vm4166_vm2, %v7107_v45, %v4163_v24 }
 0xd1f   :  { %v4172_v3 = vsel %vm4169_vm3, %v4171_v57, %v4167_v2 }
 0xd20   :  { %v4178_v55 = vmul.f32 %v4176_v44, %v4172_v3 }
 0xd5b   :  { %v4125_v6 = vpop.permute.xlu2 %4124 }
 0xd5c   :  { %v4127_v53 = vmul.f32 %v4125_v6, %v4116_v54 }
 0xd5e   :  { %4129 = vrot.lane.b32.xlu1 %v4127_v53, %s7334_s29 }
 0xd6b   :  { %v4181_v11 = vpop.permute.xlu1 %4180 }
 0xd6c   :  { %v4183_v33 = vmul.f32 %v4181_v11, %v4172_v3 }
 0xd6e   :  { %4185 = vrot.lane.b32.xlu0 %v4183_v33, %s7334_s29 }
 0xdd0   :  { %v4130_v35 = vpop.permute.xlu1 %4129 }
 0xdd1   :  { %v8591_v29 = vadd.f32 %v4130_v35, %v4122_v22 }
 0xdd3   :  { %7108 = vtanh.f32 %v8591_v29 }
 0xdd9   :  { %v7109_v40 = vpop.eup %7108 }
 0xdda   :  { %4135 = vrot.lane.b32.xlu0 %v7109_v40, %s7322_s14 }
 0xde0   :  { %v4186_v51 = vpop.permute.xlu0 %4185 }
 0xde1   :  { %v8596_v42 = vadd.f32 %v4186_v51, %v4178_v55 }
 0xde3   :  { %7110 = vtanh.f32 %v8596_v42 }
 0xde9   :  { %v7111_v19 = vpop.eup %7110 }
 0xdea   :  { %4191 = vrot.lane.b32.xlu2 %v7111_v19, %s7322_s14 }
 0xe44   :  { %v4192_v49 = vpop.permute.xlu2 %4191 }
 0xe45   :  { %v8600_v15 = vmul.f32 %v4192_v49, %v4172_v3  ;;  %v4288_v49 = vrot.slane %v8596_v42, 2 }
 0xe47   :  { %4258 = vperm.xlu2 %6930, %v8600_v15   ;;  %4253 = vperm.xlu1 %6929, %v8600_v15  }
 0xe4c   :  { %v4136_v0 = vpop.permute.xlu0 %4135 }
 0xe4d   :  { %v4138_v18 = vmul.f32 %v4136_v0, %v4116_v54 }
 0xe4f   :  { %v8608_v4 = vsel %vm1938_vm11, %v4756_v39, %v4138_v18  ;;  %6932 = vset.pattern.permute.xlu1 %v7361_v62  ;;  %4197 = vperm.xlu0 %6931, %v4138_v18  }
 0xe50   :  { %4202 = vperm.xlu1 %6932, %v4138_v18   ;;  %6933 = vset.pattern.permute.xlu2 %v7360_v43 }
 0xea1   :  { %v4259_v27 = vpop.permute.xlu2 %4258 }
 0xea2   :  { %v4261_v9 = vmul.f32 %v4259_v27, %v8510_v50 }
 0xeb9   :  { %v4254_v28 = vpop.permute.xlu1 %4253 }
 0xeba   :  { %v4256_v60 = vmul.f32 %v4254_v28, %v8508_v30  ;;  %v4232_v28 = vrot.slane %v8591_v29, 6 }
 0xebc   :  { %v4262_v21 = vadd.f32 %v4261_v9, %v4256_v60 }
 0xebe   :  { %v4264_v59 = vrot.slane %v4262_v21, 2 }
 0xec0   :  { %v4266_v1 = vadd.f32 %v4264_v59, %v8517_v52 }
 0xec1   :  { %v4198_v12 = vpop.permute.xlu0 %4197 }
 0xec2   :  { %7112 = vtanh.f32 %v4266_v1  ;;  %v4200_v37 = vmul.f32 %v4198_v12, %v8491_v26  ;;  %v4203_v63 = vpop.permute.xlu1 %4202  ;;  %v6628_v38 = vmul.f32 -1.442695, %v4266_v1 }
 0xec3   :  { %v4205_v17 = vmul.f32 %v4203_v63, %v8493_v13 }
 0xec5   :  { %v4206_v31 = vadd.f32 %v4205_v17, %v4200_v37 }
 0xec7   :  { %v4208_v47 = vrot.slane %v4206_v31, 6 }
 0xec8   :  { %v7113_v46 = vpop.eup %7112 }
 0xec9   :  { %v4210_v10 = vadd.f32 %v4208_v47, %v8504_v5  ;;  %4292 = vrot.lane.b32.xlu2 %v7113_v46, %s7325_s20 }
 0xecb   :  { %7114 = vtanh.f32 %v4210_v10  ;;  %v6627_v16 = vmul.f32 -1.442695, %v4210_v10 }
 0xecc   :  { %7116 = vpow2.f32 %v6628_v38 }
 0xed1   :  { %v7115_v61 = vpop.eup %7114 }
 0xed2   :  { %4236 = vrot.lane.b32.xlu1 %v7115_v61, %s7325_s20  ;;  %v7117_v52 = vpop.eup %7116 }
 0xed3   :  { %v4270_v45 = vadd.f32 1.0, %v7117_v52 }
 0xed5   :  { %7118 = vrcp.f32 %v4270_v45  ;;  %v4282_v5 = vand.u32 2147483648, %v4270_v45  ;;  %vm4276_vm5 = vweird.f32 %v4270_v45  ;;  %v4280_v54 = vand.u32 2147483647, %v4270_v45 }
 0xed6   :  { %7120 = vpow2.f32 %v6627_v16 }
 0xed7   :  { %v4283_v36 = vor.u32 1.1754944e-38, %v4282_v5  ;;  %vm4281_vm7 = vcmp.eq.f32.partialorder %v4280_v54, 8.507059e+37 }
 0xedb   :  { %v7119_v56 = vpop.eup %7118 }
 0xedc   :  { %v4272_v8 = vmul.f32 %v7119_v56, %v4270_v45  ;;  %vm4277_vm4 = vweird.f32 %v7119_v56  ;;  %v7121_v58 = vpop.eup %7120 }
 0xedd   :  { %vm4278_vm6 = vmor %vm4276_vm5, %vm4277_vm4  ;;  %v4214_v14 = vadd.f32 1.0, %v7121_v58 }
 0xede   :  { %v4273_v32 = vsub.f32 1.0, %v4272_v8  ;;  %v3827_v8 = vpop.f32.mrf.mxu3 }
 0xedf   :  { %7122 = vrcp.f32 %v4214_v14  ;;  %v4226_v22 = vand.u32 2147483648, %v4214_v14  ;;  %vm4220_vm0 = vweird.f32 %v4214_v14  ;;  %v4224_v35 = vand.u32 2147483647, %v4214_v14 }
 0xee0   :  { %v4274_v20 = vmul.f32 %v7119_v56, %v4273_v32  ;;  %v8649_v16 = vadd.f32 %v8501_v48, %v3827_v8 }
 0xee1   :  { %v4227_v44 = vor.u32 1.1754944e-38, %v4226_v22  ;;  %vm4225_vm12 = vcmp.eq.f32.partialorder %v4224_v35, 8.507059e+37 }
 0xee2   :  { %v4275_v6 = vadd.f32 %v7119_v56, %v4274_v20 }
 0xee4   :  { %v4279_v53 = vsel %vm4278_vm6, %v7119_v56, %v4275_v6 }
 0xee5   :  { %v4284_v41 = vsel %vm4281_vm7, %v4283_v36, %v4279_v53  ;;  %v7123_v57 = vpop.eup %7122 }
 0xee6   :  { %v4216_v11 = vmul.f32 %v7123_v57, %v4214_v14  ;;  %vm4221_vm8 = vweird.f32 %v7123_v57  ;;  %v4290_v0 = vmul.f32 %v4288_v49, %v4284_v41 }
 0xee7   :  { %vm4222_vm10 = vmor %vm4220_vm0, %vm4221_vm8 }
 0xee8   :  { %v4217_v3 = vsub.f32 1.0, %v4216_v11 }
 0xeea   :  { %v4218_v33 = vmul.f32 %v7123_v57, %v4217_v3 }
 0xeec   :  { %v4219_v25 = vadd.f32 %v7123_v57, %v4218_v33 }
 0xeee   :  { %v4223_v40 = vsel %vm4222_vm10, %v7123_v57, %v4219_v25 }
 0xeef   :  { %v4228_v51 = vsel %vm4225_vm12, %v4227_v44, %v4223_v40 }
 0xef0   :  { %v4234_v9 = vmul.f32 %v4232_v28, %v4228_v51 }
 0xf23   :  { %v4293_v24 = vpop.permute.xlu2 %4292 }
 0xf24   :  { %v4295_v2 = vmul.f32 %v4293_v24, %v4284_v41 }
 0xf26   :  { %4297 = vrot.lane.b32.xlu2 %v4295_v2, %s7334_s29 }
 0xf44   :  { %v4237_v55 = vpop.permute.xlu1 %4236 }
 0xf45   :  { %v4239_v19 = vmul.f32 %v4237_v55, %v4228_v51 }
 0xf47   :  { %4241 = vrot.lane.b32.xlu0 %v4239_v19, %s7334_s29 }
 0xf80   :  { %v4298_v18 = vpop.permute.xlu2 %4297 }
 0xf81   :  { %v8623_v39 = vadd.f32 %v4298_v18, %v4290_v0 }
 0xf83   :  { %7124 = vtanh.f32 %v8623_v39 }
 0xf89   :  { %v7125_v27 = vpop.eup %7124 }
 0xf8a   :  { %4303 = vrot.lane.b32.xlu1 %v7125_v27, %s7322_s14 }
 0xfb9   :  { %v4242_v60 = vpop.permute.xlu0 %4241 }
 0xfba   :  { %v8628_v21 = vadd.f32 %v4242_v60, %v4234_v9 }
 0xfbc   :  { %7126 = vtanh.f32 %v8628_v21 }
 0xfc2   :  { %v7127_v59 = vpop.eup %7126 }
 0xfc3   :  { %4247 = vrot.lane.b32.xlu2 %v7127_v59, %s7322_s14 }
 0xffc   :  { %v4304_v42 = vpop.permute.xlu1 %4303 }
 0xffd   :  { %v8632_v1 = vmul.f32 %v4304_v42, %v4284_v41 }
 0xfff   :  { %4370 = vperm.xlu1 %6932, %v8632_v1   ;;  %4365 = vperm.xlu0 %6931, %v8632_v1  }
0x1007   :  { %6934 = vset.pattern.permute.xlu0 %v7361_v62  ;;  %6935 = vset.pattern.permute.xlu1 %v7360_v43 }
0x101d   :  { %v4248_v29 = vpop.permute.xlu2 %4247 }
0x101e   :  { %v4250_v12 = vmul.f32 %v4248_v29, %v4228_v51  ;;  %v4344_v29 = vrot.slane %v8628_v21, 6 }
0x1020   :  { %4314 = vperm.xlu0 %6934, %v4250_v12   ;;  %4309 = vperm.xlu2 %6933, %v4250_v12   ;;  %v8640_v37 = vsel %vm4758_vm13, %v8608_v4, %v4250_v12 }
0x1071   :  { %v4371_v63 = vpop.permute.xlu1 %4370  ;;  %v4366_v17 = vpop.permute.xlu0 %4365 }
0x1072   :  { %v4373_v31 = vmul.f32 %v4371_v63, %v8510_v50  ;;  %v4368_v47 = vmul.f32 %v4366_v17, %v8508_v30 }
0x1074   :  { %v4374_v46 = vadd.f32 %v4373_v31, %v4368_v47  ;;  %v4400_v47 = vrot.slane %v8623_v39, 2 }
0x1076   :  { %v4376_v10 = vrot.slane %v4374_v46, 2 }
0x1078   :  { %v4378_v61 = vadd.f32 %v4376_v10, %v8512_v7 }
0x107a   :  { %7128 = vtanh.f32 %v4378_v61  ;;  %v4310_v52 = vpop.permute.xlu2 %4309  ;;  %v6630_v54 = vmul.f32 -1.442695, %v4378_v61 }
0x107b   :  { %v4312_v56 = vmul.f32 %v4310_v52, %v8491_v26 }
0x1080   :  { %v7129_v38 = vpop.eup %7128 }
0x1081   :  { %4404 = vrot.lane.b32.xlu1 %v7129_v38, %s7325_s20 }
0x1092   :  { %v4315_v45 = vpop.permute.xlu0 %4314 }
0x1093   :  { %v4317_v4 = vmul.f32 %v4315_v45, %v8493_v13 }
0x1095   :  { %v4318_v32 = vadd.f32 %v4317_v4, %v4312_v56 }
0x1097   :  { %v4320_v20 = vrot.slane %v4318_v32, 6 }
0x1099   :  { %v4322_v6 = vadd.f32 %v4320_v20, %v8649_v16 }
0x109b   :  { %7130 = vtanh.f32 %v4322_v6  ;;  %v6629_v53 = vmul.f32 -1.442695, %v4322_v6 }
0x109c   :  { %7132 = vpow2.f32 %v6630_v54 }
0x109d   :  { %7134 = vpow2.f32 %v6629_v53 }
0x10a1   :  { %v7131_v5 = vpop.eup %7130 }
0x10a2   :  { %4348 = vrot.lane.b32.xlu2 %v7131_v5, %s7325_s20  ;;  %v7133_v58 = vpop.eup %7132 }
0x10a3   :  { %v4382_v36 = vadd.f32 1.0, %v7133_v58  ;;  %v7135_v24 = vpop.eup %7134 }
0x10a4   :  { %v4326_v41 = vadd.f32 1.0, %v7135_v24 }
0x10a5   :  { %7136 = vrcp.f32 %v4382_v36  ;;  %v4394_v25 = vand.u32 2147483648, %v4382_v36  ;;  %vm4388_vm15 = vweird.f32 %v4382_v36  ;;  %v4392_v35 = vand.u32 2147483647, %v4382_v36 }
0x10a6   :  { %7138 = vrcp.f32 %v4326_v41  ;;  %v4338_v18 = vand.u32 2147483648, %v4326_v41  ;;  %vm4332_vm4 = vweird.f32 %v4326_v41  ;;  %v4336_v27 = vand.u32 2147483647, %v4326_v41 }
0x10a7   :  { %v4395_v44 = vor.u32 1.1754944e-38, %v4394_v25  ;;  %vm4393_vm2 = vcmp.eq.f32.partialorder %v4392_v35, 8.507059e+37 }
0x10a8   :  { %v4339_v9 = vor.u32 1.1754944e-38, %v4338_v18  ;;  %vm4337_vm6 = vcmp.eq.f32.partialorder %v4336_v27, 8.507059e+37 }
0x10ab   :  { %v7137_v14 = vpop.eup %7136 }
0x10ac   :  { %v4384_v48 = vmul.f32 %v7137_v14, %v4382_v36  ;;  %v7139_v57 = vpop.eup %7138  ;;  %vm4389_vm14 = vweird.f32 %v7137_v14 }
0x10ad   :  { %v4328_v3 = vmul.f32 %v7139_v57, %v4326_v41  ;;  %vm4390_vm1 = vmor %vm4388_vm15, %vm4389_vm14  ;;  %vm4333_vm3 = vweird.f32 %v7139_v57 }
0x10ae   :  { %v4385_v2 = vsub.f32 1.0, %v4384_v48  ;;  %vm4334_vm5 = vmor %vm4332_vm4, %vm4333_vm3 }
0x10af   :  { %v4329_v22 = vsub.f32 1.0, %v4328_v3 }
0x10b0   :  { %v4386_v11 = vmul.f32 %v7137_v14, %v4385_v2 }
0x10b1   :  { %v4330_v55 = vmul.f32 %v7139_v57, %v4329_v22 }
0x10b2   :  { %v4387_v33 = vadd.f32 %v7137_v14, %v4386_v11 }
0x10b3   :  { %v4331_v0 = vadd.f32 %v7139_v57, %v4330_v55 }
0x10b4   :  { %v4391_v40 = vsel %vm4390_vm1, %v7137_v14, %v4387_v33 }
0x10b5   :  { %v4396_v19 = vsel %vm4393_vm2, %v4395_v44, %v4391_v40  ;;  %v4335_v28 = vsel %vm4334_vm5, %v7139_v57, %v4331_v0 }
0x10b6   :  { %v4340_v59 = vsel %vm4337_vm6, %v4339_v9, %v4335_v28  ;;  %v4402_v46 = vmul.f32 %v4400_v47, %v4396_v19 }
0x10b7   :  { %v4346_v12 = vmul.f32 %v4344_v29, %v4340_v59 }
0x10f3   :  { %v4405_v51 = vpop.permute.xlu1 %4404 }
0x10f4   :  { %v4407_v49 = vmul.f32 %v4405_v51, %v4396_v19 }
0x10f6   :  { %4409 = vrot.lane.b32.xlu1 %v4407_v49, %s7334_s29 }
0x10fc   :  { %v4349_v60 = vpop.permute.xlu2 %4348 }
0x10fd   :  { %v4351_v42 = vmul.f32 %v4349_v60, %v4340_v59 }
0x10ff   :  { %4353 = vrot.lane.b32.xlu2 %v4351_v42, %s7334_s29 }
0x1159   :  { %v4354_v63 = vpop.permute.xlu2 %4353 }
0x115a   :  { %v8656_v17 = vadd.f32 %v4354_v63, %v4346_v12 }
0x115c   :  { %7140 = vtanh.f32 %v8656_v17 }
0x1162   :  { %v7141_v31 = vpop.eup %7140 }
0x1163   :  { %4359 = vrot.lane.b32.xlu1 %v7141_v31, %s7322_s14 }
0x1168   :  { %v4410_v10 = vpop.permute.xlu1 %4409 }
0x1169   :  { %v8661_v61 = vadd.f32 %v4410_v10, %v4402_v46 }
0x116b   :  { %7142 = vtanh.f32 %v8661_v61 }
0x1171   :  { %v7143_v38 = vpop.eup %7142 }
0x1172   :  { %4415 = vrot.lane.b32.xlu0 %v7143_v38, %s7322_s14 }
0x11d5   :  { %v4360_v21 = vpop.permute.xlu1 %4359 }
0x11d6   :  { %v8665_v52 = vmul.f32 %v4360_v21, %v4340_v59 }
0x11d8   :  { %4421 = vperm.xlu1 %6935, %v8665_v52  }
0x11e0   :  { %6938 = vset.pattern.permute.xlu1 %v7361_v62 }
0x11e4   :  { %v4416_v45 = vpop.permute.xlu0 %4415 }
0x11e5   :  { %v8669_v56 = vmul.f32 %v4416_v45, %v4396_v19  ;;  %v4512_v45 = vrot.slane %v8661_v61, 2 }
0x11e7   :  { %4482 = vperm.xlu0 %6934, %v8669_v56   ;;  %4477 = vperm.xlu2 %6933, %v8669_v56  }
0x11ef   :  { %6936 = vset.pattern.permute.xlu2 %v7361_v62  ;;  %6937 = vset.pattern.permute.xlu0 %v7360_v43 }
0x11f0   :  { %4426 = vperm.xlu2 %6936, %v8665_v52  }
0x11f8   :  { %6939 = vset.pattern.permute.xlu2 %v7360_v43 }
0x1241   :  { %v4478_v39 = vpop.permute.xlu2 %4477 }
0x1242   :  { %v4480_v36 = vmul.f32 %v4478_v39, %v8508_v30 }
0x124a   :  { %v4427_v4 = vpop.permute.xlu2 %4426  ;;  %v4422_v8 = vpop.permute.xlu1 %4421 }
0x124b   :  { %v4429_v32 = vmul.f32 %v4427_v4, %v8493_v13  ;;  %v4424_v20 = vmul.f32 %v4422_v8, %v8491_v26 }
0x124d   :  { %v4430_v6 = vadd.f32 %v4429_v32, %v4424_v20  ;;  %v4456_v32 = vrot.slane %v8656_v17, 6 }
0x124f   :  { %v4432_v5 = vrot.slane %v4430_v6, 6 }
0x1251   :  { %v4434_v54 = vadd.f32 %v4432_v5, %v8649_v16 }
0x1253   :  { %7144 = vtanh.f32 %v4434_v54  ;;  %v6631_v57 = vmul.f32 -1.442695, %v4434_v54 }
0x1259   :  { %v7145_v53 = vpop.eup %7144  ;;  %v4483_v58 = vpop.permute.xlu0 %4482 }
0x125a   :  { %v4485_v24 = vmul.f32 %v4483_v58, %v8510_v50  ;;  %4460 = vrot.lane.b32.xlu1 %v7145_v53, %s7325_s20 }
0x125c   :  { %v4486_v41 = vadd.f32 %v4485_v24, %v4480_v36 }
0x125e   :  { %v4488_v14 = vrot.slane %v4486_v41, 2 }
0x1260   :  { %v4490_v48 = vadd.f32 %v4488_v14, %v8512_v7 }
0x1262   :  { %7146 = vtanh.f32 %v4490_v48  ;;  %v6632_v33 = vmul.f32 -1.442695, %v4490_v48 }
0x1263   :  { %7148 = vpow2.f32 %v6631_v57 }
0x1268   :  { %v7147_v2 = vpop.eup %7146 }
0x1269   :  { %4516 = vrot.lane.b32.xlu0 %v7147_v2, %s7325_s20  ;;  %v7149_v11 = vpop.eup %7148 }
0x126a   :  { %v4438_v3 = vadd.f32 1.0, %v7149_v11 }
0x126c   :  { %7150 = vrcp.f32 %v4438_v3  ;;  %v4450_v49 = vand.u32 2147483648, %v4438_v3  ;;  %vm4444_vm8 = vweird.f32 %v4438_v3  ;;  %v4448_v0 = vand.u32 2147483647, %v4438_v3 }
0x126d   :  { %7152 = vpow2.f32 %v6632_v33 }
0x126e   :  { %v4451_v28 = vor.u32 1.1754944e-38, %v4450_v49  ;;  %vm4449_vm10 = vcmp.eq.f32.partialorder %v4448_v0, 8.507059e+37 }
0x1272   :  { %v7151_v25 = vpop.eup %7150 }
0x1273   :  { %v7153_v22 = vpop.eup %7152  ;;  %v4440_v35 = vmul.f32 %v7151_v25, %v4438_v3  ;;  %vm4445_vm7 = vweird.f32 %v7151_v25 }
0x1274   :  { %v4494_v40 = vadd.f32 1.0, %v7153_v22  ;;  %vm4446_vm0 = vmor %vm4444_vm8, %vm4445_vm7 }
0x1275   :  { %v4441_v44 = vsub.f32 1.0, %v4440_v35 }
0x1276   :  { %7154 = vrcp.f32 %v4494_v40  ;;  %v4506_v63 = vand.u32 2147483648, %v4494_v40  ;;  %vm4500_vm14 = vweird.f32 %v4494_v40  ;;  %v4504_v31 = vand.u32 2147483647, %v4494_v40 }
0x1277   :  { %v4442_v55 = vmul.f32 %v7151_v25, %v4441_v44 }
0x1278   :  { %v4507_v46 = vor.u32 1.1754944e-38, %v4506_v63  ;;  %vm4505_vm1 = vcmp.eq.f32.partialorder %v4504_v31, 8.507059e+37 }
0x1279   :  { %v4443_v19 = vadd.f32 %v7151_v25, %v4442_v55 }
0x127b   :  { %v4447_v27 = vsel %vm4446_vm0, %v7151_v25, %v4443_v19 }
0x127c   :  { %v7155_v51 = vpop.eup %7154  ;;  %v4452_v60 = vsel %vm4449_vm10, %v4451_v28, %v4447_v27 }
0x127d   :  { %v4496_v18 = vmul.f32 %v7155_v51, %v4494_v40  ;;  %vm4501_vm12 = vweird.f32 %v7155_v51  ;;  %v4458_v20 = vmul.f32 %v4456_v32, %v4452_v60 }
0x127e   :  { %vm4502_vm15 = vmor %vm4500_vm14, %vm4501_vm12 }
0x127f   :  { %v4497_v59 = vsub.f32 1.0, %v4496_v18 }
0x1281   :  { %v4498_v29 = vmul.f32 %v7155_v51, %v4497_v59 }
0x1283   :  { %v4499_v12 = vadd.f32 %v7155_v51, %v4498_v29 }
0x1285   :  { %v4503_v47 = vsel %vm4502_vm15, %v7155_v51, %v4499_v12 }
0x1286   :  { %v4508_v38 = vsel %vm4505_vm1, %v4507_v46, %v4503_v47 }
0x1287   :  { %v4514_v39 = vmul.f32 %v4512_v45, %v4508_v38 }
0x12cc   :  { %v4461_v9 = vpop.permute.xlu1 %4460 }
0x12cd   :  { %v4463_v42 = vmul.f32 %v4461_v9, %v4452_v60 }
0x12cf   :  { %4465 = vrot.lane.b32.xlu0 %v4463_v42, %s7334_s29 }
0x12db   :  { %v4517_v10 = vpop.permute.xlu0 %4516 }
0x12dc   :  { %v4519_v21 = vmul.f32 %v4517_v10, %v4508_v38 }
0x12de   :  { %4521 = vrot.lane.b32.xlu2 %v4519_v21, %s7334_s29 }
0x1338   :  { %v4522_v4 = vpop.permute.xlu2 %4521 }
0x1339   :  { %v8688_v8 = vadd.f32 %v4522_v4, %v4514_v39 }
0x133b   :  { %7156 = vtanh.f32 %v8688_v8 }
0x1341   :  { %v7157_v6 = vpop.eup %7156  ;;  %v4466_v5 = vpop.permute.xlu0 %4465 }
0x1342   :  { %v8692_v54 = vadd.f32 %v4466_v5, %v4458_v20  ;;  %4527 = vrot.lane.b32.xlu1 %v7157_v6, %s7322_s14 }
0x1344   :  { %7158 = vtanh.f32 %v8692_v54 }
0x134a   :  { %v7159_v53 = vpop.eup %7158 }
0x134b   :  { %4471 = vrot.lane.b32.xlu2 %v7159_v53, %s7322_s14 }
0x13a5   :  { %v4472_v61 = vpop.permute.xlu2 %4471 }
0x13a6   :  { %v8697_v58 = vmul.f32 %v4472_v61, %v4452_v60 }
0x13a8   :  { %4533 = vperm.xlu2 %6939, %v8697_v58  }
0x13b4   :  { %v4528_v36 = vpop.permute.xlu1 %4527 }
0x13b5   :  { %v8700_v24 = vmul.f32 %v4528_v36, %v4508_v38 }
0x13b7   :  { %4594 = vperm.xlu1 %6938, %v8700_v24   ;;  %4589 = vperm.xlu0 %6937, %v8700_v24  }
0x13bf   :  { %4538 = vperm.xlu1 %6938, %v8697_v58   ;;  %6940 = vset.pattern.permute.xlu0 %v7361_v62 }
0x13c7   :  { %6941 = vset.pattern.permute.xlu1 %v7360_v43 }
0x1402   :  { %v4534_v11 = vpop.permute.xlu2 %4533 }
0x1403   :  { %v4536_v25 = vmul.f32 %v4534_v11, %v8491_v26 }
0x1429   :  { %v4595_v17 = vpop.permute.xlu1 %4594  ;;  %v4590_v41 = vpop.permute.xlu0 %4589 }
0x142a   :  { %v4597_v14 = vmul.f32 %v4595_v17, %v8510_v50  ;;  %v4592_v48 = vmul.f32 %v4590_v41, %v8508_v30  ;;  %v4624_v41 = vrot.slane %v8688_v8, 2 }
0x142c   :  { %v4598_v2 = vadd.f32 %v4597_v14, %v4592_v48 }
0x142e   :  { %v4600_v57 = vrot.slane %v4598_v2, 2 }
0x1430   :  { %v4602_v3 = vadd.f32 %v4600_v57, %v8512_v7  ;;  %v4568_v57 = vrot.slane %v8692_v54, 6 }
0x1431   :  { %v4539_v33 = vpop.permute.xlu1 %4538 }
0x1432   :  { %7160 = vtanh.f32 %v4602_v3  ;;  %v4541_v22 = vmul.f32 %v4539_v33, %v8493_v13  ;;  %v6634_v19 = vmul.f32 -1.442695, %v4602_v3 }
0x1434   :  { %v4542_v35 = vadd.f32 %v4541_v22, %v4536_v25 }
0x1436   :  { %v4544_v40 = vrot.slane %v4542_v35, 6 }
0x1438   :  { %v7161_v44 = vpop.eup %7160  ;;  %v4546_v55 = vadd.f32 %v4544_v40, %v8649_v16 }
0x1439   :  { %4628 = vrot.lane.b32.xlu2 %v7161_v44, %s7325_s20  ;;  %v4760_v44 = vsel %vm4755_vm9, %v8665_v52, %v8697_v58 }
0x143a   :  { %7162 = vtanh.f32 %v4546_v55  ;;  %v6633_v9 = vmul.f32 -1.442695, %v4546_v55 }
0x143b   :  { %7164 = vpow2.f32 %v6634_v19 }
0x1440   :  { %v7163_v51 = vpop.eup %7162 }
0x1441   :  { %4572 = vrot.lane.b32.xlu0 %v7163_v51, %s7325_s20  ;;  %v7165_v49 = vpop.eup %7164 }
0x1442   :  { %v4606_v0 = vadd.f32 1.0, %v7165_v49 }
0x1444   :  { %7166 = vrcp.f32 %v4606_v0  ;;  %v4618_v42 = vand.u32 2147483648, %v4606_v0  ;;  %vm4612_vm3 = vweird.f32 %v4606_v0  ;;  %v4616_v29 = vand.u32 2147483647, %v4606_v0 }
0x1445   :  { %7168 = vpow2.f32 %v6633_v9 }
0x1446   :  { %v4619_v31 = vor.u32 1.1754944e-38, %v4618_v42  ;;  %vm4617_vm5 = vcmp.eq.f32.partialorder %v4616_v29, 8.507059e+37 }
0x144a   :  { %v7167_v18 = vpop.eup %7166 }
0x144b   :  { %v4608_v27 = vmul.f32 %v7167_v18, %v4606_v0  ;;  %vm4613_vm2 = vweird.f32 %v7167_v18  ;;  %v7169_v12 = vpop.eup %7168 }
0x144c   :  { %vm4614_vm4 = vmor %vm4612_vm3, %vm4613_vm2  ;;  %v4550_v47 = vadd.f32 1.0, %v7169_v12 }
0x144d   :  { %v4609_v28 = vsub.f32 1.0, %v4608_v27 }
0x144e   :  { %7170 = vrcp.f32 %v4550_v47  ;;  %v4562_v20 = vand.u32 2147483648, %v4550_v47  ;;  %vm4556_vm7 = vweird.f32 %v4550_v47  ;;  %v4560_v6 = vand.u32 2147483647, %v4550_v47 }
0x144f   :  { %v4610_v60 = vmul.f32 %v7167_v18, %v4609_v28 }
0x1450   :  { %v4563_v53 = vor.u32 1.1754944e-38, %v4562_v20  ;;  %vm4561_vm0 = vcmp.eq.f32.partialorder %v4560_v6, 8.507059e+37 }
0x1451   :  { %v4611_v59 = vadd.f32 %v7167_v18, %v4610_v60 }
0x1453   :  { %v4615_v63 = vsel %vm4614_vm4, %v7167_v18, %v4611_v59 }
0x1454   :  { %v4620_v46 = vsel %vm4617_vm5, %v4619_v31, %v4615_v63  ;;  %v7171_v21 = vpop.eup %7170  ;;  %vm4779_vm5 = vcmask 15360  }
0x1455   :  { %v4552_v45 = vmul.f32 %v7171_v21, %v4550_v47  ;;  %vm4557_vm6 = vweird.f32 %v7171_v21  ;;  %v4626_v14 = vmul.f32 %v4624_v41, %v4620_v46 }
0x1456   :  { %vm4558_vm8 = vmor %vm4556_vm7, %vm4557_vm6 }
0x1457   :  { %v4553_v39 = vsub.f32 1.0, %v4552_v45 }
0x1459   :  { %v4554_v4 = vmul.f32 %v7171_v21, %v4553_v39 }
0x145b   :  { %v4555_v32 = vadd.f32 %v7171_v21, %v4554_v4 }
0x145d   :  { %v4559_v5 = vsel %vm4558_vm8, %v7171_v21, %v4555_v32 }
0x145e   :  { %v4564_v36 = vsel %vm4561_vm0, %v4563_v53, %v4559_v5 }
0x145f   :  { %v4570_v11 = vmul.f32 %v4568_v57, %v4564_v36 }
0x1493   :  { %v4629_v10 = vpop.permute.xlu2 %4628 }
0x1494   :  { %v4631_v38 = vmul.f32 %v4629_v10, %v4620_v46 }
0x1496   :  { %4633 = vrot.lane.b32.xlu1 %v4631_v38, %s7334_s29 }
0x14b3   :  { %v4573_v61 = vpop.permute.xlu0 %4572 }
0x14b4   :  { %v4575_v17 = vmul.f32 %v4573_v61, %v4564_v36 }
0x14b6   :  { %4577 = vrot.lane.b32.xlu2 %v4575_v17, %s7334_s29 }
0x1508   :  { %v4634_v48 = vpop.permute.xlu1 %4633 }
0x1509   :  { %v8718_v2 = vadd.f32 %v4634_v48, %v4626_v14 }
0x150b   :  { %7172 = vtanh.f32 %v8718_v2 }
0x1510   :  { %v4578_v3 = vpop.permute.xlu2 %4577 }
0x1511   :  { %v7173_v33 = vpop.eup %7172  ;;  %v8722_v25 = vadd.f32 %v4578_v3, %v4570_v11 }
0x1512   :  { %4639 = vrot.lane.b32.xlu0 %v7173_v33, %s7322_s14 }
0x1513   :  { %7174 = vtanh.f32 %v8722_v25 }
0x1519   :  { %v7175_v22 = vpop.eup %7174 }
0x151a   :  { %4583 = vrot.lane.b32.xlu1 %v7175_v22, %s7322_s14  ;;  %v4680_v22 = vrot.slane %v8722_v25, 6 }
0x1584   :  { %v4640_v8 = vpop.permute.xlu0 %4639 }
0x1585   :  { %v8727_v35 = vmul.f32 %v4640_v8, %v4620_v46 }
0x1587   :  { %4706 = vperm.xlu0 %6940, %v8727_v35   ;;  %4701 = vperm.xlu2 %6939, %v8727_v35  }
0x158c   :  { %v4584_v54 = vpop.permute.xlu1 %4583 }
0x158d   :  { %v4586_v40 = vmul.f32 %v4584_v54, %v4564_v36 }
0x158f   :  { %v8735_v55 = vsel %vm1938_vm11, %v4760_v44, %v4586_v40  ;;  %6942 = vset.pattern.permute.xlu2 %v7361_v62  ;;  %4645 = vperm.xlu1 %6941, %v4586_v40  }
0x1590   :  { %4650 = vperm.xlu2 %6942, %v4586_v40  }
0x1598   :  { %6943 = vset.pattern.permute.xlu2 %v7360_v43 }
0x15e1   :  { %v4702_v51 = vpop.permute.xlu2 %4701 }
0x15e2   :  { %v4704_v49 = vmul.f32 %v4702_v51, %v8508_v30  ;;  %v4766_v51 = vsel %vm4755_vm9, %v8632_v1, %v8600_v15 }
0x15ea   :  { %v4651_v28 = vpop.permute.xlu2 %4650 }
0x15eb   :  { %v4653_v9 = vmul.f32 %v4651_v28, %v8493_v13 }
0x15f9   :  { %v4707_v19 = vpop.permute.xlu0 %4706 }
0x15fa   :  { %v4709_v0 = vmul.f32 %v4707_v19, %v8510_v50  ;;  %v4736_v19 = vrot.slane %v8718_v2, 2 }
0x15fc   :  { %v4710_v18 = vadd.f32 %v4709_v0, %v4704_v49  ;;  %v4767_v49 = vsel %vm1938_vm11, %v4766_v51, %v8570_v34  ;;  %v4769_v34 = vld [vmem:[%s5888_s5] sm:$0xf] }
0x15fd   :  { %v4768_v25 = vsel %vm4758_vm13, %v4767_v49, %v8537_v23  ;;  %v4778_v15 = vrot.slane %v4769_v34, 2  ;;  %6640 = vmatpush.msk.msra.mxu2 %vm4755_vm9, %v4769_v34 }
0x15fe   :  { %v4712_v27 = vrot.slane %v4710_v18, 2 }
0x15ff   :  { %6637 = vmatpush.msk.msra.mxu1 %vm4755_vm9, %v4778_v15 }
0x1600   :  { %v4714_v52 = vadd.f32 %v4712_v27, %v8512_v7 }
0x1601   :  { %v4646_v58 = vpop.permute.xlu1 %4645 }
0x1602   :  { %7176 = vtanh.f32 %v4714_v52  ;;  %v4648_v60 = vmul.f32 %v4646_v58, %v8491_v26  ;;  %v6636_v31 = vmul.f32 -1.442695, %v4714_v52 }
0x1604   :  { %v4654_v59 = vadd.f32 %v4653_v9, %v4648_v60 }
0x1606   :  { %v4656_v42 = vrot.slane %v4654_v59, 6 }
0x1608   :  { %v7177_v29 = vpop.eup %7176  ;;  %v4658_v12 = vadd.f32 %v4656_v42, %v8649_v16 }
0x1609   :  { %4740 = vrot.lane.b32.xlu1 %v7177_v29, %s7325_s20 }
0x160a   :  { %7178 = vtanh.f32 %v4658_v12  ;;  %v6635_v50 = vmul.f32 -1.442695, %v4658_v12 }
0x160c   :  { %7180 = vpow2.f32 %v6635_v50  ;;  %v8804_v50 = vld [vmem:[%s5890_s11] ss:$0 sm:$0xff] }
0x1610   :  { %v7179_v30 = vpop.eup %7178 }
0x1611   :  { %4684 = vrot.lane.b32.xlu2 %v7179_v30, %s7325_s20 }
0x1612   :  { %v7181_v7 = vpop.eup %7180 }
0x1613   :  { %v4662_v63 = vadd.f32 1.0, %v7181_v7 }
0x1615   :  { %7182 = vrcp.f32 %v4662_v63  ;;  %v4674_v45 = vand.u32 2147483648, %v4662_v63  ;;  %vm4668_vm12 = vweird.f32 %v4662_v63  ;;  %v4672_v39 = vand.u32 2147483647, %v4662_v63 }
0x1616   :  { %7184 = vpow2.f32 %v6636_v31 }
0x1617   :  { %v4675_v20 = vor.u32 1.1754944e-38, %v4674_v45  ;;  %vm4673_vm15 = vcmp.eq.f32.partialorder %v4672_v39, 8.507059e+37 }
0x161b   :  { %v7183_v13 = vpop.eup %7182 }
0x161c   :  { %v7185_v26 = vpop.eup %7184  ;;  %v4664_v47 = vmul.f32 %v7183_v13, %v4662_v63  ;;  %vm4669_vm10 = vweird.f32 %v7183_v13 }
0x161d   :  { %v4718_v46 = vadd.f32 1.0, %v7185_v26  ;;  %vm4670_vm14 = vmor %vm4668_vm12, %vm4669_vm10 }
0x161e   :  { %v4665_v10 = vsub.f32 1.0, %v4664_v47 }
0x161f   :  { %7186 = vrcp.f32 %v4718_v46  ;;  %v4730_v41 = vand.u32 2147483648, %v4718_v46  ;;  %vm4724_vm2 = vweird.f32 %v4718_v46  ;;  %v4728_v14 = vand.u32 2147483647, %v4718_v46 }
0x1620   :  { %v4666_v16 = vmul.f32 %v7183_v13, %v4665_v10  ;;  %v4909_v10 = vld [vmem:[%s5892_s27] sm:$0x3] }
0x1621   :  { %v4731_v57 = vor.u32 1.1754944e-38, %v4730_v41  ;;  %vm4729_vm4 = vcmp.eq.f32.partialorder %v4728_v14, 8.507059e+37  ;;  %v8810_v45 = vperm.slane %v4909_v10, 0  ;;  %v8812_v39 = vperm.slane %v4909_v10, 1 }
0x1622   :  { %v4667_v38 = vadd.f32 %v7183_v13, %v4666_v16 }
0x1624   :  { %v4671_v4 = vsel %vm4670_vm14, %v7183_v13, %v4667_v38 }
0x1625   :  { %v7187_v21 = vpop.eup %7186  ;;  %v4676_v5 = vsel %vm4673_vm15, %v4675_v20, %v4671_v4  ;;  %v4956_v20 = vmul.f32 0.0, %v8812_v39 }
0x1626   :  { %v4720_v32 = vmul.f32 %v7187_v21, %v4718_v46  ;;  %vm4725_vm1 = vweird.f32 %v7187_v21  ;;  %v4682_v8 = vmul.f32 %v4680_v22, %v4676_v5  ;;  %v6971_v46 = vld [vmem:[%s5893_s16] ss:$0 sm:$0xff] }
0x1627   :  { %vm4726_vm3 = vmor %vm4724_vm2, %vm4725_vm1 }
0x1628   :  { %v4721_v61 = vsub.f32 1.0, %v4720_v32  ;;  %v4954_v32 = vmul.f32 0.0, %v8810_v45 }
0x162a   :  { %v4722_v36 = vmul.f32 %v7187_v21, %v4721_v61 }
0x162c   :  { %v4723_v17 = vadd.f32 %v7187_v21, %v4722_v36  ;;  %v4957_v36 = vadd.f32 %v4956_v20, %v4954_v32 }
0x162e   :  { %v4727_v48 = vsel %vm4726_vm3, %v7187_v21, %v4723_v17 }
0x162f   :  { %v4732_v3 = vsel %vm4729_vm4, %v4731_v57, %v4727_v48 }
0x1630   :  { %v4738_v0 = vmul.f32 %v4736_v19, %v4732_v3 }
0x166b   :  { %v4685_v6 = vpop.permute.xlu2 %4684 }
0x166c   :  { %v4687_v53 = vmul.f32 %v4685_v6, %v4676_v5 }
0x166e   :  { %4689 = vrot.lane.b32.xlu1 %v4687_v53, %s7334_s29 }
0x167b   :  { %v4741_v11 = vpop.permute.xlu1 %4740 }
0x167c   :  { %v4743_v33 = vmul.f32 %v4741_v11, %v4732_v3 }
0x167e   :  { %4745 = vrot.lane.b32.xlu0 %v4743_v33, %s7334_s29 }
0x16e0   :  { %v4690_v54 = vpop.permute.xlu1 %4689 }
0x16e1   :  { %v4692_v40 = vadd.f32 %v4690_v54, %v4682_v8 }
0x16e3   :  { %7188 = vtanh.f32 %v4692_v40 }
0x16e9   :  { %v7189_v44 = vpop.eup %7188 }
0x16ea   :  { %4695 = vrot.lane.b32.xlu0 %v7189_v44, %s7322_s14 }
0x16f0   :  { %v4746_v18 = vpop.permute.xlu0 %4745 }
0x16f1   :  { %v4748_v27 = vadd.f32 %v4746_v18, %v4738_v0 }
0x16f2   :  { %4775 = vrot.lane.b32.xlu0 %v4768_v25, %s7362_s22 }
0x16f3   :  { %7190 = vtanh.f32 %v4748_v27 }
0x16f9   :  { %v7191_v28 = vpop.eup %7190 }
0x16fa   :  { %4751 = vrot.lane.b32.xlu2 %v7191_v28, %s7322_s14 }
0x1702   :  { %4811 = vrot.lane.b32.xlu2 %v8640_v37, %s7362_s22 }
0x1754   :  { %v4752_v23 = vpop.permute.xlu2 %4751 }
0x1755   :  { %v4754_v1 = vmul.f32 %v4752_v23, %v4732_v3 }
0x1757   :  { %v4763_v2 = vsel %vm4755_vm9, %v4754_v1, %v8727_v35 }
0x1758   :  { %v4764_v52 = vsel %vm1938_vm11, %v4763_v2, %v8700_v24 }
0x1759   :  { %v4765_v37 = vsel %vm4758_vm13, %v4764_v52, %v8669_v56 }
0x175a   :  { %4773 = vrot.lane.b32.xlu1 %v4765_v37, %s7362_s22 }
0x175c   :  { %v4812_v58 = vpop.permute.xlu2 %4811  ;;  %v4696_v9 = vpop.permute.xlu0 %4695 }
0x175d   :  { %v4698_v60 = vmul.f32 %v4696_v9, %v4676_v5  ;;  %6641 = vmatmul.msk.f32.vlgmr.msra.gmra.mxu2 %vm4779_vm5, %v4812_v58  ;;  %6647 = vmatmul.msk.f32.vlgmr.msra.gmra.mxu0 %vm4779_vm5, %v4812_v58 }
0x175f   :  { %v4762_v59 = vsel %vm4758_vm13, %v8735_v55, %v4698_v60  ;;  %v4908_v55 = vld [vmem:[%s5889_s23] sm:$0x3] }
0x1760   :  { %v8795_v42 = vperm.slane %v4908_v55, 0  ;;  %v8797_v29 = vperm.slane %v4908_v55, 1 }
0x1762   :  { %4813 = vrot.lane.b32.xlu1 %v4762_v59, %s7362_s22  ;;  %v4911_v12 = vmul.f32 0.0, %v8795_v42  ;;  %v4913_v30 = vmul.f32 0.0, %v8797_v29 }
0x1764   :  { %v4776_v24 = vpop.permute.xlu0 %4775  ;;  %v4914_v13 = vadd.f32 %v4913_v30, %v4911_v12 }
0x17cc   :  { %v4774_v56 = vpop.permute.xlu1 %4773 }
0x17cd   :  { %6638 = vmatmul.msk.f32.vlgmr.msra.gmra.mxu1 %vm4779_vm5, %v4774_v56  ;;  %6644 = vmatmul.msk.f32.vlgmr.msra.gmra.mxu3 %vm4779_vm5, %v4774_v56 }
0x17d4   :  { %v4814_v35 = vpop.permute.xlu1 %4813 }
0x17d5   :  { %6639 = vmatmul.msk.f32.gmra.mxu1 %vm4779_vm5, %v4776_v24  ;;  %6642 = vmatmul.msk.f32.gmra.mxu2 %vm4779_vm5, %v4814_v35 }
0x17d6   :  { %6645 = vmatmul.msk.f32.gmra.mxu3 %vm4779_vm5, %v4776_v24  ;;  %6648 = vmatmul.msk.f32.gmra.mxu0 %vm4779_vm5, %v4814_v35 }
0x17da   :  { %v4896_v16 = vpop.f32.mrf.mxu0 }
0x17e0   :  { %v4838_v7 = vpop.f32.mrf.mxu2 }
0x184a   :  { %v4803_v63 = vpop.f32.mrf.mxu1 }
0x184b   :  { %v4839_v31 = vadd.f32 %v4838_v7, %v4803_v63 }
0x184d   :  { %v8807_v26 = vadd.f32 %v8804_v50, %v4839_v31 }
0x184f   :  { %v4915_v47 = vadd.f32 %v4914_v13, %v8807_v26 }
0x1850   :  { %v4871_v38 = vpop.f32.mrf.mxu3 }
0x1851   :  { %7192 = vtanh.f32 %v4915_v47  ;;  %v4897_v21 = vadd.f32 %v4896_v16, %v4871_v38  ;;  %v6649_v57 = vmul.f32 -1.442695, %v4915_v47 }
0x1853   :  { %v8814_v4 = vadd.f32 %v6971_v46, %v4897_v21  ;;  %v4899_v5 = vpop.f32.mrf.mxu0 }
0x1857   :  { %v7193_v6 = vpop.eup %7192 }
0x1858   :  { %4938 = vrot.lane.b32.xlu0 %v7193_v6, %s7325_s20 }
0x1859   :  { %v4874_v53 = vpop.f32.mrf.mxu3 }
0x185a   :  { %v4900_v61 = vadd.f32 %v4899_v5, %v4874_v53 }
0x185c   :  { %v8819_v17 = vadd.f32 %v6971_v46, %v4900_v61 }
0x185e   :  { %v4958_v41 = vadd.f32 %v4957_v36, %v8819_v17 }
0x1860   :  { %7194 = vtanh.f32 %v4958_v41  ;;  %v6650_v48 = vmul.f32 -1.442695, %v4958_v41 }
0x1862   :  { %7196 = vpow2.f32 %v6650_v48 }
0x1863   :  { %7198 = vpow2.f32 %v6649_v57 }
0x1866   :  { %v7195_v14 = vpop.eup %7194 }
0x1867   :  { %4981 = vrot.lane.b32.xlu2 %v7195_v14, %s7325_s20 }
0x1868   :  { %v7197_v11 = vpop.eup %7196 }
0x1869   :  { %v4962_v3 = vadd.f32 1.0, %v7197_v11  ;;  %v7199_v33 = vpop.eup %7198 }
0x186a   :  { %v4919_v22 = vadd.f32 1.0, %v7199_v33 }
0x186b   :  { %7200 = vrcp.f32 %v4962_v3  ;;  %v4974_v0 = vand.u32 2147483648, %v4962_v3  ;;  %vm4968_vm7 = vweird.f32 %v4962_v3  ;;  %v4972_v27 = vand.u32 2147483647, %v4962_v3 }
0x186c   :  { %7202 = vrcp.f32 %v4919_v22  ;;  %v4931_v52 = vand.u32 2147483648, %v4919_v22  ;;  %vm4925_vm12 = vweird.f32 %v4919_v22  ;;  %v4929_v37 = vand.u32 2147483647, %v4919_v22 }
0x186d   :  { %v4975_v28 = vor.u32 1.1754944e-38, %v4974_v0  ;;  %vm4973_vm0 = vcmp.eq.f32.partialorder %v4972_v27, 8.507059e+37 }
0x186e   :  { %v4932_v9 = vor.u32 1.1754944e-38, %v4931_v52  ;;  %vm4930_vm15 = vcmp.eq.f32.partialorder %v4929_v37, 8.507059e+37 }
0x1871   :  { %v7201_v8 = vpop.eup %7200 }
0x1872   :  { %v4964_v54 = vmul.f32 %v7201_v8, %v4962_v3  ;;  %v7203_v44 = vpop.eup %7202  ;;  %vm4969_vm6 = vweird.f32 %v7201_v8 }
0x1873   :  { %v4921_v19 = vmul.f32 %v7203_v44, %v4919_v22  ;;  %vm4970_vm8 = vmor %vm4968_vm7, %vm4969_vm6  ;;  %vm4926_vm10 = vweird.f32 %v7203_v44 }
0x1874   :  { %v4965_v40 = vsub.f32 1.0, %v4964_v54  ;;  %vm4927_vm14 = vmor %vm4925_vm12, %vm4926_vm10 }
0x1875   :  { %v4922_v18 = vsub.f32 1.0, %v4921_v19 }
0x1876   :  { %v4966_v51 = vmul.f32 %v7201_v8, %v4965_v40 }
0x1877   :  { %v4923_v34 = vmul.f32 %v7203_v44, %v4922_v18 }
0x1878   :  { %v4967_v49 = vadd.f32 %v7201_v8, %v4966_v51 }
0x1879   :  { %v4924_v2 = vadd.f32 %v7203_v44, %v4923_v34 }
0x187a   :  { %v4971_v25 = vsel %vm4970_vm8, %v7201_v8, %v4967_v49 }
0x187b   :  { %v4976_v23 = vsel %vm4973_vm0, %v4975_v28, %v4971_v25  ;;  %v4928_v58 = vsel %vm4927_vm14, %v7203_v44, %v4924_v2 }
0x187c   :  { %v4933_v60 = vsel %vm4930_vm15, %v4932_v9, %v4928_v58  ;;  %v4979_v30 = vmul.f32 0.0, %v4976_v23 }
0x187d   :  { %v4936_v24 = vmul.f32 0.0, %v4933_v60 }
0x18c1   :  { %v4982_v15 = vpop.permute.xlu2 %4981 }
0x18c2   :  { %v4984_v1 = vmul.f32 %v4982_v15, %v4976_v23 }
0x18c4   :  { %4986 = vrot.lane.b32.xlu1 %v4984_v1, %s7334_s29 }
0x18ca   :  { %v4939_v59 = vpop.permute.xlu0 %4938 }
0x18cb   :  { %v4941_v56 = vmul.f32 %v4939_v59, %v4933_v60 }
0x18cd   :  { %4943 = vrot.lane.b32.xlu2 %v4941_v56, %s7334_s29 }
0x1927   :  { %v4944_v35 = vpop.permute.xlu2 %4943 }
0x1928   :  { %v8825_v55 = vadd.f32 %v4944_v35, %v4936_v24 }
0x192a   :  { %7204 = vtanh.f32 %v8825_v55 }
0x1930   :  { %v7205_v12 = vpop.eup %7204 }
0x1931   :  { %4949 = vrot.lane.b32.xlu1 %v7205_v12, %s7322_s14 }
0x1936   :  { %v4987_v7 = vpop.permute.xlu1 %4986 }
0x1937   :  { %v8829_v63 = vadd.f32 %v4987_v7, %v4979_v30 }
0x1939   :  { %7206 = vtanh.f32 %v8829_v63  ;;  %v5089_v7 = vrot.slane %v8829_v63, 2 }
0x193f   :  { %v7207_v31 = vpop.eup %7206 }
0x1940   :  { %4992 = vrot.lane.b32.xlu0 %v7207_v31, %s7322_s14 }
0x19a3   :  { %v4950_v13 = vpop.permute.xlu1 %4949 }
0x19a4   :  { %v8833_v47 = vmul.f32 %v4950_v13, %v4933_v60 }
0x19a6   :  { %4998 = vperm.xlu1 %6941, %v8833_v47  }
0x19ae   :  { %6947 = vset.pattern.permute.xlu1 %v7361_v62 }
0x19b2   :  { %v4993_v46 = vpop.permute.xlu0 %4992 }
0x19b3   :  { %v8837_v10 = vmul.f32 %v4993_v46, %v4976_v23 }
0x19b5   :  { %5059 = vperm.xlu0 %6940, %v8837_v10   ;;  %5054 = vperm.xlu2 %6943, %v8837_v10  }
0x19bd   :  { %6944 = vset.pattern.permute.xlu2 %v7361_v62  ;;  %6945 = vset.pattern.permute.xlu0 %v7360_v43 }
0x19be   :  { %5003 = vperm.xlu2 %6944, %v8833_v47  }
0x19c6   :  { %6946 = vset.pattern.permute.xlu2 %v7360_v43 }
0x1a0f   :  { %v5055_v16 = vpop.permute.xlu2 %5054 }
0x1a10   :  { %v5057_v41 = vmul.f32 %v5055_v16, %v8810_v45  ;;  %v5033_v16 = vrot.slane %v8825_v55, 6 }
0x1a18   :  { %v5004_v38 = vpop.permute.xlu2 %5003  ;;  %v4999_v21 = vpop.permute.xlu1 %4998 }
0x1a19   :  { %v5006_v32 = vmul.f32 %v5004_v38, %v8797_v29  ;;  %v5001_v20 = vmul.f32 %v4999_v21, %v8795_v42 }
0x1a1b   :  { %v5007_v6 = vadd.f32 %v5006_v32, %v5001_v20 }
0x1a1d   :  { %v5009_v5 = vrot.slane %v5007_v6, 6 }
0x1a1f   :  { %v5011_v53 = vadd.f32 %v5009_v5, %v8807_v26 }
0x1a21   :  { %7208 = vtanh.f32 %v5011_v53  ;;  %v6651_v33 = vmul.f32 -1.442695, %v5011_v53 }
0x1a27   :  { %v7209_v61 = vpop.eup %7208  ;;  %v5060_v36 = vpop.permute.xlu0 %5059 }
0x1a28   :  { %v5062_v14 = vmul.f32 %v5060_v36, %v8812_v39  ;;  %5037 = vrot.lane.b32.xlu1 %v7209_v61, %s7325_s20 }
0x1a2a   :  { %v5063_v48 = vadd.f32 %v5062_v14, %v5057_v41 }
0x1a2c   :  { %v5065_v57 = vrot.slane %v5063_v48, 2 }
0x1a2e   :  { %v5067_v11 = vadd.f32 %v5065_v57, %v8819_v17 }
0x1a30   :  { %7210 = vtanh.f32 %v5067_v11  ;;  %v6652_v54 = vmul.f32 -1.442695, %v5067_v11 }
0x1a31   :  { %7212 = vpow2.f32 %v6651_v33 }
0x1a36   :  { %v7211_v3 = vpop.eup %7210 }
0x1a37   :  { %5093 = vrot.lane.b32.xlu0 %v7211_v3, %s7325_s20  ;;  %v7213_v22 = vpop.eup %7212 }
0x1a38   :  { %v5015_v8 = vadd.f32 1.0, %v7213_v22 }
0x1a3a   :  { %7214 = vrcp.f32 %v5015_v8  ;;  %v5027_v25 = vand.u32 2147483648, %v5015_v8  ;;  %vm5021_vm2 = vweird.f32 %v5015_v8  ;;  %v5025_v28 = vand.u32 2147483647, %v5015_v8 }
0x1a3b   :  { %7216 = vpow2.f32 %v6652_v54 }
0x1a3c   :  { %v5028_v23 = vor.u32 1.1754944e-38, %v5027_v25  ;;  %vm5026_vm4 = vcmp.eq.f32.partialorder %v5025_v28, 8.507059e+37 }
0x1a40   :  { %v7215_v40 = vpop.eup %7214 }
0x1a41   :  { %v7217_v44 = vpop.eup %7216  ;;  %v5017_v51 = vmul.f32 %v7215_v40, %v5015_v8  ;;  %vm5022_vm1 = vweird.f32 %v7215_v40 }
0x1a42   :  { %v5071_v19 = vadd.f32 1.0, %v7217_v44  ;;  %vm5023_vm3 = vmor %vm5021_vm2, %vm5022_vm1 }
0x1a43   :  { %v5018_v49 = vsub.f32 1.0, %v5017_v51 }
0x1a44   :  { %7218 = vrcp.f32 %v5071_v19  ;;  %v5083_v60 = vand.u32 2147483648, %v5071_v19  ;;  %vm5077_vm7 = vweird.f32 %v5071_v19  ;;  %v5081_v59 = vand.u32 2147483647, %v5071_v19 }
0x1a45   :  { %v5019_v0 = vmul.f32 %v7215_v40, %v5018_v49 }
0x1a46   :  { %v5084_v24 = vor.u32 1.1754944e-38, %v5083_v60  ;;  %vm5082_vm0 = vcmp.eq.f32.partialorder %v5081_v59, 8.507059e+37 }
0x1a47   :  { %v5020_v27 = vadd.f32 %v7215_v40, %v5019_v0 }
0x1a49   :  { %v5024_v15 = vsel %vm5023_vm3, %v7215_v40, %v5020_v27 }
0x1a4a   :  { %v7219_v18 = vpop.eup %7218  ;;  %v5029_v2 = vsel %vm5026_vm4, %v5028_v23, %v5024_v15 }
0x1a4b   :  { %v5073_v34 = vmul.f32 %v7219_v18, %v5071_v19  ;;  %vm5078_vm6 = vweird.f32 %v7219_v18  ;;  %v5035_v38 = vmul.f32 %v5033_v16, %v5029_v2 }
0x1a4c   :  { %vm5079_vm8 = vmor %vm5077_vm7, %vm5078_vm6 }
0x1a4d   :  { %v5074_v52 = vsub.f32 1.0, %v5073_v34 }
0x1a4f   :  { %v5075_v58 = vmul.f32 %v7219_v18, %v5074_v52 }
0x1a51   :  { %v5076_v9 = vadd.f32 %v7219_v18, %v5075_v58 }
0x1a53   :  { %v5080_v56 = vsel %vm5079_vm8, %v7219_v18, %v5076_v9 }
0x1a54   :  { %v5085_v12 = vsel %vm5082_vm0, %v5084_v24, %v5080_v56 }
0x1a55   :  { %v5091_v31 = vmul.f32 %v5089_v7, %v5085_v12 }
0x1a9a   :  { %v5038_v1 = vpop.permute.xlu1 %5037 }
0x1a9b   :  { %v5040_v37 = vmul.f32 %v5038_v1, %v5029_v2 }
0x1a9d   :  { %5042 = vrot.lane.b32.xlu0 %v5040_v37, %s7334_s29 }
0x1aa9   :  { %v5094_v35 = vpop.permute.xlu0 %5093 }
0x1aaa   :  { %v5096_v30 = vmul.f32 %v5094_v35, %v5085_v12 }
0x1aac   :  { %5098 = vrot.lane.b32.xlu2 %v5096_v30, %s7334_s29 }
0x1b06   :  { %v5099_v13 = vpop.permute.xlu2 %5098 }
0x1b07   :  { %v8856_v46 = vadd.f32 %v5099_v13, %v5091_v31 }
0x1b09   :  { %7220 = vtanh.f32 %v8856_v46 }
0x1b0f   :  { %v7221_v21 = vpop.eup %7220  ;;  %v5043_v32 = vpop.permute.xlu0 %5042 }
0x1b10   :  { %v8860_v20 = vadd.f32 %v5043_v32, %v5035_v38  ;;  %5104 = vrot.lane.b32.xlu1 %v7221_v21, %s7322_s14 }
0x1b12   :  { %7222 = vtanh.f32 %v8860_v20 }
0x1b18   :  { %v7223_v6 = vpop.eup %7222 }
0x1b19   :  { %5048 = vrot.lane.b32.xlu2 %v7223_v6, %s7322_s14 }
0x1b73   :  { %v5049_v63 = vpop.permute.xlu2 %5048 }
0x1b74   :  { %v8865_v5 = vmul.f32 %v5049_v63, %v5029_v2  ;;  %v5201_v63 = vrot.slane %v8856_v46, 2 }
0x1b76   :  { %5110 = vperm.xlu2 %6946, %v8865_v5  }
0x1b82   :  { %v5105_v53 = vpop.permute.xlu1 %5104 }
0x1b83   :  { %v8868_v61 = vmul.f32 %v5105_v53, %v5085_v12 }
0x1b85   :  { %5171 = vperm.xlu1 %6947, %v8868_v61   ;;  %5166 = vperm.xlu0 %6945, %v8868_v61  }
0x1b8d   :  { %5115 = vperm.xlu1 %6947, %v8865_v5   ;;  %6948 = vset.pattern.permute.xlu0 %v7361_v62 }
0x1b95   :  { %6949 = vset.pattern.permute.xlu1 %v7360_v43 }
0x1bd0   :  { %v5111_v11 = vpop.permute.xlu2 %5110 }
0x1bd1   :  { %v5113_v22 = vmul.f32 %v5111_v11, %v8795_v42 }
0x1bf7   :  { %v5172_v55 = vpop.permute.xlu1 %5171  ;;  %v5167_v36 = vpop.permute.xlu0 %5166 }
0x1bf8   :  { %v5174_v41 = vmul.f32 %v5172_v55, %v8812_v39  ;;  %v5169_v14 = vmul.f32 %v5167_v36, %v8810_v45 }
0x1bfa   :  { %v5175_v48 = vadd.f32 %v5174_v41, %v5169_v14  ;;  %v5145_v41 = vrot.slane %v8860_v20, 6 }
0x1bfc   :  { %v5177_v57 = vrot.slane %v5175_v48, 2 }
0x1bfe   :  { %v5179_v3 = vadd.f32 %v5177_v57, %v8819_v17 }
0x1bff   :  { %v5116_v33 = vpop.permute.xlu1 %5115 }
0x1c00   :  { %7224 = vtanh.f32 %v5179_v3  ;;  %v5118_v8 = vmul.f32 %v5116_v33, %v8797_v29  ;;  %v6654_v49 = vmul.f32 -1.442695, %v5179_v3 }
0x1c02   :  { %v5119_v54 = vadd.f32 %v5118_v8, %v5113_v22  ;;  %v5780_v8 = vsel %vm4755_vm9, %v8833_v47, %v8865_v5 }
0x1c04   :  { %v5121_v40 = vrot.slane %v5119_v54, 6 }
0x1c06   :  { %v7225_v44 = vpop.eup %7224  ;;  %v5123_v51 = vadd.f32 %v5121_v40, %v8807_v26 }
0x1c07   :  { %5205 = vrot.lane.b32.xlu2 %v7225_v44, %s7325_s20 }
0x1c08   :  { %7226 = vtanh.f32 %v5123_v51  ;;  %v6653_v34 = vmul.f32 -1.442695, %v5123_v51 }
0x1c09   :  { %7228 = vpow2.f32 %v6654_v49 }
0x1c0e   :  { %v7227_v19 = vpop.eup %7226 }
0x1c0f   :  { %5149 = vrot.lane.b32.xlu0 %v7227_v19, %s7325_s20  ;;  %v7229_v0 = vpop.eup %7228 }
0x1c10   :  { %v5183_v18 = vadd.f32 1.0, %v7229_v0 }
0x1c12   :  { %7230 = vrcp.f32 %v5183_v18  ;;  %v5195_v1 = vand.u32 2147483648, %v5183_v18  ;;  %vm5189_vm12 = vweird.f32 %v5183_v18  ;;  %v5193_v2 = vand.u32 2147483647, %v5183_v18 }
0x1c13   :  { %7232 = vpow2.f32 %v6653_v34 }
0x1c14   :  { %v5196_v58 = vor.u32 1.1754944e-38, %v5195_v1  ;;  %vm5194_vm15 = vcmp.eq.f32.partialorder %v5193_v2, 8.507059e+37 }
0x1c18   :  { %v7231_v27 = vpop.eup %7230 }
0x1c19   :  { %v5185_v25 = vmul.f32 %v7231_v27, %v5183_v18  ;;  %vm5190_vm10 = vweird.f32 %v7231_v27  ;;  %v7233_v52 = vpop.eup %7232 }
0x1c1a   :  { %vm5191_vm14 = vmor %vm5189_vm12, %vm5190_vm10  ;;  %v5127_v9 = vadd.f32 1.0, %v7233_v52 }
0x1c1b   :  { %v5186_v28 = vsub.f32 1.0, %v5185_v25 }
0x1c1c   :  { %7234 = vrcp.f32 %v5127_v9  ;;  %v5139_v31 = vand.u32 2147483648, %v5127_v9  ;;  %vm5133_vm2 = vweird.f32 %v5127_v9  ;;  %v5137_v13 = vand.u32 2147483647, %v5127_v9 }
0x1c1d   :  { %v5187_v15 = vmul.f32 %v7231_v27, %v5186_v28 }
0x1c1e   :  { %v5140_v38 = vor.u32 1.1754944e-38, %v5139_v31  ;;  %vm5138_vm4 = vcmp.eq.f32.partialorder %v5137_v13, 8.507059e+37 }
0x1c1f   :  { %v5188_v23 = vadd.f32 %v7231_v27, %v5187_v15 }
0x1c21   :  { %v5192_v37 = vsel %vm5191_vm14, %v7231_v27, %v5188_v23 }
0x1c22   :  { %v5197_v60 = vsel %vm5194_vm15, %v5196_v58, %v5192_v37  ;;  %v7235_v24 = vpop.eup %7234 }
0x1c23   :  { %v5129_v35 = vmul.f32 %v7235_v24, %v5127_v9  ;;  %vm5134_vm1 = vweird.f32 %v7235_v24  ;;  %v5203_v53 = vmul.f32 %v5201_v63, %v5197_v60 }
0x1c24   :  { %vm5135_vm3 = vmor %vm5133_vm2, %vm5134_vm1 }
0x1c25   :  { %v5130_v12 = vsub.f32 1.0, %v5129_v35 }
0x1c27   :  { %v5131_v30 = vmul.f32 %v7235_v24, %v5130_v12 }
0x1c29   :  { %v5132_v7 = vadd.f32 %v7235_v24, %v5131_v30 }
0x1c2b   :  { %v5136_v16 = vsel %vm5135_vm3, %v7235_v24, %v5132_v7 }
0x1c2c   :  { %v5141_v32 = vsel %vm5138_vm4, %v5140_v38, %v5136_v16 }
0x1c2d   :  { %v5147_v14 = vmul.f32 %v5145_v41, %v5141_v32 }
0x1c61   :  { %v5206_v59 = vpop.permute.xlu2 %5205 }
0x1c62   :  { %v5208_v56 = vmul.f32 %v5206_v59, %v5197_v60 }
0x1c64   :  { %5210 = vrot.lane.b32.xlu1 %v5208_v56, %s7334_s29 }
0x1c81   :  { %v5150_v21 = vpop.permute.xlu0 %5149 }
0x1c82   :  { %v5152_v6 = vmul.f32 %v5150_v21, %v5141_v32 }
0x1c84   :  { %5154 = vrot.lane.b32.xlu2 %v5152_v6, %s7334_s29 }
0x1cd6   :  { %v5211_v55 = vpop.permute.xlu1 %5210 }
0x1cd7   :  { %v8886_v36 = vadd.f32 %v5211_v55, %v5203_v53 }
0x1cd9   :  { %7236 = vtanh.f32 %v8886_v36 }
0x1cde   :  { %v5155_v48 = vpop.permute.xlu2 %5154 }
0x1cdf   :  { %v7237_v57 = vpop.eup %7236  ;;  %v8890_v11 = vadd.f32 %v5155_v48, %v5147_v14 }
0x1ce0   :  { %5216 = vrot.lane.b32.xlu0 %v7237_v57, %s7322_s14 }
0x1ce1   :  { %7238 = vtanh.f32 %v8890_v11 }
0x1ce7   :  { %v7239_v3 = vpop.eup %7238 }
0x1ce8   :  { %5160 = vrot.lane.b32.xlu1 %v7239_v3, %s7322_s14 }
0x1d52   :  { %v5217_v46 = vpop.permute.xlu0 %5216 }
0x1d53   :  { %v8895_v33 = vmul.f32 %v5217_v46, %v5197_v60  ;;  %v5257_v46 = vrot.slane %v8890_v11, 6 }
0x1d55   :  { %5283 = vperm.xlu0 %6948, %v8895_v33   ;;  %5278 = vperm.xlu2 %6946, %v8895_v33  }
0x1d5a   :  { %v5161_v20 = vpop.permute.xlu1 %5160 }
0x1d5b   :  { %v5163_v22 = vmul.f32 %v5161_v20, %v5141_v32 }
0x1d5d   :  { %6950 = vset.pattern.permute.xlu2 %v7361_v62  ;;  %5222 = vperm.xlu1 %6949, %v5163_v22   ;;  %v8904_v54 = vsel %vm1938_vm11, %v5780_v8, %v5163_v22 }
0x1d5e   :  { %5227 = vperm.xlu2 %6950, %v5163_v22   ;;  %6951 = vset.pattern.permute.xlu0 %v7360_v43 }
0x1daf   :  { %v5279_v40 = vpop.permute.xlu2 %5278 }
0x1db0   :  { %v5281_v51 = vmul.f32 %v5279_v40, %v8810_v45 }
0x1db8   :  { %v5228_v18 = vpop.permute.xlu2 %5227 }
0x1db9   :  { %v5230_v27 = vmul.f32 %v5228_v18, %v8797_v29 }
0x1dc7   :  { %v5284_v44 = vpop.permute.xlu0 %5283 }
0x1dc8   :  { %v5286_v19 = vmul.f32 %v5284_v44, %v8812_v39  ;;  %v5313_v44 = vrot.slane %v8886_v36, 2 }
0x1dca   :  { %v5287_v49 = vadd.f32 %v5286_v19, %v5281_v51 }
0x1dcc   :  { %v5289_v0 = vrot.slane %v5287_v49, 2 }
0x1dce   :  { %v5291_v47 = vadd.f32 %v5289_v0, %v8819_v17 }
0x1dcf   :  { %v5223_v5 = vpop.permute.xlu1 %5222 }
0x1dd0   :  { %7240 = vtanh.f32 %v5291_v47  ;;  %v5225_v25 = vmul.f32 %v5223_v5, %v8795_v42  ;;  %v6656_v37 = vmul.f32 -1.442695, %v5291_v47 }
0x1dd2   :  { %v5231_v28 = vadd.f32 %v5230_v27, %v5225_v25 }
0x1dd4   :  { %v5233_v34 = vrot.slane %v5231_v28, 6 }
0x1dd6   :  { %v7241_v15 = vpop.eup %7240  ;;  %v5235_v23 = vadd.f32 %v5233_v34, %v8807_v26 }
0x1dd7   :  { %5317 = vrot.lane.b32.xlu1 %v7241_v15, %s7325_s20 }
0x1dd8   :  { %7242 = vtanh.f32 %v5235_v23  ;;  %v6655_v2 = vmul.f32 -1.442695, %v5235_v23 }
0x1dda   :  { %7244 = vpow2.f32 %v6655_v2 }
0x1dde   :  { %v7243_v1 = vpop.eup %7242 }
0x1ddf   :  { %5261 = vrot.lane.b32.xlu2 %v7243_v1, %s7325_s20  ;;  %v4841_v1 = vpop.f32.mrf.mxu2 }
0x1de0   :  { %v7245_v17 = vpop.eup %7244 }
0x1de1   :  { %v5239_v52 = vadd.f32 1.0, %v7245_v17 }
0x1de3   :  { %7246 = vrcp.f32 %v5239_v52  ;;  %v5251_v12 = vand.u32 2147483648, %v5239_v52  ;;  %vm5245_vm7 = vweird.f32 %v5239_v52  ;;  %v5249_v30 = vand.u32 2147483647, %v5239_v52 }
0x1de4   :  { %7248 = vpow2.f32 %v6656_v37 }
0x1de5   :  { %v5252_v13 = vor.u32 1.1754944e-38, %v5251_v12  ;;  %vm5250_vm0 = vcmp.eq.f32.partialorder %v5249_v30, 8.507059e+37 }
0x1de9   :  { %v7247_v58 = vpop.eup %7246 }
0x1dea   :  { %v7249_v9 = vpop.eup %7248  ;;  %v5241_v60 = vmul.f32 %v7247_v58, %v5239_v52  ;;  %vm5246_vm6 = vweird.f32 %v7247_v58  ;;  %v4806_v52 = vpop.f32.mrf.mxu1 }
0x1deb   :  { %v5295_v59 = vadd.f32 1.0, %v7249_v9  ;;  %vm5247_vm8 = vmor %vm5245_vm7, %vm5246_vm6 }
0x1dec   :  { %v5242_v56 = vsub.f32 1.0, %v5241_v60 }
0x1ded   :  { %7250 = vrcp.f32 %v5295_v59  ;;  %v5307_v53 = vand.u32 2147483648, %v5295_v59  ;;  %vm5301_vm12 = vweird.f32 %v5295_v59  ;;  %v5305_v55 = vand.u32 2147483647, %v5295_v59 }
0x1dee   :  { %v5243_v26 = vmul.f32 %v7247_v58, %v5242_v56 }
0x1def   :  { %v5308_v14 = vor.u32 1.1754944e-38, %v5307_v53  ;;  %vm5306_vm15 = vcmp.eq.f32.partialorder %v5305_v55, 8.507059e+37 }
0x1df0   :  { %v5244_v24 = vadd.f32 %v7247_v58, %v5243_v26 }
0x1df2   :  { %v5248_v7 = vsel %vm5247_vm8, %v7247_v58, %v5244_v24  ;;  %v4842_v58 = vadd.f32 %v4841_v1, %v4806_v52 }
0x1df3   :  { %v7251_v35 = vpop.eup %7250  ;;  %v5253_v38 = vsel %vm5250_vm0, %v5252_v13, %v5248_v7 }
0x1df4   :  { %v5297_v31 = vmul.f32 %v7251_v35, %v5295_v59  ;;  %vm5302_vm10 = vweird.f32 %v7251_v35  ;;  %v5259_v20 = vmul.f32 %v5257_v46, %v5253_v38  ;;  %v8943_v59 = vadd.f32 %v8804_v50, %v4842_v58 }
0x1df5   :  { %vm5303_vm14 = vmor %vm5301_vm12, %vm5302_vm10 }
0x1df6   :  { %v5298_v32 = vsub.f32 1.0, %v5297_v31 }
0x1df8   :  { %v5299_v6 = vmul.f32 %v7251_v35, %v5298_v32 }
0x1dfa   :  { %v5300_v63 = vadd.f32 %v7251_v35, %v5299_v6 }
0x1dfc   :  { %v5304_v41 = vsel %vm5303_vm14, %v7251_v35, %v5300_v63 }
0x1dfd   :  { %v5309_v57 = vsel %vm5306_vm15, %v5308_v14, %v5304_v41 }
0x1dfe   :  { %v5315_v51 = vmul.f32 %v5313_v44, %v5309_v57 }
0x1e39   :  { %v5262_v16 = vpop.permute.xlu2 %5261 }
0x1e3a   :  { %v5264_v21 = vmul.f32 %v5262_v16, %v5253_v38 }
0x1e3c   :  { %5266 = vrot.lane.b32.xlu1 %v5264_v21, %s7334_s29 }
0x1e49   :  { %v5318_v48 = vpop.permute.xlu1 %5317 }
0x1e4a   :  { %v5320_v3 = vmul.f32 %v5318_v48, %v5309_v57 }
0x1e4c   :  { %5322 = vrot.lane.b32.xlu0 %v5320_v3, %s7334_s29 }
0x1eae   :  { %v5267_v22 = vpop.permute.xlu1 %5266 }
0x1eaf   :  { %v8918_v8 = vadd.f32 %v5267_v22, %v5259_v20 }
0x1eb1   :  { %7252 = vtanh.f32 %v8918_v8 }
0x1eb7   :  { %v7253_v40 = vpop.eup %7252 }
0x1eb8   :  { %5272 = vrot.lane.b32.xlu0 %v7253_v40, %s7322_s14 }
0x1ebe   :  { %v5323_v19 = vpop.permute.xlu0 %5322 }
0x1ebf   :  { %v8923_v49 = vadd.f32 %v5323_v19, %v5315_v51 }
0x1ec1   :  { %7254 = vtanh.f32 %v8923_v49 }
0x1ec7   :  { %v7255_v0 = vpop.eup %7254 }
0x1ec8   :  { %5328 = vrot.lane.b32.xlu2 %v7255_v0, %s7322_s14 }
0x1f22   :  { %v5329_v11 = vpop.permute.xlu2 %5328 }
0x1f23   :  { %v8927_v18 = vmul.f32 %v5329_v11, %v5309_v57 }
0x1f25   :  { %5395 = vperm.xlu2 %6950, %v8927_v18   ;;  %5390 = vperm.xlu1 %6949, %v8927_v18  }
0x1f2a   :  { %v5273_v47 = vpop.permute.xlu0 %5272 }
0x1f2b   :  { %v5275_v5 = vmul.f32 %v5273_v47, %v5253_v38 }
0x1f2d   :  { %6952 = vset.pattern.permute.xlu1 %v7361_v62  ;;  %5334 = vperm.xlu0 %6951, %v5275_v5   ;;  %v8934_v36 = vsel %vm4758_vm13, %v8904_v54, %v5275_v5 }
0x1f2e   :  { %5339 = vperm.xlu1 %6952, %v5275_v5   ;;  %6953 = vset.pattern.permute.xlu2 %v7360_v43 }
0x1f7f   :  { %v5396_v27 = vpop.permute.xlu2 %5395 }
0x1f80   :  { %v5398_v28 = vmul.f32 %v5396_v27, %v8812_v39  ;;  %v5425_v27 = vrot.slane %v8923_v49, 2 }
0x1f97   :  { %v5391_v25 = vpop.permute.xlu1 %5390 }
0x1f98   :  { %v5393_v34 = vmul.f32 %v5391_v25, %v8810_v45 }
0x1f9a   :  { %v5399_v15 = vadd.f32 %v5398_v28, %v5393_v34 }
0x1f9c   :  { %v5401_v23 = vrot.slane %v5399_v15, 2 }
0x1f9e   :  { %v5403_v2 = vadd.f32 %v5401_v23, %v8814_v4  ;;  %v5369_v23 = vrot.slane %v8918_v8, 6 }
0x1f9f   :  { %v5335_v17 = vpop.permute.xlu0 %5334 }
0x1fa0   :  { %7256 = vtanh.f32 %v5403_v2  ;;  %v5337_v54 = vmul.f32 %v5335_v17, %v8795_v42  ;;  %v5340_v37 = vpop.permute.xlu1 %5339  ;;  %v6658_v12 = vmul.f32 -1.442695, %v5403_v2 }
0x1fa1   :  { %v5342_v9 = vmul.f32 %v5340_v37, %v8797_v29 }
0x1fa3   :  { %v5343_v60 = vadd.f32 %v5342_v9, %v5337_v54 }
0x1fa5   :  { %v5345_v56 = vrot.slane %v5343_v60, 6 }
0x1fa6   :  { %v7257_v26 = vpop.eup %7256 }
0x1fa7   :  { %v5347_v24 = vadd.f32 %v5345_v56, %v8943_v59  ;;  %5429 = vrot.lane.b32.xlu2 %v7257_v26, %s7325_s20 }
0x1fa9   :  { %7258 = vtanh.f32 %v5347_v24  ;;  %v6657_v50 = vmul.f32 -1.442695, %v5347_v24 }
0x1faa   :  { %7260 = vpow2.f32 %v6658_v12 }
0x1faf   :  { %v7259_v35 = vpop.eup %7258 }
0x1fb0   :  { %5373 = vrot.lane.b32.xlu1 %v7259_v35, %s7325_s20  ;;  %v7261_v30 = vpop.eup %7260 }
0x1fb1   :  { %v5407_v7 = vadd.f32 1.0, %v7261_v30 }
0x1fb3   :  { %7262 = vrcp.f32 %v5407_v7  ;;  %v5419_v32 = vand.u32 2147483648, %v5407_v7  ;;  %vm5413_vm2 = vweird.f32 %v5407_v7  ;;  %v5417_v6 = vand.u32 2147483647, %v5407_v7 }
0x1fb4   :  { %7264 = vpow2.f32 %v6657_v50 }
0x1fb5   :  { %v5420_v55 = vor.u32 1.1754944e-38, %v5419_v32  ;;  %vm5418_vm4 = vcmp.eq.f32.partialorder %v5417_v6, 8.507059e+37 }
0x1fb9   :  { %v7263_v31 = vpop.eup %7262 }
0x1fba   :  { %v5409_v13 = vmul.f32 %v7263_v31, %v5407_v7  ;;  %vm5414_vm1 = vweird.f32 %v7263_v31  ;;  %v7265_v53 = vpop.eup %7264 }
0x1fbb   :  { %vm5415_vm3 = vmor %vm5413_vm2, %vm5414_vm1  ;;  %v5351_v48 = vadd.f32 1.0, %v7265_v53 }
0x1fbc   :  { %v5410_v16 = vsub.f32 1.0, %v5409_v13 }
0x1fbd   :  { %7266 = vrcp.f32 %v5351_v48  ;;  %v5363_v44 = vand.u32 2147483648, %v5351_v48  ;;  %vm5357_vm7 = vweird.f32 %v5351_v48  ;;  %v5361_v51 = vand.u32 2147483647, %v5351_v48 }
0x1fbe   :  { %v5411_v38 = vmul.f32 %v7263_v31, %v5410_v16 }
0x1fbf   :  { %v5364_v0 = vor.u32 1.1754944e-38, %v5363_v44  ;;  %vm5362_vm0 = vcmp.eq.f32.partialorder %v5361_v51, 8.507059e+37 }
0x1fc0   :  { %v5412_v21 = vadd.f32 %v7263_v31, %v5411_v38 }
0x1fc2   :  { %v5416_v63 = vsel %vm5415_vm3, %v7263_v31, %v5412_v21 }
0x1fc3   :  { %v5421_v14 = vsel %vm5418_vm4, %v5420_v55, %v5416_v63  ;;  %v7267_v3 = vpop.eup %7266 }
0x1fc4   :  { %v5353_v46 = vmul.f32 %v7267_v3, %v5351_v48  ;;  %vm5358_vm6 = vweird.f32 %v7267_v3  ;;  %v5427_v25 = vmul.f32 %v5425_v27, %v5421_v14 }
0x1fc5   :  { %vm5359_vm8 = vmor %vm5357_vm7, %vm5358_vm6 }
0x1fc6   :  { %v5354_v20 = vsub.f32 1.0, %v5353_v46 }
0x1fc8   :  { %v5355_v22 = vmul.f32 %v7267_v3, %v5354_v20 }
0x1fca   :  { %v5356_v40 = vadd.f32 %v7267_v3, %v5355_v22 }
0x1fcc   :  { %v5360_v19 = vsel %vm5359_vm8, %v7267_v3, %v5356_v40 }
0x1fcd   :  { %v5365_v47 = vsel %vm5362_vm0, %v5364_v0, %v5360_v19 }
0x1fce   :  { %v5371_v1 = vmul.f32 %v5369_v23, %v5365_v47 }
0x2001   :  { %v5430_v41 = vpop.permute.xlu2 %5429 }
0x2002   :  { %v5432_v57 = vmul.f32 %v5430_v41, %v5421_v14 }
0x2004   :  { %5434 = vrot.lane.b32.xlu2 %v5432_v57, %s7334_s29 }
0x2022   :  { %v5374_v11 = vpop.permute.xlu1 %5373 }
0x2023   :  { %v5376_v5 = vmul.f32 %v5374_v11, %v5365_v47 }
0x2025   :  { %5378 = vrot.lane.b32.xlu0 %v5376_v5, %s7334_s29 }
0x205e   :  { %v5435_v28 = vpop.permute.xlu2 %5434 }
0x205f   :  { %v8951_v34 = vadd.f32 %v5435_v28, %v5427_v25 }
0x2061   :  { %7268 = vtanh.f32 %v8951_v34 }
0x2067   :  { %v7269_v15 = vpop.eup %7268 }
0x2068   :  { %5440 = vrot.lane.b32.xlu1 %v7269_v15, %s7322_s14 }
0x2097   :  { %v5379_v2 = vpop.permute.xlu0 %5378 }
0x2098   :  { %v8956_v17 = vadd.f32 %v5379_v2, %v5371_v1 }
0x209a   :  { %7270 = vtanh.f32 %v8956_v17 }
0x20a0   :  { %v7271_v52 = vpop.eup %7270 }
0x20a1   :  { %5384 = vrot.lane.b32.xlu2 %v7271_v52, %s7322_s14 }
0x20da   :  { %v5441_v49 = vpop.permute.xlu1 %5440 }
0x20db   :  { %v8960_v54 = vmul.f32 %v5441_v49, %v5421_v14 }
0x20dd   :  { %5507 = vperm.xlu1 %6952, %v8960_v54   ;;  %5502 = vperm.xlu0 %6951, %v8960_v54  }
0x20e5   :  { %6954 = vset.pattern.permute.xlu0 %v7361_v62  ;;  %6955 = vset.pattern.permute.xlu1 %v7360_v43 }
0x20fb   :  { %v5385_v8 = vpop.permute.xlu2 %5384 }
0x20fc   :  { %v8966_v37 = vmul.f32 %v5385_v8, %v5365_v47  ;;  %v5481_v8 = vrot.slane %v8956_v17, 6 }
0x20fe   :  { %5451 = vperm.xlu0 %6954, %v8966_v37   ;;  %5446 = vperm.xlu2 %6953, %v8966_v37  }
0x214f   :  { %v5508_v58 = vpop.permute.xlu1 %5507  ;;  %v5503_v9 = vpop.permute.xlu0 %5502 }
0x2150   :  { %v5510_v60 = vmul.f32 %v5508_v58, %v8812_v39  ;;  %v5505_v56 = vmul.f32 %v5503_v9, %v8810_v45 }
0x2152   :  { %v5511_v26 = vadd.f32 %v5510_v60, %v5505_v56 }
0x2154   :  { %v5513_v24 = vrot.slane %v5511_v26, 2  ;;  %v5537_v26 = vrot.slane %v8951_v34, 2 }
0x2156   :  { %v5515_v35 = vadd.f32 %v5513_v24, %v8814_v4 }
0x2158   :  { %7272 = vtanh.f32 %v5515_v35  ;;  %v5447_v30 = vpop.permute.xlu2 %5446  ;;  %v6660_v32 = vmul.f32 -1.442695, %v5515_v35 }
0x2159   :  { %v5449_v31 = vmul.f32 %v5447_v30, %v8795_v42 }
0x215e   :  { %v7273_v12 = vpop.eup %7272 }
0x215f   :  { %5541 = vrot.lane.b32.xlu1 %v7273_v12, %s7325_s20 }
0x2170   :  { %v5452_v7 = vpop.permute.xlu0 %5451 }
0x2171   :  { %v5454_v13 = vmul.f32 %v5452_v7, %v8797_v29 }
0x2173   :  { %v5455_v16 = vadd.f32 %v5454_v13, %v5449_v31 }
0x2175   :  { %v5457_v50 = vrot.slane %v5455_v16, 6 }
0x2177   :  { %v5459_v38 = vadd.f32 %v5457_v50, %v8943_v59 }
0x2179   :  { %7274 = vtanh.f32 %v5459_v38  ;;  %v6659_v6 = vmul.f32 -1.442695, %v5459_v38 }
0x217a   :  { %7276 = vpow2.f32 %v6660_v32 }
0x217b   :  { %7278 = vpow2.f32 %v6659_v6 }
0x217f   :  { %v7275_v21 = vpop.eup %7274 }
0x2180   :  { %5485 = vrot.lane.b32.xlu2 %v7275_v21, %s7325_s20  ;;  %v7277_v63 = vpop.eup %7276 }
0x2181   :  { %v5519_v53 = vadd.f32 1.0, %v7277_v63  ;;  %v7279_v55 = vpop.eup %7278 }
0x2182   :  { %v5463_v41 = vadd.f32 1.0, %v7279_v55 }
0x2183   :  { %7280 = vrcp.f32 %v5519_v53  ;;  %v5531_v40 = vand.u32 2147483648, %v5519_v53  ;;  %vm5525_vm12 = vweird.f32 %v5519_v53  ;;  %v5529_v51 = vand.u32 2147483647, %v5519_v53 }
0x2184   :  { %7282 = vrcp.f32 %v5463_v41  ;;  %v5475_v28 = vand.u32 2147483648, %v5463_v41  ;;  %vm5469_vm2 = vweird.f32 %v5463_v41  ;;  %v5473_v15 = vand.u32 2147483647, %v5463_v41 }
0x2185   :  { %v5532_v0 = vor.u32 1.1754944e-38, %v5531_v40  ;;  %vm5530_vm15 = vcmp.eq.f32.partialorder %v5529_v51, 8.507059e+37 }
0x2186   :  { %v5476_v1 = vor.u32 1.1754944e-38, %v5475_v28  ;;  %vm5474_vm4 = vcmp.eq.f32.partialorder %v5473_v15, 8.507059e+37 }
0x2189   :  { %v7281_v14 = vpop.eup %7280 }
0x218a   :  { %v5521_v48 = vmul.f32 %v7281_v14, %v5519_v53  ;;  %v7283_v3 = vpop.eup %7282  ;;  %vm5526_vm10 = vweird.f32 %v7281_v14 }
0x218b   :  { %v5465_v20 = vmul.f32 %v7283_v3, %v5463_v41  ;;  %vm5527_vm14 = vmor %vm5525_vm12, %vm5526_vm10  ;;  %vm5470_vm1 = vweird.f32 %v7283_v3 }
0x218c   :  { %v5522_v57 = vsub.f32 1.0, %v5521_v48  ;;  %vm5471_vm3 = vmor %vm5469_vm2, %vm5470_vm1 }
0x218d   :  { %v5466_v44 = vsub.f32 1.0, %v5465_v20 }
0x218e   :  { %v5523_v46 = vmul.f32 %v7281_v14, %v5522_v57 }
0x218f   :  { %v5467_v11 = vmul.f32 %v7283_v3, %v5466_v44 }
0x2190   :  { %v5524_v22 = vadd.f32 %v7281_v14, %v5523_v46 }
0x2191   :  { %v5468_v25 = vadd.f32 %v7283_v3, %v5467_v11 }
0x2192   :  { %v5528_v19 = vsel %vm5527_vm14, %v7281_v14, %v5524_v22 }
0x2193   :  { %v5533_v5 = vsel %vm5530_vm15, %v5532_v0, %v5528_v19  ;;  %v5472_v23 = vsel %vm5471_vm3, %v7283_v3, %v5468_v25 }
0x2194   :  { %v5477_v52 = vsel %vm5474_vm4, %v5476_v1, %v5472_v23  ;;  %v5539_v24 = vmul.f32 %v5537_v26, %v5533_v5 }
0x2195   :  { %v5483_v58 = vmul.f32 %v5481_v8, %v5477_v52 }
0x21d1   :  { %v5542_v47 = vpop.permute.xlu1 %5541 }
0x21d2   :  { %v5544_v27 = vmul.f32 %v5542_v47, %v5533_v5 }
0x21d4   :  { %5546 = vrot.lane.b32.xlu1 %v5544_v27, %s7334_s29 }
0x21da   :  { %v5486_v2 = vpop.permute.xlu2 %5485 }
0x21db   :  { %v5488_v49 = vmul.f32 %v5486_v2, %v5477_v52 }
0x21dd   :  { %5490 = vrot.lane.b32.xlu2 %v5488_v49, %s7334_s29 }
0x2237   :  { %v5491_v9 = vpop.permute.xlu2 %5490 }
0x2238   :  { %v8981_v60 = vadd.f32 %v5491_v9, %v5483_v58 }
0x223a   :  { %7284 = vtanh.f32 %v8981_v60 }
0x2240   :  { %v7285_v56 = vpop.eup %7284 }
0x2241   :  { %5496 = vrot.lane.b32.xlu1 %v7285_v56, %s7322_s14 }
0x2246   :  { %v5547_v35 = vpop.permute.xlu1 %5546 }
0x2247   :  { %v8986_v12 = vadd.f32 %v5547_v35, %v5539_v24 }
0x2249   :  { %7286 = vtanh.f32 %v8986_v12 }
0x224f   :  { %v7287_v30 = vpop.eup %7286 }
0x2250   :  { %5552 = vrot.lane.b32.xlu0 %v7287_v30, %s7322_s14 }
0x22b3   :  { %v5497_v17 = vpop.permute.xlu1 %5496 }
0x22b4   :  { %v8990_v7 = vmul.f32 %v5497_v17, %v5477_v52 }
0x22b6   :  { %5558 = vperm.xlu1 %6955, %v8990_v7  }
0x22be   :  { %6959 = vset.pattern.permute.xlu1 %v7361_v62 }
0x22c2   :  { %v5553_v31 = vpop.permute.xlu0 %5552 }
0x22c3   :  { %v8994_v13 = vmul.f32 %v5553_v31, %v5533_v5 }
0x22c5   :  { %5619 = vperm.xlu0 %6954, %v8994_v13   ;;  %5614 = vperm.xlu2 %6953, %v8994_v13  }
0x22cd   :  { %6956 = vset.pattern.permute.xlu2 %v7361_v62  ;;  %6957 = vset.pattern.permute.xlu0 %v7360_v43 }
0x22ce   :  { %5563 = vperm.xlu2 %6956, %v8990_v7  }
0x22d6   :  { %6958 = vset.pattern.permute.xlu2 %v7360_v43 }
0x231f   :  { %v5615_v34 = vpop.permute.xlu2 %5614 }
0x2320   :  { %v5617_v41 = vmul.f32 %v5615_v34, %v8810_v45  ;;  %v5649_v34 = vrot.slane %v8986_v12, 2 }
0x2328   :  { %v5564_v16 = vpop.permute.xlu2 %5563  ;;  %v5559_v50 = vpop.permute.xlu1 %5558 }
0x2329   :  { %v5566_v38 = vmul.f32 %v5564_v16, %v8797_v29  ;;  %v5561_v21 = vmul.f32 %v5559_v50, %v8795_v42 }
0x232b   :  { %v5567_v32 = vadd.f32 %v5566_v38, %v5561_v21  ;;  %v5593_v21 = vrot.slane %v8981_v60, 6 }
0x232d   :  { %v5569_v6 = vrot.slane %v5567_v32, 6 }
0x232f   :  { %v5571_v63 = vadd.f32 %v5569_v6, %v8943_v59 }
0x2331   :  { %7288 = vtanh.f32 %v5571_v63  ;;  %v6661_v46 = vmul.f32 -1.442695, %v5571_v63 }
0x2337   :  { %v7289_v53 = vpop.eup %7288  ;;  %v5620_v55 = vpop.permute.xlu0 %5619 }
0x2338   :  { %v5622_v14 = vmul.f32 %v5620_v55, %v8812_v39  ;;  %5597 = vrot.lane.b32.xlu1 %v7289_v53, %s7325_s20 }
0x233a   :  { %v5623_v43 = vadd.f32 %v5622_v14, %v5617_v41  ;;  %v5783_v14 = vsel %vm4755_vm9, %v8966_v37, %v8990_v7 }
0x233c   :  { %v5625_v48 = vrot.slane %v5623_v43, 2 }
0x233e   :  { %v5627_v57 = vadd.f32 %v5625_v48, %v8814_v4 }
0x2340   :  { %7290 = vtanh.f32 %v5627_v57  ;;  %v6662_v40 = vmul.f32 -1.442695, %v5627_v57 }
0x2341   :  { %7292 = vpow2.f32 %v6661_v46 }
0x2346   :  { %v7291_v3 = vpop.eup %7290 }
0x2347   :  { %5653 = vrot.lane.b32.xlu0 %v7291_v3, %s7325_s20  ;;  %v7293_v20 = vpop.eup %7292 }
0x2348   :  { %v5575_v22 = vadd.f32 1.0, %v7293_v20 }
0x234a   :  { %7294 = vrcp.f32 %v5575_v22  ;;  %v5587_v25 = vand.u32 2147483648, %v5575_v22  ;;  %vm5581_vm7 = vweird.f32 %v5575_v22  ;;  %v5585_v28 = vand.u32 2147483647, %v5575_v22 }
0x234b   :  { %7296 = vpow2.f32 %v6662_v40 }
0x234c   :  { %v5588_v1 = vor.u32 1.1754944e-38, %v5587_v25  ;;  %vm5586_vm0 = vcmp.eq.f32.partialorder %v5585_v28, 8.507059e+37 }
0x2350   :  { %v7295_v44 = vpop.eup %7294 }
0x2351   :  { %v7297_v51 = vpop.eup %7296  ;;  %v5577_v19 = vmul.f32 %v7295_v44, %v5575_v22  ;;  %vm5582_vm6 = vweird.f32 %v7295_v44 }
0x2352   :  { %v5631_v0 = vadd.f32 1.0, %v7297_v51  ;;  %vm5583_vm8 = vmor %vm5581_vm7, %vm5582_vm6 }
0x2353   :  { %v5578_v11 = vsub.f32 1.0, %v5577_v19 }
0x2354   :  { %7298 = vrcp.f32 %v5631_v0  ;;  %v5643_v56 = vand.u32 2147483648, %v5631_v0  ;;  %vm5637_vm12 = vweird.f32 %v5631_v0  ;;  %v5641_v26 = vand.u32 2147483647, %v5631_v0 }
0x2355   :  { %v5579_v47 = vmul.f32 %v7295_v44, %v5578_v11 }
0x2356   :  { %v5644_v35 = vor.u32 1.1754944e-38, %v5643_v56  ;;  %vm5642_vm15 = vcmp.eq.f32.partialorder %v5641_v26, 8.507059e+37 }
0x2357   :  { %v5580_v27 = vadd.f32 %v7295_v44, %v5579_v47 }
0x2359   :  { %v5584_v23 = vsel %vm5583_vm8, %v7295_v44, %v5580_v27 }
0x235a   :  { %v7299_v5 = vpop.eup %7298  ;;  %v5589_v52 = vsel %vm5586_vm0, %v5588_v1, %v5584_v23 }
0x235b   :  { %v5633_v15 = vmul.f32 %v7299_v5, %v5631_v0  ;;  %vm5638_vm10 = vweird.f32 %v7299_v5  ;;  %v5595_v32 = vmul.f32 %v5593_v21, %v5589_v52 }
0x235c   :  { %vm5639_vm14 = vmor %vm5637_vm12, %vm5638_vm10 }
0x235d   :  { %v5634_v49 = vsub.f32 1.0, %v5633_v15 }
0x235f   :  { %v5635_v58 = vmul.f32 %v7299_v5, %v5634_v49 }
0x2361   :  { %v5636_v9 = vadd.f32 %v7299_v5, %v5635_v58 }
0x2363   :  { %v5640_v24 = vsel %vm5639_vm14, %v7299_v5, %v5636_v9 }
0x2364   :  { %v5645_v17 = vsel %vm5642_vm15, %v5644_v35, %v5640_v24 }
0x2365   :  { %v5651_v16 = vmul.f32 %v5649_v34, %v5645_v17 }
0x23aa   :  { %v5598_v2 = vpop.permute.xlu1 %5597 }
0x23ab   :  { %v5600_v8 = vmul.f32 %v5598_v2, %v5589_v52 }
0x23ad   :  { %5602 = vrot.lane.b32.xlu0 %v5600_v8, %s7334_s29 }
0x23b9   :  { %v5654_v30 = vpop.permute.xlu0 %5653 }
0x23ba   :  { %v5656_v31 = vmul.f32 %v5654_v30, %v5645_v17 }
0x23bc   :  { %5658 = vrot.lane.b32.xlu2 %v5656_v31, %s7334_s29 }
0x2416   :  { %v5659_v50 = vpop.permute.xlu2 %5658 }
0x2417   :  { %v9013_v38 = vadd.f32 %v5659_v50, %v5651_v16 }
0x2419   :  { %7300 = vtanh.f32 %v9013_v38 }
0x241f   :  { %v7301_v6 = vpop.eup %7300  ;;  %v5603_v63 = vpop.permute.xlu0 %5602 }
0x2420   :  { %v9017_v53 = vadd.f32 %v5603_v63, %v5595_v32  ;;  %5664 = vrot.lane.b32.xlu1 %v7301_v6, %s7322_s14  ;;  %v6972_v6 = vld [vmem:[%s9041_s21] ss:$0 sm:$0xff]  ;;  %v5761_v63 = vrot.slane %v9013_v38, 2 }
0x2422   :  { %7302 = vtanh.f32 %v9017_v53 }
0x2428   :  { %v7303_v55 = vpop.eup %7302 }
0x2429   :  { %5608 = vrot.lane.b32.xlu2 %v7303_v55, %s7322_s14 }
0x2483   :  { %v5609_v12 = vpop.permute.xlu2 %5608 }
0x2484   :  { %v5611_v41 = vmul.f32 %v5609_v12, %v5589_v52 }
0x2486   :  { %v9026_v60 = vsel %vm1938_vm11, %v5783_v14, %v5611_v41  ;;  %5670 = vperm.xlu2 %6958, %v5611_v41   ;;  %v5705_v14 = vrot.slane %v9017_v53, 6  ;;  %v5789_v53 = vsel %vm4755_vm9, %v8927_v18, %v8895_v33 }
0x2492   :  { %v5665_v43 = vpop.permute.xlu1 %5664 }
0x2493   :  { %v9028_v48 = vmul.f32 %v5665_v43, %v5645_v17 }
0x2495   :  { %5731 = vperm.xlu1 %6959, %v9028_v48   ;;  %5726 = vperm.xlu0 %6957, %v9028_v48  }
0x249d   :  { %5675 = vperm.xlu1 %6959, %v5611_v41   ;;  %6960 = vset.pattern.permute.xlu0 %v7361_v62 }
0x24e0   :  { %v5671_v22 = vpop.permute.xlu2 %5670 }
0x24e1   :  { %v5673_v51 = vmul.f32 %v5671_v22, %v8795_v42 }
0x2507   :  { %v5732_v57 = vpop.permute.xlu1 %5731  ;;  %v5727_v3 = vpop.permute.xlu0 %5726 }
0x2508   :  { %v5734_v46 = vmul.f32 %v5732_v57, %v8812_v39  ;;  %v5729_v37 = vmul.f32 %v5727_v3, %v8810_v45 }
0x250a   :  { %v5735_v7 = vadd.f32 %v5734_v46, %v5729_v37 }
0x250c   :  { %v5737_v20 = vrot.slane %v5735_v7, 2 }
0x250e   :  { %v5739_v40 = vadd.f32 %v5737_v20, %v8814_v4 }
0x250f   :  { %v5676_v44 = vpop.permute.xlu1 %5675 }
0x2510   :  { %7304 = vtanh.f32 %v5739_v40  ;;  %v5678_v19 = vmul.f32 %v5676_v44, %v8797_v29  ;;  %v6664_v42 = vmul.f32 -1.442695, %v5739_v40 }
0x2512   :  { %v5679_v0 = vadd.f32 %v5678_v19, %v5673_v51  ;;  %v5790_v51 = vsel %vm1938_vm11, %v5789_v53, %v8868_v61 }
0x2513   :  { %v5791_v19 = vsel %vm4758_vm13, %v5790_v51, %v8837_v10 }
0x2514   :  { %v5681_v11 = vrot.slane %v5679_v0, 6 }
0x2516   :  { %v7305_v62 = vpop.eup %7304  ;;  %v5683_v45 = vadd.f32 %v5681_v11, %v8943_v59 }
0x2517   :  { %5765 = vrot.lane.b32.xlu2 %v7305_v62, %s7325_s20 }
0x2518   :  { %7306 = vtanh.f32 %v5683_v45  ;;  %v6663_v25 = vmul.f32 -1.442695, %v5683_v45 }
0x2519   :  { %7308 = vpow2.f32 %v6664_v42 }
0x251e   :  { %v7307_v39 = vpop.eup %7306 }
0x251f   :  { %5709 = vrot.lane.b32.xlu0 %v7307_v39, %s7325_s20  ;;  %v7309_v29 = vpop.eup %7308 }
0x2520   :  { %v5743_v4 = vadd.f32 1.0, %v7309_v29 }
0x2522   :  { %7310 = vrcp.f32 %v5743_v4  ;;  %v5755_v59 = vand.u32 2147483648, %v5743_v4  ;;  %vm5749_vm2 = vweird.f32 %v5743_v4  ;;  %v5753_v23 = vand.u32 2147483647, %v5743_v4 }
0x2523   :  { %7312 = vpow2.f32 %v6663_v25 }
0x2524   :  { %v5756_v52 = vor.u32 1.1754944e-38, %v5755_v59  ;;  %vm5754_vm4 = vcmp.eq.f32.partialorder %v5753_v23, 8.507059e+37 }
0x2528   :  { %v7311_v47 = vpop.eup %7310 }
0x2529   :  { %v5745_v5 = vmul.f32 %v7311_v47, %v5743_v4  ;;  %vm5750_vm1 = vweird.f32 %v7311_v47  ;;  %v7313_v1 = vpop.eup %7312 }
0x252a   :  { %vm5751_vm3 = vmor %vm5749_vm2, %vm5750_vm1  ;;  %v5687_v49 = vadd.f32 1.0, %v7313_v1 }
0x252b   :  { %v5746_v27 = vsub.f32 1.0, %v5745_v5  ;;  %v6973_v5 = vld [vmem:[#allocation2] ss:$0 sm:$0xff] }
0x252c   :  { %7314 = vrcp.f32 %v5687_v49  ;;  %v5699_v17 = vand.u32 2147483648, %v5687_v49  ;;  %vm5693_vm7 = vweird.f32 %v5687_v49  ;;  %v5697_v31 = vand.u32 2147483647, %v5687_v49 }
0x252d   :  { %v5747_v28 = vmul.f32 %v7311_v47, %v5746_v27 }
0x252e   :  { %v5700_v16 = vor.u32 1.1754944e-38, %v5699_v17  ;;  %vm5698_vm0 = vcmp.eq.f32.partialorder %v5697_v31, 8.507059e+37 }
0x252f   :  { %v5748_v15 = vadd.f32 %v7311_v47, %v5747_v28 }
0x2531   :  { %v5752_v2 = vsel %vm5751_vm3, %v7311_v47, %v5748_v15 }
0x2532   :  { %v5757_v8 = vsel %vm5754_vm4, %v5756_v52, %v5752_v2  ;;  %v7315_v56 = vpop.eup %7314 }
0x2533   :  { %v5689_v26 = vmul.f32 %v7315_v56, %v5687_v49  ;;  %vm5694_vm6 = vweird.f32 %v7315_v56  ;;  %v5763_v55 = vmul.f32 %v5761_v63, %v5757_v8 }
0x2534   :  { %vm5695_vm8 = vmor %vm5693_vm7, %vm5694_vm6 }
0x2535   :  { %v5690_v24 = vsub.f32 1.0, %v5689_v26 }
0x2537   :  { %v5691_v35 = vmul.f32 %v7315_v56, %v5690_v24 }
0x2539   :  { %v5692_v30 = vadd.f32 %v7315_v56, %v5691_v35 }
0x253b   :  { %v5696_v34 = vsel %vm5695_vm8, %v7315_v56, %v5692_v30 }
0x253c   :  { %v5701_v21 = vsel %vm5698_vm0, %v5700_v16, %v5696_v34 }
0x253d   :  { %v5707_v43 = vmul.f32 %v5705_v14, %v5701_v21 }
0x2571   :  { %v5766_v58 = vpop.permute.xlu2 %5765 }
0x2572   :  { %v5768_v9 = vmul.f32 %v5766_v58, %v5757_v8 }
0x2574   :  { %5770 = vrot.lane.b32.xlu1 %v5768_v9, %s7334_s29 }
0x2591   :  { %v5710_v50 = vpop.permute.xlu0 %5709 }
0x2592   :  { %v5712_v32 = vmul.f32 %v5710_v50, %v5701_v21 }
0x2594   :  { %5714 = vrot.lane.b32.xlu2 %v5712_v32, %s7334_s29 }
0x259c   :  { %5795 = vrot.lane.b32.xlu2 %v6972_v6, %s7342_s24 }
0x25e6   :  { %v5771_v12 = vpop.permute.xlu1 %5770 }
0x25e7   :  { %v5773_v41 = vadd.f32 %v5771_v12, %v5763_v55 }
0x25e9   :  { %7316 = vtanh.f32 %v5773_v41 }
0x25ee   :  { %v5715_v57 = vpop.permute.xlu2 %5714 }
0x25ef   :  { %v7317_v3 = vpop.eup %7316  ;;  %v5717_v46 = vadd.f32 %v5715_v57, %v5707_v43 }
0x25f0   :  { %5776 = vrot.lane.b32.xlu0 %v7317_v3, %s7322_s14 }
0x25f1   :  { %7318 = vtanh.f32 %v5717_v46 }
0x25f6   :  { %v5796_v7 = vpop.permute.xlu2 %5795 }
0x25f7   :  { %v7319_v37 = vpop.eup %7318  ;;  %v5798_v38 = vmul.f32 %v5796_v7, %v8934_v36 }
0x25f8   :  { %5814 = vrot.lane.b32.xlu0 %v6972_v6, %s7322_s14  ;;  %5720 = vrot.lane.b32.xlu1 %v7319_v37, %s7322_s14  ;;  %s7369_s14 = smov 29  }
0x25f9   :  { %s5896_s24 = sld [smem:[%s9090_s0 + %s7369_s14]]  }
0x2600   :  { %5802 = vrot.lane.b32.xlu1 %v5798_v38, %s7362_s22 }
0x2662   :  { %v5777_v20 = vpop.permute.xlu0 %5776 }
0x2663   :  { %v5779_v22 = vmul.f32 %v5777_v20, %v5757_v8 }
0x2665   :  { %v5786_v40 = vsel %vm4755_vm9, %v5779_v22, %v9028_v48 }
0x2666   :  { %v5787_v44 = vsel %vm1938_vm11, %v5786_v40, %v8994_v13  ;;  %vm5855_vm11 = vcmask 1024  }
0x2667   :  { %v5788_v36 = vsel %vm4758_vm13, %v5787_v44, %v8960_v54 }
0x266a   :  { %v5815_v0 = vpop.permute.xlu0 %5814  ;;  %v5721_v11 = vpop.permute.xlu1 %5720 }
0x266b   :  { %v5817_v62 = vmul.f32 %v5815_v0, %v5788_v36  ;;  %v5818_v45 = vmul.f32 %v5815_v0, %v5791_v19  ;;  %v5723_v33 = vmul.f32 %v5721_v11, %v5701_v21 }
0x266d   :  { %v5785_v18 = vsel %vm4758_vm13, %v9026_v60, %v5723_v33  ;;  %5821 = vrot.lane.b32.xlu0 %v5817_v62, %s7362_s22  ;;  %5823 = vrot.lane.b32.xlu1 %v5818_v45, %s7362_s22 }
0x266e   :  { %v5799_v13 = vmul.f32 %v5796_v7, %v5785_v18 }
0x2670   :  { %5804 = vrot.lane.b32.xlu2 %v5799_v13, %s7362_s22 }
0x2672   :  { %v5803_v61 = vpop.permute.xlu1 %5802 }
0x2673   :  { %v5808_v54 = vsel %vm4779_vm5, %v5803_v61, 0.0 }
0x2699   :  { %5809 = vadd.xlane.f32.xlu2 %v5808_v54 }
0x26ca   :  { %v5805_v10 = vpop.permute.xlu2 %5804 }
0x26cb   :  { %v5811_v48 = vsel %vm4779_vm5, %v5805_v10, 0.0 }
0x26cc   :  { %5812 = vadd.xlane.f32.xlu0 %v5811_v48 }
0x26df   :  { %v5822_v39 = vpop.permute.xlu0 %5821  ;;  %v5824_v42 = vpop.permute.xlu1 %5823 }
0x26e0   :  { %v5827_v29 = vsel %vm4779_vm5, %v5822_v39, 0.0  ;;  %v5830_v60 = vsel %vm4779_vm5, %v5824_v42, 0.0 }
0x26e1   :  { %5828 = vadd.xlane.f32.xlu1 %v5827_v29  ;;  %5831 = vadd.xlane.f32.xlu2 %v5830_v60 }
0x270c   :  { %v5810_v4 = vpop.xlane.xlu2 %5809 }
0x273f   :  { %v5813_v47 = vpop.xlane.xlu0 %5812 }
0x2754   :  { %v5829_v27 = vpop.xlane.xlu1 %5828  ;;  %v5832_v25 = vpop.xlane.xlu2 %5831 }
0x2755   :  { %v5833_v28 = vadd.f32 %v5829_v27, %v5810_v4  ;;  %v5834_v15 = vadd.f32 %v5832_v25, %v5813_v47 }
0x2757   :  { %v5839_v59 = vadd.f32 %v6973_v5, %v5833_v28  ;;  %v5840_v23 = vadd.f32 %v6973_v5, %v5834_v15 }
0x2759   :  { %v5843_v1 = vrot.slane %v5839_v59, 2  ;;  %v5844_v2 = vrot.slane %v5839_v59, 4  ;;  %v5845_v52 = vrot.slane %v5839_v59, 6  ;;  %5856 = vst.msk [vmem:[%s5896_s24] sm:$0x3] %vm5855_vm11, %v5839_v59  ;;  %v5846_v49 = vrot.slane %v5840_v23, 2 }
0x275a   :  { %5860 = vst.msk [vmem:[%s5896_s24 + $0x8] sm:$0x3] %vm5855_vm11, %v5840_v23  ;;  %v5847_v8 = vrot.slane %v5840_v23, 4  ;;  %v5848_v58 = vrot.slane %v5840_v23, 6 }
0x275b   :  { %5857 = vst.msk [vmem:[%s5896_s24 + $0x2] sm:$0x3] %vm5855_vm11, %v5843_v1 }
0x275c   :  { %5858 = vst.msk [vmem:[%s5896_s24 + $0x4] sm:$0x3] %vm5855_vm11, %v5844_v2 }
0x275d   :  { %5859 = vst.msk [vmem:[%s5896_s24 + $0x6] sm:$0x3] %vm5855_vm11, %v5845_v52 }
0x275e   :  { %5861 = vst.msk [vmem:[%s5896_s24 + $0xa] sm:$0x3] %vm5855_vm11, %v5846_v49 }
0x275f   :  { %5862 = vst.msk [vmem:[%s5896_s24 + $0xc] sm:$0x3] %vm5855_vm11, %v5847_v8 }
0x2760   :  { %5863 = vst.msk [vmem:[%s5896_s24 + $0xe] sm:$0x3] %vm5855_vm11, %v5848_v58 }

</bundles_post_ra>
